<compile_context>
chip_gen: v7x
topology: tpu7x:2x2x1
jax: 0.10.0
libtpu: 0.0.40
codegen_flags: <defaults>
</compile_context>

<pallas_src>
import functools
import math

import jax
import jax.numpy as jnp
from jax.experimental import pallas as pl
from jax.experimental.pallas import tpu as pltpu


# ----------------------------------------------------------------------------
# Tiling helpers
# ----------------------------------------------------------------------------
def _tile_dim(dim, cap, unit):
    """Return (tile, padded_dim).  Full-dim block when dim <= cap (always a
    legal block shape); otherwise a cap-sized tile with the dim padded up to a
    tile multiple (no silent full-dim fallback)."""
    if dim <= cap:
        return dim, dim
    tile = (cap // unit) * unit
    padded = ((dim + tile - 1) // tile) * tile
    return tile, padded


def _pad2(a, rows, cols):
    r, c = a.shape
    if r == rows and c == cols:
        return a
    return jnp.pad(a, ((0, rows - r), (0, cols - c)))


def _gemm_vmem_limit(tm, tk, tn, out_bytes):
    """Footprint-derived VMEM limit: double-buffered input/output tiles + f32
    accumulator + headroom, clamped to the device capacity when queryable."""
    fp = 2 * (tm * tk * 2 + tk * tn * 2 + tn * 4 + tm * tn * out_bytes) + tm * tn * 4
    limit = fp + (8 << 20)
    try:
        cap = getattr(pltpu.get_tpu_info(), "vmem_capacity_bytes", 64 << 20)
        limit = min(limit, cap - (8 << 20))
    except Exception:
        limit = min(limit, 48 << 20)
    return int(max(limit, 16 << 20))


# ----------------------------------------------------------------------------
# Main GEMM kernel (conv-as-GEMM and fc1): tiled over (M, N, K)
# ----------------------------------------------------------------------------
def _gemm_kernel(a_ref, b_ref, shift_ref, o_ref, acc_ref, *, act):
    @pl.when(pl.program_id(2) == 0)
    def _():
        acc_ref[...] = jnp.zeros_like(acc_ref)

    acc_ref[...] += jnp.dot(a_ref[...], b_ref[...],
                            preferred_element_type=jnp.float32)

    @pl.when(pl.program_id(2) == pl.num_programs(2) - 1)
    def _():
        y = acc_ref[...] + shift_ref[...]        # folded conv-bias + BN shift
        if act == "relu":
            y = jnp.maximum(y, 0.0)
        elif act == "sigmoid":
            y = jax.nn.sigmoid(y)
        o_ref[...] = y.astype(o_ref.dtype)


def pallas_gemm(a, b, shift, act="relu", out_dtype=jnp.bfloat16,
                tm_cap=256, tn_cap=512, tk_cap=2048):
    """(M,K)bf16 @ (K,N)bf16 + shift, fused activation.  Tiled over (M,N,K);
    dims that exceed the tile caps are zero-padded up to tile multiples."""
    M, K = a.shape
    K2, N = b.shape
    assert K == K2
    tm, Mp = _tile_dim(M, tm_cap, 8)      # cap 256 -> >=2 M-blocks at M>=512
    tk, Kp = _tile_dim(K, tk_cap, 128)
    tn, Np = _tile_dim(N, tn_cap, 128)
    a = _pad2(a, Mp, Kp)
    b = _pad2(b, Kp, Np)
    shift = _pad2(shift, 1, Np)
    grid = (Mp // tm, Np // tn, Kp // tk)
    out = pl.pallas_call(
        functools.partial(_gemm_kernel, act=act),
        out_shape=jax.ShapeDtypeStruct((Mp, Np), out_dtype),
        grid_spec=pltpu.PrefetchScalarGridSpec(
            num_scalar_prefetch=0,
            grid=grid,
            in_specs=[
                pl.BlockSpec((tm, tk), lambda i, j, k: (i, k)),
                pl.BlockSpec((tk, tn), lambda i, j, k: (k, j)),
                pl.BlockSpec((1, tn), lambda i, j, k: (0, j)),
            ],
            out_specs=pl.BlockSpec((tm, tn), lambda i, j, k: (i, j)),
            scratch_shapes=[pltpu.VMEM((tm, tn), jnp.float32)],
        ),
        compiler_params=pltpu.CompilerParams(
            dimension_semantics=("parallel", "parallel", "arbitrary"),
            vmem_limit_bytes=_gemm_vmem_limit(
                tm, tk, tn, jnp.dtype(out_dtype).itemsize),
        ),
    )(a, b, shift)
    return out[:M, :N] if (Mp, Np) != (M, N) else out


# ----------------------------------------------------------------------------
# Fused decoder-tail kernel: d*_c2 conv + ReLU + 1x1 out-head + sigmoid + gate
# (optionally also emits the CBAM channel pool).  Tiled over M.
# ----------------------------------------------------------------------------
def _decoder_gate_kernel(*refs, pool):
    if pool:
        a_ref, w_ref, s_ref, wrow_ref, bout_ref, x_ref, o_ref, p_ref = refs
    else:
        a_ref, w_ref, s_ref, wrow_ref, bout_ref, x_ref, o_ref = refs
        p_ref = None
    # d*_c2 conv block (conv + folded BN + ReLU) on this M-tile.
    u = jnp.dot(a_ref[...], w_ref[...], preferred_element_type=jnp.float32)
    u = jnp.maximum(u + s_ref[...], 0.0)                       # (tm, 8)
    # out head (Cout=1): VPU multiply + lane reduce, keeps the MXU free.
    logits = jnp.sum(u * wrow_ref[...].astype(jnp.float32),
                     axis=1, keepdims=True) + bout_ref[...]    # (tm, 1)
    mask = jax.nn.sigmoid(logits)
    y = x_ref[...].astype(jnp.float32) * mask                  # gate over C
    # TODO(synk): store in a lane-dense (B*H, W*C) slab layout instead of (M,C).
    o_ref[...] = y.astype(o_ref.dtype)
    if pool:
        p_ref[...] = jnp.concatenate(
            [jnp.max(y, axis=1, keepdims=True),
             jnp.mean(y, axis=1, keepdims=True)], axis=1).astype(p_ref.dtype)


def pallas_decoder_gate(a, conv_p, head_p, x, pool=False, tm_cap=256):
    """a:(M,K) conv patches (bf16), x:(M,C) features to gate (bf16).
    Returns x * sigmoid(out_head(relu(conv(a)))) in bf16 (+ CBAM pool)."""
    M, K = a.shape
    N = conv_p["w"].shape[1]
    C = x.shape[1]
    tm, Mp = _tile_dim(M, tm_cap, 8)
    a = _pad2(a, Mp, K)
    x = _pad2(x, Mp, C)
    wrow = head_p["w"].reshape(1, N)            # (N,1) vector -> (1,N) row
    bout = head_p["shift"].reshape(1, 1)
    in_specs = [
        pl.BlockSpec((tm, K), lambda i: (i, 0)),
        pl.BlockSpec((K, N), lambda i: (0, 0)),
        pl.BlockSpec((1, N), lambda i: (0, 0)),
        pl.BlockSpec((1, N), lambda i: (0, 0)),
        pl.BlockSpec((1, 1), lambda i: (0, 0)),
        pl.BlockSpec((tm, C), lambda i: (i, 0)),
    ]
    out_shapes = [jax.ShapeDtypeStruct((Mp, C), jnp.bfloat16)]
    out_specs = [pl.BlockSpec((tm, C), lambda i: (i, 0))]
    if pool:
        out_shapes.append(jax.ShapeDtypeStruct((Mp, 2), jnp.bfloat16))
        out_specs.append(pl.BlockSpec((tm, 2), lambda i: (i, 0)))
    res = pl.pallas_call(
        functools.partial(_decoder_gate_kernel, pool=pool),
        out_shape=tuple(out_shapes) if pool else out_shapes[0],
        grid_spec=pltpu.PrefetchScalarGridSpec(
            num_scalar_prefetch=0, grid=(Mp // tm,),
            in_specs=in_specs,
            out_specs=tuple(out_specs) if pool else out_specs[0]),
        compiler_params=pltpu.CompilerParams(
            dimension_semantics=("parallel",)),
    )(a, conv_p["w"], conv_p["shift"], wrow, bout, x)
    if pool:
        y, p = res
        return y[:M], p[:M]
    return res[:M]


# ----------------------------------------------------------------------------
# Fused CBAM spatial gate: 7x7 gate conv (Cout=1) + sigmoid + gating multiply
# ----------------------------------------------------------------------------
def _cbam_gate_kernel(a_ref, wrow_ref, bout_ref, x_ref, o_ref):
    logits = jnp.sum(a_ref[...].astype(jnp.float32)
                     * wrow_ref[...].astype(jnp.float32),
                     axis=1, keepdims=True) + bout_ref[...]
    gate = jax.nn.sigmoid(logits)
    o_ref[...] = (x_ref[...].astype(jnp.float32) * gate).astype(o_ref.dtype)


def pallas_cbam_gate(a, gate_p, x, tm_cap=256):
    M, K = a.shape
    C = x.shape[1]
    tm, Mp = _tile_dim(M, tm_cap, 8)
    a = _pad2(a, Mp, K)
    x = _pad2(x, Mp, C)
    wrow = gate_p["w"].reshape(1, K)
    bout = gate_p["shift"].reshape(1, 1)
    out = pl.pallas_call(
        _cbam_gate_kernel,
        out_shape=jax.ShapeDtypeStruct((Mp, C), jnp.bfloat16),
        grid_spec=pltpu.PrefetchScalarGridSpec(
            num_scalar_prefetch=0, grid=(Mp // tm,),
            in_specs=[
                pl.BlockSpec((tm, K), lambda i: (i, 0)),
                pl.BlockSpec((1, K), lambda i: (0, 0)),
                pl.BlockSpec((1, 1), lambda i: (0, 0)),
                pl.BlockSpec((tm, C), lambda i: (i, 0)),
            ],
            out_specs=pl.BlockSpec((tm, C), lambda i: (i, 0))),
        compiler_params=pltpu.CompilerParams(
            dimension_semantics=("parallel",)),
    )(a, wrow, bout, x)
    return out[:M]


# ----------------------------------------------------------------------------
# Classifier tail: fc2 -> ReLU -> fc3 (fc1 runs through K-tiled pallas_gemm)
# ----------------------------------------------------------------------------
def _classifier_tail_kernel(x_ref, w2_ref, b2_ref, w3_ref, b3_ref, o_ref):
    h = jnp.dot(x_ref[...], w2_ref[...], preferred_element_type=jnp.float32)
    h = jnp.maximum(h + b2_ref[...], 0.0)
    y = jnp.dot(h.astype(jnp.bfloat16), w3_ref[...],
                preferred_element_type=jnp.float32) + b3_ref[...]
    o_ref[...] = y


def pallas_classifier_tail(h, P, num_classes):
    w2, b2 = P["fc2"]["w"], P["fc2"]["shift"]
    w3, b3 = P["fc3"]["w"], P["fc3"]["shift"]      # padded to 128 lanes
    B = h.shape[0]
    npad = w3.shape[1]
    shapes = [h.shape, w2.shape, b2.shape, w3.shape, b3.shape]
    out = pl.pallas_call(
        _classifier_tail_kernel,
        out_shape=jax.ShapeDtypeStruct((B, npad), jnp.float32),
        grid=(1,),
        in_specs=[pl.BlockSpec(s, lambda i: (0, 0)) for s in shapes],
        out_specs=pl.BlockSpec((B, npad), lambda i: (0, 0)),
    )(h, w2, b2, w3, b3)
    return out[:, :num_classes]


# ----------------------------------------------------------------------------
# Glue (im2col, pooling, upsampling) -- layout plumbing only, no hot compute
# ----------------------------------------------------------------------------
def im2col(x, k, pad, dilation=1):
    """x: [B,H,W,C] -> [B,H,W,k*k*C] patches (stride 1, 'same' output)."""
    # TODO(synk): replace with an in-kernel halo-tiled conv (k*k shifted
    # accumulate-matmuls from a haloed VMEM tile) to avoid k*k x HBM traffic.
    B, H, W, C = x.shape
    if k == 1:
        return x
    xp = jnp.pad(x, ((0, 0), (pad, pad), (pad, pad), (0, 0)))
    cols = []
    for i in range(k):
        for j in range(k):
            cols.append(xp[:, i * dilation:i * dilation + H,
                           j * dilation:j * dilation + W, :])
    return jnp.concatenate(cols, axis=-1)


def conv_bn_act(x, p, k, pad, dilation=1, act="relu"):
    """Conv2D block (conv + folded BN + activation) via im2col + Pallas GEMM."""
    B, H, W, C = x.shape
    patches = im2col(x, k, pad, dilation).reshape(B * H * W, k * k * C)
    out = pallas_gemm(patches.astype(jnp.bfloat16), p["w"], p["shift"], act)
    return out.reshape(B, H, W, -1)


def maxpool2(x):
    # TODO(synk): fuse the 2x2 max into the preceding GEMM epilogue.
    B, H, W, C = x.shape
    return x.reshape(B, H // 2, 2, W // 2, 2, C).max(axis=(2, 4))


def upsample2(x):
    # nn.Upsample(scale_factor=2, mode='bilinear', align_corners=False)
    # TODO(synk): fold the fixed 2x bilinear stencil into the consumer conv.
    B, H, W, C = x.shape
    return jax.image.resize(x, (B, 2 * H, 2 * W, C), method="bilinear")


def aspp(x, P, prefix):
    # TODO(synk): feed the four branch outputs as K-splits of the a*_out GEMM
    # instead of materializing the channel concat in HBM.
    y0 = conv_bn_act(x, P[prefix + "_b0"], 1, 0)
    y1 = conv_bn_act(x, P[prefix + "_b1"], 3, 1, dilation=1)
    y2 = conv_bn_act(x, P[prefix + "_b2"], 3, 2, dilation=2)
    gp = jnp.mean(x.astype(jnp.float32), axis=(1, 2), keepdims=True)
    y3 = conv_bn_act(gp.astype(jnp.bfloat16), P[prefix + "_gp"], 1, 0)
    y3 = jnp.broadcast_to(y3, y0.shape[:3] + (y3.shape[-1],))
    y = jnp.concatenate([y0, y1, y2, y3], axis=-1)
    return conv_bn_act(y, P[prefix + "_out"], 1, 0)


# ----------------------------------------------------------------------------
# Deterministic parameter construction (BN scale pre-folded into bf16 weights)
# ----------------------------------------------------------------------------
def make_conv(key, cin, cout, k):
    k1, k2, k3 = jax.random.split(key, 3)
    w = jax.random.normal(k1, (k * k * cin, cout), jnp.float32) / math.sqrt(k * k * cin)
    scale = 1.0 + 0.1 * jax.random.normal(k2, (1, cout), jnp.float32)
    shift = 0.1 * jax.random.normal(k3, (1, cout), jnp.float32)
    # (A@W)*scale + shift == A@(W*scale) + shift  -> fold scale offline.
    return {"w": (w * scale).astype(jnp.bfloat16), "shift": shift}


def make_linear(key, fin, fout):
    k1, k2 = jax.random.split(key)
    w = jax.random.normal(k1, (fin, fout), jnp.float32) / math.sqrt(fin)
    b = 0.01 * jax.random.normal(k2, (1, fout), jnp.float32)
    return {"w": w.astype(jnp.bfloat16), "shift": b}


def build_params(key, cin, H, W, num_classes=5):
    ks = iter(jax.random.split(key, 40))
    P = {}
    # Encoder1 (scaled VGG-style)
    P["e1_c1"] = make_conv(next(ks), cin, 16, 3)
    P["e1_c2"] = make_conv(next(ks), 16, 32, 3)
    P["e1_c3"] = make_conv(next(ks), 32, 64, 3)
    # ASPP(1024,64) scaled -> ASPP(64,16)
    for b, ci in [("b0", 64), ("b1", 64), ("b2", 64), ("gp", 64)]:
        P[f"a1_{b}"] = make_conv(next(ks), ci, 16, 1 if b in ("b0", "gp") else 3)
    P["a1_out"] = make_conv(next(ks), 64, 16, 1)
    # Decoder1
    P["d1_c1"] = make_conv(next(ks), 16 + 32, 16, 3)
    P["d1_c2"] = make_conv(next(ks), 16 + 16, 8, 3)
    P["out1"] = make_conv(next(ks), 8, 1, 1)
    # Encoder2
    P["e2_c1"] = make_conv(next(ks), cin, 16, 3)
    P["e2_c2"] = make_conv(next(ks), 16, 32, 3)
    # ASPP(256,64) scaled -> ASPP(32,16)
    for b, ci in [("b0", 32), ("b1", 32), ("b2", 32), ("gp", 32)]:
        P[f"a2_{b}"] = make_conv(next(ks), ci, 16, 1 if b in ("b0", "gp") else 3)
    P["a2_out"] = make_conv(next(ks), 64, 16, 1)
    # Decoder2 (concats skips1 AND skips2)
    P["d2_c1"] = make_conv(next(ks), 16 + 32 + 32, 16, 3)
    P["d2_c2"] = make_conv(next(ks), 16 + 16 + 16, 8, 3)
    P["out2"] = make_conv(next(ks), 8, 1, 1)
    # CBAM SpatialGate: 7x7 conv on [max,mean] channel pool, BN, sigmoid
    P["cbam"] = make_conv(next(ks), 2, 1, 7)
    # Classifier.  fc1 rows are built in NHWC flatten order (for a real
    # checkpoint this is just a row permutation of the NCHW-order weights),
    # which lets us skip the NHWC->NCHW transpose before flattening.
    flat = cin * H * W
    P["fc1"] = make_linear(next(ks), flat, 64)
    P["fc2"] = make_linear(next(ks), 64, 16)
    fc3 = make_linear(next(ks), 16, num_classes)
    # Pad fc3 to a lane-dense 128-wide output; wrapper slices back to 5.
    P["fc3"] = {
        "w": jnp.pad(fc3["w"], ((0, 0), (0, 128 - num_classes))),
        "shift": jnp.pad(fc3["shift"], ((0, 0), (0, 128 - num_classes))),
    }
    return P


# ----------------------------------------------------------------------------
# Forward pass (mirrors DoubleUNetCBAM.forward)
# ----------------------------------------------------------------------------
def forward(x_nchw, P, *, num_classes=5):
    x = jnp.transpose(x_nchw, (0, 2, 3, 1)).astype(jnp.bfloat16)  # NCHW -> NHWC
    B, H, W, C = x.shape
    M = B * H * W

    # ---- e1: Encoder1 -> (x5, skips1) ----
    s1 = conv_bn_act(x, P["e1_c1"], 3, 1)                  # [B,16,16,16]
    s2 = conv_bn_act(maxpool2(s1), P["e1_c2"], 3, 1)       # [B,8,8,32]
    x5 = conv_bn_act(maxpool2(s2), P["e1_c3"], 3, 1)       # [B,4,4,64]
    # ---- a1: ASPP ----
    x5 = aspp(x5, P, "a1")                                 # [B,4,4,16]
    # ---- d1: Decoder1(x5, skips1); last conv fused with out1+sigmoid+gate ----
    u = conv_bn_act(jnp.concatenate([upsample2(x5), s2], -1), P["d1_c1"], 3, 1)
    d1_patches = im2col(jnp.concatenate([upsample2(u), s1], -1), 3, 1
                        ).reshape(M, -1).astype(jnp.bfloat16)
    # x2_in = x * sigmoid(out1(u1))  (u1 never leaves VMEM)
    x2_in_flat = pallas_decoder_gate(d1_patches, P["d1_c2"], P["out1"],
                                     x.reshape(M, C))      # [M, C] bf16
    x2_in = x2_in_flat.reshape(B, H, W, C)

    # ---- e2: Encoder2 -> (p4, skips2) ----
    t1 = conv_bn_act(x2_in, P["e2_c1"], 3, 1)
    t2 = conv_bn_act(maxpool2(t1), P["e2_c2"], 3, 1)
    p4 = maxpool2(t2)                                      # [B,4,4,32]
    # ---- a2: ASPP ----
    p4 = aspp(p4, P, "a2")                                 # [B,4,4,16]
    # ---- d2: Decoder2(p4, skips1, skips2); fused with out2 + CBAM pool ----
    v = conv_bn_act(jnp.concatenate([upsample2(p4), s2, t2], -1), P["d2_c1"], 3, 1)
    d2_patches = im2col(jnp.concatenate([upsample2(v), s1, t1], -1), 3, 1
                        ).reshape(M, -1).astype(jnp.bfloat16)
    # feat = x2_in * sigmoid(out2(u2)), plus [max_C, mean_C] channel pool.
    feat_flat, pooled_flat = pallas_decoder_gate(
        d2_patches, P["d2_c2"], P["out2"], x2_in_flat, pool=True)  # [M,C],[M,2]

    # ---- cbam: SpatialGate (7x7 gate conv fused with the gating multiply) ----
    # TODO(synk): the pooled map is tiny; keep it VMEM-resident and do the 7x7
    # stencil with shifted loads instead of XLA im2col.
    pooled = pooled_flat.reshape(B, H, W, 2)
    gate_patches = im2col(pooled, 7, 3).reshape(M, 49 * 2).astype(jnp.bfloat16)
    feat_flat = pallas_cbam_gate(gate_patches, P["cbam"], feat_flat)  # [M, C]

    # ---- classifier: fc1 via K-tiled GEMM, fused fc2/fc3 tail ----
    # TODO(synk): Dropout(0.5) implemented as eval-mode identity (no RNG mask).
    flat = feat_flat.reshape(B, H * W * C)                 # NHWC flatten, bf16
    h1 = pallas_gemm(flat, P["fc1"]["w"], P["fc1"]["shift"], act="relu")
    return pallas_classifier_tail(h1, P, num_classes)


# ----------------------------------------------------------------------------
if __name__ == "__main__":
    B, C, H, W = 2, 4, 16, 16
    num_classes = 5

    key = jax.random.PRNGKey(0)
    kx, kp = jax.random.split(key)
    x = jax.random.normal(kx, (B, C, H, W), jnp.float32)
    params = build_params(kp, C, H, W, num_classes)

    fwd = jax.jit(functools.partial(forward, num_classes=num_classes))
    logits = jax.block_until_ready(fwd(x, params))
    assert logits.shape == (B, num_classes)
    assert bool(jnp.all(jnp.isfinite(logits)))
    print("KERNEL_OK")
</pallas_src>

<mosaic_0001>
module attributes {stable_mosaic.version = 11 : i64} {
  func.func @_gemm_kernel(%arg0: i32, %arg1: i32, %arg2: i32, %arg3: memref<256x36xbf16, #tpu.memory_space<vmem>>, %arg4: memref<36x16xbf16, #tpu.memory_space<vmem>>, %arg5: memref<1x16xf32, #tpu.memory_space<vmem>>, %arg6: memref<256x16xbf16, #tpu.memory_space<vmem>>, %arg7: memref<256x16xf32, #tpu.memory_space<vmem>>) attributes {dimension_semantics = [#tpu.dimension_semantics<parallel>, #tpu.dimension_semantics<parallel>, #tpu.dimension_semantics<arbitrary>], iteration_bounds = array<i64: 2, 1, 1>, scalar_prefetch = 0 : i64, scratch_operands = 1 : i64, tpu.core_type = #tpu.core_type<tc>, window_params = [{transform_indices = @transform_0, window_bounds = array<i64: 256, 36>}, {transform_indices = @transform_1, window_bounds = array<i64: 36, 16>}, {transform_indices = @transform_2, window_bounds = array<i64: 1, 16>}, {transform_indices = @transform_3, window_bounds = array<i64: 256, 16>}]} {
    %c0_i32 = arith.constant 0 : i32
    %0 = arith.cmpi eq, %arg2, %c0_i32 : i32
    %1 = arith.extui %0 : i1 to i32
    %c0_i32_0 = arith.constant 0 : i32
    %2 = arith.cmpi ne, %1, %c0_i32_0 : i32
    scf.if %2 {
      %cst_10 = arith.constant 0.000000e+00 : f32
      %12 = vector.broadcast %cst_10 : f32 to vector<256x16xf32>
      %c0_11 = arith.constant 0 : index
      %c0_12 = arith.constant 0 : index
      %13 = vector.load %arg7[%c0_11, %c0_12] : memref<256x16xf32, #tpu.memory_space<vmem>>, vector<256x16xf32>
      tpu.vector_store %arg7[%c0_11, %c0_12], %12 {strides = array<i32>} : memref<256x16xf32, #tpu.memory_space<vmem>>, vector<256x16xf32>,
    } else {
    }
    %c0 = arith.constant 0 : index
    %c0_1 = arith.constant 0 : index
    %3 = vector.load %arg7[%c0, %c0_1] : memref<256x16xf32, #tpu.memory_space<vmem>>, vector<256x16xf32>
    %c0_2 = arith.constant 0 : index
    %c0_3 = arith.constant 0 : index
    %4 = vector.load %arg3[%c0_2, %c0_3] : memref<256x36xbf16, #tpu.memory_space<vmem>>, vector<256x36xbf16>
    %c0_4 = arith.constant 0 : index
    %c0_5 = arith.constant 0 : index
    %5 = vector.load %arg4[%c0_4, %c0_5] : memref<36x16xbf16, #tpu.memory_space<vmem>>, vector<36x16xbf16>
    %cst = arith.constant dense<0.000000e+00> : vector<256x16xf32>
    %6 = tpu.matmul %4, %5, %cst {dimension_numbers = #tpu.dot_dimension_numbers<[1], [0], [0], [1], [0, 0, 1, 1], [], []>} : vector<256x36xbf16>, vector<36x16xbf16>, vector<256x16xf32> -> vector<256x16xf32>
    %7 = arith.addf %3, %6 : vector<256x16xf32>
    %c0_6 = arith.constant 0 : index
    %c0_7 = arith.constant 0 : index
    %8 = vector.load %arg7[%c0_6, %c0_7] : memref<256x16xf32, #tpu.memory_space<vmem>>, vector<256x16xf32>
    tpu.vector_store %arg7[%c0_6, %c0_7], %7 {strides = array<i32>} : memref<256x16xf32, #tpu.memory_space<vmem>>, vector<256x16xf32>,
    %c0_i32_8 = arith.constant 0 : i32
    %9 = arith.cmpi eq, %arg2, %c0_i32_8 : i32
    %10 = arith.extui %9 : i1 to i32
    %c0_i32_9 = arith.constant 0 : i32
    %11 = arith.cmpi ne, %10, %c0_i32_9 : i32
    scf.if %11 {
      %c0_10 = arith.constant 0 : index
      %c0_11 = arith.constant 0 : index
      %12 = vector.load %arg7[%c0_10, %c0_11] : memref<256x16xf32, #tpu.memory_space<vmem>>, vector<256x16xf32>
      %c0_12 = arith.constant 0 : index
      %c0_13 = arith.constant 0 : index
      %13 = vector.load %arg5[%c0_12, %c0_13] : memref<1x16xf32, #tpu.memory_space<vmem>>, vector<1x16xf32>
      %14 = vector.broadcast %13 : vector<1x16xf32> to vector<256x16xf32>
      %15 = arith.addf %12, %14 : vector<256x16xf32>
      %cst_14 = arith.constant 0.000000e+00 : f32
      %16 = vector.broadcast %cst_14 : f32 to vector<256x16xf32>
      %17 = arith.maximumf %15, %16 : vector<256x16xf32>
      %18 = arith.truncf %17 : vector<256x16xf32> to vector<256x16xbf16>
      %c0_15 = arith.constant 0 : index
      %c0_16 = arith.constant 0 : index
      %19 = vector.load %arg6[%c0_15, %c0_16] : memref<256x16xbf16, #tpu.memory_space<vmem>>, vector<256x16xbf16>
      tpu.vector_store %arg6[%c0_15, %c0_16], %18 {strides = array<i32>} : memref<256x16xbf16, #tpu.memory_space<vmem>>, vector<256x16xbf16>,
    } else {
    }
    return
  }
  func.func @transform_0(%arg0: i32, %arg1: i32, %arg2: i32) -> (i32, i32) {
    %c0_i32 = arith.constant 0 : i32
    return %arg0, %arg2 : i32, i32
  }
  func.func @transform_1(%arg0: i32, %arg1: i32, %arg2: i32) -> (i32, i32) {
    %c0_i32 = arith.constant 0 : i32
    return %arg2, %arg1 : i32, i32
  }
  func.func @transform_2(%arg0: i32, %arg1: i32, %arg2: i32) -> (i32, i32) {
    %c0_i32 = arith.constant 0 : i32
    %c0_i32_0 = arith.constant 0 : i32
    return %c0_i32, %arg1 : i32, i32
  }
  func.func @transform_3(%arg0: i32, %arg1: i32, %arg2: i32) -> (i32, i32) {
    %c0_i32 = arith.constant 0 : i32
    return %arg0, %arg1 : i32, i32
  }
}

module attributes {stable_mosaic.version = 11 : i64} {
  func.func @_gemm_kernel(%arg0: i32, %arg1: i32, %arg2: i32, %arg3: memref<128x144xbf16, #tpu.memory_space<vmem>>, %arg4: memref<144x32xbf16, #tpu.memory_space<vmem>>, %arg5: memref<1x32xf32, #tpu.memory_space<vmem>>, %arg6: memref<128x32xbf16, #tpu.memory_space<vmem>>, %arg7: memref<128x32xf32, #tpu.memory_space<vmem>>) attributes {dimension_semantics = [#tpu.dimension_semantics<parallel>, #tpu.dimension_semantics<parallel>, #tpu.dimension_semantics<arbitrary>], iteration_bounds = array<i64: 1, 1, 1>, scalar_prefetch = 0 : i64, scratch_operands = 1 : i64, tpu.core_type = #tpu.core_type<tc>, window_params = [{transform_indices = @transform_0, window_bounds = array<i64: 128, 144>}, {transform_indices = @transform_1, window_bounds = array<i64: 144, 32>}, {transform_indices = @transform_2, window_bounds = array<i64: 1, 32>}, {transform_indices = @transform_3, window_bounds = array<i64: 128, 32>}]} {
    %c0_i32 = arith.constant 0 : i32
    %0 = arith.cmpi eq, %arg2, %c0_i32 : i32
    %1 = arith.extui %0 : i1 to i32
    %c0_i32_0 = arith.constant 0 : i32
    %2 = arith.cmpi ne, %1, %c0_i32_0 : i32
    scf.if %2 {
      %cst_10 = arith.constant 0.000000e+00 : f32
      %12 = vector.broadcast %cst_10 : f32 to vector<128x32xf32>
      %c0_11 = arith.constant 0 : index
      %c0_12 = arith.constant 0 : index
      %13 = vector.load %arg7[%c0_11, %c0_12] : memref<128x32xf32, #tpu.memory_space<vmem>>, vector<128x32xf32>
      tpu.vector_store %arg7[%c0_11, %c0_12], %12 {strides = array<i32>} : memref<128x32xf32, #tpu.memory_space<vmem>>, vector<128x32xf32>,
    } else {
    }
    %c0 = arith.constant 0 : index
    %c0_1 = arith.constant 0 : index
    %3 = vector.load %arg7[%c0, %c0_1] : memref<128x32xf32, #tpu.memory_space<vmem>>, vector<128x32xf32>
    %c0_2 = arith.constant 0 : index
    %c0_3 = arith.constant 0 : index
    %4 = vector.load %arg3[%c0_2, %c0_3] : memref<128x144xbf16, #tpu.memory_space<vmem>>, vector<128x144xbf16>
    %c0_4 = arith.constant 0 : index
    %c0_5 = arith.constant 0 : index
    %5 = vector.load %arg4[%c0_4, %c0_5] : memref<144x32xbf16, #tpu.memory_space<vmem>>, vector<144x32xbf16>
    %cst = arith.constant dense<0.000000e+00> : vector<128x32xf32>
    %6 = tpu.matmul %4, %5, %cst {dimension_numbers = #tpu.dot_dimension_numbers<[1], [0], [0], [1], [0, 0, 1, 1], [], []>} : vector<128x144xbf16>, vector<144x32xbf16>, vector<128x32xf32> -> vector<128x32xf32>
    %7 = arith.addf %3, %6 : vector<128x32xf32>
    %c0_6 = arith.constant 0 : index
    %c0_7 = arith.constant 0 : index
    %8 = vector.load %arg7[%c0_6, %c0_7] : memref<128x32xf32, #tpu.memory_space<vmem>>, vector<128x32xf32>
    tpu.vector_store %arg7[%c0_6, %c0_7], %7 {strides = array<i32>} : memref<128x32xf32, #tpu.memory_space<vmem>>, vector<128x32xf32>,
    %c0_i32_8 = arith.constant 0 : i32
    %9 = arith.cmpi eq, %arg2, %c0_i32_8 : i32
    %10 = arith.extui %9 : i1 to i32
    %c0_i32_9 = arith.constant 0 : i32
    %11 = arith.cmpi ne, %10, %c0_i32_9 : i32
    scf.if %11 {
      %c0_10 = arith.constant 0 : index
      %c0_11 = arith.constant 0 : index
      %12 = vector.load %arg7[%c0_10, %c0_11] : memref<128x32xf32, #tpu.memory_space<vmem>>, vector<128x32xf32>
      %c0_12 = arith.constant 0 : index
      %c0_13 = arith.constant 0 : index
      %13 = vector.load %arg5[%c0_12, %c0_13] : memref<1x32xf32, #tpu.memory_space<vmem>>, vector<1x32xf32>
      %14 = vector.broadcast %13 : vector<1x32xf32> to vector<128x32xf32>
      %15 = arith.addf %12, %14 : vector<128x32xf32>
      %cst_14 = arith.constant 0.000000e+00 : f32
      %16 = vector.broadcast %cst_14 : f32 to vector<128x32xf32>
      %17 = arith.maximumf %15, %16 : vector<128x32xf32>
      %18 = arith.truncf %17 : vector<128x32xf32> to vector<128x32xbf16>
      %c0_15 = arith.constant 0 : index
      %c0_16 = arith.constant 0 : index
      %19 = vector.load %arg6[%c0_15, %c0_16] : memref<128x32xbf16, #tpu.memory_space<vmem>>, vector<128x32xbf16>
      tpu.vector_store %arg6[%c0_15, %c0_16], %18 {strides = array<i32>} : memref<128x32xbf16, #tpu.memory_space<vmem>>, vector<128x32xbf16>,
    } else {
    }
    return
  }
  func.func @transform_0(%arg0: i32, %arg1: i32, %arg2: i32) -> (i32, i32) {
    %c0_i32 = arith.constant 0 : i32
    return %arg0, %arg2 : i32, i32
  }
  func.func @transform_1(%arg0: i32, %arg1: i32, %arg2: i32) -> (i32, i32) {
    %c0_i32 = arith.constant 0 : i32
    return %arg2, %arg1 : i32, i32
  }
  func.func @transform_2(%arg0: i32, %arg1: i32, %arg2: i32) -> (i32, i32) {
    %c0_i32 = arith.constant 0 : i32
    %c0_i32_0 = arith.constant 0 : i32
    return %c0_i32, %arg1 : i32, i32
  }
  func.func @transform_3(%arg0: i32, %arg1: i32, %arg2: i32) -> (i32, i32) {
    %c0_i32 = arith.constant 0 : i32
    return %arg0, %arg1 : i32, i32
  }
}

module attributes {stable_mosaic.version = 11 : i64} {
  func.func @_gemm_kernel(%arg0: i32, %arg1: i32, %arg2: i32, %arg3: memref<32x288xbf16, #tpu.memory_space<vmem>>, %arg4: memref<288x64xbf16, #tpu.memory_space<vmem>>, %arg5: memref<1x64xf32, #tpu.memory_space<vmem>>, %arg6: memref<32x64xbf16, #tpu.memory_space<vmem>>, %arg7: memref<32x64xf32, #tpu.memory_space<vmem>>) attributes {dimension_semantics = [#tpu.dimension_semantics<parallel>, #tpu.dimension_semantics<parallel>, #tpu.dimension_semantics<arbitrary>], iteration_bounds = array<i64: 1, 1, 1>, scalar_prefetch = 0 : i64, scratch_operands = 1 : i64, tpu.core_type = #tpu.core_type<tc>, window_params = [{transform_indices = @transform_0, window_bounds = array<i64: 32, 288>}, {transform_indices = @transform_1, window_bounds = array<i64: 288, 64>}, {transform_indices = @transform_2, window_bounds = array<i64: 1, 64>}, {transform_indices = @transform_3, window_bounds = array<i64: 32, 64>}]} {
    %c0_i32 = arith.constant 0 : i32
    %0 = arith.cmpi eq, %arg2, %c0_i32 : i32
    %1 = arith.extui %0 : i1 to i32
    %c0_i32_0 = arith.constant 0 : i32
    %2 = arith.cmpi ne, %1, %c0_i32_0 : i32
    scf.if %2 {
      %cst_10 = arith.constant 0.000000e+00 : f32
      %12 = vector.broadcast %cst_10 : f32 to vector<32x64xf32>
      %c0_11 = arith.constant 0 : index
      %c0_12 = arith.constant 0 : index
      %13 = vector.load %arg7[%c0_11, %c0_12] : memref<32x64xf32, #tpu.memory_space<vmem>>, vector<32x64xf32>
      tpu.vector_store %arg7[%c0_11, %c0_12], %12 {strides = array<i32>} : memref<32x64xf32, #tpu.memory_space<vmem>>, vector<32x64xf32>,
    } else {
    }
    %c0 = arith.constant 0 : index
    %c0_1 = arith.constant 0 : index
    %3 = vector.load %arg7[%c0, %c0_1] : memref<32x64xf32, #tpu.memory_space<vmem>>, vector<32x64xf32>
    %c0_2 = arith.constant 0 : index
    %c0_3 = arith.constant 0 : index
    %4 = vector.load %arg3[%c0_2, %c0_3] : memref<32x288xbf16, #tpu.memory_space<vmem>>, vector<32x288xbf16>
    %c0_4 = arith.constant 0 : index
    %c0_5 = arith.constant 0 : index
    %5 = vector.load %arg4[%c0_4, %c0_5] : memref<288x64xbf16, #tpu.memory_space<vmem>>, vector<288x64xbf16>
    %cst = arith.constant dense<0.000000e+00> : vector<32x64xf32>
    %6 = tpu.matmul %4, %5, %cst {dimension_numbers = #tpu.dot_dimension_numbers<[1], [0], [0], [1], [0, 0, 1, 1], [], []>} : vector<32x288xbf16>, vector<288x64xbf16>, vector<32x64xf32> -> vector<32x64xf32>
    %7 = arith.addf %3, %6 : vector<32x64xf32>
    %c0_6 = arith.constant 0 : index
    %c0_7 = arith.constant 0 : index
    %8 = vector.load %arg7[%c0_6, %c0_7] : memref<32x64xf32, #tpu.memory_space<vmem>>, vector<32x64xf32>
    tpu.vector_store %arg7[%c0_6, %c0_7], %7 {strides = array<i32>} : memref<32x64xf32, #tpu.memory_space<vmem>>, vector<32x64xf32>,
    %c0_i32_8 = arith.constant 0 : i32
    %9 = arith.cmpi eq, %arg2, %c0_i32_8 : i32
    %10 = arith.extui %9 : i1 to i32
    %c0_i32_9 = arith.constant 0 : i32
    %11 = arith.cmpi ne, %10, %c0_i32_9 : i32
    scf.if %11 {
      %c0_10 = arith.constant 0 : index
      %c0_11 = arith.constant 0 : index
      %12 = vector.load %arg7[%c0_10, %c0_11] : memref<32x64xf32, #tpu.memory_space<vmem>>, vector<32x64xf32>
      %c0_12 = arith.constant 0 : index
      %c0_13 = arith.constant 0 : index
      %13 = vector.load %arg5[%c0_12, %c0_13] : memref<1x64xf32, #tpu.memory_space<vmem>>, vector<1x64xf32>
      %14 = vector.broadcast %13 : vector<1x64xf32> to vector<32x64xf32>
      %15 = arith.addf %12, %14 : vector<32x64xf32>
      %cst_14 = arith.constant 0.000000e+00 : f32
      %16 = vector.broadcast %cst_14 : f32 to vector<32x64xf32>
      %17 = arith.maximumf %15, %16 : vector<32x64xf32>
      %18 = arith.truncf %17 : vector<32x64xf32> to vector<32x64xbf16>
      %c0_15 = arith.constant 0 : index
      %c0_16 = arith.constant 0 : index
      %19 = vector.load %arg6[%c0_15, %c0_16] : memref<32x64xbf16, #tpu.memory_space<vmem>>, vector<32x64xbf16>
      tpu.vector_store %arg6[%c0_15, %c0_16], %18 {strides = array<i32>} : memref<32x64xbf16, #tpu.memory_space<vmem>>, vector<32x64xbf16>,
    } else {
    }
    return
  }
  func.func @transform_0(%arg0: i32, %arg1: i32, %arg2: i32) -> (i32, i32) {
    %c0_i32 = arith.constant 0 : i32
    return %arg0, %arg2 : i32, i32
  }
  func.func @transform_1(%arg0: i32, %arg1: i32, %arg2: i32) -> (i32, i32) {
    %c0_i32 = arith.constant 0 : i32
    return %arg2, %arg1 : i32, i32
  }
  func.func @transform_2(%arg0: i32, %arg1: i32, %arg2: i32) -> (i32, i32) {
    %c0_i32 = arith.constant 0 : i32
    %c0_i32_0 = arith.constant 0 : i32
    return %c0_i32, %arg1 : i32, i32
  }
  func.func @transform_3(%arg0: i32, %arg1: i32, %arg2: i32) -> (i32, i32) {
    %c0_i32 = arith.constant 0 : i32
    return %arg0, %arg1 : i32, i32
  }
}

module attributes {stable_mosaic.version = 11 : i64} {
  func.func @_gemm_kernel(%arg0: i32, %arg1: i32, %arg2: i32, %arg3: memref<32x576xbf16, #tpu.memory_space<vmem>>, %arg4: memref<576x16xbf16, #tpu.memory_space<vmem>>, %arg5: memref<1x16xf32, #tpu.memory_space<vmem>>, %arg6: memref<32x16xbf16, #tpu.memory_space<vmem>>, %arg7: memref<32x16xf32, #tpu.memory_space<vmem>>) attributes {dimension_semantics = [#tpu.dimension_semantics<parallel>, #tpu.dimension_semantics<parallel>, #tpu.dimension_semantics<arbitrary>], iteration_bounds = array<i64: 1, 1, 1>, scalar_prefetch = 0 : i64, scratch_operands = 1 : i64, tpu.core_type = #tpu.core_type<tc>, window_params = [{transform_indices = @transform_0, window_bounds = array<i64: 32, 576>}, {transform_indices = @transform_1, window_bounds = array<i64: 576, 16>}, {transform_indices = @transform_2, window_bounds = array<i64: 1, 16>}, {transform_indices = @transform_3, window_bounds = array<i64: 32, 16>}]} {
    %c0_i32 = arith.constant 0 : i32
    %0 = arith.cmpi eq, %arg2, %c0_i32 : i32
    %1 = arith.extui %0 : i1 to i32
    %c0_i32_0 = arith.constant 0 : i32
    %2 = arith.cmpi ne, %1, %c0_i32_0 : i32
    scf.if %2 {
      %cst_10 = arith.constant 0.000000e+00 : f32
      %12 = vector.broadcast %cst_10 : f32 to vector<32x16xf32>
      %c0_11 = arith.constant 0 : index
      %c0_12 = arith.constant 0 : index
      %13 = vector.load %arg7[%c0_11, %c0_12] : memref<32x16xf32, #tpu.memory_space<vmem>>, vector<32x16xf32>
      tpu.vector_store %arg7[%c0_11, %c0_12], %12 {strides = array<i32>} : memref<32x16xf32, #tpu.memory_space<vmem>>, vector<32x16xf32>,
    } else {
    }
    %c0 = arith.constant 0 : index
    %c0_1 = arith.constant 0 : index
    %3 = vector.load %arg7[%c0, %c0_1] : memref<32x16xf32, #tpu.memory_space<vmem>>, vector<32x16xf32>
    %c0_2 = arith.constant 0 : index
    %c0_3 = arith.constant 0 : index
    %4 = vector.load %arg3[%c0_2, %c0_3] : memref<32x576xbf16, #tpu.memory_space<vmem>>, vector<32x576xbf16>
    %c0_4 = arith.constant 0 : index
    %c0_5 = arith.constant 0 : index
    %5 = vector.load %arg4[%c0_4, %c0_5] : memref<576x16xbf16, #tpu.memory_space<vmem>>, vector<576x16xbf16>
    %cst = arith.constant dense<0.000000e+00> : vector<32x16xf32>
    %6 = tpu.matmul %4, %5, %cst {dimension_numbers = #tpu.dot_dimension_numbers<[1], [0], [0], [1], [0, 0, 1, 1], [], []>} : vector<32x576xbf16>, vector<576x16xbf16>, vector<32x16xf32> -> vector<32x16xf32>
    %7 = arith.addf %3, %6 : vector<32x16xf32>
    %c0_6 = arith.constant 0 : index
    %c0_7 = arith.constant 0 : index
    %8 = vector.load %arg7[%c0_6, %c0_7] : memref<32x16xf32, #tpu.memory_space<vmem>>, vector<32x16xf32>
    tpu.vector_store %arg7[%c0_6, %c0_7], %7 {strides = array<i32>} : memref<32x16xf32, #tpu.memory_space<vmem>>, vector<32x16xf32>,
    %c0_i32_8 = arith.constant 0 : i32
    %9 = arith.cmpi eq, %arg2, %c0_i32_8 : i32
    %10 = arith.extui %9 : i1 to i32
    %c0_i32_9 = arith.constant 0 : i32
    %11 = arith.cmpi ne, %10, %c0_i32_9 : i32
    scf.if %11 {
      %c0_10 = arith.constant 0 : index
      %c0_11 = arith.constant 0 : index
      %12 = vector.load %arg7[%c0_10, %c0_11] : memref<32x16xf32, #tpu.memory_space<vmem>>, vector<32x16xf32>
      %c0_12 = arith.constant 0 : index
      %c0_13 = arith.constant 0 : index
      %13 = vector.load %arg5[%c0_12, %c0_13] : memref<1x16xf32, #tpu.memory_space<vmem>>, vector<1x16xf32>
      %14 = vector.broadcast %13 : vector<1x16xf32> to vector<32x16xf32>
      %15 = arith.addf %12, %14 : vector<32x16xf32>
      %cst_14 = arith.constant 0.000000e+00 : f32
      %16 = vector.broadcast %cst_14 : f32 to vector<32x16xf32>
      %17 = arith.maximumf %15, %16 : vector<32x16xf32>
      %18 = arith.truncf %17 : vector<32x16xf32> to vector<32x16xbf16>
      %c0_15 = arith.constant 0 : index
      %c0_16 = arith.constant 0 : index
      %19 = vector.load %arg6[%c0_15, %c0_16] : memref<32x16xbf16, #tpu.memory_space<vmem>>, vector<32x16xbf16>
      tpu.vector_store %arg6[%c0_15, %c0_16], %18 {strides = array<i32>} : memref<32x16xbf16, #tpu.memory_space<vmem>>, vector<32x16xbf16>,
    } else {
    }
    return
  }
  func.func @transform_0(%arg0: i32, %arg1: i32, %arg2: i32) -> (i32, i32) {
    %c0_i32 = arith.constant 0 : i32
    return %arg0, %arg2 : i32, i32
  }
  func.func @transform_1(%arg0: i32, %arg1: i32, %arg2: i32) -> (i32, i32) {
    %c0_i32 = arith.constant 0 : i32
    return %arg2, %arg1 : i32, i32
  }
  func.func @transform_2(%arg0: i32, %arg1: i32, %arg2: i32) -> (i32, i32) {
    %c0_i32 = arith.constant 0 : i32
    %c0_i32_0 = arith.constant 0 : i32
    return %c0_i32, %arg1 : i32, i32
  }
  func.func @transform_3(%arg0: i32, %arg1: i32, %arg2: i32) -> (i32, i32) {
    %c0_i32 = arith.constant 0 : i32
    return %arg0, %arg1 : i32, i32
  }
}

module attributes {stable_mosaic.version = 11 : i64} {
  func.func @_gemm_kernel(%arg0: i32, %arg1: i32, %arg2: i32, %arg3: memref<32x64xbf16, #tpu.memory_space<vmem>>, %arg4: memref<64x16xbf16, #tpu.memory_space<vmem>>, %arg5: memref<1x16xf32, #tpu.memory_space<vmem>>, %arg6: memref<32x16xbf16, #tpu.memory_space<vmem>>, %arg7: memref<32x16xf32, #tpu.memory_space<vmem>>) attributes {dimension_semantics = [#tpu.dimension_semantics<parallel>, #tpu.dimension_semantics<parallel>, #tpu.dimension_semantics<arbitrary>], iteration_bounds = array<i64: 1, 1, 1>, scalar_prefetch = 0 : i64, scratch_operands = 1 : i64, tpu.core_type = #tpu.core_type<tc>, window_params = [{transform_indices = @transform_0, window_bounds = array<i64: 32, 64>}, {transform_indices = @transform_1, window_bounds = array<i64: 64, 16>}, {transform_indices = @transform_2, window_bounds = array<i64: 1, 16>}, {transform_indices = @transform_3, window_bounds = array<i64: 32, 16>}]} {
    %c0_i32 = arith.constant 0 : i32
    %0 = arith.cmpi eq, %arg2, %c0_i32 : i32
    %1 = arith.extui %0 : i1 to i32
    %c0_i32_0 = arith.constant 0 : i32
    %2 = arith.cmpi ne, %1, %c0_i32_0 : i32
    scf.if %2 {
      %cst_10 = arith.constant 0.000000e+00 : f32
      %12 = vector.broadcast %cst_10 : f32 to vector<32x16xf32>
      %c0_11 = arith.constant 0 : index
      %c0_12 = arith.constant 0 : index
      %13 = vector.load %arg7[%c0_11, %c0_12] : memref<32x16xf32, #tpu.memory_space<vmem>>, vector<32x16xf32>
      tpu.vector_store %arg7[%c0_11, %c0_12], %12 {strides = array<i32>} : memref<32x16xf32, #tpu.memory_space<vmem>>, vector<32x16xf32>,
    } else {
    }
    %c0 = arith.constant 0 : index
    %c0_1 = arith.constant 0 : index
    %3 = vector.load %arg7[%c0, %c0_1] : memref<32x16xf32, #tpu.memory_space<vmem>>, vector<32x16xf32>
    %c0_2 = arith.constant 0 : index
    %c0_3 = arith.constant 0 : index
    %4 = vector.load %arg3[%c0_2, %c0_3] : memref<32x64xbf16, #tpu.memory_space<vmem>>, vector<32x64xbf16>
    %c0_4 = arith.constant 0 : index
    %c0_5 = arith.constant 0 : index
    %5 = vector.load %arg4[%c0_4, %c0_5] : memref<64x16xbf16, #tpu.memory_space<vmem>>, vector<64x16xbf16>
    %cst = arith.constant dense<0.000000e+00> : vector<32x16xf32>
    %6 = tpu.matmul %4, %5, %cst {dimension_numbers = #tpu.dot_dimension_numbers<[1], [0], [0], [1], [0, 0, 1, 1], [], []>} : vector<32x64xbf16>, vector<64x16xbf16>, vector<32x16xf32> -> vector<32x16xf32>
    %7 = arith.addf %3, %6 : vector<32x16xf32>
    %c0_6 = arith.constant 0 : index
    %c0_7 = arith.constant 0 : index
    %8 = vector.load %arg7[%c0_6, %c0_7] : memref<32x16xf32, #tpu.memory_space<vmem>>, vector<32x16xf32>
    tpu.vector_store %arg7[%c0_6, %c0_7], %7 {strides = array<i32>} : memref<32x16xf32, #tpu.memory_space<vmem>>, vector<32x16xf32>,
    %c0_i32_8 = arith.constant 0 : i32
    %9 = arith.cmpi eq, %arg2, %c0_i32_8 : i32
    %10 = arith.extui %9 : i1 to i32
    %c0_i32_9 = arith.constant 0 : i32
    %11 = arith.cmpi ne, %10, %c0_i32_9 : i32
    scf.if %11 {
      %c0_10 = arith.constant 0 : index
      %c0_11 = arith.constant 0 : index
      %12 = vector.load %arg7[%c0_10, %c0_11] : memref<32x16xf32, #tpu.memory_space<vmem>>, vector<32x16xf32>
      %c0_12 = arith.constant 0 : index
      %c0_13 = arith.constant 0 : index
      %13 = vector.load %arg5[%c0_12, %c0_13] : memref<1x16xf32, #tpu.memory_space<vmem>>, vector<1x16xf32>
      %14 = vector.broadcast %13 : vector<1x16xf32> to vector<32x16xf32>
      %15 = arith.addf %12, %14 : vector<32x16xf32>
      %cst_14 = arith.constant 0.000000e+00 : f32
      %16 = vector.broadcast %cst_14 : f32 to vector<32x16xf32>
      %17 = arith.maximumf %15, %16 : vector<32x16xf32>
      %18 = arith.truncf %17 : vector<32x16xf32> to vector<32x16xbf16>
      %c0_15 = arith.constant 0 : index
      %c0_16 = arith.constant 0 : index
      %19 = vector.load %arg6[%c0_15, %c0_16] : memref<32x16xbf16, #tpu.memory_space<vmem>>, vector<32x16xbf16>
      tpu.vector_store %arg6[%c0_15, %c0_16], %18 {strides = array<i32>} : memref<32x16xbf16, #tpu.memory_space<vmem>>, vector<32x16xbf16>,
    } else {
    }
    return
  }
  func.func @transform_0(%arg0: i32, %arg1: i32, %arg2: i32) -> (i32, i32) {
    %c0_i32 = arith.constant 0 : i32
    return %arg0, %arg2 : i32, i32
  }
  func.func @transform_1(%arg0: i32, %arg1: i32, %arg2: i32) -> (i32, i32) {
    %c0_i32 = arith.constant 0 : i32
    return %arg2, %arg1 : i32, i32
  }
  func.func @transform_2(%arg0: i32, %arg1: i32, %arg2: i32) -> (i32, i32) {
    %c0_i32 = arith.constant 0 : i32
    %c0_i32_0 = arith.constant 0 : i32
    return %c0_i32, %arg1 : i32, i32
  }
  func.func @transform_3(%arg0: i32, %arg1: i32, %arg2: i32) -> (i32, i32) {
    %c0_i32 = arith.constant 0 : i32
    return %arg0, %arg1 : i32, i32
  }
}

module attributes {stable_mosaic.version = 11 : i64} {
  func.func @_gemm_kernel(%arg0: i32, %arg1: i32, %arg2: i32, %arg3: memref<2x64xbf16, #tpu.memory_space<vmem>>, %arg4: memref<64x16xbf16, #tpu.memory_space<vmem>>, %arg5: memref<1x16xf32, #tpu.memory_space<vmem>>, %arg6: memref<2x16xbf16, #tpu.memory_space<vmem>>, %arg7: memref<2x16xf32, #tpu.memory_space<vmem>>) attributes {dimension_semantics = [#tpu.dimension_semantics<parallel>, #tpu.dimension_semantics<parallel>, #tpu.dimension_semantics<arbitrary>], iteration_bounds = array<i64: 1, 1, 1>, scalar_prefetch = 0 : i64, scratch_operands = 1 : i64, tpu.core_type = #tpu.core_type<tc>, window_params = [{transform_indices = @transform_0, window_bounds = array<i64: 2, 64>}, {transform_indices = @transform_1, window_bounds = array<i64: 64, 16>}, {transform_indices = @transform_2, window_bounds = array<i64: 1, 16>}, {transform_indices = @transform_3, window_bounds = array<i64: 2, 16>}]} {
    %c0_i32 = arith.constant 0 : i32
    %0 = arith.cmpi eq, %arg2, %c0_i32 : i32
    %1 = arith.extui %0 : i1 to i32
    %c0_i32_0 = arith.constant 0 : i32
    %2 = arith.cmpi ne, %1, %c0_i32_0 : i32
    scf.if %2 {
      %cst_10 = arith.constant 0.000000e+00 : f32
      %12 = vector.broadcast %cst_10 : f32 to vector<2x16xf32>
      %c0_11 = arith.constant 0 : index
      %c0_12 = arith.constant 0 : index
      %13 = vector.load %arg7[%c0_11, %c0_12] : memref<2x16xf32, #tpu.memory_space<vmem>>, vector<2x16xf32>
      tpu.vector_store %arg7[%c0_11, %c0_12], %12 {strides = array<i32>} : memref<2x16xf32, #tpu.memory_space<vmem>>, vector<2x16xf32>,
    } else {
    }
    %c0 = arith.constant 0 : index
    %c0_1 = arith.constant 0 : index
    %3 = vector.load %arg7[%c0, %c0_1] : memref<2x16xf32, #tpu.memory_space<vmem>>, vector<2x16xf32>
    %c0_2 = arith.constant 0 : index
    %c0_3 = arith.constant 0 : index
    %4 = vector.load %arg3[%c0_2, %c0_3] : memref<2x64xbf16, #tpu.memory_space<vmem>>, vector<2x64xbf16>
    %c0_4 = arith.constant 0 : index
    %c0_5 = arith.constant 0 : index
    %5 = vector.load %arg4[%c0_4, %c0_5] : memref<64x16xbf16, #tpu.memory_space<vmem>>, vector<64x16xbf16>
    %cst = arith.constant dense<0.000000e+00> : vector<2x16xf32>
    %6 = tpu.matmul %4, %5, %cst {dimension_numbers = #tpu.dot_dimension_numbers<[1], [0], [0], [1], [0, 0, 1, 1], [], []>} : vector<2x64xbf16>, vector<64x16xbf16>, vector<2x16xf32> -> vector<2x16xf32>
    %7 = arith.addf %3, %6 : vector<2x16xf32>
    %c0_6 = arith.constant 0 : index
    %c0_7 = arith.constant 0 : index
    %8 = vector.load %arg7[%c0_6, %c0_7] : memref<2x16xf32, #tpu.memory_space<vmem>>, vector<2x16xf32>
    tpu.vector_store %arg7[%c0_6, %c0_7], %7 {strides = array<i32>} : memref<2x16xf32, #tpu.memory_space<vmem>>, vector<2x16xf32>,
    %c0_i32_8 = arith.constant 0 : i32
    %9 = arith.cmpi eq, %arg2, %c0_i32_8 : i32
    %10 = arith.extui %9 : i1 to i32
    %c0_i32_9 = arith.constant 0 : i32
    %11 = arith.cmpi ne, %10, %c0_i32_9 : i32
    scf.if %11 {
      %c0_10 = arith.constant 0 : index
      %c0_11 = arith.constant 0 : index
      %12 = vector.load %arg7[%c0_10, %c0_11] : memref<2x16xf32, #tpu.memory_space<vmem>>, vector<2x16xf32>
      %c0_12 = arith.constant 0 : index
      %c0_13 = arith.constant 0 : index
      %13 = vector.load %arg5[%c0_12, %c0_13] : memref<1x16xf32, #tpu.memory_space<vmem>>, vector<1x16xf32>
      %14 = vector.broadcast %13 : vector<1x16xf32> to vector<2x16xf32>
      %15 = arith.addf %12, %14 : vector<2x16xf32>
      %cst_14 = arith.constant 0.000000e+00 : f32
      %16 = vector.broadcast %cst_14 : f32 to vector<2x16xf32>
      %17 = arith.maximumf %15, %16 : vector<2x16xf32>
      %18 = arith.truncf %17 : vector<2x16xf32> to vector<2x16xbf16>
      %c0_15 = arith.constant 0 : index
      %c0_16 = arith.constant 0 : index
      %19 = vector.load %arg6[%c0_15, %c0_16] : memref<2x16xbf16, #tpu.memory_space<vmem>>, vector<2x16xbf16>
      tpu.vector_store %arg6[%c0_15, %c0_16], %18 {strides = array<i32>} : memref<2x16xbf16, #tpu.memory_space<vmem>>, vector<2x16xbf16>,
    } else {
    }
    return
  }
  func.func @transform_0(%arg0: i32, %arg1: i32, %arg2: i32) -> (i32, i32) {
    %c0_i32 = arith.constant 0 : i32
    return %arg0, %arg2 : i32, i32
  }
  func.func @transform_1(%arg0: i32, %arg1: i32, %arg2: i32) -> (i32, i32) {
    %c0_i32 = arith.constant 0 : i32
    return %arg2, %arg1 : i32, i32
  }
  func.func @transform_2(%arg0: i32, %arg1: i32, %arg2: i32) -> (i32, i32) {
    %c0_i32 = arith.constant 0 : i32
    %c0_i32_0 = arith.constant 0 : i32
    return %c0_i32, %arg1 : i32, i32
  }
  func.func @transform_3(%arg0: i32, %arg1: i32, %arg2: i32) -> (i32, i32) {
    %c0_i32 = arith.constant 0 : i32
    return %arg0, %arg1 : i32, i32
  }
}

module attributes {stable_mosaic.version = 11 : i64} {
  func.func @_gemm_kernel(%arg0: i32, %arg1: i32, %arg2: i32, %arg3: memref<128x432xbf16, #tpu.memory_space<vmem>>, %arg4: memref<432x16xbf16, #tpu.memory_space<vmem>>, %arg5: memref<1x16xf32, #tpu.memory_space<vmem>>, %arg6: memref<128x16xbf16, #tpu.memory_space<vmem>>, %arg7: memref<128x16xf32, #tpu.memory_space<vmem>>) attributes {dimension_semantics = [#tpu.dimension_semantics<parallel>, #tpu.dimension_semantics<parallel>, #tpu.dimension_semantics<arbitrary>], iteration_bounds = array<i64: 1, 1, 1>, scalar_prefetch = 0 : i64, scratch_operands = 1 : i64, tpu.core_type = #tpu.core_type<tc>, window_params = [{transform_indices = @transform_0, window_bounds = array<i64: 128, 432>}, {transform_indices = @transform_1, window_bounds = array<i64: 432, 16>}, {transform_indices = @transform_2, window_bounds = array<i64: 1, 16>}, {transform_indices = @transform_3, window_bounds = array<i64: 128, 16>}]} {
    %c0_i32 = arith.constant 0 : i32
    %0 = arith.cmpi eq, %arg2, %c0_i32 : i32
    %1 = arith.extui %0 : i1 to i32
    %c0_i32_0 = arith.constant 0 : i32
    %2 = arith.cmpi ne, %1, %c0_i32_0 : i32
    scf.if %2 {
      %cst_10 = arith.constant 0.000000e+00 : f32
      %12 = vector.broadcast %cst_10 : f32 to vector<128x16xf32>
      %c0_11 = arith.constant 0 : index
      %c0_12 = arith.constant 0 : index
      %13 = vector.load %arg7[%c0_11, %c0_12] : memref<128x16xf32, #tpu.memory_space<vmem>>, vector<128x16xf32>
      tpu.vector_store %arg7[%c0_11, %c0_12], %12 {strides = array<i32>} : memref<128x16xf32, #tpu.memory_space<vmem>>, vector<128x16xf32>,
    } else {
    }
    %c0 = arith.constant 0 : index
    %c0_1 = arith.constant 0 : index
    %3 = vector.load %arg7[%c0, %c0_1] : memref<128x16xf32, #tpu.memory_space<vmem>>, vector<128x16xf32>
    %c0_2 = arith.constant 0 : index
    %c0_3 = arith.constant 0 : index
    %4 = vector.load %arg3[%c0_2, %c0_3] : memref<128x432xbf16, #tpu.memory_space<vmem>>, vector<128x432xbf16>
    %c0_4 = arith.constant 0 : index
    %c0_5 = arith.constant 0 : index
    %5 = vector.load %arg4[%c0_4, %c0_5] : memref<432x16xbf16, #tpu.memory_space<vmem>>, vector<432x16xbf16>
    %cst = arith.constant dense<0.000000e+00> : vector<128x16xf32>
    %6 = tpu.matmul %4, %5, %cst {dimension_numbers = #tpu.dot_dimension_numbers<[1], [0], [0], [1], [0, 0, 1, 1], [], []>} : vector<128x432xbf16>, vector<432x16xbf16>, vector<128x16xf32> -> vector<128x16xf32>
    %7 = arith.addf %3, %6 : vector<128x16xf32>
    %c0_6 = arith.constant 0 : index
    %c0_7 = arith.constant 0 : index
    %8 = vector.load %arg7[%c0_6, %c0_7] : memref<128x16xf32, #tpu.memory_space<vmem>>, vector<128x16xf32>
    tpu.vector_store %arg7[%c0_6, %c0_7], %7 {strides = array<i32>} : memref<128x16xf32, #tpu.memory_space<vmem>>, vector<128x16xf32>,
    %c0_i32_8 = arith.constant 0 : i32
    %9 = arith.cmpi eq, %arg2, %c0_i32_8 : i32
    %10 = arith.extui %9 : i1 to i32
    %c0_i32_9 = arith.constant 0 : i32
    %11 = arith.cmpi ne, %10, %c0_i32_9 : i32
    scf.if %11 {
      %c0_10 = arith.constant 0 : index
      %c0_11 = arith.constant 0 : index
      %12 = vector.load %arg7[%c0_10, %c0_11] : memref<128x16xf32, #tpu.memory_space<vmem>>, vector<128x16xf32>
      %c0_12 = arith.constant 0 : index
      %c0_13 = arith.constant 0 : index
      %13 = vector.load %arg5[%c0_12, %c0_13] : memref<1x16xf32, #tpu.memory_space<vmem>>, vector<1x16xf32>
      %14 = vector.broadcast %13 : vector<1x16xf32> to vector<128x16xf32>
      %15 = arith.addf %12, %14 : vector<128x16xf32>
      %cst_14 = arith.constant 0.000000e+00 : f32
      %16 = vector.broadcast %cst_14 : f32 to vector<128x16xf32>
      %17 = arith.maximumf %15, %16 : vector<128x16xf32>
      %18 = arith.truncf %17 : vector<128x16xf32> to vector<128x16xbf16>
      %c0_15 = arith.constant 0 : index
      %c0_16 = arith.constant 0 : index
      %19 = vector.load %arg6[%c0_15, %c0_16] : memref<128x16xbf16, #tpu.memory_space<vmem>>, vector<128x16xbf16>
      tpu.vector_store %arg6[%c0_15, %c0_16], %18 {strides = array<i32>} : memref<128x16xbf16, #tpu.memory_space<vmem>>, vector<128x16xbf16>,
    } else {
    }
    return
  }
  func.func @transform_0(%arg0: i32, %arg1: i32, %arg2: i32) -> (i32, i32) {
    %c0_i32 = arith.constant 0 : i32
    return %arg0, %arg2 : i32, i32
  }
  func.func @transform_1(%arg0: i32, %arg1: i32, %arg2: i32) -> (i32, i32) {
    %c0_i32 = arith.constant 0 : i32
    return %arg2, %arg1 : i32, i32
  }
  func.func @transform_2(%arg0: i32, %arg1: i32, %arg2: i32) -> (i32, i32) {
    %c0_i32 = arith.constant 0 : i32
    %c0_i32_0 = arith.constant 0 : i32
    return %c0_i32, %arg1 : i32, i32
  }
  func.func @transform_3(%arg0: i32, %arg1: i32, %arg2: i32) -> (i32, i32) {
    %c0_i32 = arith.constant 0 : i32
    return %arg0, %arg1 : i32, i32
  }
}

module attributes {stable_mosaic.version = 11 : i64} {
  func.func @_decoder_gate_kernel(%arg0: i32, %arg1: memref<256x288xbf16, #tpu.memory_space<vmem>>, %arg2: memref<288x8xbf16, #tpu.memory_space<vmem>>, %arg3: memref<1x8xf32, #tpu.memory_space<vmem>>, %arg4: memref<1x8xbf16, #tpu.memory_space<vmem>>, %arg5: memref<1x1xf32, #tpu.memory_space<vmem>>, %arg6: memref<256x4xbf16, #tpu.memory_space<vmem>>, %arg7: memref<256x4xbf16, #tpu.memory_space<vmem>>) attributes {dimension_semantics = [#tpu.dimension_semantics<parallel>], iteration_bounds = array<i64: 2>, scalar_prefetch = 0 : i64, scratch_operands = 0 : i64, tpu.core_type = #tpu.core_type<tc>, window_params = [{transform_indices = @transform_0, window_bounds = array<i64: 256, 288>}, {pipeline_mode = #tpu.pipeline_mode<synchronous>, transform_indices = @transform_1, window_bounds = array<i64: 288, 8>}, {pipeline_mode = #tpu.pipeline_mode<synchronous>, transform_indices = @transform_2, window_bounds = array<i64: 1, 8>}, {pipeline_mode = #tpu.pipeline_mode<synchronous>, transform_indices = @transform_3, window_bounds = array<i64: 1, 8>}, {pipeline_mode = #tpu.pipeline_mode<synchronous>, transform_indices = @transform_4, window_bounds = array<i64: 1, 1>}, {transform_indices = @transform_5, window_bounds = array<i64: 256, 4>}, {transform_indices = @transform_6, window_bounds = array<i64: 256, 4>}]} {
    %c0 = arith.constant 0 : index
    %c0_0 = arith.constant 0 : index
    %0 = vector.load %arg1[%c0, %c0_0] : memref<256x288xbf16, #tpu.memory_space<vmem>>, vector<256x288xbf16>
    %c0_1 = arith.constant 0 : index
    %c0_2 = arith.constant 0 : index
    %1 = vector.load %arg2[%c0_1, %c0_2] : memref<288x8xbf16, #tpu.memory_space<vmem>>, vector<288x8xbf16>
    %cst = arith.constant dense<0.000000e+00> : vector<256x8xf32>
    %2 = tpu.matmul %0, %1, %cst {dimension_numbers = #tpu.dot_dimension_numbers<[1], [0], [0], [1], [0, 0, 1, 1], [], []>} : vector<256x288xbf16>, vector<288x8xbf16>, vector<256x8xf32> -> vector<256x8xf32>
    %c0_3 = arith.constant 0 : index
    %c0_4 = arith.constant 0 : index
    %3 = vector.load %arg3[%c0_3, %c0_4] : memref<1x8xf32, #tpu.memory_space<vmem>>, vector<1x8xf32>
    %4 = vector.broadcast %3 : vector<1x8xf32> to vector<256x8xf32>
    %5 = arith.addf %2, %4 : vector<256x8xf32>
    %cst_5 = arith.constant 0.000000e+00 : f32
    %6 = vector.broadcast %cst_5 : f32 to vector<256x8xf32>
    %7 = arith.maximumf %5, %6 : vector<256x8xf32>
    %c0_6 = arith.constant 0 : index
    %c0_7 = arith.constant 0 : index
    %8 = vector.load %arg4[%c0_6, %c0_7] : memref<1x8xbf16, #tpu.memory_space<vmem>>, vector<1x8xbf16>
    %9 = arith.extf %8 : vector<1x8xbf16> to vector<1x8xf32>
    %10 = vector.broadcast %9 : vector<1x8xf32> to vector<256x8xf32>
    %11 = arith.mulf %7, %10 : vector<256x8xf32>
    %cst_8 = arith.constant dense<0.000000e+00> : vector<256xf32>
    %12 = vector.multi_reduction <add>, %11, %cst_8 [1] : vector<256x8xf32> to vector<256xf32>
    %13 = vector.shape_cast %12 : vector<256xf32> to vector<256x1xf32>
    %c0_9 = arith.constant 0 : index
    %c0_10 = arith.constant 0 : index
    %14 = vector.load %arg5[%c0_9, %c0_10] : memref<1x1xf32, #tpu.memory_space<vmem>>, vector<1x1xf32>
    %15 = vector.broadcast %14 : vector<1x1xf32> to vector<256x1xf32>
    %16 = arith.addf %13, %15 : vector<256x1xf32>
    %17 = arith.negf %16 : vector<256x1xf32>
    %18 = math.exp %17 : vector<256x1xf32>
    %cst_11 = arith.constant 1.000000e+00 : f32
    %19 = vector.broadcast %cst_11 : f32 to vector<256x1xf32>
    %20 = arith.addf %19, %18 : vector<256x1xf32>
    %21 = arith.divf %19, %20 : vector<256x1xf32>
    %c0_12 = arith.constant 0 : index
    %c0_13 = arith.constant 0 : index
    %22 = vector.load %arg6[%c0_12, %c0_13] : memref<256x4xbf16, #tpu.memory_space<vmem>>, vector<256x4xbf16>
    %23 = arith.extf %22 : vector<256x4xbf16> to vector<256x4xf32>
    %24 = vector.broadcast %21 : vector<256x1xf32> to vector<256x4xf32>
    %25 = arith.mulf %23, %24 : vector<256x4xf32>
    %26 = arith.truncf %25 : vector<256x4xf32> to vector<256x4xbf16>
    %c0_14 = arith.constant 0 : index
    %c0_15 = arith.constant 0 : index
    %27 = vector.load %arg7[%c0_14, %c0_15] : memref<256x4xbf16, #tpu.memory_space<vmem>>, vector<256x4xbf16>
    tpu.vector_store %arg7[%c0_14, %c0_15], %26 {strides = array<i32>} : memref<256x4xbf16, #tpu.memory_space<vmem>>, vector<256x4xbf16>,
    return
  }
  func.func @transform_0(%arg0: i32) -> (i32, i32) {
    %c0_i32 = arith.constant 0 : i32
    %c0_i32_0 = arith.constant 0 : i32
    return %arg0, %c0_i32 : i32, i32
  }
  func.func @transform_1(%arg0: i32) -> (i32, i32) {
    %c0_i32 = arith.constant 0 : i32
    %c0_i32_0 = arith.constant 0 : i32
    %c0_i32_1 = arith.constant 0 : i32
    return %c0_i32, %c0_i32_0 : i32, i32
  }
  func.func @transform_2(%arg0: i32) -> (i32, i32) {
    %c0_i32 = arith.constant 0 : i32
    %c0_i32_0 = arith.constant 0 : i32
    %c0_i32_1 = arith.constant 0 : i32
    return %c0_i32, %c0_i32_0 : i32, i32
  }
  func.func @transform_3(%arg0: i32) -> (i32, i32) {
    %c0_i32 = arith.constant 0 : i32
    %c0_i32_0 = arith.constant 0 : i32
    %c0_i32_1 = arith.constant 0 : i32
    return %c0_i32, %c0_i32_0 : i32, i32
  }
  func.func @transform_4(%arg0: i32) -> (i32, i32) {
    %c0_i32 = arith.constant 0 : i32
    %c0_i32_0 = arith.constant 0 : i32
    %c0_i32_1 = arith.constant 0 : i32
    return %c0_i32, %c0_i32_0 : i32, i32
  }
  func.func @transform_5(%arg0: i32) -> (i32, i32) {
    %c0_i32 = arith.constant 0 : i32
    %c0_i32_0 = arith.constant 0 : i32
    return %arg0, %c0_i32 : i32, i32
  }
  func.func @transform_6(%arg0: i32) -> (i32, i32) {
    %c0_i32 = arith.constant 0 : i32
    %c0_i32_0 = arith.constant 0 : i32
    return %arg0, %c0_i32 : i32, i32
  }
}

module attributes {stable_mosaic.version = 11 : i64} {
  func.func @_gemm_kernel(%arg0: i32, %arg1: i32, %arg2: i32, %arg3: memref<32x288xbf16, #tpu.memory_space<vmem>>, %arg4: memref<288x16xbf16, #tpu.memory_space<vmem>>, %arg5: memref<1x16xf32, #tpu.memory_space<vmem>>, %arg6: memref<32x16xbf16, #tpu.memory_space<vmem>>, %arg7: memref<32x16xf32, #tpu.memory_space<vmem>>) attributes {dimension_semantics = [#tpu.dimension_semantics<parallel>, #tpu.dimension_semantics<parallel>, #tpu.dimension_semantics<arbitrary>], iteration_bounds = array<i64: 1, 1, 1>, scalar_prefetch = 0 : i64, scratch_operands = 1 : i64, tpu.core_type = #tpu.core_type<tc>, window_params = [{transform_indices = @transform_0, window_bounds = array<i64: 32, 288>}, {transform_indices = @transform_1, window_bounds = array<i64: 288, 16>}, {transform_indices = @transform_2, window_bounds = array<i64: 1, 16>}, {transform_indices = @transform_3, window_bounds = array<i64: 32, 16>}]} {
    %c0_i32 = arith.constant 0 : i32
    %0 = arith.cmpi eq, %arg2, %c0_i32 : i32
    %1 = arith.extui %0 : i1 to i32
    %c0_i32_0 = arith.constant 0 : i32
    %2 = arith.cmpi ne, %1, %c0_i32_0 : i32
    scf.if %2 {
      %cst_10 = arith.constant 0.000000e+00 : f32
      %12 = vector.broadcast %cst_10 : f32 to vector<32x16xf32>
      %c0_11 = arith.constant 0 : index
      %c0_12 = arith.constant 0 : index
      %13 = vector.load %arg7[%c0_11, %c0_12] : memref<32x16xf32, #tpu.memory_space<vmem>>, vector<32x16xf32>
      tpu.vector_store %arg7[%c0_11, %c0_12], %12 {strides = array<i32>} : memref<32x16xf32, #tpu.memory_space<vmem>>, vector<32x16xf32>,
    } else {
    }
    %c0 = arith.constant 0 : index
    %c0_1 = arith.constant 0 : index
    %3 = vector.load %arg7[%c0, %c0_1] : memref<32x16xf32, #tpu.memory_space<vmem>>, vector<32x16xf32>
    %c0_2 = arith.constant 0 : index
    %c0_3 = arith.constant 0 : index
    %4 = vector.load %arg3[%c0_2, %c0_3] : memref<32x288xbf16, #tpu.memory_space<vmem>>, vector<32x288xbf16>
    %c0_4 = arith.constant 0 : index
    %c0_5 = arith.constant 0 : index
    %5 = vector.load %arg4[%c0_4, %c0_5] : memref<288x16xbf16, #tpu.memory_space<vmem>>, vector<288x16xbf16>
    %cst = arith.constant dense<0.000000e+00> : vector<32x16xf32>
    %6 = tpu.matmul %4, %5, %cst {dimension_numbers = #tpu.dot_dimension_numbers<[1], [0], [0], [1], [0, 0, 1, 1], [], []>} : vector<32x288xbf16>, vector<288x16xbf16>, vector<32x16xf32> -> vector<32x16xf32>
    %7 = arith.addf %3, %6 : vector<32x16xf32>
    %c0_6 = arith.constant 0 : index
    %c0_7 = arith.constant 0 : index
    %8 = vector.load %arg7[%c0_6, %c0_7] : memref<32x16xf32, #tpu.memory_space<vmem>>, vector<32x16xf32>
    tpu.vector_store %arg7[%c0_6, %c0_7], %7 {strides = array<i32>} : memref<32x16xf32, #tpu.memory_space<vmem>>, vector<32x16xf32>,
    %c0_i32_8 = arith.constant 0 : i32
    %9 = arith.cmpi eq, %arg2, %c0_i32_8 : i32
    %10 = arith.extui %9 : i1 to i32
    %c0_i32_9 = arith.constant 0 : i32
    %11 = arith.cmpi ne, %10, %c0_i32_9 : i32
    scf.if %11 {
      %c0_10 = arith.constant 0 : index
      %c0_11 = arith.constant 0 : index
      %12 = vector.load %arg7[%c0_10, %c0_11] : memref<32x16xf32, #tpu.memory_space<vmem>>, vector<32x16xf32>
      %c0_12 = arith.constant 0 : index
      %c0_13 = arith.constant 0 : index
      %13 = vector.load %arg5[%c0_12, %c0_13] : memref<1x16xf32, #tpu.memory_space<vmem>>, vector<1x16xf32>
      %14 = vector.broadcast %13 : vector<1x16xf32> to vector<32x16xf32>
      %15 = arith.addf %12, %14 : vector<32x16xf32>
      %cst_14 = arith.constant 0.000000e+00 : f32
      %16 = vector.broadcast %cst_14 : f32 to vector<32x16xf32>
      %17 = arith.maximumf %15, %16 : vector<32x16xf32>
      %18 = arith.truncf %17 : vector<32x16xf32> to vector<32x16xbf16>
      %c0_15 = arith.constant 0 : index
      %c0_16 = arith.constant 0 : index
      %19 = vector.load %arg6[%c0_15, %c0_16] : memref<32x16xbf16, #tpu.memory_space<vmem>>, vector<32x16xbf16>
      tpu.vector_store %arg6[%c0_15, %c0_16], %18 {strides = array<i32>} : memref<32x16xbf16, #tpu.memory_space<vmem>>, vector<32x16xbf16>,
    } else {
    }
    return
  }
  func.func @transform_0(%arg0: i32, %arg1: i32, %arg2: i32) -> (i32, i32) {
    %c0_i32 = arith.constant 0 : i32
    return %arg0, %arg2 : i32, i32
  }
  func.func @transform_1(%arg0: i32, %arg1: i32, %arg2: i32) -> (i32, i32) {
    %c0_i32 = arith.constant 0 : i32
    return %arg2, %arg1 : i32, i32
  }
  func.func @transform_2(%arg0: i32, %arg1: i32, %arg2: i32) -> (i32, i32) {
    %c0_i32 = arith.constant 0 : i32
    %c0_i32_0 = arith.constant 0 : i32
    return %c0_i32, %arg1 : i32, i32
  }
  func.func @transform_3(%arg0: i32, %arg1: i32, %arg2: i32) -> (i32, i32) {
    %c0_i32 = arith.constant 0 : i32
    return %arg0, %arg1 : i32, i32
  }
}

module attributes {stable_mosaic.version = 11 : i64} {
  func.func @_gemm_kernel(%arg0: i32, %arg1: i32, %arg2: i32, %arg3: memref<2x32xbf16, #tpu.memory_space<vmem>>, %arg4: memref<32x16xbf16, #tpu.memory_space<vmem>>, %arg5: memref<1x16xf32, #tpu.memory_space<vmem>>, %arg6: memref<2x16xbf16, #tpu.memory_space<vmem>>, %arg7: memref<2x16xf32, #tpu.memory_space<vmem>>) attributes {dimension_semantics = [#tpu.dimension_semantics<parallel>, #tpu.dimension_semantics<parallel>, #tpu.dimension_semantics<arbitrary>], iteration_bounds = array<i64: 1, 1, 1>, scalar_prefetch = 0 : i64, scratch_operands = 1 : i64, tpu.core_type = #tpu.core_type<tc>, window_params = [{transform_indices = @transform_0, window_bounds = array<i64: 2, 32>}, {transform_indices = @transform_1, window_bounds = array<i64: 32, 16>}, {transform_indices = @transform_2, window_bounds = array<i64: 1, 16>}, {transform_indices = @transform_3, window_bounds = array<i64: 2, 16>}]} {
    %c0_i32 = arith.constant 0 : i32
    %0 = arith.cmpi eq, %arg2, %c0_i32 : i32
    %1 = arith.extui %0 : i1 to i32
    %c0_i32_0 = arith.constant 0 : i32
    %2 = arith.cmpi ne, %1, %c0_i32_0 : i32
    scf.if %2 {
      %cst_10 = arith.constant 0.000000e+00 : f32
      %12 = vector.broadcast %cst_10 : f32 to vector<2x16xf32>
      %c0_11 = arith.constant 0 : index
      %c0_12 = arith.constant 0 : index
      %13 = vector.load %arg7[%c0_11, %c0_12] : memref<2x16xf32, #tpu.memory_space<vmem>>, vector<2x16xf32>
      tpu.vector_store %arg7[%c0_11, %c0_12], %12 {strides = array<i32>} : memref<2x16xf32, #tpu.memory_space<vmem>>, vector<2x16xf32>,
    } else {
    }
    %c0 = arith.constant 0 : index
    %c0_1 = arith.constant 0 : index
    %3 = vector.load %arg7[%c0, %c0_1] : memref<2x16xf32, #tpu.memory_space<vmem>>, vector<2x16xf32>
    %c0_2 = arith.constant 0 : index
    %c0_3 = arith.constant 0 : index
    %4 = vector.load %arg3[%c0_2, %c0_3] : memref<2x32xbf16, #tpu.memory_space<vmem>>, vector<2x32xbf16>
    %c0_4 = arith.constant 0 : index
    %c0_5 = arith.constant 0 : index
    %5 = vector.load %arg4[%c0_4, %c0_5] : memref<32x16xbf16, #tpu.memory_space<vmem>>, vector<32x16xbf16>
    %cst = arith.constant dense<0.000000e+00> : vector<2x16xf32>
    %6 = tpu.matmul %4, %5, %cst {dimension_numbers = #tpu.dot_dimension_numbers<[1], [0], [0], [1], [0, 0, 1, 1], [], []>} : vector<2x32xbf16>, vector<32x16xbf16>, vector<2x16xf32> -> vector<2x16xf32>
    %7 = arith.addf %3, %6 : vector<2x16xf32>
    %c0_6 = arith.constant 0 : index
    %c0_7 = arith.constant 0 : index
    %8 = vector.load %arg7[%c0_6, %c0_7] : memref<2x16xf32, #tpu.memory_space<vmem>>, vector<2x16xf32>
    tpu.vector_store %arg7[%c0_6, %c0_7], %7 {strides = array<i32>} : memref<2x16xf32, #tpu.memory_space<vmem>>, vector<2x16xf32>,
    %c0_i32_8 = arith.constant 0 : i32
    %9 = arith.cmpi eq, %arg2, %c0_i32_8 : i32
    %10 = arith.extui %9 : i1 to i32
    %c0_i32_9 = arith.constant 0 : i32
    %11 = arith.cmpi ne, %10, %c0_i32_9 : i32
    scf.if %11 {
      %c0_10 = arith.constant 0 : index
      %c0_11 = arith.constant 0 : index
      %12 = vector.load %arg7[%c0_10, %c0_11] : memref<2x16xf32, #tpu.memory_space<vmem>>, vector<2x16xf32>
      %c0_12 = arith.constant 0 : index
      %c0_13 = arith.constant 0 : index
      %13 = vector.load %arg5[%c0_12, %c0_13] : memref<1x16xf32, #tpu.memory_space<vmem>>, vector<1x16xf32>
      %14 = vector.broadcast %13 : vector<1x16xf32> to vector<2x16xf32>
      %15 = arith.addf %12, %14 : vector<2x16xf32>
      %cst_14 = arith.constant 0.000000e+00 : f32
      %16 = vector.broadcast %cst_14 : f32 to vector<2x16xf32>
      %17 = arith.maximumf %15, %16 : vector<2x16xf32>
      %18 = arith.truncf %17 : vector<2x16xf32> to vector<2x16xbf16>
      %c0_15 = arith.constant 0 : index
      %c0_16 = arith.constant 0 : index
      %19 = vector.load %arg6[%c0_15, %c0_16] : memref<2x16xbf16, #tpu.memory_space<vmem>>, vector<2x16xbf16>
      tpu.vector_store %arg6[%c0_15, %c0_16], %18 {strides = array<i32>} : memref<2x16xbf16, #tpu.memory_space<vmem>>, vector<2x16xbf16>,
    } else {
    }
    return
  }
  func.func @transform_0(%arg0: i32, %arg1: i32, %arg2: i32) -> (i32, i32) {
    %c0_i32 = arith.constant 0 : i32
    return %arg0, %arg2 : i32, i32
  }
  func.func @transform_1(%arg0: i32, %arg1: i32, %arg2: i32) -> (i32, i32) {
    %c0_i32 = arith.constant 0 : i32
    return %arg2, %arg1 : i32, i32
  }
  func.func @transform_2(%arg0: i32, %arg1: i32, %arg2: i32) -> (i32, i32) {
    %c0_i32 = arith.constant 0 : i32
    %c0_i32_0 = arith.constant 0 : i32
    return %c0_i32, %arg1 : i32, i32
  }
  func.func @transform_3(%arg0: i32, %arg1: i32, %arg2: i32) -> (i32, i32) {
    %c0_i32 = arith.constant 0 : i32
    return %arg0, %arg1 : i32, i32
  }
}

module attributes {stable_mosaic.version = 11 : i64} {
  func.func @_gemm_kernel(%arg0: i32, %arg1: i32, %arg2: i32, %arg3: memref<32x32xbf16, #tpu.memory_space<vmem>>, %arg4: memref<32x16xbf16, #tpu.memory_space<vmem>>, %arg5: memref<1x16xf32, #tpu.memory_space<vmem>>, %arg6: memref<32x16xbf16, #tpu.memory_space<vmem>>, %arg7: memref<32x16xf32, #tpu.memory_space<vmem>>) attributes {dimension_semantics = [#tpu.dimension_semantics<parallel>, #tpu.dimension_semantics<parallel>, #tpu.dimension_semantics<arbitrary>], iteration_bounds = array<i64: 1, 1, 1>, scalar_prefetch = 0 : i64, scratch_operands = 1 : i64, tpu.core_type = #tpu.core_type<tc>, window_params = [{transform_indices = @transform_0, window_bounds = array<i64: 32, 32>}, {transform_indices = @transform_1, window_bounds = array<i64: 32, 16>}, {transform_indices = @transform_2, window_bounds = array<i64: 1, 16>}, {transform_indices = @transform_3, window_bounds = array<i64: 32, 16>}]} {
    %c0_i32 = arith.constant 0 : i32
    %0 = arith.cmpi eq, %arg2, %c0_i32 : i32
    %1 = arith.extui %0 : i1 to i32
    %c0_i32_0 = arith.constant 0 : i32
    %2 = arith.cmpi ne, %1, %c0_i32_0 : i32
    scf.if %2 {
      %cst_10 = arith.constant 0.000000e+00 : f32
      %12 = vector.broadcast %cst_10 : f32 to vector<32x16xf32>
      %c0_11 = arith.constant 0 : index
      %c0_12 = arith.constant 0 : index
      %13 = vector.load %arg7[%c0_11, %c0_12] : memref<32x16xf32, #tpu.memory_space<vmem>>, vector<32x16xf32>
      tpu.vector_store %arg7[%c0_11, %c0_12], %12 {strides = array<i32>} : memref<32x16xf32, #tpu.memory_space<vmem>>, vector<32x16xf32>,
    } else {
    }
    %c0 = arith.constant 0 : index
    %c0_1 = arith.constant 0 : index
    %3 = vector.load %arg7[%c0, %c0_1] : memref<32x16xf32, #tpu.memory_space<vmem>>, vector<32x16xf32>
    %c0_2 = arith.constant 0 : index
    %c0_3 = arith.constant 0 : index
    %4 = vector.load %arg3[%c0_2, %c0_3] : memref<32x32xbf16, #tpu.memory_space<vmem>>, vector<32x32xbf16>
    %c0_4 = arith.constant 0 : index
    %c0_5 = arith.constant 0 : index
    %5 = vector.load %arg4[%c0_4, %c0_5] : memref<32x16xbf16, #tpu.memory_space<vmem>>, vector<32x16xbf16>
    %cst = arith.constant dense<0.000000e+00> : vector<32x16xf32>
    %6 = tpu.matmul %4, %5, %cst {dimension_numbers = #tpu.dot_dimension_numbers<[1], [0], [0], [1], [0, 0, 1, 1], [], []>} : vector<32x32xbf16>, vector<32x16xbf16>, vector<32x16xf32> -> vector<32x16xf32>
    %7 = arith.addf %3, %6 : vector<32x16xf32>
    %c0_6 = arith.constant 0 : index
    %c0_7 = arith.constant 0 : index
    %8 = vector.load %arg7[%c0_6, %c0_7] : memref<32x16xf32, #tpu.memory_space<vmem>>, vector<32x16xf32>
    tpu.vector_store %arg7[%c0_6, %c0_7], %7 {strides = array<i32>} : memref<32x16xf32, #tpu.memory_space<vmem>>, vector<32x16xf32>,
    %c0_i32_8 = arith.constant 0 : i32
    %9 = arith.cmpi eq, %arg2, %c0_i32_8 : i32
    %10 = arith.extui %9 : i1 to i32
    %c0_i32_9 = arith.constant 0 : i32
    %11 = arith.cmpi ne, %10, %c0_i32_9 : i32
    scf.if %11 {
      %c0_10 = arith.constant 0 : index
      %c0_11 = arith.constant 0 : index
      %12 = vector.load %arg7[%c0_10, %c0_11] : memref<32x16xf32, #tpu.memory_space<vmem>>, vector<32x16xf32>
      %c0_12 = arith.constant 0 : index
      %c0_13 = arith.constant 0 : index
      %13 = vector.load %arg5[%c0_12, %c0_13] : memref<1x16xf32, #tpu.memory_space<vmem>>, vector<1x16xf32>
      %14 = vector.broadcast %13 : vector<1x16xf32> to vector<32x16xf32>
      %15 = arith.addf %12, %14 : vector<32x16xf32>
      %cst_14 = arith.constant 0.000000e+00 : f32
      %16 = vector.broadcast %cst_14 : f32 to vector<32x16xf32>
      %17 = arith.maximumf %15, %16 : vector<32x16xf32>
      %18 = arith.truncf %17 : vector<32x16xf32> to vector<32x16xbf16>
      %c0_15 = arith.constant 0 : index
      %c0_16 = arith.constant 0 : index
      %19 = vector.load %arg6[%c0_15, %c0_16] : memref<32x16xbf16, #tpu.memory_space<vmem>>, vector<32x16xbf16>
      tpu.vector_store %arg6[%c0_15, %c0_16], %18 {strides = array<i32>} : memref<32x16xbf16, #tpu.memory_space<vmem>>, vector<32x16xbf16>,
    } else {
    }
    return
  }
  func.func @transform_0(%arg0: i32, %arg1: i32, %arg2: i32) -> (i32, i32) {
    %c0_i32 = arith.constant 0 : i32
    return %arg0, %arg2 : i32, i32
  }
  func.func @transform_1(%arg0: i32, %arg1: i32, %arg2: i32) -> (i32, i32) {
    %c0_i32 = arith.constant 0 : i32
    return %arg2, %arg1 : i32, i32
  }
  func.func @transform_2(%arg0: i32, %arg1: i32, %arg2: i32) -> (i32, i32) {
    %c0_i32 = arith.constant 0 : i32
    %c0_i32_0 = arith.constant 0 : i32
    return %c0_i32, %arg1 : i32, i32
  }
  func.func @transform_3(%arg0: i32, %arg1: i32, %arg2: i32) -> (i32, i32) {
    %c0_i32 = arith.constant 0 : i32
    return %arg0, %arg1 : i32, i32
  }
}

module attributes {stable_mosaic.version = 11 : i64} {
  func.func @_gemm_kernel(%arg0: i32, %arg1: i32, %arg2: i32, %arg3: memref<128x720xbf16, #tpu.memory_space<vmem>>, %arg4: memref<720x16xbf16, #tpu.memory_space<vmem>>, %arg5: memref<1x16xf32, #tpu.memory_space<vmem>>, %arg6: memref<128x16xbf16, #tpu.memory_space<vmem>>, %arg7: memref<128x16xf32, #tpu.memory_space<vmem>>) attributes {dimension_semantics = [#tpu.dimension_semantics<parallel>, #tpu.dimension_semantics<parallel>, #tpu.dimension_semantics<arbitrary>], iteration_bounds = array<i64: 1, 1, 1>, scalar_prefetch = 0 : i64, scratch_operands = 1 : i64, tpu.core_type = #tpu.core_type<tc>, window_params = [{transform_indices = @transform_0, window_bounds = array<i64: 128, 720>}, {transform_indices = @transform_1, window_bounds = array<i64: 720, 16>}, {transform_indices = @transform_2, window_bounds = array<i64: 1, 16>}, {transform_indices = @transform_3, window_bounds = array<i64: 128, 16>}]} {
    %c0_i32 = arith.constant 0 : i32
    %0 = arith.cmpi eq, %arg2, %c0_i32 : i32
    %1 = arith.extui %0 : i1 to i32
    %c0_i32_0 = arith.constant 0 : i32
    %2 = arith.cmpi ne, %1, %c0_i32_0 : i32
    scf.if %2 {
      %cst_10 = arith.constant 0.000000e+00 : f32
      %12 = vector.broadcast %cst_10 : f32 to vector<128x16xf32>
      %c0_11 = arith.constant 0 : index
      %c0_12 = arith.constant 0 : index
      %13 = vector.load %arg7[%c0_11, %c0_12] : memref<128x16xf32, #tpu.memory_space<vmem>>, vector<128x16xf32>
      tpu.vector_store %arg7[%c0_11, %c0_12], %12 {strides = array<i32>} : memref<128x16xf32, #tpu.memory_space<vmem>>, vector<128x16xf32>,
    } else {
    }
    %c0 = arith.constant 0 : index
    %c0_1 = arith.constant 0 : index
    %3 = vector.load %arg7[%c0, %c0_1] : memref<128x16xf32, #tpu.memory_space<vmem>>, vector<128x16xf32>
    %c0_2 = arith.constant 0 : index
    %c0_3 = arith.constant 0 : index
    %4 = vector.load %arg3[%c0_2, %c0_3] : memref<128x720xbf16, #tpu.memory_space<vmem>>, vector<128x720xbf16>
    %c0_4 = arith.constant 0 : index
    %c0_5 = arith.constant 0 : index
    %5 = vector.load %arg4[%c0_4, %c0_5] : memref<720x16xbf16, #tpu.memory_space<vmem>>, vector<720x16xbf16>
    %cst = arith.constant dense<0.000000e+00> : vector<128x16xf32>
    %6 = tpu.matmul %4, %5, %cst {dimension_numbers = #tpu.dot_dimension_numbers<[1], [0], [0], [1], [0, 0, 1, 1], [], []>} : vector<128x720xbf16>, vector<720x16xbf16>, vector<128x16xf32> -> vector<128x16xf32>
    %7 = arith.addf %3, %6 : vector<128x16xf32>
    %c0_6 = arith.constant 0 : index
    %c0_7 = arith.constant 0 : index
    %8 = vector.load %arg7[%c0_6, %c0_7] : memref<128x16xf32, #tpu.memory_space<vmem>>, vector<128x16xf32>
    tpu.vector_store %arg7[%c0_6, %c0_7], %7 {strides = array<i32>} : memref<128x16xf32, #tpu.memory_space<vmem>>, vector<128x16xf32>,
    %c0_i32_8 = arith.constant 0 : i32
    %9 = arith.cmpi eq, %arg2, %c0_i32_8 : i32
    %10 = arith.extui %9 : i1 to i32
    %c0_i32_9 = arith.constant 0 : i32
    %11 = arith.cmpi ne, %10, %c0_i32_9 : i32
    scf.if %11 {
      %c0_10 = arith.constant 0 : index
      %c0_11 = arith.constant 0 : index
      %12 = vector.load %arg7[%c0_10, %c0_11] : memref<128x16xf32, #tpu.memory_space<vmem>>, vector<128x16xf32>
      %c0_12 = arith.constant 0 : index
      %c0_13 = arith.constant 0 : index
      %13 = vector.load %arg5[%c0_12, %c0_13] : memref<1x16xf32, #tpu.memory_space<vmem>>, vector<1x16xf32>
      %14 = vector.broadcast %13 : vector<1x16xf32> to vector<128x16xf32>
      %15 = arith.addf %12, %14 : vector<128x16xf32>
      %cst_14 = arith.constant 0.000000e+00 : f32
      %16 = vector.broadcast %cst_14 : f32 to vector<128x16xf32>
      %17 = arith.maximumf %15, %16 : vector<128x16xf32>
      %18 = arith.truncf %17 : vector<128x16xf32> to vector<128x16xbf16>
      %c0_15 = arith.constant 0 : index
      %c0_16 = arith.constant 0 : index
      %19 = vector.load %arg6[%c0_15, %c0_16] : memref<128x16xbf16, #tpu.memory_space<vmem>>, vector<128x16xbf16>
      tpu.vector_store %arg6[%c0_15, %c0_16], %18 {strides = array<i32>} : memref<128x16xbf16, #tpu.memory_space<vmem>>, vector<128x16xbf16>,
    } else {
    }
    return
  }
  func.func @transform_0(%arg0: i32, %arg1: i32, %arg2: i32) -> (i32, i32) {
    %c0_i32 = arith.constant 0 : i32
    return %arg0, %arg2 : i32, i32
  }
  func.func @transform_1(%arg0: i32, %arg1: i32, %arg2: i32) -> (i32, i32) {
    %c0_i32 = arith.constant 0 : i32
    return %arg2, %arg1 : i32, i32
  }
  func.func @transform_2(%arg0: i32, %arg1: i32, %arg2: i32) -> (i32, i32) {
    %c0_i32 = arith.constant 0 : i32
    %c0_i32_0 = arith.constant 0 : i32
    return %c0_i32, %arg1 : i32, i32
  }
  func.func @transform_3(%arg0: i32, %arg1: i32, %arg2: i32) -> (i32, i32) {
    %c0_i32 = arith.constant 0 : i32
    return %arg0, %arg1 : i32, i32
  }
}

module attributes {stable_mosaic.version = 11 : i64} {
  func.func @_decoder_gate_kernel(%arg0: i32, %arg1: memref<256x432xbf16, #tpu.memory_space<vmem>>, %arg2: memref<432x8xbf16, #tpu.memory_space<vmem>>, %arg3: memref<1x8xf32, #tpu.memory_space<vmem>>, %arg4: memref<1x8xbf16, #tpu.memory_space<vmem>>, %arg5: memref<1x1xf32, #tpu.memory_space<vmem>>, %arg6: memref<256x4xbf16, #tpu.memory_space<vmem>>, %arg7: memref<256x4xbf16, #tpu.memory_space<vmem>>, %arg8: memref<256x2xbf16, #tpu.memory_space<vmem>>) attributes {dimension_semantics = [#tpu.dimension_semantics<parallel>], iteration_bounds = array<i64: 2>, scalar_prefetch = 0 : i64, scratch_operands = 0 : i64, tpu.core_type = #tpu.core_type<tc>, window_params = [{transform_indices = @transform_0, window_bounds = array<i64: 256, 432>}, {pipeline_mode = #tpu.pipeline_mode<synchronous>, transform_indices = @transform_1, window_bounds = array<i64: 432, 8>}, {pipeline_mode = #tpu.pipeline_mode<synchronous>, transform_indices = @transform_2, window_bounds = array<i64: 1, 8>}, {pipeline_mode = #tpu.pipeline_mode<synchronous>, transform_indices = @transform_3, window_bounds = array<i64: 1, 8>}, {pipeline_mode = #tpu.pipeline_mode<synchronous>, transform_indices = @transform_4, window_bounds = array<i64: 1, 1>}, {transform_indices = @transform_5, window_bounds = array<i64: 256, 4>}, {transform_indices = @transform_6, window_bounds = array<i64: 256, 4>}, {transform_indices = @transform_7, window_bounds = array<i64: 256, 2>}]} {
    %c0 = arith.constant 0 : index
    %c0_0 = arith.constant 0 : index
    %0 = vector.load %arg1[%c0, %c0_0] : memref<256x432xbf16, #tpu.memory_space<vmem>>, vector<256x432xbf16>
    %c0_1 = arith.constant 0 : index
    %c0_2 = arith.constant 0 : index
    %1 = vector.load %arg2[%c0_1, %c0_2] : memref<432x8xbf16, #tpu.memory_space<vmem>>, vector<432x8xbf16>
    %cst = arith.constant dense<0.000000e+00> : vector<256x8xf32>
    %2 = tpu.matmul %0, %1, %cst {dimension_numbers = #tpu.dot_dimension_numbers<[1], [0], [0], [1], [0, 0, 1, 1], [], []>} : vector<256x432xbf16>, vector<432x8xbf16>, vector<256x8xf32> -> vector<256x8xf32>
    %c0_3 = arith.constant 0 : index
    %c0_4 = arith.constant 0 : index
    %3 = vector.load %arg3[%c0_3, %c0_4] : memref<1x8xf32, #tpu.memory_space<vmem>>, vector<1x8xf32>
    %4 = vector.broadcast %3 : vector<1x8xf32> to vector<256x8xf32>
    %5 = arith.addf %2, %4 : vector<256x8xf32>
    %cst_5 = arith.constant 0.000000e+00 : f32
    %6 = vector.broadcast %cst_5 : f32 to vector<256x8xf32>
    %7 = arith.maximumf %5, %6 : vector<256x8xf32>
    %c0_6 = arith.constant 0 : index
    %c0_7 = arith.constant 0 : index
    %8 = vector.load %arg4[%c0_6, %c0_7] : memref<1x8xbf16, #tpu.memory_space<vmem>>, vector<1x8xbf16>
    %9 = arith.extf %8 : vector<1x8xbf16> to vector<1x8xf32>
    %10 = vector.broadcast %9 : vector<1x8xf32> to vector<256x8xf32>
    %11 = arith.mulf %7, %10 : vector<256x8xf32>
    %cst_8 = arith.constant dense<0.000000e+00> : vector<256xf32>
    %12 = vector.multi_reduction <add>, %11, %cst_8 [1] : vector<256x8xf32> to vector<256xf32>
    %13 = vector.shape_cast %12 : vector<256xf32> to vector<256x1xf32>
    %c0_9 = arith.constant 0 : index
    %c0_10 = arith.constant 0 : index
    %14 = vector.load %arg5[%c0_9, %c0_10] : memref<1x1xf32, #tpu.memory_space<vmem>>, vector<1x1xf32>
    %15 = vector.broadcast %14 : vector<1x1xf32> to vector<256x1xf32>
    %16 = arith.addf %13, %15 : vector<256x1xf32>
    %17 = arith.negf %16 : vector<256x1xf32>
    %18 = math.exp %17 : vector<256x1xf32>
    %cst_11 = arith.constant 1.000000e+00 : f32
    %19 = vector.broadcast %cst_11 : f32 to vector<256x1xf32>
    %20 = arith.addf %19, %18 : vector<256x1xf32>
    %21 = arith.divf %19, %20 : vector<256x1xf32>
    %c0_12 = arith.constant 0 : index
    %c0_13 = arith.constant 0 : index
    %22 = vector.load %arg6[%c0_12, %c0_13] : memref<256x4xbf16, #tpu.memory_space<vmem>>, vector<256x4xbf16>
    %23 = arith.extf %22 : vector<256x4xbf16> to vector<256x4xf32>
    %24 = vector.broadcast %21 : vector<256x1xf32> to vector<256x4xf32>
    %25 = arith.mulf %23, %24 : vector<256x4xf32>
    %26 = arith.truncf %25 : vector<256x4xf32> to vector<256x4xbf16>
    %c0_14 = arith.constant 0 : index
    %c0_15 = arith.constant 0 : index
    %27 = vector.load %arg7[%c0_14, %c0_15] : memref<256x4xbf16, #tpu.memory_space<vmem>>, vector<256x4xbf16>
    tpu.vector_store %arg7[%c0_14, %c0_15], %26 {strides = array<i32>} : memref<256x4xbf16, #tpu.memory_space<vmem>>, vector<256x4xbf16>,
    %cst_16 = arith.constant dense<0xFF800000> : vector<256xf32>
    %28 = vector.multi_reduction <maximumf>, %25, %cst_16 [1] : vector<256x4xf32> to vector<256xf32>
    %29 = vector.shape_cast %28 : vector<256xf32> to vector<256x1xf32>
    %cst_17 = arith.constant dense<0.000000e+00> : vector<256xf32>
    %30 = vector.multi_reduction <add>, %25, %cst_17 [1] : vector<256x4xf32> to vector<256xf32>
    %31 = vector.shape_cast %30 : vector<256xf32> to vector<256x1xf32>
    %cst_18 = arith.constant 4.000000e+00 : f32
    %32 = vector.broadcast %cst_18 : f32 to vector<256x1xf32>
    %33 = arith.divf %31, %32 : vector<256x1xf32>
    %34 = tpu.concatenate %29, %33 in 1 : vector<256x1xf32>, vector<256x1xf32> -> vector<256x2xf32>
    %35 = arith.truncf %34 : vector<256x2xf32> to vector<256x2xbf16>
    %c0_19 = arith.constant 0 : index
    %c0_20 = arith.constant 0 : index
    %36 = vector.load %arg8[%c0_19, %c0_20] : memref<256x2xbf16, #tpu.memory_space<vmem>>, vector<256x2xbf16>
    tpu.vector_store %arg8[%c0_19, %c0_20], %35 {strides = array<i32>} : memref<256x2xbf16, #tpu.memory_space<vmem>>, vector<256x2xbf16>,
    return
  }
  func.func @transform_0(%arg0: i32) -> (i32, i32) {
    %c0_i32 = arith.constant 0 : i32
    %c0_i32_0 = arith.constant 0 : i32
    return %arg0, %c0_i32 : i32, i32
  }
  func.func @transform_1(%arg0: i32) -> (i32, i32) {
    %c0_i32 = arith.constant 0 : i32
    %c0_i32_0 = arith.constant 0 : i32
    %c0_i32_1 = arith.constant 0 : i32
    return %c0_i32, %c0_i32_0 : i32, i32
  }
  func.func @transform_2(%arg0: i32) -> (i32, i32) {
    %c0_i32 = arith.constant 0 : i32
    %c0_i32_0 = arith.constant 0 : i32
    %c0_i32_1 = arith.constant 0 : i32
    return %c0_i32, %c0_i32_0 : i32, i32
  }
  func.func @transform_3(%arg0: i32) -> (i32, i32) {
    %c0_i32 = arith.constant 0 : i32
    %c0_i32_0 = arith.constant 0 : i32
    %c0_i32_1 = arith.constant 0 : i32
    return %c0_i32, %c0_i32_0 : i32, i32
  }
  func.func @transform_4(%arg0: i32) -> (i32, i32) {
    %c0_i32 = arith.constant 0 : i32
    %c0_i32_0 = arith.constant 0 : i32
    %c0_i32_1 = arith.constant 0 : i32
    return %c0_i32, %c0_i32_0 : i32, i32
  }
  func.func @transform_5(%arg0: i32) -> (i32, i32) {
    %c0_i32 = arith.constant 0 : i32
    %c0_i32_0 = arith.constant 0 : i32
    return %arg0, %c0_i32 : i32, i32
  }
  func.func @transform_6(%arg0: i32) -> (i32, i32) {
    %c0_i32 = arith.constant 0 : i32
    %c0_i32_0 = arith.constant 0 : i32
    return %arg0, %c0_i32 : i32, i32
  }
  func.func @transform_7(%arg0: i32) -> (i32, i32) {
    %c0_i32 = arith.constant 0 : i32
    %c0_i32_0 = arith.constant 0 : i32
    return %arg0, %c0_i32 : i32, i32
  }
}

module attributes {stable_mosaic.version = 11 : i64} {
  func.func @_cbam_gate_kernel(%arg0: i32, %arg1: memref<256x98xbf16, #tpu.memory_space<vmem>>, %arg2: memref<1x98xbf16, #tpu.memory_space<vmem>>, %arg3: memref<1x1xf32, #tpu.memory_space<vmem>>, %arg4: memref<256x4xbf16, #tpu.memory_space<vmem>>, %arg5: memref<256x4xbf16, #tpu.memory_space<vmem>>) attributes {dimension_semantics = [#tpu.dimension_semantics<parallel>], iteration_bounds = array<i64: 2>, scalar_prefetch = 0 : i64, scratch_operands = 0 : i64, tpu.core_type = #tpu.core_type<tc>, window_params = [{transform_indices = @transform_0, window_bounds = array<i64: 256, 98>}, {pipeline_mode = #tpu.pipeline_mode<synchronous>, transform_indices = @transform_1, window_bounds = array<i64: 1, 98>}, {pipeline_mode = #tpu.pipeline_mode<synchronous>, transform_indices = @transform_2, window_bounds = array<i64: 1, 1>}, {transform_indices = @transform_3, window_bounds = array<i64: 256, 4>}, {transform_indices = @transform_4, window_bounds = array<i64: 256, 4>}]} {
    %c0 = arith.constant 0 : index
    %c0_0 = arith.constant 0 : index
    %0 = vector.load %arg1[%c0, %c0_0] : memref<256x98xbf16, #tpu.memory_space<vmem>>, vector<256x98xbf16>
    %1 = arith.extf %0 : vector<256x98xbf16> to vector<256x98xf32>
    %c0_1 = arith.constant 0 : index
    %c0_2 = arith.constant 0 : index
    %2 = vector.load %arg2[%c0_1, %c0_2] : memref<1x98xbf16, #tpu.memory_space<vmem>>, vector<1x98xbf16>
    %3 = arith.extf %2 : vector<1x98xbf16> to vector<1x98xf32>
    %4 = vector.broadcast %3 : vector<1x98xf32> to vector<256x98xf32>
    %5 = arith.mulf %1, %4 : vector<256x98xf32>
    %cst = arith.constant dense<0.000000e+00> : vector<256xf32>
    %6 = vector.multi_reduction <add>, %5, %cst [1] : vector<256x98xf32> to vector<256xf32>
    %7 = vector.shape_cast %6 : vector<256xf32> to vector<256x1xf32>
    %c0_3 = arith.constant 0 : index
    %c0_4 = arith.constant 0 : index
    %8 = vector.load %arg3[%c0_3, %c0_4] : memref<1x1xf32, #tpu.memory_space<vmem>>, vector<1x1xf32>
    %9 = vector.broadcast %8 : vector<1x1xf32> to vector<256x1xf32>
    %10 = arith.addf %7, %9 : vector<256x1xf32>
    %11 = arith.negf %10 : vector<256x1xf32>
    %12 = math.exp %11 : vector<256x1xf32>
    %cst_5 = arith.constant 1.000000e+00 : f32
    %13 = vector.broadcast %cst_5 : f32 to vector<256x1xf32>
    %14 = arith.addf %13, %12 : vector<256x1xf32>
    %15 = arith.divf %13, %14 : vector<256x1xf32>
    %c0_6 = arith.constant 0 : index
    %c0_7 = arith.constant 0 : index
    %16 = vector.load %arg4[%c0_6, %c0_7] : memref<256x4xbf16, #tpu.memory_space<vmem>>, vector<256x4xbf16>
    %17 = arith.extf %16 : vector<256x4xbf16> to vector<256x4xf32>
    %18 = vector.broadcast %15 : vector<256x1xf32> to vector<256x4xf32>
    %19 = arith.mulf %17, %18 : vector<256x4xf32>
    %20 = arith.truncf %19 : vector<256x4xf32> to vector<256x4xbf16>
    %c0_8 = arith.constant 0 : index
    %c0_9 = arith.constant 0 : index
    %21 = vector.load %arg5[%c0_8, %c0_9] : memref<256x4xbf16, #tpu.memory_space<vmem>>, vector<256x4xbf16>
    tpu.vector_store %arg5[%c0_8, %c0_9], %20 {strides = array<i32>} : memref<256x4xbf16, #tpu.memory_space<vmem>>, vector<256x4xbf16>,
    return
  }
  func.func @transform_0(%arg0: i32) -> (i32, i32) {
    %c0_i32 = arith.constant 0 : i32
    %c0_i32_0 = arith.constant 0 : i32
    return %arg0, %c0_i32 : i32, i32
  }
  func.func @transform_1(%arg0: i32) -> (i32, i32) {
    %c0_i32 = arith.constant 0 : i32
    %c0_i32_0 = arith.constant 0 : i32
    %c0_i32_1 = arith.constant 0 : i32
    return %c0_i32, %c0_i32_0 : i32, i32
  }
  func.func @transform_2(%arg0: i32) -> (i32, i32) {
    %c0_i32 = arith.constant 0 : i32
    %c0_i32_0 = arith.constant 0 : i32
    %c0_i32_1 = arith.constant 0 : i32
    return %c0_i32, %c0_i32_0 : i32, i32
  }
  func.func @transform_3(%arg0: i32) -> (i32, i32) {
    %c0_i32 = arith.constant 0 : i32
    %c0_i32_0 = arith.constant 0 : i32
    return %arg0, %c0_i32 : i32, i32
  }
  func.func @transform_4(%arg0: i32) -> (i32, i32) {
    %c0_i32 = arith.constant 0 : i32
    %c0_i32_0 = arith.constant 0 : i32
    return %arg0, %c0_i32 : i32, i32
  }
}

module attributes {stable_mosaic.version = 11 : i64} {
  func.func @_gemm_kernel(%arg0: i32, %arg1: i32, %arg2: i32, %arg3: memref<2x1024xbf16, #tpu.memory_space<vmem>>, %arg4: memref<1024x64xbf16, #tpu.memory_space<vmem>>, %arg5: memref<1x64xf32, #tpu.memory_space<vmem>>, %arg6: memref<2x64xbf16, #tpu.memory_space<vmem>>, %arg7: memref<2x64xf32, #tpu.memory_space<vmem>>) attributes {dimension_semantics = [#tpu.dimension_semantics<parallel>, #tpu.dimension_semantics<parallel>, #tpu.dimension_semantics<arbitrary>], iteration_bounds = array<i64: 1, 1, 1>, scalar_prefetch = 0 : i64, scratch_operands = 1 : i64, tpu.core_type = #tpu.core_type<tc>, window_params = [{transform_indices = @transform_0, window_bounds = array<i64: 2, 1024>}, {transform_indices = @transform_1, window_bounds = array<i64: 1024, 64>}, {transform_indices = @transform_2, window_bounds = array<i64: 1, 64>}, {transform_indices = @transform_3, window_bounds = array<i64: 2, 64>}]} {
    %c0_i32 = arith.constant 0 : i32
    %0 = arith.cmpi eq, %arg2, %c0_i32 : i32
    %1 = arith.extui %0 : i1 to i32
    %c0_i32_0 = arith.constant 0 : i32
    %2 = arith.cmpi ne, %1, %c0_i32_0 : i32
    scf.if %2 {
      %cst_10 = arith.constant 0.000000e+00 : f32
      %12 = vector.broadcast %cst_10 : f32 to vector<2x64xf32>
      %c0_11 = arith.constant 0 : index
      %c0_12 = arith.constant 0 : index
      %13 = vector.load %arg7[%c0_11, %c0_12] : memref<2x64xf32, #tpu.memory_space<vmem>>, vector<2x64xf32>
      tpu.vector_store %arg7[%c0_11, %c0_12], %12 {strides = array<i32>} : memref<2x64xf32, #tpu.memory_space<vmem>>, vector<2x64xf32>,
    } else {
    }
    %c0 = arith.constant 0 : index
    %c0_1 = arith.constant 0 : index
    %3 = vector.load %arg7[%c0, %c0_1] : memref<2x64xf32, #tpu.memory_space<vmem>>, vector<2x64xf32>
    %c0_2 = arith.constant 0 : index
    %c0_3 = arith.constant 0 : index
    %4 = vector.load %arg3[%c0_2, %c0_3] : memref<2x1024xbf16, #tpu.memory_space<vmem>>, vector<2x1024xbf16>
    %c0_4 = arith.constant 0 : index
    %c0_5 = arith.constant 0 : index
    %5 = vector.load %arg4[%c0_4, %c0_5] : memref<1024x64xbf16, #tpu.memory_space<vmem>>, vector<1024x64xbf16>
    %cst = arith.constant dense<0.000000e+00> : vector<2x64xf32>
    %6 = tpu.matmul %4, %5, %cst {dimension_numbers = #tpu.dot_dimension_numbers<[1], [0], [0], [1], [0, 0, 1, 1], [], []>} : vector<2x1024xbf16>, vector<1024x64xbf16>, vector<2x64xf32> -> vector<2x64xf32>
    %7 = arith.addf %3, %6 : vector<2x64xf32>
    %c0_6 = arith.constant 0 : index
    %c0_7 = arith.constant 0 : index
    %8 = vector.load %arg7[%c0_6, %c0_7] : memref<2x64xf32, #tpu.memory_space<vmem>>, vector<2x64xf32>
    tpu.vector_store %arg7[%c0_6, %c0_7], %7 {strides = array<i32>} : memref<2x64xf32, #tpu.memory_space<vmem>>, vector<2x64xf32>,
    %c0_i32_8 = arith.constant 0 : i32
    %9 = arith.cmpi eq, %arg2, %c0_i32_8 : i32
    %10 = arith.extui %9 : i1 to i32
    %c0_i32_9 = arith.constant 0 : i32
    %11 = arith.cmpi ne, %10, %c0_i32_9 : i32
    scf.if %11 {
      %c0_10 = arith.constant 0 : index
      %c0_11 = arith.constant 0 : index
      %12 = vector.load %arg7[%c0_10, %c0_11] : memref<2x64xf32, #tpu.memory_space<vmem>>, vector<2x64xf32>
      %c0_12 = arith.constant 0 : index
      %c0_13 = arith.constant 0 : index
      %13 = vector.load %arg5[%c0_12, %c0_13] : memref<1x64xf32, #tpu.memory_space<vmem>>, vector<1x64xf32>
      %14 = vector.broadcast %13 : vector<1x64xf32> to vector<2x64xf32>
      %15 = arith.addf %12, %14 : vector<2x64xf32>
      %cst_14 = arith.constant 0.000000e+00 : f32
      %16 = vector.broadcast %cst_14 : f32 to vector<2x64xf32>
      %17 = arith.maximumf %15, %16 : vector<2x64xf32>
      %18 = arith.truncf %17 : vector<2x64xf32> to vector<2x64xbf16>
      %c0_15 = arith.constant 0 : index
      %c0_16 = arith.constant 0 : index
      %19 = vector.load %arg6[%c0_15, %c0_16] : memref<2x64xbf16, #tpu.memory_space<vmem>>, vector<2x64xbf16>
      tpu.vector_store %arg6[%c0_15, %c0_16], %18 {strides = array<i32>} : memref<2x64xbf16, #tpu.memory_space<vmem>>, vector<2x64xbf16>,
    } else {
    }
    return
  }
  func.func @transform_0(%arg0: i32, %arg1: i32, %arg2: i32) -> (i32, i32) {
    %c0_i32 = arith.constant 0 : i32
    return %arg0, %arg2 : i32, i32
  }
  func.func @transform_1(%arg0: i32, %arg1: i32, %arg2: i32) -> (i32, i32) {
    %c0_i32 = arith.constant 0 : i32
    return %arg2, %arg1 : i32, i32
  }
  func.func @transform_2(%arg0: i32, %arg1: i32, %arg2: i32) -> (i32, i32) {
    %c0_i32 = arith.constant 0 : i32
    %c0_i32_0 = arith.constant 0 : i32
    return %c0_i32, %arg1 : i32, i32
  }
  func.func @transform_3(%arg0: i32, %arg1: i32, %arg2: i32) -> (i32, i32) {
    %c0_i32 = arith.constant 0 : i32
    return %arg0, %arg1 : i32, i32
  }
}

module attributes {stable_mosaic.version = 11 : i64} {
  func.func @_classifier_tail_kernel(%arg0: i32, %arg1: memref<2x64xbf16, #tpu.memory_space<vmem>>, %arg2: memref<64x16xbf16, #tpu.memory_space<vmem>>, %arg3: memref<1x16xf32, #tpu.memory_space<vmem>>, %arg4: memref<16x128xbf16, #tpu.memory_space<vmem>>, %arg5: memref<1x128xf32, #tpu.memory_space<vmem>>, %arg6: memref<2x128xf32, #tpu.memory_space<vmem>>) attributes {dimension_semantics = [#tpu.dimension_semantics<arbitrary>], iteration_bounds = array<i64: 1>, scalar_prefetch = 0 : i64, scratch_operands = 0 : i64, tpu.core_type = #tpu.core_type<tc>, window_params = [{pipeline_mode = #tpu.pipeline_mode<synchronous>, transform_indices = @transform_0, window_bounds = array<i64: 2, 64>}, {pipeline_mode = #tpu.pipeline_mode<synchronous>, transform_indices = @transform_1, window_bounds = array<i64: 64, 16>}, {pipeline_mode = #tpu.pipeline_mode<synchronous>, transform_indices = @transform_2, window_bounds = array<i64: 1, 16>}, {pipeline_mode = #tpu.pipeline_mode<synchronous>, transform_indices = @transform_3, window_bounds = array<i64: 16, 128>}, {pipeline_mode = #tpu.pipeline_mode<synchronous>, transform_indices = @transform_4, window_bounds = array<i64: 1, 128>}, {pipeline_mode = #tpu.pipeline_mode<synchronous>, transform_indices = @transform_5, window_bounds = array<i64: 2, 128>}]} {
    %c0 = arith.constant 0 : index
    %c0_0 = arith.constant 0 : index
    %0 = vector.load %arg1[%c0, %c0_0] : memref<2x64xbf16, #tpu.memory_space<vmem>>, vector<2x64xbf16>
    %c0_1 = arith.constant 0 : index
    %c0_2 = arith.constant 0 : index
    %1 = vector.load %arg2[%c0_1, %c0_2] : memref<64x16xbf16, #tpu.memory_space<vmem>>, vector<64x16xbf16>
    %cst = arith.constant dense<0.000000e+00> : vector<2x16xf32>
    %2 = tpu.matmul %0, %1, %cst {dimension_numbers = #tpu.dot_dimension_numbers<[1], [0], [0], [1], [0, 0, 1, 1], [], []>} : vector<2x64xbf16>, vector<64x16xbf16>, vector<2x16xf32> -> vector<2x16xf32>
    %c0_3 = arith.constant 0 : index
    %c0_4 = arith.constant 0 : index
    %3 = vector.load %arg3[%c0_3, %c0_4] : memref<1x16xf32, #tpu.memory_space<vmem>>, vector<1x16xf32>
    %4 = vector.broadcast %3 : vector<1x16xf32> to vector<2x16xf32>
    %5 = arith.addf %2, %4 : vector<2x16xf32>
    %cst_5 = arith.constant 0.000000e+00 : f32
    %6 = vector.broadcast %cst_5 : f32 to vector<2x16xf32>
    %7 = arith.maximumf %5, %6 : vector<2x16xf32>
    %8 = arith.truncf %7 : vector<2x16xf32> to vector<2x16xbf16>
    %c0_6 = arith.constant 0 : index
    %c0_7 = arith.constant 0 : index
    %9 = vector.load %arg4[%c0_6, %c0_7] : memref<16x128xbf16, #tpu.memory_space<vmem>>, vector<16x128xbf16>
    %cst_8 = arith.constant dense<0.000000e+00> : vector<2x128xf32>
    %10 = tpu.matmul %8, %9, %cst_8 {dimension_numbers = #tpu.dot_dimension_numbers<[1], [0], [0], [1], [0, 0, 1, 1], [], []>} : vector<2x16xbf16>, vector<16x128xbf16>, vector<2x128xf32> -> vector<2x128xf32>
    %c0_9 = arith.constant 0 : index
    %c0_10 = arith.constant 0 : index
    %11 = vector.load %arg5[%c0_9, %c0_10] : memref<1x128xf32, #tpu.memory_space<vmem>>, vector<1x128xf32>
    %12 = vector.broadcast %11 : vector<1x128xf32> to vector<2x128xf32>
    %13 = arith.addf %10, %12 : vector<2x128xf32>
    %c0_11 = arith.constant 0 : index
    %c0_12 = arith.constant 0 : index
    %14 = vector.load %arg6[%c0_11, %c0_12] : memref<2x128xf32, #tpu.memory_space<vmem>>, vector<2x128xf32>
    tpu.vector_store %arg6[%c0_11, %c0_12], %13 {strides = array<i32>} : memref<2x128xf32, #tpu.memory_space<vmem>>, vector<2x128xf32>,
    return
  }
  func.func @transform_0(%arg0: i32) -> (i32, i32) {
    %c0_i32 = arith.constant 0 : i32
    %c0_i32_0 = arith.constant 0 : i32
    %c0_i32_1 = arith.constant 0 : i32
    return %c0_i32, %c0_i32_0 : i32, i32
  }
  func.func @transform_1(%arg0: i32) -> (i32, i32) {
    %c0_i32 = arith.constant 0 : i32
    %c0_i32_0 = arith.constant 0 : i32
    %c0_i32_1 = arith.constant 0 : i32
    return %c0_i32, %c0_i32_0 : i32, i32
  }
  func.func @transform_2(%arg0: i32) -> (i32, i32) {
    %c0_i32 = arith.constant 0 : i32
    %c0_i32_0 = arith.constant 0 : i32
    %c0_i32_1 = arith.constant 0 : i32
    return %c0_i32, %c0_i32_0 : i32, i32
  }
  func.func @transform_3(%arg0: i32) -> (i32, i32) {
    %c0_i32 = arith.constant 0 : i32
    %c0_i32_0 = arith.constant 0 : i32
    %c0_i32_1 = arith.constant 0 : i32
    return %c0_i32, %c0_i32_0 : i32, i32
  }
  func.func @transform_4(%arg0: i32) -> (i32, i32) {
    %c0_i32 = arith.constant 0 : i32
    %c0_i32_0 = arith.constant 0 : i32
    %c0_i32_1 = arith.constant 0 : i32
    return %c0_i32, %c0_i32_0 : i32, i32
  }
  func.func @transform_5(%arg0: i32) -> (i32, i32) {
    %c0_i32 = arith.constant 0 : i32
    %c0_i32_0 = arith.constant 0 : i32
    %c0_i32_1 = arith.constant 0 : i32
    return %c0_i32, %c0_i32_0 : i32, i32
  }
}

</mosaic_0001>

<bundles_post_ra>
// kernel: forward.22
= control target key start
LH: loop header
LB: loop body
LE: loop exit
PB: predicated region body
PF: predicated region fallthrough
CT: control target
= control target key end

     0   :  { %s1385_s12 = smov 0   ;;  %s1387_s13 = smov 0   ;;  %s1635_s0 = inlined_call_operand.vmem [shape: bf16[512,36], index: 0, kind: input, shape index: {}]   ;;  %s1636_s1 = inlined_call_operand.vmem [shape: bf16[36,16], index: 1, kind: input, shape index: {}]   ;;  %s1637_s2 = inlined_call_operand.vmem [shape: f32[1,16], index: 2, kind: input, shape index: {}]   ;;  %s1638_s3 = inlined_call_operand.vmem [shape: bf16[512,16], index: 3, kind: output, shape index: {}]  }
   0x1   :  { %s1389_s14 = smov 0  }
   0x2 LB: > { %s32_s15 = sadd.s32 1, %s1358_s13  ;;  %p1124_p0 = scmp.ge.s32.totalorder %s1362_s14, 1  ;;  %s1362_s14 = sphi %s1389_s14, %s13_s14   ;;  %s1358_s13 = sphi %s1387_s13, %s1640_s13   ;;  %s1354_s12 = sphi %s1385_s12, %s1639_s12  }
   0x3   : > { %p34_p1 = scmp.ge.s32.totalorder %s32_s15, 2  ;;  %p188_p2 = scmp.lt.s32.totalorder %s1362_s14, 3 }
   0x5   : > { %s1642_s15 = smov (%p34_p1, %s32_s15), 0  ;;  %p189_p3 = pnand %p1124_p0, %p188_p2 }
   0x6   : > { %v1321_v0 = vld [vmem:[%s1636_s1] sm:$0xff] (!%p189_p3)   ;;  %v1322_v1 = vld [vmem:[%s1636_s1 + $0x8] sm:$0xff] (!%p189_p3)   ;;  %s1125_s20 = sshll.u32 (!%p189_p3), %s1354_s12, 5  ;;  %vm264_vm0 = vcmask (!%p189_p3), 130048   ;;  %v1364_v3 = vmov (!%p189_p3), 0.0   ;;  %vm510_vm1 = vcmask (!%p189_p3), 1041408  }
   0x7   : > { %192 = sbr.rel (%p189_p3) target bundleno = 280 (0x118), region = 32  ;;  %1250 = vmatprep.subr.bf16.mxu0 (!%p189_p3), %v1321_v0  ;;  %1288 = vmatprep.subr.bf16.mxu1 (!%p189_p3), %v1321_v0  ;;  %p230_p4 = scmp.lt.s32.totalorder (!%p189_p3), %s1125_s20, 63  ;;  %v1323_v2 = vld [vmem:[%s1636_s1 + $0x10] ss:$0 sps:$4 sm:$0x33] (!%p189_p3)   ;;  %267 = vst.msk [vmem:[#allocation2 + $0x10] sm:$0xff] (!%p189_p3), %vm264_vm0, %v1364_v3 }
   0x8   : > { %1251 = vmatpush3.bf16.msra.mxu0 (!%p189_p3), %v1321_v0  ;;  %1291 = vmatpush3.bf16.msra.mxu1 (!%p189_p3), %v1321_v0  ;;  %265 = vst.msk [vmem:[#allocation2] sm:$0xff] (!%p189_p3), %vm264_vm0, %v1364_v3  ;;  %266 = vst.msk [vmem:[#allocation2 + $0x8] sm:$0xff] (!%p189_p3), %vm264_vm0, %v1364_v3  ;;  %vm461_vm2 = vcmask (!%p189_p3), 293888   ;;  %v512_v4 = vsel (!%p189_p3), %vm510_vm1, %v1323_v2, 0  ;;  %v1497_v49 = vld [vmem:[%s1637_s2] ss:$0 sm:$0xff] (!%p189_p3) }
   0x9   : > { %1252 = vmatprep.subr.bf16.mxu0 (!%p189_p3), %v1322_v1  ;;  %1289 = vmatprep.subr.bf16.mxu1 (!%p189_p3), %v1322_v1  ;;  %268 = vst.msk [vmem:[#allocation2 + $0x18] sm:$0xff] (!%p189_p3), %vm264_vm0, %v1364_v3  ;;  %269 = vst.msk [vmem:[#allocation2 + $0x20] sm:$0xff] (!%p189_p3), %vm264_vm0, %v1364_v3  ;;  %vm974_vm3 = vcmask (!%p189_p3), 125952  }
   0xa   : > { %270 = vst.msk [vmem:[#allocation2 + $0x28] sm:$0xff] (!%p189_p3), %vm264_vm0, %v1364_v3  ;;  %271 = vst.msk [vmem:[#allocation2 + $0x30] sm:$0xff] (!%p189_p3), %vm264_vm0, %v1364_v3 }
   0xb   : > { %272 = vst.msk [vmem:[#allocation2 + $0x38] sm:$0xff] (!%p189_p3), %vm264_vm0, %v1364_v3  ;;  %273 = vst.msk [vmem:[#allocation2 + $0x40] sm:$0xff] (!%p189_p3), %vm264_vm0, %v1364_v3 }
   0xc   : > { %274 = vst.msk [vmem:[#allocation2 + $0x48] sm:$0xff] (!%p189_p3), %vm264_vm0, %v1364_v3  ;;  %275 = vst.msk [vmem:[#allocation2 + $0x50] sm:$0xff] (!%p189_p3), %vm264_vm0, %v1364_v3  ;;  %1253 = vmatpush3.bf16.msra.mxu0 (!%p189_p3), %v1322_v1  ;;  %1292 = vmatpush3.bf16.msra.mxu1 (!%p189_p3), %v1322_v1 }
   0xd   : > { %276 = vst.msk [vmem:[#allocation2 + $0x58] sm:$0xff] (!%p189_p3), %vm264_vm0, %v1364_v3  ;;  %277 = vst.msk [vmem:[#allocation2 + $0x60] sm:$0xff] (!%p189_p3), %vm264_vm0, %v1364_v3  ;;  %1294 = vmatprep.subr.msk.bf16.mxu0 (!%p189_p3), %vm510_vm1, %v1323_v2  ;;  %1295 = vmatprep.subr.msk.bf16.mxu1 (!%p189_p3), %vm510_vm1, %v1323_v2 }
   0xe   : > { %s1644_s20 = smov (!%p230_p4, %s1125_s20), 63  ;;  %278 = vst.msk [vmem:[#allocation2 + $0x68] sm:$0xff] %vm264_vm0, %v1364_v3  ;;  %279 = vst.msk [vmem:[#allocation2 + $0x70] sm:$0xff] %vm264_vm0, %v1364_v3  ;;  %v299_v21 = vld [vmem:[#allocation2 + $0x10] sm:$0xff] }
   0xf   : > { %280 = vst.msk [vmem:[#allocation2 + $0x78] sm:$0xff] %vm264_vm0, %v1364_v3  ;;  %281 = vst.msk [vmem:[#allocation2 + $0x80] sm:$0xff] %vm264_vm0, %v1364_v3  ;;  %s1126_s23 = sshll.u32 %s1644_s20, 2  ;;  %v297_v23 = vld [vmem:[#allocation2] sm:$0xff]  ;;  %v298_v33 = vld [vmem:[#allocation2 + $0x8] sm:$0xff] }
  0x10   : > { %282 = vst.msk [vmem:[#allocation2 + $0x88] sm:$0xff] %vm264_vm0, %v1364_v3  ;;  %283 = vst.msk [vmem:[#allocation2 + $0x90] sm:$0xff] %vm264_vm0, %v1364_v3  ;;  %s1452_s26 = scalar_lea.vmem %s1635_s0, %s1126_s23  ;;  %1255 = vmatpush3.bf16.msra.mxu0 %v512_v4  ;;  %1293 = vmatpush3.bf16.msra.mxu1 %v512_v4  ;;  %v300_v27 = vld [vmem:[#allocation2 + $0x18] sm:$0xff]  ;;  %v301_v47 = vld [vmem:[#allocation2 + $0x20] sm:$0xff]  ;;  %s1516_s4 = scalar_lea.vmem %s1638_s3, %s1126_s23 }
  0x11   : > { %284 = vst.msk [vmem:[#allocation2 + $0x98] sm:$0xff] %vm264_vm0, %v1364_v3  ;;  %285 = vst.msk [vmem:[#allocation2 + $0xa0] sm:$0xff] %vm264_vm0, %v1364_v3  ;;  %v1324_v5 = vld [vmem:[%s1452_s26] sm:$0xff]   ;;  %v1326_v7 = vld [vmem:[%s1452_s26 + $0x8] sm:$0xff]  }
  0x12   : > { %286 = vst.msk [vmem:[#allocation2 + $0xa8] sm:$0xff] %vm264_vm0, %v1364_v3  ;;  %287 = vst.msk [vmem:[#allocation2 + $0xb0] sm:$0xff] %vm264_vm0, %v1364_v3  ;;  %v1325_v6 = vld [vmem:[%s1452_s26 + $0x40] sm:$0xff]   ;;  %1256 = vmatprep.mubr.msk.bf16.mxu0 %vm461_vm2, %v1324_v5  ;;  %v1327_v8 = vld [vmem:[%s1452_s26 + $0x48] sm:$0xff]  }
  0x13   : > { %288 = vst.msk [vmem:[#allocation2 + $0xb8] sm:$0xff] %vm264_vm0, %v1364_v3  ;;  %289 = vst.msk [vmem:[#allocation2 + $0xc0] sm:$0xff] %vm264_vm0, %v1364_v3  ;;  %1272 = vmatprep.mubr.msk.bf16.mxu1 %vm461_vm2, %v1325_v6  ;;  %v1328_v9 = vld [vmem:[%s1452_s26 + $0x10] sm:$0xff]   ;;  %1257 = vmatmul.mubr.msk.bf16.vlgmr.msra.gmra.mrb[0].mxu0 %vm461_vm2, %v1326_v7  ;;  %v1330_v11 = vld [vmem:[%s1452_s26 + $0x18] sm:$0xff]  }
  0x14   : > { %290 = vst.msk [vmem:[#allocation2 + $0xc8] sm:$0xff] %vm264_vm0, %v1364_v3  ;;  %291 = vst.msk [vmem:[#allocation2 + $0xd0] sm:$0xff] %vm264_vm0, %v1364_v3  ;;  %v1329_v10 = vld [vmem:[%s1452_s26 + $0x50] sm:$0xff]   ;;  %1273 = vmatmul.mubr.msk.bf16.vlgmr.msra.gmra.mrb[0].mxu1 %vm461_vm2, %v1327_v8  ;;  %1260 = vmatprep.mubr.msk.bf16.mxu0 %vm461_vm2, %v1328_v9  ;;  %v1331_v12 = vld [vmem:[%s1452_s26 + $0x58] sm:$0xff]  }
  0x15   : > { %292 = vst.msk [vmem:[#allocation2 + $0xd8] sm:$0xff] %vm264_vm0, %v1364_v3  ;;  %293 = vst.msk [vmem:[#allocation2 + $0xe0] sm:$0xff] %vm264_vm0, %v1364_v3  ;;  %1276 = vmatprep.mubr.msk.bf16.mxu1 %vm461_vm2, %v1329_v10  ;;  %v1332_v13 = vld [vmem:[%s1452_s26 + $0x20] sm:$0xff]   ;;  %v1334_v15 = vld [vmem:[%s1452_s26 + $0x28] sm:$0xff]  }
  0x16   : > { %294 = vst.msk [vmem:[#allocation2 + $0xe8] sm:$0xff] %vm264_vm0, %v1364_v3  ;;  %295 = vst.msk [vmem:[#allocation2 + $0xf0] sm:$0xff] %vm264_vm0, %v1364_v3  ;;  %v1333_v14 = vld [vmem:[%s1452_s26 + $0x60] sm:$0xff]   ;;  %v1335_v16 = vld [vmem:[%s1452_s26 + $0x68] sm:$0xff]  }
  0x17   : > { %296 = vst.msk [vmem:[#allocation2 + $0xf8] sm:$0xff] %vm264_vm0, %v1364_v3  ;;  %v1336_v17 = vld [vmem:[%s1452_s26 + $0x30] sm:$0xff]   ;;  %v1338_v19 = vld [vmem:[%s1452_s26 + $0x38] sm:$0xff]   ;;  %v313_v24 = vld [vmem:[#allocation2 + $0x80] sm:$0xff] }
  0x18   : > { %v1337_v18 = vld [vmem:[%s1452_s26 + $0x70] sm:$0xff]   ;;  %v1339_v20 = vld [vmem:[%s1452_s26 + $0x78] sm:$0xff]   ;;  %v314_v34 = vld [vmem:[#allocation2 + $0x88] sm:$0xff] }
  0x19   : > { %v315_v22 = vld [vmem:[#allocation2 + $0x90] sm:$0xff]  ;;  %v316_v28 = vld [vmem:[#allocation2 + $0x98] sm:$0xff]  ;;  %v317_v48 = vld [vmem:[#allocation2 + $0xa0] sm:$0xff] }
  0x1a   : > { %v303_v45 = vld [vmem:[#allocation2 + $0x30] sm:$0xff]  ;;  %v304_v52 = vld [vmem:[#allocation2 + $0x38] sm:$0xff]  ;;  %v302_v58 = vld [vmem:[#allocation2 + $0x28] sm:$0xff] }
  0x1b   : > { %1261 = vmatmul.mubr.msk.bf16.gmra.mrb[4].mxu0 %vm461_vm2, %v1330_v11  ;;  %v319_v46 = vld [vmem:[#allocation2 + $0xb0] sm:$0xff]  ;;  %v320_v53 = vld [vmem:[#allocation2 + $0xb8] sm:$0xff]  ;;  %v318_v59 = vld [vmem:[#allocation2 + $0xa8] sm:$0xff] }
  0x1c   : > { %1277 = vmatmul.mubr.msk.bf16.gmra.mrb[4].mxu1 %vm461_vm2, %v1331_v12  ;;  %1264 = vmatprep.mubr.msk.bf16.mxu0 %vm461_vm2, %v1332_v13 }
  0x1d   : > { %1280 = vmatprep.mubr.msk.bf16.mxu1 %vm461_vm2, %v1333_v14 }
  0x23   : > { %1265 = vmatmul.mubr.msk.bf16.gmra.mrb[8].mxu0 %vm461_vm2, %v1334_v15 }
  0x24   : > { %1281 = vmatmul.mubr.msk.bf16.gmra.mrb[8].mxu1 %vm461_vm2, %v1335_v16  ;;  %1268 = vmatprep.mubr.msk.bf16.mxu0 %vm461_vm2, %v1336_v17 }
  0x25   : > { %1284 = vmatprep.mubr.msk.bf16.mxu1 %vm461_vm2, %v1337_v18 }
  0x2b   : > { %1269 = vmatmul.mubr.msk.bf16.gmra.mrb[12].mxu0 %vm461_vm2, %v1338_v19 }
  0x2c   : > { %1285 = vmatmul.mubr.msk.bf16.gmra.mrb[12].mxu1 %vm461_vm2, %v1339_v20 }
  0xe6   : > { %v1258_v25 = vpop.f32.mrb[0].mxu0 }
  0xe7   : > { %v1274_v26 = vpop.f32.mrb[0].mxu1  ;;  %v677_v29 = vadd.f32 %v1258_v25, %v299_v21  ;;  %v548_v31 = vpop.f32.mrb[1].mxu0 }
  0xe8   : > { %v693_v30 = vadd.f32 %v1274_v26, %v315_v22  ;;  %v612_v32 = vpop.f32.mrb[1].mxu1  ;;  %v675_v35 = vadd.f32 %v548_v31, %v297_v23  ;;  %v1259_v37 = vpop.f32.mrb[2].mxu0  ;;  %v307_v26 = vld [vmem:[#allocation2 + $0x50] sm:$0xff] }
  0xe9   : > { %v691_v36 = vadd.f32 %v612_v32, %v313_v24  ;;  %v1275_v38 = vpop.f32.mrb[2].mxu1  ;;  %710 = vst.msk [vmem:[#allocation2 + $0x10] sm:$0xff] %vm264_vm0, %v677_v29  ;;  %v678_v39 = vadd.f32 %v1259_v37, %v300_v27  ;;  %v551_v41 = vpop.f32.mrb[3].mxu0  ;;  %v323_v27 = vld [vmem:[#allocation2 + $0xd0] sm:$0xff]  ;;  %v305_v32 = vld [vmem:[#allocation2 + $0x40] sm:$0xff] }
  0xea   : > { %726 = vst.msk [vmem:[#allocation2 + $0x90] sm:$0xff] %vm264_vm0, %v693_v30  ;;  %v694_v40 = vadd.f32 %v1275_v38, %v316_v28  ;;  %v615_v42 = vpop.f32.mrb[3].mxu1  ;;  %708 = vst.msk [vmem:[#allocation2] sm:$0xff] %vm264_vm0, %v675_v35  ;;  %v676_v43 = vadd.f32 %v551_v41, %v298_v33  ;;  %v321_v33 = vld [vmem:[#allocation2 + $0xc0] sm:$0xff]  ;;  %v324_v41 = vld [vmem:[#allocation2 + $0xd8] sm:$0xff] }
  0xeb   : > { %724 = vst.msk [vmem:[#allocation2 + $0x80] sm:$0xff] %vm264_vm0, %v691_v36  ;;  %v692_v44 = vadd.f32 %v615_v42, %v314_v34  ;;  %711 = vst.msk [vmem:[#allocation2 + $0x18] sm:$0xff] %vm264_vm0, %v678_v39 }
  0xec   : > { %727 = vst.msk [vmem:[#allocation2 + $0x98] sm:$0xff] %vm264_vm0, %v694_v40  ;;  %709 = vst.msk [vmem:[#allocation2 + $0x8] sm:$0xff] %vm264_vm0, %v676_v43  ;;  %v308_v40 = vld [vmem:[#allocation2 + $0x58] sm:$0xff] }
  0xed   : > { %725 = vst.msk [vmem:[#allocation2 + $0x88] sm:$0xff] %vm264_vm0, %v692_v44 }
  0xee   : > { %v1262_v50 = vpop.f32.mrb[4].mxu0 }
  0xef   : > { %v1278_v51 = vpop.f32.mrb[4].mxu1  ;;  %v681_v54 = vadd.f32 %v1262_v50, %v303_v45  ;;  %v564_v56 = vpop.f32.mrb[5].mxu0  ;;  %v322_v50 = vld [vmem:[#allocation2 + $0xc8] sm:$0xff] }
  0xf0   : > { %v697_v55 = vadd.f32 %v1278_v51, %v319_v46  ;;  %v628_v57 = vpop.f32.mrb[5].mxu1  ;;  %v745_v60 = vld [vmem:[#allocation2 + $0x10] sm:$0xff]  ;;  %v679_v62 = vadd.f32 %v564_v56, %v301_v47  ;;  %v1263_v0 = vpop.f32.mrb[6].mxu0 }
  0xf1   : > { %v761_v61 = vld [vmem:[#allocation2 + $0x90] sm:$0xff]  ;;  %v695_v63 = vadd.f32 %v628_v57, %v317_v48  ;;  %v1279_v1 = vpop.f32.mrb[6].mxu1  ;;  %v784_v2 = vadd.f32 %v1497_v49, %v745_v60  ;;  %v743_v4 = vld [vmem:[#allocation2] sm:$0xff]  ;;  %714 = vst.msk [vmem:[#allocation2 + $0x30] sm:$0xff] %vm264_vm0, %v681_v54  ;;  %v682_v6 = vadd.f32 %v1263_v0, %v304_v52  ;;  %v567_v8 = vpop.f32.mrb[7].mxu0  ;;  %v306_v48 = vld [vmem:[#allocation2 + $0x48] sm:$0xff] }
  0xf2   : > { %v800_v3 = vadd.f32 %v1497_v49, %v761_v61  ;;  %v759_v5 = vld [vmem:[#allocation2 + $0x80] sm:$0xff]  ;;  %730 = vst.msk [vmem:[#allocation2 + $0xb0] sm:$0xff] %vm264_vm0, %v697_v55  ;;  %v698_v7 = vadd.f32 %v1279_v1, %v320_v53  ;;  %v631_v9 = vpop.f32.mrb[7].mxu1  ;;  %v782_v10 = vadd.f32 %v1497_v49, %v743_v4  ;;  %v746_v12 = vld [vmem:[#allocation2 + $0x18] sm:$0xff]  ;;  %712 = vst.msk [vmem:[#allocation2 + $0x20] sm:$0xff] %vm264_vm0, %v679_v62 }
  0xf3   : > { %v798_v11 = vadd.f32 %v1497_v49, %v759_v5  ;;  %v762_v13 = vld [vmem:[#allocation2 + $0x98] sm:$0xff]  ;;  %728 = vst.msk [vmem:[#allocation2 + $0xa0] sm:$0xff] %vm264_vm0, %v695_v63  ;;  %v680_v14 = vadd.f32 %v567_v8, %v302_v58  ;;  %v696_v15 = vadd.f32 %v631_v9, %v318_v59  ;;  %v816_v16 = vmax.f32 %v784_v2, 0.0  ;;  %v744_v20 = vld [vmem:[#allocation2 + $0x8] sm:$0xff]  ;;  %715 = vst.msk [vmem:[#allocation2 + $0x38] sm:$0xff] %vm264_vm0, %v682_v6 }
  0xf4   : > { %v832_v17 = vmax.f32 %v800_v3, 0.0  ;;  %v785_v18 = vadd.f32 %v1497_v49, %v746_v12  ;;  %v801_v19 = vadd.f32 %v1497_v49, %v762_v13  ;;  %v760_v21 = vld [vmem:[#allocation2 + $0x88] sm:$0xff]  ;;  %731 = vst.msk [vmem:[#allocation2 + $0xb8] sm:$0xff] %vm264_vm0, %v698_v7  ;;  %v814_v22 = vmax.f32 %v782_v10, 0.0 }
  0xf5   : > { %v830_v23 = vmax.f32 %v798_v11, 0.0  ;;  %v783_v24 = vadd.f32 %v1497_v49, %v744_v20  ;;  %v799_v25 = vadd.f32 %v1497_v49, %v760_v21  ;;  %713 = vst.msk [vmem:[#allocation2 + $0x28] sm:$0xff] %vm264_vm0, %v680_v14  ;;  %729 = vst.msk [vmem:[#allocation2 + $0xa8] sm:$0xff] %vm264_vm0, %v696_v15  ;;  %v1201_v28 = vpack.c.bf16 %v816_v16, %v816_v16  ;;  %v327_v20 = vld [vmem:[#allocation2 + $0xf0] sm:$0xff] }
  0xf6   : > { %v1217_v29 = vpack.c.bf16 %v832_v17, %v832_v17  ;;  %v817_v30 = vmax.f32 %v785_v18, 0.0  ;;  %v833_v31 = vmax.f32 %v801_v19, 0.0  ;;  %v1199_v34 = vpack.c.bf16 %v814_v22, %v814_v22  ;;  %v1266_v38 = vpop.f32.mrb[8].mxu0  ;;  %v311_v19 = vld [vmem:[#allocation2 + $0x70] sm:$0xff] }
  0xf7   : > { %v1215_v35 = vpack.c.bf16 %v830_v23, %v830_v23  ;;  %v815_v36 = vmax.f32 %v783_v24, 0.0  ;;  %v831_v37 = vmax.f32 %v799_v25, 0.0  ;;  %v1282_v39 = vpop.f32.mrb[8].mxu1  ;;  %977 = vst.msk [vmem:[%s1516_s4 + $0x8] sm:$0xf] %vm974_vm3, %v1201_v28  ;;  %v685_v44 = vadd.f32 %v1266_v38, %v307_v26  ;;  %v580_v46 = vpop.f32.mrb[9].mxu0 }
  0xf8   : > { %993 = vst.msk [vmem:[%s1516_s4 + $0x48] sm:$0xf] %vm974_vm3, %v1217_v29  ;;  %v1202_v42 = vpack.c.bf16 %v817_v30, %v817_v30  ;;  %v1218_v43 = vpack.c.bf16 %v833_v31, %v833_v31  ;;  %v701_v45 = vadd.f32 %v1282_v39, %v323_v27  ;;  %v644_v47 = vpop.f32.mrb[9].mxu1  ;;  %975 = vst.msk [vmem:[%s1516_s4] sm:$0xf] %vm974_vm3, %v1199_v34  ;;  %v749_v53 = vld [vmem:[#allocation2 + $0x30] sm:$0xff] }
  0xf9   : > { %991 = vst.msk [vmem:[%s1516_s4 + $0x40] sm:$0xf] %vm974_vm3, %v1215_v35  ;;  %v1200_v51 = vpack.c.bf16 %v815_v36, %v815_v36  ;;  %v1216_v52 = vpack.c.bf16 %v831_v37, %v831_v37  ;;  %v765_v54 = vld [vmem:[#allocation2 + $0xb0] sm:$0xff]  ;;  %v683_v55 = vadd.f32 %v580_v46, %v305_v32  ;;  %v699_v56 = vadd.f32 %v644_v47, %v321_v33  ;;  %v1267_v57 = vpop.f32.mrb[10].mxu0  ;;  %v1283_v58 = vpop.f32.mrb[10].mxu1  ;;  %v747_v61 = vld [vmem:[#allocation2 + $0x20] sm:$0xff] }
  0xfa   : > { %978 = vst.msk [vmem:[%s1516_s4 + $0xc] sm:$0xf] %vm974_vm3, %v1202_v42  ;;  %994 = vst.msk [vmem:[%s1516_s4 + $0x4c] sm:$0xf] %vm974_vm3, %v1218_v43  ;;  %v788_v59 = vadd.f32 %v1497_v49, %v749_v53  ;;  %v804_v60 = vadd.f32 %v1497_v49, %v765_v54  ;;  %v763_v62 = vld [vmem:[#allocation2 + $0xa0] sm:$0xff]  ;;  %v686_v63 = vadd.f32 %v1267_v57, %v308_v40  ;;  %v583_v1 = vpop.f32.mrb[11].mxu0 }
  0xfb   : > { %718 = vst.msk [vmem:[#allocation2 + $0x50] sm:$0xff] %vm264_vm0, %v685_v44  ;;  %734 = vst.msk [vmem:[#allocation2 + $0xd0] sm:$0xff] %vm264_vm0, %v701_v45  ;;  %v702_v0 = vadd.f32 %v1283_v58, %v324_v41  ;;  %v647_v2 = vpop.f32.mrb[11].mxu1  ;;  %v786_v3 = vadd.f32 %v1497_v49, %v747_v61  ;;  %v802_v4 = vadd.f32 %v1497_v49, %v763_v62  ;;  %v750_v5 = vld [vmem:[#allocation2 + $0x38] sm:$0xff]  ;;  %v309_v25 = vld [vmem:[#allocation2 + $0x60] sm:$0xff] }
  0xfc   : > { %976 = vst.msk [vmem:[%s1516_s4 + $0x4] sm:$0xf] %vm974_vm3, %v1200_v51  ;;  %992 = vst.msk [vmem:[%s1516_s4 + $0x44] sm:$0xf] %vm974_vm3, %v1216_v52  ;;  %v766_v6 = vld [vmem:[#allocation2 + $0xb8] sm:$0xff]  ;;  %v684_v7 = vadd.f32 %v583_v1, %v306_v48  ;;  %v700_v8 = vadd.f32 %v647_v2, %v322_v50  ;;  %v820_v9 = vmax.f32 %v788_v59, 0.0  ;;  %v789_v11 = vadd.f32 %v1497_v49, %v750_v5 }
  0xfd   : > { %716 = vst.msk [vmem:[#allocation2 + $0x40] sm:$0xff] %vm264_vm0, %v683_v55  ;;  %732 = vst.msk [vmem:[#allocation2 + $0xc0] sm:$0xff] %vm264_vm0, %v699_v56  ;;  %v836_v10 = vmax.f32 %v804_v60, 0.0  ;;  %v805_v12 = vadd.f32 %v1497_v49, %v766_v6  ;;  %v748_v13 = vld [vmem:[#allocation2 + $0x28] sm:$0xff]  ;;  %v818_v15 = vmax.f32 %v786_v3, 0.0  ;;  %v834_v16 = vmax.f32 %v802_v4, 0.0 }
  0xfe   : > { %v764_v14 = vld [vmem:[#allocation2 + $0xa8] sm:$0xff]  ;;  %719 = vst.msk [vmem:[#allocation2 + $0x58] sm:$0xff] %vm264_vm0, %v686_v63  ;;  %735 = vst.msk [vmem:[#allocation2 + $0xd8] sm:$0xff] %vm264_vm0, %v702_v0  ;;  %v787_v17 = vadd.f32 %v1497_v49, %v748_v13  ;;  %v1205_v21 = vpack.c.bf16 %v820_v9, %v820_v9  ;;  %v821_v23 = vmax.f32 %v789_v11, 0.0  ;;  %v325_v26 = vld [vmem:[#allocation2 + $0xe0] sm:$0xff]  ;;  %v1270_v31 = vpop.f32.mrb[12].mxu0 }
  0xff   : > { %v803_v18 = vadd.f32 %v1497_v49, %v764_v14  ;;  %717 = vst.msk [vmem:[#allocation2 + $0x48] sm:$0xff] %vm264_vm0, %v684_v7  ;;  %733 = vst.msk [vmem:[#allocation2 + $0xc8] sm:$0xff] %vm264_vm0, %v700_v8  ;;  %v1221_v22 = vpack.c.bf16 %v836_v10, %v836_v10  ;;  %v837_v24 = vmax.f32 %v805_v12, 0.0  ;;  %v1203_v27 = vpack.c.bf16 %v818_v15, %v818_v15  ;;  %v1286_v32 = vpop.f32.mrb[12].mxu1  ;;  %v312_v33 = vld [vmem:[#allocation2 + $0x78] sm:$0xff]  ;;  %v596_v39 = vpop.f32.mrb[13].mxu0 }
 0x100   : > { %v1219_v28 = vpack.c.bf16 %v834_v16, %v834_v16  ;;  %v819_v29 = vmax.f32 %v787_v17, 0.0  ;;  %v328_v34 = vld [vmem:[#allocation2 + $0xf8] sm:$0xff]  ;;  %981 = vst.msk [vmem:[%s1516_s4 + $0x18] sm:$0xf] %vm974_vm3, %v1205_v21  ;;  %v1206_v35 = vpack.c.bf16 %v821_v23, %v821_v23  ;;  %v689_v37 = vadd.f32 %v1270_v31, %v311_v19  ;;  %v660_v40 = vpop.f32.mrb[13].mxu1  ;;  %v310_v41 = vld [vmem:[#allocation2 + $0x68] sm:$0xff] }
 0x101   : > { %v835_v30 = vmax.f32 %v803_v18, 0.0  ;;  %997 = vst.msk [vmem:[%s1516_s4 + $0x58] sm:$0xf] %vm974_vm3, %v1221_v22  ;;  %v1222_v36 = vpack.c.bf16 %v837_v24, %v837_v24  ;;  %v705_v38 = vadd.f32 %v1286_v32, %v327_v20  ;;  %v326_v42 = vld [vmem:[#allocation2 + $0xe8] sm:$0xff]  ;;  %979 = vst.msk [vmem:[%s1516_s4 + $0x10] sm:$0xf] %vm974_vm3, %v1203_v27  ;;  %v687_v47 = vadd.f32 %v596_v39, %v309_v25 }
 0x102   : > { %995 = vst.msk [vmem:[%s1516_s4 + $0x50] sm:$0xf] %vm974_vm3, %v1219_v28  ;;  %v1204_v43 = vpack.c.bf16 %v819_v29, %v819_v29  ;;  %v753_v45 = vld [vmem:[#allocation2 + $0x50] sm:$0xff]  ;;  %v703_v48 = vadd.f32 %v660_v40, %v325_v26  ;;  %v1271_v50 = vpop.f32.mrb[14].mxu0  ;;  %v1287_v51 = vpop.f32.mrb[14].mxu1 }
 0x103   : > { %v1220_v44 = vpack.c.bf16 %v835_v30, %v835_v30  ;;  %v769_v46 = vld [vmem:[#allocation2 + $0xd0] sm:$0xff]  ;;  %982 = vst.msk [vmem:[%s1516_s4 + $0x1c] sm:$0xf] %vm974_vm3, %v1206_v35  ;;  %998 = vst.msk [vmem:[%s1516_s4 + $0x5c] sm:$0xf] %vm974_vm3, %v1222_v36  ;;  %v792_v52 = vadd.f32 %v1497_v49, %v753_v45  ;;  %v690_v56 = vadd.f32 %v1271_v50, %v312_v33  ;;  %v599_v58 = vpop.f32.mrb[15].mxu0 }
 0x104   : > { %v808_v53 = vadd.f32 %v1497_v49, %v769_v46  ;;  %v751_v54 = vld [vmem:[#allocation2 + $0x40] sm:$0xff]  ;;  %722 = vst.msk [vmem:[#allocation2 + $0x70] sm:$0xff] %vm264_vm0, %v689_v37  ;;  %738 = vst.msk [vmem:[#allocation2 + $0xf0] sm:$0xff] %vm264_vm0, %v705_v38  ;;  %v706_v57 = vadd.f32 %v1287_v51, %v328_v34  ;;  %v663_v59 = vpop.f32.mrb[15].mxu1  ;;  %v688_v0 = vadd.f32 %v599_v58, %v310_v41 }
 0x105   : > { %v767_v55 = vld [vmem:[#allocation2 + $0xc0] sm:$0xff]  ;;  %980 = vst.msk [vmem:[%s1516_s4 + $0x14] sm:$0xf] %vm974_vm3, %v1204_v43  ;;  %996 = vst.msk [vmem:[%s1516_s4 + $0x54] sm:$0xf] %vm974_vm3, %v1220_v44  ;;  %v790_v60 = vadd.f32 %v1497_v49, %v751_v54  ;;  %v754_v62 = vld [vmem:[#allocation2 + $0x58] sm:$0xff]  ;;  %v704_v1 = vadd.f32 %v663_v59, %v326_v42 }
 0x106   : > { %v806_v61 = vadd.f32 %v1497_v49, %v767_v55  ;;  %v770_v63 = vld [vmem:[#allocation2 + $0xd8] sm:$0xff]  ;;  %720 = vst.msk [vmem:[#allocation2 + $0x60] sm:$0xff] %vm264_vm0, %v687_v47  ;;  %736 = vst.msk [vmem:[#allocation2 + $0xe0] sm:$0xff] %vm264_vm0, %v703_v48  ;;  %v824_v2 = vmax.f32 %v792_v52, 0.0  ;;  %v840_v3 = vmax.f32 %v808_v53, 0.0  ;;  %v793_v4 = vadd.f32 %v1497_v49, %v754_v62  ;;  %v752_v6 = vld [vmem:[#allocation2 + $0x48] sm:$0xff] }
 0x107   : > { %v809_v5 = vadd.f32 %v1497_v49, %v770_v63  ;;  %v768_v7 = vld [vmem:[#allocation2 + $0xc8] sm:$0xff]  ;;  %723 = vst.msk [vmem:[#allocation2 + $0x78] sm:$0xff] %vm264_vm0, %v690_v56  ;;  %739 = vst.msk [vmem:[#allocation2 + $0xf8] sm:$0xff] %vm264_vm0, %v706_v57  ;;  %v822_v8 = vmax.f32 %v790_v60, 0.0  ;;  %v791_v10 = vadd.f32 %v1497_v49, %v752_v6 }
 0x108   : > { %v838_v9 = vmax.f32 %v806_v61, 0.0  ;;  %v807_v11 = vadd.f32 %v1497_v49, %v768_v7  ;;  %721 = vst.msk [vmem:[#allocation2 + $0x68] sm:$0xff] %vm264_vm0, %v688_v0  ;;  %737 = vst.msk [vmem:[#allocation2 + $0xe8] sm:$0xff] %vm264_vm0, %v704_v1  ;;  %v1209_v12 = vpack.c.bf16 %v824_v2, %v824_v2  ;;  %v1225_v13 = vpack.c.bf16 %v840_v3, %v840_v3 }
 0x109   : > { %v825_v14 = vmax.f32 %v793_v4, 0.0  ;;  %v841_v15 = vmax.f32 %v809_v5, 0.0  ;;  %v1207_v16 = vpack.c.bf16 %v822_v8, %v822_v8  ;;  %v823_v18 = vmax.f32 %v791_v10, 0.0 }
 0x10a   : > { %v1223_v17 = vpack.c.bf16 %v838_v9, %v838_v9  ;;  %v839_v19 = vmax.f32 %v807_v11, 0.0  ;;  %985 = vst.msk [vmem:[%s1516_s4 + $0x28] sm:$0xf] %vm974_vm3, %v1209_v12  ;;  %1001 = vst.msk [vmem:[%s1516_s4 + $0x68] sm:$0xf] %vm974_vm3, %v1225_v13 }
 0x10b   : > { %v1210_v20 = vpack.c.bf16 %v825_v14, %v825_v14  ;;  %v1226_v21 = vpack.c.bf16 %v841_v15, %v841_v15  ;;  %983 = vst.msk [vmem:[%s1516_s4 + $0x20] sm:$0xf] %vm974_vm3, %v1207_v16  ;;  %v1208_v22 = vpack.c.bf16 %v823_v18, %v823_v18  ;;  %v757_v24 = vld [vmem:[#allocation2 + $0x70] sm:$0xff] }
 0x10c   : > { %999 = vst.msk [vmem:[%s1516_s4 + $0x60] sm:$0xf] %vm974_vm3, %v1223_v17  ;;  %v1224_v23 = vpack.c.bf16 %v839_v19, %v839_v19  ;;  %v773_v25 = vld [vmem:[#allocation2 + $0xf0] sm:$0xff]  ;;  %v796_v26 = vadd.f32 %v1497_v49, %v757_v24 }
 0x10d   : > { %986 = vst.msk [vmem:[%s1516_s4 + $0x2c] sm:$0xf] %vm974_vm3, %v1210_v20  ;;  %1002 = vst.msk [vmem:[%s1516_s4 + $0x6c] sm:$0xf] %vm974_vm3, %v1226_v21  ;;  %v812_v27 = vadd.f32 %v1497_v49, %v773_v25  ;;  %v755_v28 = vld [vmem:[#allocation2 + $0x60] sm:$0xff] }
 0x10e   : > { %v771_v29 = vld [vmem:[#allocation2 + $0xe0] sm:$0xff]  ;;  %984 = vst.msk [vmem:[%s1516_s4 + $0x24] sm:$0xf] %vm974_vm3, %v1208_v22  ;;  %1000 = vst.msk [vmem:[%s1516_s4 + $0x64] sm:$0xf] %vm974_vm3, %v1224_v23  ;;  %v794_v30 = vadd.f32 %v1497_v49, %v755_v28  ;;  %v758_v32 = vld [vmem:[#allocation2 + $0x78] sm:$0xff] }
 0x10f   : > { %v810_v31 = vadd.f32 %v1497_v49, %v771_v29  ;;  %v774_v33 = vld [vmem:[#allocation2 + $0xf8] sm:$0xff]  ;;  %v828_v34 = vmax.f32 %v796_v26, 0.0  ;;  %v844_v35 = vmax.f32 %v812_v27, 0.0  ;;  %v797_v36 = vadd.f32 %v1497_v49, %v758_v32  ;;  %v756_v38 = vld [vmem:[#allocation2 + $0x68] sm:$0xff] }
 0x110   : > { %v813_v37 = vadd.f32 %v1497_v49, %v774_v33  ;;  %v772_v39 = vld [vmem:[#allocation2 + $0xe8] sm:$0xff]  ;;  %v826_v40 = vmax.f32 %v794_v30, 0.0  ;;  %v795_v42 = vadd.f32 %v1497_v49, %v756_v38 }
 0x111   : > { %v842_v41 = vmax.f32 %v810_v31, 0.0  ;;  %v811_v43 = vadd.f32 %v1497_v49, %v772_v39  ;;  %v1213_v44 = vpack.c.bf16 %v828_v34, %v828_v34  ;;  %v1229_v45 = vpack.c.bf16 %v844_v35, %v844_v35 }
 0x112   : > { %v829_v46 = vmax.f32 %v797_v36, 0.0  ;;  %v845_v47 = vmax.f32 %v813_v37, 0.0  ;;  %v1211_v48 = vpack.c.bf16 %v826_v40, %v826_v40  ;;  %v827_v51 = vmax.f32 %v795_v42, 0.0 }
 0x113   : > { %v1227_v50 = vpack.c.bf16 %v842_v41, %v842_v41  ;;  %v843_v52 = vmax.f32 %v811_v43, 0.0  ;;  %989 = vst.msk [vmem:[%s1516_s4 + $0x38] sm:$0xf] %vm974_vm3, %v1213_v44  ;;  %1005 = vst.msk [vmem:[%s1516_s4 + $0x78] sm:$0xf] %vm974_vm3, %v1229_v45 }
 0x114   : > { %v1214_v53 = vpack.c.bf16 %v829_v46, %v829_v46  ;;  %v1230_v54 = vpack.c.bf16 %v845_v47, %v845_v47  ;;  %987 = vst.msk [vmem:[%s1516_s4 + $0x30] sm:$0xf] %vm974_vm3, %v1211_v48  ;;  %v1212_v49 = vpack.c.bf16 %v827_v51, %v827_v51 }
 0x115   : > { %1003 = vst.msk [vmem:[%s1516_s4 + $0x70] sm:$0xf] %vm974_vm3, %v1227_v50  ;;  %v1228_v55 = vpack.c.bf16 %v843_v52, %v843_v52 }
 0x116   : > { %990 = vst.msk [vmem:[%s1516_s4 + $0x3c] sm:$0xf] %vm974_vm3, %v1214_v53  ;;  %1006 = vst.msk [vmem:[%s1516_s4 + $0x7c] sm:$0xf] %vm974_vm3, %v1230_v54 }
 0x117   : > { %988 = vst.msk [vmem:[%s1516_s4 + $0x34] sm:$0xf] %vm974_vm3, %v1212_v49  ;;  %1004 = vst.msk [vmem:[%s1516_s4 + $0x74] sm:$0xf] %vm974_vm3, %v1228_v55 }
 0x118 PF: > { %s13_s14 = sadd.s32 1, %s1362_s14   ;;  %s1639_s12 = smov %s1358_s13 }
 0x119   : > { %p10_p5 = scmp.ge.s32.totalorder %s13_s14, 4   ;;  %s1640_s13 = smov %s1642_s15 }
 0x11b   :  { %12 = sbr.rel (!%p10_p5) target bundleno = 2 (0x2), region = 76 }

// kernel: forward.23
= control target key start
LH: loop header
LB: loop body
LE: loop exit
PB: predicated region body
PF: predicated region fallthrough
CT: control target
= control target key end

     0   :  { %vm19_vm0 = vcmask 261120   ;;  %v629_v0 = vmov 0   ;;  %v630_v2 = vmov 0.0   ;;  %vm212_vm1 = vcmask 130048   ;;  %s869_s1 = inlined_call_operand.vmem [shape: bf16[144,32], index: 1, kind: input, shape index: {}]   ;;  %s870_s0 = inlined_call_operand.vmem [shape: bf16[128,144], index: 0, kind: input, shape index: {}]   ;;  %s871_s2 = inlined_call_operand.vmem [shape: f32[1,32], index: 2, kind: input, shape index: {}]   ;;  %s872_s3 = inlined_call_operand.vmem [shape: bf16[128,32], index: 3, kind: output, shape index: {}]  }
   0x1   :  { %237 = vmatprep.subr.bf16.mxu0 %v629_v0  ;;  %576 = vmatprep.subr.bf16.mxu1 %v629_v0  ;;  %v596_v1 = vld [vmem:[%s869_s1] sm:$0xff]   ;;  %20 = vst.msk [vmem:[#allocation2] sm:$0xff] %vm19_vm0, %v630_v2  ;;  %21 = vst.msk [vmem:[#allocation2 + $0x8] sm:$0xff] %vm19_vm0, %v630_v2  ;;  %v597_v3 = vld [vmem:[%s869_s1 + $0x8] sm:$0xff]   ;;  %vm489_vm2 = vcmask 257024  }
   0x2   :  { %22 = vst.msk [vmem:[#allocation2 + $0x10] sm:$0xff] %vm19_vm0, %v630_v2  ;;  %23 = vst.msk [vmem:[#allocation2 + $0x18] sm:$0xff] %vm19_vm0, %v630_v2  ;;  %238 = vmatpush1.bf16.msra.mxu0 %v596_v1  ;;  %585 = vmatpush1.bf16.msra.mxu1 %v596_v1  ;;  %v598_v4 = vld [vmem:[%s869_s1 + $0x10] sm:$0xff]   ;;  %v599_v5 = vld [vmem:[%s869_s1 + $0x18] sm:$0xff]  }
   0x3   :  { %24 = vst.msk [vmem:[#allocation2 + $0x20] sm:$0xff] %vm19_vm0, %v630_v2  ;;  %25 = vst.msk [vmem:[#allocation2 + $0x28] sm:$0xff] %vm19_vm0, %v630_v2  ;;  %239 = vmatprep.subr.bf16.mxu0 %v629_v0  ;;  %577 = vmatprep.subr.bf16.mxu1 %v629_v0  ;;  %v607_v6 = vld [vmem:[%s870_s0 + $0x4] ss:$8 sps:$4 sm:$0xff]   ;;  %v602_v10 = vld [vmem:[%s869_s1 + $0x30] sm:$0xff]  }
   0x4   :  { %26 = vst.msk [vmem:[#allocation2 + $0x30] sm:$0xff] %vm19_vm0, %v630_v2  ;;  %27 = vst.msk [vmem:[#allocation2 + $0x38] sm:$0xff] %vm19_vm0, %v630_v2  ;;  %v610_v7 = vld [vmem:[%s870_s0 + $0x44] ss:$8 sps:$4 sm:$0xff]   ;;  %535 = vmatprep.mubr.msk.bf16.mxu0 %vm212_vm1, %v607_v6  ;;  %v603_v11 = vld [vmem:[%s869_s1 + $0x38] sm:$0xff]  }
   0x5   :  { %28 = vst.msk [vmem:[#allocation2 + $0x40] sm:$0xff] %vm19_vm0, %v630_v2  ;;  %29 = vst.msk [vmem:[#allocation2 + $0x48] sm:$0xff] %vm19_vm0, %v630_v2  ;;  %539 = vmatprep.mubr.msk.bf16.mxu1 %vm212_vm1, %v610_v7  ;;  %v600_v8 = vld [vmem:[%s869_s1 + $0x20] sm:$0xff]   ;;  %v601_v9 = vld [vmem:[%s869_s1 + $0x28] sm:$0xff]  }
   0x6   :  { %30 = vst.msk [vmem:[#allocation2 + $0x50] sm:$0xff] %vm19_vm0, %v630_v2  ;;  %31 = vst.msk [vmem:[#allocation2 + $0x58] sm:$0xff] %vm19_vm0, %v630_v2  ;;  %240 = vmatpush1.bf16.msra.mxu0 %v597_v3  ;;  %586 = vmatpush1.bf16.msra.mxu1 %v597_v3  ;;  %v604_v12 = vld [vmem:[%s869_s1 + $0x40] sm:$0xff]   ;;  %v611_v15 = vld [vmem:[%s870_s0 + $0x14] ss:$8 sps:$4 sm:$0xff]  }
   0x7   :  { %32 = vst.msk [vmem:[#allocation2 + $0x60] sm:$0xff] %vm19_vm0, %v630_v2  ;;  %33 = vst.msk [vmem:[#allocation2 + $0x68] sm:$0xff] %vm19_vm0, %v630_v2  ;;  %241 = vmatprep.subr.bf16.mxu0 %v629_v0  ;;  %578 = vmatprep.subr.bf16.mxu1 %v629_v0  ;;  %v605_v13 = vld [vmem:[%s870_s0] ss:$8 sps:$4 sm:$0xff]   ;;  %v613_v16 = vld [vmem:[%s870_s0 + $0x54] ss:$8 sps:$4 sm:$0xff]  }
   0x8   :  { %34 = vst.msk [vmem:[#allocation2 + $0x70] sm:$0xff] %vm19_vm0, %v630_v2  ;;  %35 = vst.msk [vmem:[#allocation2 + $0x78] sm:$0xff] %vm19_vm0, %v630_v2  ;;  %v608_v14 = vld [vmem:[%s870_s0 + $0x40] ss:$8 sps:$4 sm:$0xff]   ;;  %v615_v17 = vld [vmem:[%s870_s0 + $0x10] ss:$8 sps:$4 sm:$0xff]  }
   0x9   :  { %v616_v18 = vld [vmem:[%s870_s0 + $0x50] ss:$8 sps:$4 sm:$0xff]   ;;  %v617_v19 = vld [vmem:[%s870_s0 + $0x24] ss:$8 sps:$4 sm:$0xff]   ;;  %v621_v21 = vld [vmem:[%s870_s0 + $0x20] ss:$8 sps:$4 sm:$0xff]  }
   0xa   :  { %242 = vmatpush1.bf16.msra.mxu0 %v598_v4  ;;  %587 = vmatpush1.bf16.msra.mxu1 %v598_v4  ;;  %v619_v20 = vld [vmem:[%s870_s0 + $0x64] ss:$8 sps:$4 sm:$0xff]   ;;  %v622_v22 = vld [vmem:[%s870_s0 + $0x60] ss:$8 sps:$4 sm:$0xff]   ;;  %v623_v23 = vld [vmem:[%s870_s0 + $0x34] ss:$8 sps:$4 sm:$0xff]  }
   0xb   :  { %243 = vmatprep.subr.bf16.mxu0 %v629_v0  ;;  %579 = vmatprep.subr.bf16.mxu1 %v629_v0  ;;  %v625_v24 = vld [vmem:[%s870_s0 + $0x74] ss:$8 sps:$4 sm:$0xff]   ;;  %v627_v25 = vld [vmem:[%s870_s0 + $0x30] ss:$8 sps:$4 sm:$0xff]   ;;  %v36_v27 = vld [vmem:[#allocation2] sm:$0xff] }
   0xc   :  { %v628_v26 = vld [vmem:[%s870_s0 + $0x70] ss:$8 sps:$4 sm:$0xff]   ;;  %v44_v28 = vld [vmem:[#allocation2 + $0x40] sm:$0xff]  ;;  %v37_v31 = vld [vmem:[#allocation2 + $0x8] sm:$0xff] }
   0xd   :  { %v45_v32 = vld [vmem:[#allocation2 + $0x48] sm:$0xff]  ;;  %v38_v43 = vld [vmem:[#allocation2 + $0x10] sm:$0xff]  ;;  %v775_v45 = vld [vmem:[%s871_s2] ss:$0 sm:$0xff] }
   0xe   :  { %244 = vmatpush1.bf16.msra.mxu0 %v599_v5  ;;  %588 = vmatpush1.bf16.msra.mxu1 %v599_v5  ;;  %v46_v44 = vld [vmem:[#allocation2 + $0x50] sm:$0xff]  ;;  %v39_v48 = vld [vmem:[#allocation2 + $0x18] sm:$0xff]  ;;  %v40_v6 = vld [vmem:[#allocation2 + $0x20] sm:$0xff] }
   0xf   :  { %245 = vmatprep.subr.bf16.mxu0 %v629_v0  ;;  %580 = vmatprep.subr.bf16.mxu1 %v629_v0  ;;  %v47_v49 = vld [vmem:[#allocation2 + $0x58] sm:$0xff]  ;;  %v48_v7 = vld [vmem:[#allocation2 + $0x60] sm:$0xff] }
  0x12   :  { %246 = vmatpush1.bf16.msra.mxu0 %v600_v8  ;;  %589 = vmatpush1.bf16.msra.mxu1 %v600_v8 }
  0x13   :  { %247 = vmatprep.subr.bf16.mxu0 %v629_v0  ;;  %581 = vmatprep.subr.bf16.mxu1 %v629_v0 }
  0x16   :  { %248 = vmatpush1.bf16.msra.mxu0 %v601_v9  ;;  %590 = vmatpush1.bf16.msra.mxu1 %v601_v9 }
  0x17   :  { %249 = vmatprep.subr.bf16.mxu0 %v629_v0  ;;  %582 = vmatprep.subr.bf16.mxu1 %v629_v0 }
  0x1a   :  { %250 = vmatpush1.bf16.msra.mxu0 %v602_v10  ;;  %591 = vmatpush1.bf16.msra.mxu1 %v602_v10 }
  0x1b   :  { %251 = vmatprep.subr.bf16.mxu0 %v629_v0  ;;  %583 = vmatprep.subr.bf16.mxu1 %v629_v0 }
  0x1e   :  { %252 = vmatpush1.bf16.msra.mxu0 %v603_v11  ;;  %592 = vmatpush1.bf16.msra.mxu1 %v603_v11 }
  0x1f   :  { %253 = vmatprep.subr.bf16.mxu0 %v629_v0  ;;  %584 = vmatprep.subr.bf16.mxu1 %v629_v0 }
  0x22   :  { %254 = vmatpush1.bf16.msra.mxu0 %v604_v12  ;;  %593 = vmatpush1.bf16.msra.mxu1 %v604_v12 }
  0x25   :  { %270 = vmatmul.mubr.bf16.vlgmr.msra.gmra.mrb[0].mxu0 %v605_v13  ;;  %302 = vmatmul.mubr.bf16.vlgmr.msra.gmra.mrb[0].mxu1 %v608_v14  ;;  %v41_v14 = vld [vmem:[#allocation2 + $0x28] sm:$0xff] }
  0x26   :  { %536 = vmatprep.mubr.msk.bf16.mxu0 %vm212_vm1, %v611_v15  ;;  %540 = vmatprep.mubr.msk.bf16.mxu1 %vm212_vm1, %v613_v16  ;;  %v49_v15 = vld [vmem:[#allocation2 + $0x68] sm:$0xff] }
  0x2d   :  { %278 = vmatmul.mubr.bf16.gmra.mrb[4].mxu0 %v615_v17  ;;  %310 = vmatmul.mubr.bf16.gmra.mrb[4].mxu1 %v616_v18 }
  0x2e   :  { %537 = vmatprep.mubr.msk.bf16.mxu0 %vm212_vm1, %v617_v19  ;;  %541 = vmatprep.mubr.msk.bf16.mxu1 %vm212_vm1, %v619_v20 }
  0x35   :  { %286 = vmatmul.mubr.bf16.gmra.mrb[8].mxu0 %v621_v21  ;;  %318 = vmatmul.mubr.bf16.gmra.mrb[8].mxu1 %v622_v22 }
  0x36   :  { %538 = vmatprep.mubr.msk.bf16.mxu0 %vm212_vm1, %v623_v23  ;;  %542 = vmatprep.mubr.msk.bf16.mxu1 %vm212_vm1, %v625_v24 }
  0x3d   :  { %294 = vmatmul.mubr.bf16.gmra.mrb[12].mxu0 %v627_v25  ;;  %326 = vmatmul.mubr.bf16.gmra.mrb[12].mxu1 %v628_v26 }
  0xf8   :  { %v271_v29 = vpop.f32.mrb[0].mxu0  ;;  %v303_v30 = vpop.f32.mrb[0].mxu1 }
  0xf9   :  { %v334_v33 = vadd.f32 %v271_v29, %v36_v27  ;;  %v342_v34 = vadd.f32 %v303_v30, %v44_v28  ;;  %v273_v35 = vpop.f32.mrb[1].mxu0  ;;  %v305_v36 = vpop.f32.mrb[1].mxu1 }
  0xfa   :  { %v274_v37 = vpop.f32.mrb[2].mxu0  ;;  %v306_v38 = vpop.f32.mrb[2].mxu1 }
  0xfb   :  { %351 = vst.msk [vmem:[#allocation2] sm:$0xff] %vm19_vm0, %v334_v33  ;;  %359 = vst.msk [vmem:[#allocation2 + $0x40] sm:$0xff] %vm19_vm0, %v342_v34  ;;  %v335_v39 = vadd.f32 %v274_v37, %v37_v31  ;;  %v343_v40 = vadd.f32 %v306_v38, %v45_v32  ;;  %v276_v41 = vpop.f32.mrb[3].mxu0  ;;  %v308_v42 = vpop.f32.mrb[3].mxu1  ;;  %v42_v38 = vld [vmem:[#allocation2 + $0x30] sm:$0xff] }
  0xfd   :  { %352 = vst.msk [vmem:[#allocation2 + $0x8] sm:$0xff] %vm19_vm0, %v335_v39  ;;  %360 = vst.msk [vmem:[#allocation2 + $0x48] sm:$0xff] %vm19_vm0, %v343_v40  ;;  %v50_v39 = vld [vmem:[#allocation2 + $0x70] sm:$0xff] }
 0x100   :  { %v279_v46 = vpop.f32.mrb[4].mxu0  ;;  %v311_v47 = vpop.f32.mrb[4].mxu1 }
 0x101   :  { %v336_v50 = vadd.f32 %v279_v46, %v38_v43  ;;  %v344_v51 = vadd.f32 %v311_v47, %v46_v44  ;;  %v281_v52 = vpop.f32.mrb[5].mxu0  ;;  %v313_v53 = vpop.f32.mrb[5].mxu1  ;;  %v43_v47 = vld [vmem:[#allocation2 + $0x38] sm:$0xff] }
 0x102   :  { %v370_v54 = vld [vmem:[#allocation2] sm:$0xff]  ;;  %v282_v56 = vpop.f32.mrb[6].mxu0  ;;  %v314_v57 = vpop.f32.mrb[6].mxu1 }
 0x103   :  { %v378_v55 = vld [vmem:[#allocation2 + $0x40] sm:$0xff]  ;;  %v393_v58 = vadd.f32 %v775_v45, %v370_v54  ;;  %353 = vst.msk [vmem:[#allocation2 + $0x10] sm:$0xff] %vm19_vm0, %v336_v50  ;;  %361 = vst.msk [vmem:[#allocation2 + $0x50] sm:$0xff] %vm19_vm0, %v344_v51  ;;  %v337_v60 = vadd.f32 %v282_v56, %v39_v48  ;;  %v345_v61 = vadd.f32 %v314_v57, %v47_v49  ;;  %v284_v62 = vpop.f32.mrb[7].mxu0  ;;  %v316_v63 = vpop.f32.mrb[7].mxu1  ;;  %v51_v48 = vld [vmem:[#allocation2 + $0x78] sm:$0xff] }
 0x104   :  { %v401_v59 = vadd.f32 %v775_v45, %v378_v55  ;;  %v371_v0 = vld [vmem:[#allocation2 + $0x8] sm:$0xff] }
 0x105   :  { %v379_v1 = vld [vmem:[#allocation2 + $0x48] sm:$0xff]  ;;  %v409_v2 = vmax.f32 %v393_v58, 0.0  ;;  %v394_v4 = vadd.f32 %v775_v45, %v371_v0  ;;  %354 = vst.msk [vmem:[#allocation2 + $0x18] sm:$0xff] %vm19_vm0, %v337_v60  ;;  %362 = vst.msk [vmem:[#allocation2 + $0x58] sm:$0xff] %vm19_vm0, %v345_v61 }
 0x106   :  { %v417_v3 = vmax.f32 %v401_v59, 0.0  ;;  %v402_v5 = vadd.f32 %v775_v45, %v379_v1 }
 0x107   :  { %v560_v8 = vpack.c.bf16 %v409_v2, %v409_v2  ;;  %v410_v10 = vmax.f32 %v394_v4, 0.0 }
 0x108   :  { %v568_v9 = vpack.c.bf16 %v417_v3, %v417_v3  ;;  %v418_v11 = vmax.f32 %v402_v5, 0.0  ;;  %v287_v12 = vpop.f32.mrb[8].mxu0  ;;  %v319_v13 = vpop.f32.mrb[8].mxu1 }
 0x109   :  { %490 = vst.msk [vmem:[%s872_s3] sm:$0xf] %vm489_vm2, %v560_v8  ;;  %v561_v16 = vpack.c.bf16 %v410_v10, %v410_v10  ;;  %v338_v18 = vadd.f32 %v287_v12, %v40_v6  ;;  %v346_v19 = vadd.f32 %v319_v13, %v48_v7  ;;  %v289_v20 = vpop.f32.mrb[9].mxu0  ;;  %v321_v21 = vpop.f32.mrb[9].mxu1 }
 0x10a   :  { %498 = vst.msk [vmem:[%s872_s3 + $0x20] sm:$0xf] %vm489_vm2, %v568_v9  ;;  %v569_v17 = vpack.c.bf16 %v418_v11, %v418_v11  ;;  %v372_v22 = vld [vmem:[#allocation2 + $0x10] sm:$0xff]  ;;  %v290_v24 = vpop.f32.mrb[10].mxu0  ;;  %v322_v25 = vpop.f32.mrb[10].mxu1 }
 0x10b   :  { %v380_v23 = vld [vmem:[#allocation2 + $0x50] sm:$0xff]  ;;  %491 = vst.msk [vmem:[%s872_s3 + $0x4] sm:$0xf] %vm489_vm2, %v561_v16  ;;  %v395_v26 = vadd.f32 %v775_v45, %v372_v22  ;;  %v339_v28 = vadd.f32 %v290_v24, %v41_v14  ;;  %v347_v29 = vadd.f32 %v322_v25, %v49_v15  ;;  %v292_v30 = vpop.f32.mrb[11].mxu0  ;;  %v324_v31 = vpop.f32.mrb[11].mxu1 }
 0x10c   :  { %499 = vst.msk [vmem:[%s872_s3 + $0x24] sm:$0xf] %vm489_vm2, %v569_v17  ;;  %v403_v27 = vadd.f32 %v775_v45, %v380_v23  ;;  %v373_v32 = vld [vmem:[#allocation2 + $0x18] sm:$0xff] }
 0x10d   :  { %355 = vst.msk [vmem:[#allocation2 + $0x20] sm:$0xff] %vm19_vm0, %v338_v18  ;;  %363 = vst.msk [vmem:[#allocation2 + $0x60] sm:$0xff] %vm19_vm0, %v346_v19  ;;  %v381_v33 = vld [vmem:[#allocation2 + $0x58] sm:$0xff]  ;;  %v411_v34 = vmax.f32 %v395_v26, 0.0  ;;  %v396_v36 = vadd.f32 %v775_v45, %v373_v32 }
 0x10e   :  { %v419_v35 = vmax.f32 %v403_v27, 0.0  ;;  %v404_v37 = vadd.f32 %v775_v45, %v381_v33  ;;  %356 = vst.msk [vmem:[#allocation2 + $0x28] sm:$0xff] %vm19_vm0, %v339_v28  ;;  %364 = vst.msk [vmem:[#allocation2 + $0x68] sm:$0xff] %vm19_vm0, %v347_v29 }
 0x10f   :  { %v562_v40 = vpack.c.bf16 %v411_v34, %v411_v34  ;;  %v412_v42 = vmax.f32 %v396_v36, 0.0 }
 0x110   :  { %v570_v41 = vpack.c.bf16 %v419_v35, %v419_v35  ;;  %v420_v43 = vmax.f32 %v404_v37, 0.0  ;;  %v295_v44 = vpop.f32.mrb[12].mxu0  ;;  %v327_v46 = vpop.f32.mrb[12].mxu1 }
 0x111   :  { %492 = vst.msk [vmem:[%s872_s3 + $0x8] sm:$0xf] %vm489_vm2, %v562_v40  ;;  %v563_v49 = vpack.c.bf16 %v412_v42, %v412_v42  ;;  %v340_v51 = vadd.f32 %v295_v44, %v42_v38  ;;  %v348_v52 = vadd.f32 %v327_v46, %v50_v39  ;;  %v297_v53 = vpop.f32.mrb[13].mxu0  ;;  %v329_v54 = vpop.f32.mrb[13].mxu1 }
 0x112   :  { %500 = vst.msk [vmem:[%s872_s3 + $0x28] sm:$0xf] %vm489_vm2, %v570_v41  ;;  %v571_v50 = vpack.c.bf16 %v420_v43, %v420_v43  ;;  %v298_v57 = vpop.f32.mrb[14].mxu0  ;;  %v330_v58 = vpop.f32.mrb[14].mxu1 }
 0x113   :  { %493 = vst.msk [vmem:[%s872_s3 + $0xc] sm:$0xf] %vm489_vm2, %v563_v49  ;;  %v341_v61 = vadd.f32 %v298_v57, %v43_v47  ;;  %v349_v62 = vadd.f32 %v330_v58, %v51_v48  ;;  %v300_v63 = vpop.f32.mrb[15].mxu0  ;;  %v332_v0 = vpop.f32.mrb[15].mxu1 }
 0x114   :  { %v374_v55 = vld [vmem:[#allocation2 + $0x20] sm:$0xff]  ;;  %501 = vst.msk [vmem:[%s872_s3 + $0x2c] sm:$0xf] %vm489_vm2, %v571_v50 }
 0x115   :  { %v382_v56 = vld [vmem:[#allocation2 + $0x60] sm:$0xff]  ;;  %v397_v59 = vadd.f32 %v775_v45, %v374_v55  ;;  %357 = vst.msk [vmem:[#allocation2 + $0x30] sm:$0xff] %vm19_vm0, %v340_v51  ;;  %365 = vst.msk [vmem:[#allocation2 + $0x70] sm:$0xff] %vm19_vm0, %v348_v52  ;;  %v375_v1 = vld [vmem:[#allocation2 + $0x28] sm:$0xff] }
 0x116   :  { %v405_v60 = vadd.f32 %v775_v45, %v382_v56  ;;  %v383_v2 = vld [vmem:[#allocation2 + $0x68] sm:$0xff]  ;;  %v398_v5 = vadd.f32 %v775_v45, %v375_v1  ;;  %358 = vst.msk [vmem:[#allocation2 + $0x38] sm:$0xff] %vm19_vm0, %v341_v61  ;;  %366 = vst.msk [vmem:[#allocation2 + $0x78] sm:$0xff] %vm19_vm0, %v349_v62 }
 0x117   :  { %v413_v3 = vmax.f32 %v397_v59, 0.0  ;;  %v406_v6 = vadd.f32 %v775_v45, %v383_v2 }
 0x118   :  { %v421_v4 = vmax.f32 %v405_v60, 0.0  ;;  %v414_v9 = vmax.f32 %v398_v5, 0.0 }
 0x119   :  { %v564_v7 = vpack.c.bf16 %v413_v3, %v413_v3  ;;  %v422_v10 = vmax.f32 %v406_v6, 0.0 }
 0x11a   :  { %v572_v8 = vpack.c.bf16 %v421_v4, %v421_v4  ;;  %v565_v11 = vpack.c.bf16 %v414_v9, %v414_v9 }
 0x11b   :  { %494 = vst.msk [vmem:[%s872_s3 + $0x10] sm:$0xf] %vm489_vm2, %v564_v7  ;;  %v573_v12 = vpack.c.bf16 %v422_v10, %v422_v10 }
 0x11c   :  { %502 = vst.msk [vmem:[%s872_s3 + $0x30] sm:$0xf] %vm489_vm2, %v572_v8  ;;  %v376_v13 = vld [vmem:[#allocation2 + $0x30] sm:$0xff]  ;;  %495 = vst.msk [vmem:[%s872_s3 + $0x14] sm:$0xf] %vm489_vm2, %v565_v11 }
 0x11d   :  { %v384_v14 = vld [vmem:[#allocation2 + $0x70] sm:$0xff]  ;;  %503 = vst.msk [vmem:[%s872_s3 + $0x34] sm:$0xf] %vm489_vm2, %v573_v12  ;;  %v399_v15 = vadd.f32 %v775_v45, %v376_v13  ;;  %v377_v17 = vld [vmem:[#allocation2 + $0x38] sm:$0xff] }
 0x11e   :  { %v407_v16 = vadd.f32 %v775_v45, %v384_v14  ;;  %v385_v18 = vld [vmem:[#allocation2 + $0x78] sm:$0xff]  ;;  %v400_v21 = vadd.f32 %v775_v45, %v377_v17 }
 0x11f   :  { %v415_v19 = vmax.f32 %v399_v15, 0.0  ;;  %v408_v22 = vadd.f32 %v775_v45, %v385_v18 }
 0x120   :  { %v423_v20 = vmax.f32 %v407_v16, 0.0  ;;  %v416_v25 = vmax.f32 %v400_v21, 0.0 }
 0x121   :  { %v566_v23 = vpack.c.bf16 %v415_v19, %v415_v19  ;;  %v424_v26 = vmax.f32 %v408_v22, 0.0 }
 0x122   :  { %v574_v24 = vpack.c.bf16 %v423_v20, %v423_v20  ;;  %v567_v27 = vpack.c.bf16 %v416_v25, %v416_v25 }
 0x123   :  { %496 = vst.msk [vmem:[%s872_s3 + $0x18] sm:$0xf] %vm489_vm2, %v566_v23  ;;  %v575_v28 = vpack.c.bf16 %v424_v26, %v424_v26 }
 0x124   :  { %504 = vst.msk [vmem:[%s872_s3 + $0x38] sm:$0xf] %vm489_vm2, %v574_v24  ;;  %497 = vst.msk [vmem:[%s872_s3 + $0x1c] sm:$0xf] %vm489_vm2, %v567_v27 }
 0x125   :  { %505 = vst.msk [vmem:[%s872_s3 + $0x3c] sm:$0xf] %vm489_vm2, %v575_v28 }

// kernel: forward.24
= control target key start
LH: loop header
LB: loop body
LE: loop exit
PB: predicated region body
PF: predicated region fallthrough
CT: control target
= control target key end

     0   :  { %vm210_vm0 = vcmask 261120   ;;  %vm19_vm1 = vcmask 523264   ;;  %v473_v24 = vmov 0.0   ;;  %vm362_vm2 = vcmask 519168   ;;  %s589_s1 = inlined_call_operand.vmem [shape: bf16[288,64], index: 1, kind: input, shape index: {}]   ;;  %s590_s0 = inlined_call_operand.vmem [shape: bf16[32,288], index: 0, kind: input, shape index: {}]   ;;  %s591_s2 = inlined_call_operand.vmem [shape: f32[1,64], index: 2, kind: input, shape index: {}]   ;;  %s592_s3 = inlined_call_operand.vmem [shape: bf16[32,64], index: 3, kind: output, shape index: {}]  }
   0x1   :  { %v447_v0 = vld [vmem:[%s589_s1 + $0x40] sm:$0xff]   ;;  %v449_v2 = vld [vmem:[%s589_s1 + $0x48] sm:$0xff]   ;;  %v451_v4 = vld [vmem:[%s589_s1 + $0x50] sm:$0xff]   ;;  %20 = vst.msk [vmem:[#allocation2] sm:$0xff] %vm19_vm1, %v473_v24 }
   0x2   :  { %v448_v1 = vld [vmem:[%s589_s1] sm:$0xff]   ;;  %406 = vmatprep.subr.bf16.mxu0 %v447_v0  ;;  %v450_v3 = vld [vmem:[%s589_s1 + $0x8] sm:$0xff]   ;;  %v452_v5 = vld [vmem:[%s589_s1 + $0x10] sm:$0xff]   ;;  %21 = vst.msk [vmem:[#allocation2 + $0x8] sm:$0xff] %vm19_vm1, %v473_v24 }
   0x3   :  { %407 = vmatpush3.bf16.msra.mxu0 %v448_v1  ;;  %v453_v6 = vld [vmem:[%s589_s1 + $0x58] sm:$0xff]   ;;  %v455_v8 = vld [vmem:[%s589_s1 + $0x60] sm:$0xff]   ;;  %v457_v11 = vld [vmem:[%s589_s1 + $0x68] sm:$0xff]   ;;  %22 = vst.msk [vmem:[#allocation2 + $0x10] sm:$0xff] %vm19_vm1, %v473_v24 }
   0x4   :  { %408 = vmatprep.subr.bf16.mxu0 %v449_v2  ;;  %v454_v7 = vld [vmem:[%s589_s1 + $0x18] sm:$0xff]   ;;  %v461_v9 = vld [vmem:[%s589_s1 + $0x80] sm:$0xff]   ;;  %v458_v12 = vld [vmem:[%s589_s1 + $0x28] sm:$0xff]   ;;  %23 = vst.msk [vmem:[#allocation2 + $0x18] sm:$0xff] %vm19_vm1, %v473_v24 }
   0x5   :  { %v456_v10 = vld [vmem:[%s589_s1 + $0x20] sm:$0xff]   ;;  %438 = vmatprep.subr.bf16.mxu1 %v461_v9  ;;  %v464_v13 = vld [vmem:[%s589_s1 + $0x88] sm:$0xff]   ;;  %v459_v14 = vld [vmem:[%s589_s1 + $0x70] sm:$0xff]  }
   0x6   :  { %439 = vmatpush3.bf16.msra.mxu1 %v461_v9  ;;  %v467_v15 = vld [vmem:[%s590_s0 + $0x4] ss:$12 sps:$4 sm:$0xff]   ;;  %v468_v16 = vld [vmem:[%s590_s0 + $0x8] ss:$12 sps:$4 sm:$0xff]   ;;  %v469_v17 = vld [vmem:[%s590_s0 + $0x20] ss:$12 sps:$4 sm:$0xff]  }
   0x7   :  { %409 = vmatpush3.bf16.msra.mxu0 %v450_v3  ;;  %440 = vmatprep.subr.bf16.mxu1 %v464_v13  ;;  %v460_v18 = vld [vmem:[%s589_s1 + $0x30] sm:$0xff]   ;;  %v462_v19 = vld [vmem:[%s589_s1 + $0x78] sm:$0xff]   ;;  %v465_v21 = vld [vmem:[%s590_s0] ss:$12 sps:$4 sm:$0xff]  }
   0x8   :  { %410 = vmatprep.subr.bf16.mxu0 %v451_v4  ;;  %249 = vmatprep.mubr.bf16.mxu0 %v467_v15  ;;  %v463_v20 = vld [vmem:[%s589_s1 + $0x38] sm:$0xff]   ;;  %v24_v34 = vld [vmem:[#allocation2] sm:$0xff] }
   0x9   :  { %442 = vmatprep.mubr.msk.bf16.mxu1 %vm210_vm0, %v468_v16  ;;  %v470_v22 = vld [vmem:[%s590_s0 + $0x1c] ss:$12 sps:$4 sm:$0xff]   ;;  %v472_v23 = vld [vmem:[%s590_s0 + $0x18] ss:$12 sps:$4 sm:$0xff]   ;;  %v397_v49 = vld [vmem:[%s591_s2] ss:$0 sm:$0xff] }
   0xa   :  { %441 = vmatpush3.bf16.msra.mxu1 %v464_v13  ;;  %v25_v37 = vld [vmem:[#allocation2 + $0x8] sm:$0xff]  ;;  %v26_v45 = vld [vmem:[#allocation2 + $0x10] sm:$0xff] }
   0xb   :  { %411 = vmatpush3.bf16.msra.mxu0 %v452_v5  ;;  %v27_v50 = vld [vmem:[#allocation2 + $0x18] sm:$0xff] }
   0xc   :  { %412 = vmatprep.subr.bf16.mxu0 %v453_v6 }
   0xd   :  { %443 = vmatmul.mubr.msk.bf16.vlgmr.msra.gmra.mrb[0].mxu1 %vm210_vm0, %v469_v17 }
   0xf   :  { %413 = vmatpush3.bf16.msra.mxu0 %v454_v7 }
  0x10   :  { %414 = vmatprep.subr.bf16.mxu0 %v455_v8 }
  0x13   :  { %415 = vmatpush3.bf16.msra.mxu0 %v456_v10 }
  0x14   :  { %416 = vmatprep.subr.bf16.mxu0 %v457_v11 }
  0x17   :  { %417 = vmatpush3.bf16.msra.mxu0 %v458_v12 }
  0x18   :  { %418 = vmatprep.subr.bf16.mxu0 %v459_v14 }
  0x1b   :  { %419 = vmatpush3.bf16.msra.mxu0 %v460_v18 }
  0x1c   :  { %420 = vmatprep.subr.bf16.mxu0 %v462_v19 }
  0x1f   :  { %421 = vmatpush3.bf16.msra.mxu0 %v463_v20 }
  0x22   :  { %250 = vmatmul.mubr.bf16.vlgmr.msra.gmra.mrb[0].mxu0 %v465_v21 }
  0x23   :  { %257 = vmatprep.mubr.bf16.mxu0 %v470_v22 }
  0x2a   :  { %258 = vmatmul.mubr.bf16.gmra.mrb[4].mxu0 %v472_v23 }
  0xe0   :  { %v444_v25 = vpop.f32.mrb[0].mxu1 }
  0xe1   :  { %v300_v26 = vpop.f32.mrb[1].mxu1 }
  0xe2   :  { %v445_v27 = vpop.f32.mrb[2].mxu1 }
  0xe3   :  { %v303_v28 = vpop.f32.mrb[3].mxu1 }
  0xf5   :  { %v422_v29 = vpop.f32.mrb[0].mxu0 }
  0xf6   :  { %v423_v30 = vpop.f32.mrb[1].mxu0 }
  0xf7   :  { %v424_v31 = vadd.f32 %v423_v30, %v422_v29  ;;  %v425_v32 = vpop.f32.mrb[2].mxu0 }
  0xf8   :  { %v426_v33 = vpop.f32.mrb[3].mxu0 }
  0xf9   :  { %v427_v35 = vadd.f32 %v426_v33, %v425_v32  ;;  %v301_v36 = vadd.f32 %v424_v31, %v300_v26 }
  0xfb   :  { %v315_v38 = vadd.f32 %v301_v36, %v24_v34  ;;  %v304_v39 = vadd.f32 %v427_v35, %v303_v28 }
  0xfd   :  { %320 = vst.msk [vmem:[#allocation2] sm:$0xff] %vm19_vm1, %v315_v38  ;;  %v316_v40 = vadd.f32 %v304_v39, %v25_v37  ;;  %v428_v41 = vpop.f32.mrb[4].mxu0 }
  0xfe   :  { %v429_v42 = vpop.f32.mrb[5].mxu0 }
  0xff   :  { %321 = vst.msk [vmem:[#allocation2 + $0x8] sm:$0xff] %vm19_vm1, %v316_v40  ;;  %v430_v43 = vadd.f32 %v429_v42, %v428_v41  ;;  %v431_v44 = vpop.f32.mrb[6].mxu0 }
 0x100   :  { %v432_v46 = vpop.f32.mrb[7].mxu0 }
 0x101   :  { %v309_v47 = vadd.f32 %v444_v25, %v430_v43  ;;  %v433_v48 = vadd.f32 %v432_v46, %v431_v44 }
 0x103   :  { %v317_v51 = vadd.f32 %v309_v47, %v26_v45  ;;  %v312_v52 = vadd.f32 %v445_v27, %v433_v48 }
 0x104   :  { %v327_v53 = vld [vmem:[#allocation2] sm:$0xff] }
 0x105   :  { %v338_v54 = vadd.f32 %v397_v49, %v327_v53  ;;  %322 = vst.msk [vmem:[#allocation2 + $0x10] sm:$0xff] %vm19_vm1, %v317_v51  ;;  %v318_v55 = vadd.f32 %v312_v52, %v27_v50 }
 0x106   :  { %v328_v56 = vld [vmem:[#allocation2 + $0x8] sm:$0xff] }
 0x107   :  { %v342_v57 = vmax.f32 %v338_v54, 0.0  ;;  %v339_v58 = vadd.f32 %v397_v49, %v328_v56  ;;  %323 = vst.msk [vmem:[#allocation2 + $0x18] sm:$0xff] %vm19_vm1, %v318_v55 }
 0x109   :  { %v402_v59 = vpack.c.bf16 %v342_v57, %v342_v57  ;;  %v343_v60 = vmax.f32 %v339_v58, 0.0 }
 0x10b   :  { %363 = vst.msk [vmem:[%s592_s3] sm:$0xf] %vm362_vm2, %v402_v59  ;;  %v403_v61 = vpack.c.bf16 %v343_v60, %v343_v60 }
 0x10c   :  { %v329_v62 = vld [vmem:[#allocation2 + $0x10] sm:$0xff] }
 0x10d   :  { %364 = vst.msk [vmem:[%s592_s3 + $0x4] sm:$0xf] %vm362_vm2, %v403_v61  ;;  %v340_v63 = vadd.f32 %v397_v49, %v329_v62 }
 0x10e   :  { %v330_v0 = vld [vmem:[#allocation2 + $0x18] sm:$0xff] }
 0x10f   :  { %v344_v1 = vmax.f32 %v340_v63, 0.0  ;;  %v341_v2 = vadd.f32 %v397_v49, %v330_v0 }
 0x111   :  { %v404_v3 = vpack.c.bf16 %v344_v1, %v344_v1  ;;  %v345_v4 = vmax.f32 %v341_v2, 0.0 }
 0x113   :  { %365 = vst.msk [vmem:[%s592_s3 + $0x8] sm:$0xf] %vm362_vm2, %v404_v3  ;;  %v405_v5 = vpack.c.bf16 %v345_v4, %v345_v4 }
 0x115   :  { %366 = vst.msk [vmem:[%s592_s3 + $0xc] sm:$0xf] %vm362_vm2, %v405_v5 }

// kernel: forward.28
= control target key start
LH: loop header
LB: loop body
LE: loop exit
PB: predicated region body
PF: predicated region fallthrough
CT: control target
= control target key end

     0   :  { %vm19_vm0 = vcmask 123904   ;;  %v151_v0 = vmov 0.0   ;;  %vm152_vm1 = vmmov 0   ;;  %vm55_vm2 = vcmask 523264   ;;  %s196_s1 = inlined_call_operand.vmem [shape: bf16[64,16], index: 1, kind: input, shape index: {}]   ;;  %s197_s0 = inlined_call_operand.vmem [shape: bf16[2,64], index: 0, kind: input, shape index: {}]   ;;  %s198_s2 = inlined_call_operand.vmem [shape: f32[1,16], index: 2, kind: input, shape index: {}]   ;;  %s199_s3 = inlined_call_operand.vmem [shape: bf16[2,16], index: 3, kind: output, shape index: {}]  }
   0x1   :  { %133 = vmatprep.subr.bf16.mxu0 %v151_v0  ;;  %v147_v1 = vld [vmem:[%s196_s1] sm:$0xff]   ;;  %141 = vmatprep.mubr.msk.bf16.mxu0 %vm152_vm1, %v151_v0  ;;  %20 = vst.msk [vmem:[#allocation2] sm:$0x3] %vm19_vm0, %v151_v0  ;;  %v148_v2 = vld [vmem:[%s196_s1 + $0x8] sm:$0xff]   ;;  %v149_v3 = vld [vmem:[%s196_s1 + $0x10] sm:$0xff]   ;;  %vm116_vm3 = vcmask 122880  }
   0x2   :  { %134 = vmatpush3.bf16.msra.mxu0 %v147_v1  ;;  %v150_v4 = vld [vmem:[%s196_s1 + $0x18] sm:$0xff]   ;;  %v22_v5 = vld [vmem:[%s197_s0] sm:$0x1] }
   0x3   :  { %135 = vmatprep.subr.bf16.mxu0 %v151_v0  ;;  %v127_v12 = vld [vmem:[%s198_s2] ss:$0 sm:$0xff] }
   0x6   :  { %136 = vmatpush3.bf16.msra.mxu0 %v148_v2 }
   0x7   :  { %137 = vmatprep.subr.bf16.mxu0 %v151_v0 }
   0x8   :  { %v21_v6 = vld [vmem:[#allocation2] sm:$0x3] }
   0xa   :  { %138 = vmatpush3.bf16.msra.mxu0 %v149_v3 }
   0xb   :  { %139 = vmatprep.subr.bf16.mxu0 %v151_v0 }
   0xe   :  { %140 = vmatpush3.bf16.msra.mxu0 %v150_v4 }
  0x11   :  { %142 = vmatmul.mubr.msk.bf16.vlgmr.msra.gmra.mrb[0].mxu0 %vm55_vm2, %v22_v5 }
  0xe4   :  { %v93_v7 = vpop.f32.mrb[0].mxu0 }
  0xe5   :  { %v99_v8 = vadd.f32 %v93_v7, %v21_v6  ;;  %v143_v9 = vpop.f32.mrb[1].mxu0 }
  0xe6   :  { %v96_v10 = vpop.f32.mrb[2].mxu0 }
  0xe7   :  { %101 = vst.msk [vmem:[#allocation2] sm:$0x3] %vm19_vm0, %v99_v8  ;;  %v144_v11 = vpop.f32.mrb[3].mxu0 }
  0xee   :  { %v105_v13 = vld [vmem:[#allocation2] sm:$0x3] }
  0xef   :  { %v113_v14 = vadd.f32 %v127_v12, %v105_v13 }
  0xf1   :  { %v114_v15 = vmax.f32 %v113_v14, 0.0 }
  0xf3   :  { %v115_v16 = vpack.c.bf16 %v114_v15, %v114_v15 }
  0xf5   :  { %117 = vst.msk [vmem:[%s199_s3] sm:$0x1] %vm116_vm3, %v115_v16 }

// kernel: forward.25
= control target key start
LH: loop header
LB: loop body
LE: loop exit
PB: predicated region body
PF: predicated region fallthrough
CT: control target
= control target key end

     0   :  { %vm19_vm0 = vcmask 130048   ;;  %v228_v1 = vmov 0.0   ;;  %vm74_vm1 = vcmask 523264   ;;  %vm177_vm2 = vcmask 125952   ;;  %s290_s1 = inlined_call_operand.vmem [shape: bf16[64,16], index: 1, kind: input, shape index: {}]   ;;  %s291_s0 = inlined_call_operand.vmem [shape: bf16[32,64], index: 0, kind: input, shape index: {}]   ;;  %s292_s2 = inlined_call_operand.vmem [shape: f32[1,16], index: 2, kind: input, shape index: {}]   ;;  %s293_s3 = inlined_call_operand.vmem [shape: bf16[32,16], index: 3, kind: output, shape index: {}]  }
   0x1   :  { %v222_v0 = vld [vmem:[%s290_s1] sm:$0xff]   ;;  %22 = vst.msk [vmem:[#allocation2 + $0x10] sm:$0xff] %vm19_vm0, %v228_v1  ;;  %20 = vst.msk [vmem:[#allocation2] sm:$0xff] %vm19_vm0, %v228_v1  ;;  %v223_v2 = vld [vmem:[%s290_s1 + $0x8] sm:$0xff]  }
   0x2   :  { %21 = vst.msk [vmem:[#allocation2 + $0x8] sm:$0xff] %vm19_vm0, %v228_v1  ;;  %23 = vst.msk [vmem:[#allocation2 + $0x18] sm:$0xff] %vm19_vm0, %v228_v1  ;;  %209 = vmatprep.subr.bf16.mxu0 %v222_v0  ;;  %v224_v3 = vld [vmem:[%s290_s1 + $0x10] sm:$0xff]   ;;  %v226_v4 = vld [vmem:[%s291_s0] sm:$0xff]  }
   0x3   :  { %210 = vmatpush3.bf16.msra.mxu0 %v222_v0  ;;  %217 = vmatprep.mubr.msk.bf16.mxu0 %vm74_vm1, %v226_v4  ;;  %v225_v5 = vld [vmem:[%s290_s1 + $0x18] sm:$0xff]   ;;  %v227_v6 = vld [vmem:[%s291_s0 + $0x8] sm:$0xff]   ;;  %v194_v19 = vld [vmem:[%s292_s2] ss:$0 sm:$0xff] }
   0x4   :  { %211 = vmatprep.subr.bf16.mxu0 %v223_v2 }
   0x7   :  { %212 = vmatpush3.bf16.msra.mxu0 %v223_v2 }
   0x8   :  { %213 = vmatprep.subr.bf16.mxu0 %v224_v3  ;;  %v26_v7 = vld [vmem:[#allocation2 + $0x10] sm:$0xff]  ;;  %v24_v8 = vld [vmem:[#allocation2] sm:$0xff] }
   0x9   :  { %v27_v10 = vld [vmem:[#allocation2 + $0x18] sm:$0xff]  ;;  %v25_v13 = vld [vmem:[#allocation2 + $0x8] sm:$0xff] }
   0xb   :  { %214 = vmatpush3.bf16.msra.mxu0 %v224_v3 }
   0xc   :  { %215 = vmatprep.subr.bf16.mxu0 %v225_v5 }
   0xf   :  { %216 = vmatpush3.bf16.msra.mxu0 %v225_v5 }
  0x12   :  { %218 = vmatmul.mubr.msk.bf16.vlgmr.msra.gmra.mrb[0].mxu0 %vm74_vm1, %v227_v6 }
  0xe5   :  { %v219_v9 = vpop.f32.mrb[0].mxu0 }
  0xe6   :  { %v132_v11 = vadd.f32 %v219_v9, %v26_v7  ;;  %v115_v12 = vpop.f32.mrb[1].mxu0 }
  0xe7   :  { %v130_v14 = vadd.f32 %v115_v12, %v24_v8  ;;  %v220_v15 = vpop.f32.mrb[2].mxu0 }
  0xe8   :  { %137 = vst.msk [vmem:[#allocation2 + $0x10] sm:$0xff] %vm19_vm0, %v132_v11  ;;  %v133_v16 = vadd.f32 %v220_v15, %v27_v10  ;;  %v118_v17 = vpop.f32.mrb[3].mxu0 }
  0xe9   :  { %135 = vst.msk [vmem:[#allocation2] sm:$0xff] %vm19_vm0, %v130_v14  ;;  %v131_v18 = vadd.f32 %v118_v17, %v25_v13 }
  0xea   :  { %138 = vst.msk [vmem:[#allocation2 + $0x18] sm:$0xff] %vm19_vm0, %v133_v16 }
  0xeb   :  { %136 = vst.msk [vmem:[#allocation2 + $0x8] sm:$0xff] %vm19_vm0, %v131_v18 }
  0xef   :  { %v144_v20 = vld [vmem:[#allocation2 + $0x10] sm:$0xff] }
  0xf0   :  { %v155_v21 = vadd.f32 %v194_v19, %v144_v20  ;;  %v142_v22 = vld [vmem:[#allocation2] sm:$0xff] }
  0xf1   :  { %v153_v23 = vadd.f32 %v194_v19, %v142_v22  ;;  %v145_v24 = vld [vmem:[#allocation2 + $0x18] sm:$0xff] }
  0xf2   :  { %v159_v25 = vmax.f32 %v155_v21, 0.0  ;;  %v156_v26 = vadd.f32 %v194_v19, %v145_v24  ;;  %v143_v27 = vld [vmem:[#allocation2 + $0x8] sm:$0xff] }
  0xf3   :  { %v157_v28 = vmax.f32 %v153_v23, 0.0  ;;  %v154_v29 = vadd.f32 %v194_v19, %v143_v27 }
  0xf4   :  { %v201_v30 = vpack.c.bf16 %v159_v25, %v159_v25  ;;  %v160_v31 = vmax.f32 %v156_v26, 0.0 }
  0xf5   :  { %v199_v32 = vpack.c.bf16 %v157_v28, %v157_v28  ;;  %v158_v33 = vmax.f32 %v154_v29, 0.0 }
  0xf6   :  { %180 = vst.msk [vmem:[%s293_s3 + $0x8] sm:$0xf] %vm177_vm2, %v201_v30  ;;  %v202_v34 = vpack.c.bf16 %v160_v31, %v160_v31 }
  0xf7   :  { %178 = vst.msk [vmem:[%s293_s3] sm:$0xf] %vm177_vm2, %v199_v32  ;;  %v200_v35 = vpack.c.bf16 %v158_v33, %v158_v33 }
  0xf8   :  { %181 = vst.msk [vmem:[%s293_s3 + $0xc] sm:$0xf] %vm177_vm2, %v202_v34 }
  0xf9   :  { %179 = vst.msk [vmem:[%s293_s3 + $0x4] sm:$0xf] %vm177_vm2, %v200_v35 }

// kernel: forward.26
= control target key start
LH: loop header
LB: loop body
LE: loop exit
PB: predicated region body
PF: predicated region fallthrough
CT: control target
= control target key end

     0   :  { %vm378_vm0 = vcmask 523264   ;;  %vm19_vm1 = vcmask 130048   ;;  %v770_v46 = vmov 0.0   ;;  %vm579_vm2 = vcmask 125952   ;;  %s952_s1 = inlined_call_operand.vmem [shape: bf16[576,16], index: 1, kind: input, shape index: {}]   ;;  %s953_s0 = inlined_call_operand.vmem [shape: bf16[32,576], index: 0, kind: input, shape index: {}]   ;;  %s954_s2 = inlined_call_operand.vmem [shape: f32[1,16], index: 2, kind: input, shape index: {}]   ;;  %s955_s3 = inlined_call_operand.vmem [shape: bf16[32,16], index: 3, kind: output, shape index: {}]  }
   0x1   :  { %v720_v0 = vld [vmem:[%s952_s1 + $0x40] sm:$0xff]   ;;  %v724_v4 = vld [vmem:[%s952_s1 + $0x48] sm:$0xff]   ;;  %v728_v8 = vld [vmem:[%s952_s1 + $0x50] sm:$0xff]   ;;  %22 = vst.msk [vmem:[#allocation2 + $0x10] sm:$0xff] %vm19_vm1, %v770_v46 }
   0x2   :  { %v721_v1 = vld [vmem:[%s952_s1 + $0xc0] sm:$0xff]   ;;  %645 = vmatprep.subr.bf16.mxu0 %v720_v0  ;;  %v725_v5 = vld [vmem:[%s952_s1 + $0xc8] sm:$0xff]   ;;  %v729_v9 = vld [vmem:[%s952_s1 + $0xd0] sm:$0xff]   ;;  %20 = vst.msk [vmem:[#allocation2] sm:$0xff] %vm19_vm1, %v770_v46 }
   0x3   :  { %v722_v2 = vld [vmem:[%s952_s1] sm:$0xff]   ;;  %673 = vmatprep.subr.bf16.mxu1 %v721_v1  ;;  %v726_v6 = vld [vmem:[%s952_s1 + $0x8] sm:$0xff]   ;;  %v730_v10 = vld [vmem:[%s952_s1 + $0x10] sm:$0xff]   ;;  %21 = vst.msk [vmem:[#allocation2 + $0x8] sm:$0xff] %vm19_vm1, %v770_v46 }
   0x4   :  { %v723_v3 = vld [vmem:[%s952_s1 + $0x80] sm:$0xff]   ;;  %646 = vmatpush3.bf16.msra.mxu0 %v722_v2  ;;  %v727_v7 = vld [vmem:[%s952_s1 + $0x88] sm:$0xff]   ;;  %v731_v11 = vld [vmem:[%s952_s1 + $0x90] sm:$0xff]   ;;  %23 = vst.msk [vmem:[#allocation2 + $0x18] sm:$0xff] %vm19_vm1, %v770_v46 }
   0x5   :  { %674 = vmatpush3.bf16.msra.mxu1 %v723_v3  ;;  %647 = vmatprep.subr.bf16.mxu0 %v724_v4  ;;  %v732_v12 = vld [vmem:[%s952_s1 + $0x58] sm:$0xff]   ;;  %v736_v16 = vld [vmem:[%s952_s1 + $0x60] sm:$0xff]   ;;  %v740_v20 = vld [vmem:[%s952_s1 + $0x68] sm:$0xff]  }
   0x6   :  { %675 = vmatprep.subr.bf16.mxu1 %v725_v5  ;;  %v733_v13 = vld [vmem:[%s952_s1 + $0xd8] sm:$0xff]   ;;  %v737_v17 = vld [vmem:[%s952_s1 + $0xe0] sm:$0xff]   ;;  %v741_v21 = vld [vmem:[%s952_s1 + $0xe8] sm:$0xff]  }
   0x7   :  { %v734_v14 = vld [vmem:[%s952_s1 + $0x18] sm:$0xff]   ;;  %v738_v18 = vld [vmem:[%s952_s1 + $0x20] sm:$0xff]   ;;  %v742_v22 = vld [vmem:[%s952_s1 + $0x28] sm:$0xff]  }
   0x8   :  { %648 = vmatpush3.bf16.msra.mxu0 %v726_v6  ;;  %v735_v15 = vld [vmem:[%s952_s1 + $0x98] sm:$0xff]   ;;  %v739_v19 = vld [vmem:[%s952_s1 + $0xa0] sm:$0xff]   ;;  %v743_v23 = vld [vmem:[%s952_s1 + $0xa8] sm:$0xff]  }
   0x9   :  { %676 = vmatpush3.bf16.msra.mxu1 %v727_v7  ;;  %649 = vmatprep.subr.bf16.mxu0 %v728_v8  ;;  %v744_v24 = vld [vmem:[%s952_s1 + $0x70] sm:$0xff]   ;;  %v748_v28 = vld [vmem:[%s952_s1 + $0x78] sm:$0xff]   ;;  %v757_v35 = vld [vmem:[%s953_s0 + $0xc] ss:$20 sps:$4 sm:$0xff]  }
   0xa   :  { %677 = vmatprep.subr.bf16.mxu1 %v729_v9  ;;  %v745_v25 = vld [vmem:[%s952_s1 + $0xf0] sm:$0xff]   ;;  %v749_v29 = vld [vmem:[%s952_s1 + $0xf8] sm:$0xff]   ;;  %v758_v36 = vld [vmem:[%s952_s1 + $0x100] sm:$0xff]   ;;  %466 = vmatprep.mubr.bf16.mxu1 %v757_v35 }
   0xb   :  { %v746_v26 = vld [vmem:[%s952_s1 + $0x30] sm:$0xff]   ;;  %v750_v30 = vld [vmem:[%s952_s1 + $0x38] sm:$0xff]   ;;  %v759_v37 = vld [vmem:[%s952_s1 + $0x108] sm:$0xff]  }
   0xc   :  { %650 = vmatpush3.bf16.msra.mxu0 %v730_v10  ;;  %v747_v27 = vld [vmem:[%s952_s1 + $0xb0] sm:$0xff]   ;;  %v751_v31 = vld [vmem:[%s952_s1 + $0xb8] sm:$0xff]   ;;  %v760_v38 = vld [vmem:[%s953_s0 + $0x2c] ss:$20 sps:$4 sm:$0xff]  }
   0xd   :  { %678 = vmatpush3.bf16.msra.mxu1 %v731_v11  ;;  %651 = vmatprep.subr.bf16.mxu0 %v732_v12  ;;  %v752_v32 = vld [vmem:[%s953_s0] ss:$20 sps:$4 sm:$0xff]   ;;  %v754_v33 = vld [vmem:[%s953_s0 + $0x4] ss:$20 sps:$4 sm:$0xff]   ;;  %v755_v34 = vld [vmem:[%s953_s0 + $0x8] ss:$20 sps:$4 sm:$0xff]  }
   0xe   :  { %679 = vmatprep.subr.bf16.mxu1 %v733_v13  ;;  %417 = vmatprep.mubr.bf16.mxu0 %v754_v33  ;;  %v762_v39 = vld [vmem:[%s953_s0 + $0x34] ss:$20 sps:$4 sm:$0xff]   ;;  %v765_v42 = vld [vmem:[%s953_s0 + $0x30] ss:$20 sps:$4 sm:$0xff]   ;;  %v767_v44 = vld [vmem:[%s952_s1 + $0x118] sm:$0xff]  }
   0xf   :  { %v764_v40 = vld [vmem:[%s953_s0 + $0x28] ss:$20 sps:$4 sm:$0xff]   ;;  %v766_v41 = vld [vmem:[%s952_s1 + $0x110] sm:$0xff]   ;;  %v769_v45 = vld [vmem:[%s953_s0 + $0x38] ss:$20 sps:$4 sm:$0xff]  }
  0x10   :  { %652 = vmatpush3.bf16.msra.mxu0 %v734_v14  ;;  %v768_v43 = vld [vmem:[%s953_s0 + $0x10] ss:$20 sps:$4 sm:$0xff]  }
  0x11   :  { %680 = vmatpush3.bf16.msra.mxu1 %v735_v15  ;;  %653 = vmatprep.subr.bf16.mxu0 %v736_v16  ;;  %v26_v11 = vld [vmem:[#allocation2 + $0x10] sm:$0xff]  ;;  %v24_v14 = vld [vmem:[#allocation2] sm:$0xff] }
  0x12   :  { %681 = vmatprep.subr.bf16.mxu1 %v737_v17  ;;  %v27_v17 = vld [vmem:[#allocation2 + $0x18] sm:$0xff] }
  0x14   :  { %654 = vmatpush3.bf16.msra.mxu0 %v738_v18 }
  0x15   :  { %682 = vmatpush3.bf16.msra.mxu1 %v739_v19  ;;  %655 = vmatprep.subr.bf16.mxu0 %v740_v20 }
  0x16   :  { %683 = vmatprep.subr.bf16.mxu1 %v741_v21  ;;  %v25_v21 = vld [vmem:[#allocation2 + $0x8] sm:$0xff] }
  0x18   :  { %656 = vmatpush3.bf16.msra.mxu0 %v742_v22 }
  0x19   :  { %684 = vmatpush3.bf16.msra.mxu1 %v743_v23  ;;  %657 = vmatprep.subr.bf16.mxu0 %v744_v24 }
  0x1a   :  { %685 = vmatprep.subr.bf16.mxu1 %v745_v25 }
  0x1c   :  { %658 = vmatpush3.bf16.msra.mxu0 %v746_v26 }
  0x1d   :  { %686 = vmatpush3.bf16.msra.mxu1 %v747_v27  ;;  %659 = vmatprep.subr.bf16.mxu0 %v748_v28  ;;  %v636_v27 = vld [vmem:[%s954_s2] ss:$0 sm:$0xff] }
  0x1e   :  { %687 = vmatprep.subr.bf16.mxu1 %v749_v29 }
  0x20   :  { %660 = vmatpush3.bf16.msra.mxu0 %v750_v30 }
  0x21   :  { %688 = vmatpush3.bf16.msra.mxu1 %v751_v31  ;;  %707 = vmatprep.subr.bf16.mxu0 %v758_v36 }
  0x23   :  { %418 = vmatmul.mubr.bf16.vlgmr.msra.gmra.mrb[0].mxu0 %v752_v32 }
  0x24   :  { %467 = vmatmul.mubr.bf16.vlgmr.msra.gmra.mrb[0].mxu1 %v755_v34  ;;  %708 = vmatpush3.bf16.msra.mxu0 %v758_v36 }
  0x25   :  { %709 = vmatprep.subr.bf16.mxu0 %v759_v37  ;;  %425 = vmatprep.mubr.bf16.mxu0 %v760_v38 }
  0x26   :  { %474 = vmatprep.mubr.bf16.mxu1 %v762_v39 }
  0x28   :  { %710 = vmatpush3.bf16.msra.mxu0 %v759_v37 }
  0x29   :  { %711 = vmatprep.subr.bf16.mxu0 %v766_v41 }
  0x2b   :  { %426 = vmatmul.mubr.bf16.gmra.mrb[4].mxu0 %v764_v40 }
  0x2c   :  { %475 = vmatmul.mubr.bf16.gmra.mrb[4].mxu1 %v765_v42  ;;  %715 = vmatprep.mubr.msk.bf16.mxu0 %vm378_vm0, %v768_v43 }
  0x2d   :  { %712 = vmatpush3.bf16.msra.mxu0 %v766_v41 }
  0x2e   :  { %713 = vmatprep.subr.bf16.mxu0 %v767_v44 }
  0x31   :  { %714 = vmatpush3.bf16.msra.mxu0 %v767_v44 }
  0x34   :  { %716 = vmatmul.mubr.msk.bf16.vlgmr.msra.gmra.mrb[8].mxu0 %vm378_vm0, %v769_v45 }
  0xf6   :  { %v661_v47 = vpop.f32.mrb[0].mxu0 }
  0xf7   :  { %v689_v48 = vpop.f32.mrb[0].mxu1  ;;  %v662_v49 = vpop.f32.mrb[1].mxu0 }
  0xf8   :  { %v663_v50 = vadd.f32 %v662_v49, %v661_v47  ;;  %v690_v51 = vpop.f32.mrb[1].mxu1  ;;  %v664_v52 = vpop.f32.mrb[2].mxu0 }
  0xf9   :  { %v691_v53 = vadd.f32 %v690_v51, %v689_v48  ;;  %v692_v54 = vpop.f32.mrb[2].mxu1  ;;  %v665_v55 = vpop.f32.mrb[3].mxu0 }
  0xfa   :  { %v666_v56 = vadd.f32 %v665_v55, %v664_v52  ;;  %v693_v57 = vpop.f32.mrb[3].mxu1 }
  0xfb   :  { %v694_v58 = vadd.f32 %v693_v57, %v692_v54  ;;  %v469_v59 = vadd.f32 %v691_v53, %v663_v50 }
  0xfd   :  { %v472_v60 = vadd.f32 %v694_v58, %v666_v56 }
  0xfe   :  { %v667_v61 = vpop.f32.mrb[4].mxu0 }
  0xff   :  { %v695_v62 = vpop.f32.mrb[4].mxu1  ;;  %v668_v63 = vpop.f32.mrb[5].mxu0 }
 0x100   :  { %v669_v0 = vadd.f32 %v668_v63, %v667_v61  ;;  %v696_v1 = vpop.f32.mrb[5].mxu1  ;;  %v670_v2 = vpop.f32.mrb[6].mxu0 }
 0x101   :  { %v697_v3 = vadd.f32 %v696_v1, %v695_v62  ;;  %v698_v4 = vpop.f32.mrb[6].mxu1  ;;  %v671_v5 = vpop.f32.mrb[7].mxu0 }
 0x102   :  { %v672_v6 = vadd.f32 %v671_v5, %v670_v2  ;;  %v699_v7 = vpop.f32.mrb[7].mxu1 }
 0x103   :  { %v700_v8 = vadd.f32 %v699_v7, %v698_v4  ;;  %v477_v9 = vadd.f32 %v697_v3, %v669_v0 }
 0x105   :  { %v480_v10 = vadd.f32 %v700_v8, %v672_v6 }
 0x107   :  { %v717_v12 = vpop.f32.mrb[8].mxu0 }
 0x108   :  { %v526_v13 = vadd.f32 %v717_v12, %v477_v9  ;;  %v517_v15 = vpop.f32.mrb[9].mxu0 }
 0x109   :  { %v518_v16 = vadd.f32 %v517_v15, %v469_v59  ;;  %v718_v18 = vpop.f32.mrb[10].mxu0 }
 0x10a   :  { %v534_v19 = vadd.f32 %v526_v13, %v26_v11  ;;  %v529_v20 = vadd.f32 %v718_v18, %v480_v10  ;;  %v520_v22 = vpop.f32.mrb[11].mxu0 }
 0x10b   :  { %v532_v23 = vadd.f32 %v518_v16, %v24_v14  ;;  %v521_v24 = vadd.f32 %v520_v22, %v472_v60 }
 0x10c   :  { %539 = vst.msk [vmem:[#allocation2 + $0x10] sm:$0xff] %vm19_vm1, %v534_v19  ;;  %v535_v25 = vadd.f32 %v529_v20, %v27_v17 }
 0x10d   :  { %537 = vst.msk [vmem:[#allocation2] sm:$0xff] %vm19_vm1, %v532_v23  ;;  %v533_v26 = vadd.f32 %v521_v24, %v25_v21 }
 0x10e   :  { %540 = vst.msk [vmem:[#allocation2 + $0x18] sm:$0xff] %vm19_vm1, %v535_v25 }
 0x10f   :  { %538 = vst.msk [vmem:[#allocation2 + $0x8] sm:$0xff] %vm19_vm1, %v533_v26 }
 0x113   :  { %v546_v28 = vld [vmem:[#allocation2 + $0x10] sm:$0xff] }
 0x114   :  { %v557_v29 = vadd.f32 %v636_v27, %v546_v28  ;;  %v544_v30 = vld [vmem:[#allocation2] sm:$0xff] }
 0x115   :  { %v555_v31 = vadd.f32 %v636_v27, %v544_v30  ;;  %v547_v32 = vld [vmem:[#allocation2 + $0x18] sm:$0xff] }
 0x116   :  { %v561_v33 = vmax.f32 %v557_v29, 0.0  ;;  %v558_v34 = vadd.f32 %v636_v27, %v547_v32  ;;  %v545_v35 = vld [vmem:[#allocation2 + $0x8] sm:$0xff] }
 0x117   :  { %v559_v36 = vmax.f32 %v555_v31, 0.0  ;;  %v556_v37 = vadd.f32 %v636_v27, %v545_v35 }
 0x118   :  { %v643_v38 = vpack.c.bf16 %v561_v33, %v561_v33  ;;  %v562_v39 = vmax.f32 %v558_v34, 0.0 }
 0x119   :  { %v641_v40 = vpack.c.bf16 %v559_v36, %v559_v36  ;;  %v560_v41 = vmax.f32 %v556_v37, 0.0 }
 0x11a   :  { %582 = vst.msk [vmem:[%s955_s3 + $0x8] sm:$0xf] %vm579_vm2, %v643_v38  ;;  %v644_v42 = vpack.c.bf16 %v562_v39, %v562_v39 }
 0x11b   :  { %580 = vst.msk [vmem:[%s955_s3] sm:$0xf] %vm579_vm2, %v641_v40  ;;  %v642_v43 = vpack.c.bf16 %v560_v41, %v560_v41 }
 0x11c   :  { %583 = vst.msk [vmem:[%s955_s3 + $0xc] sm:$0xf] %vm579_vm2, %v644_v42 }
 0x11d   :  { %581 = vst.msk [vmem:[%s955_s3 + $0x4] sm:$0xf] %vm579_vm2, %v642_v43 }

// kernel: forward.30
= control target key start
LH: loop header
LB: loop body
LE: loop exit
PB: predicated region body
PF: predicated region fallthrough
CT: control target
= control target key end

     0   :  { %v1088_v0 = vmov 0   ;;  %vm452_vm0 = vcmask 392192   ;;  %vm19_vm1 = vcmask 130048   ;;  %v1089_v60 = vmov 0.0   ;;  %s1423_s1 = inlined_call_operand.vmem [shape: bf16[432,16], index: 1, kind: input, shape index: {}]   ;;  %s1424_s0 = inlined_call_operand.vmem [shape: bf16[128,432], index: 0, kind: input, shape index: {}]   ;;  %s1425_s2 = inlined_call_operand.vmem [shape: f32[1,16], index: 2, kind: input, shape index: {}]   ;;  %s1426_s3 = inlined_call_operand.vmem [shape: bf16[128,16], index: 3, kind: output, shape index: {}]  }
   0x1   :  { %574 = vmatprep.subr.bf16.mxu1 %v1088_v0  ;;  %v1013_v1 = vld [vmem:[%s1423_s1 + $0x80] sm:$0xff]   ;;  %v1014_v2 = vld [vmem:[%s1423_s1 + $0x88] sm:$0xff]   ;;  %v1017_v5 = vld [vmem:[%s1423_s1 + $0x90] sm:$0xff]   ;;  %20 = vst.msk [vmem:[#allocation2] sm:$0xff] %vm19_vm1, %v1089_v60  ;;  %vm826_vm2 = vcmask 125952  }
   0x2   :  { %575 = vmatpush1.bf16.msra.mxu1 %v1013_v1  ;;  %v1015_v3 = vld [vmem:[%s1423_s1 + $0x40] sm:$0xff]   ;;  %v1018_v6 = vld [vmem:[%s1423_s1 + $0x48] sm:$0xff]   ;;  %v1021_v8 = vld [vmem:[%s1423_s1 + $0x50] sm:$0xff]   ;;  %21 = vst.msk [vmem:[#allocation2 + $0x8] sm:$0xff] %vm19_vm1, %v1089_v60 }
   0x3   :  { %576 = vmatprep.subr.bf16.mxu1 %v1088_v0  ;;  %v1016_v4 = vld [vmem:[%s1423_s1] sm:$0xff]   ;;  %947 = vmatprep.subr.bf16.mxu0 %v1015_v3  ;;  %v1019_v7 = vld [vmem:[%s1423_s1 + $0x8] sm:$0xff]   ;;  %v1022_v9 = vld [vmem:[%s1423_s1 + $0x10] sm:$0xff]   ;;  %22 = vst.msk [vmem:[#allocation2 + $0x10] sm:$0xff] %vm19_vm1, %v1089_v60 }
   0x4   :  { %948 = vmatpush3.bf16.msra.mxu0 %v1016_v4  ;;  %v1020_v10 = vld [vmem:[%s1423_s1 + $0x98] sm:$0xff]   ;;  %v1023_v12 = vld [vmem:[%s1423_s1 + $0xa0] sm:$0xff]   ;;  %v1026_v15 = vld [vmem:[%s1423_s1 + $0xa8] sm:$0xff]   ;;  %23 = vst.msk [vmem:[#allocation2 + $0x18] sm:$0xff] %vm19_vm1, %v1089_v60 }
   0x5   :  { %949 = vmatprep.subr.bf16.mxu0 %v1018_v6  ;;  %v1024_v11 = vld [vmem:[%s1423_s1 + $0x58] sm:$0xff]   ;;  %v1027_v14 = vld [vmem:[%s1423_s1 + $0x60] sm:$0xff]   ;;  %v1030_v17 = vld [vmem:[%s1423_s1 + $0x68] sm:$0xff]   ;;  %24 = vst.msk [vmem:[#allocation2 + $0x20] sm:$0xff] %vm19_vm1, %v1089_v60 }
   0x6   :  { %577 = vmatpush1.bf16.msra.mxu1 %v1014_v2  ;;  %v1025_v13 = vld [vmem:[%s1423_s1 + $0x18] sm:$0xff]   ;;  %v1028_v16 = vld [vmem:[%s1423_s1 + $0x20] sm:$0xff]   ;;  %v1029_v18 = vld [vmem:[%s1423_s1 + $0xb0] sm:$0xff]   ;;  %25 = vst.msk [vmem:[#allocation2 + $0x28] sm:$0xff] %vm19_vm1, %v1089_v60 }
   0x7   :  { %578 = vmatprep.subr.bf16.mxu1 %v1088_v0  ;;  %v1031_v19 = vld [vmem:[%s1423_s1 + $0x28] sm:$0xff]   ;;  %v1033_v20 = vld [vmem:[%s1423_s1 + $0x70] sm:$0xff]   ;;  %v1032_v21 = vld [vmem:[%s1423_s1 + $0xb8] sm:$0xff]   ;;  %26 = vst.msk [vmem:[#allocation2 + $0x30] sm:$0xff] %vm19_vm1, %v1089_v60 }
   0x8   :  { %950 = vmatpush3.bf16.msra.mxu0 %v1019_v7  ;;  %v1034_v22 = vld [vmem:[%s1423_s1 + $0x30] sm:$0xff]   ;;  %v1036_v23 = vld [vmem:[%s1423_s1 + $0x78] sm:$0xff]   ;;  %v1035_v27 = vld [vmem:[%s1423_s1 + $0xc0] sm:$0xff]   ;;  %27 = vst.msk [vmem:[#allocation2 + $0x38] sm:$0xff] %vm19_vm1, %v1089_v60 }
   0x9   :  { %951 = vmatprep.subr.bf16.mxu0 %v1021_v8  ;;  %v1040_v24 = vld [vmem:[%s1424_s0 + $0x4] ss:$16 sps:$4 sm:$0xff]   ;;  %v1037_v25 = vld [vmem:[%s1423_s1 + $0x38] sm:$0xff]   ;;  %v1038_v28 = vld [vmem:[%s1424_s0] ss:$16 sps:$4 sm:$0xff]   ;;  %28 = vst.msk [vmem:[#allocation2 + $0x40] sm:$0xff] %vm19_vm1, %v1089_v60 }
   0xa   :  { %579 = vmatpush1.bf16.msra.mxu1 %v1017_v5  ;;  %509 = vmatprep.mubr.bf16.mxu0 %v1040_v24  ;;  %v1045_v26 = vld [vmem:[%s1424_s0 + $0xc] ss:$16 sps:$4 sm:$0xff]   ;;  %v1046_v29 = vld [vmem:[%s1424_s0 + $0x24] ss:$16 sps:$4 sm:$0xff]   ;;  %v1048_v32 = vld [vmem:[%s1424_s0 + $0x20] ss:$16 sps:$4 sm:$0xff]  }
   0xb   :  { %580 = vmatprep.subr.bf16.mxu1 %v1088_v0  ;;  %906 = vmatprep.mubr.msk.bf16.mxu1 %vm452_vm0, %v1045_v26  ;;  %v1041_v30 = vld [vmem:[%s1423_s1 + $0xc8] sm:$0xff]   ;;  %v1042_v31 = vld [vmem:[%s1423_s1 + $0xd0] sm:$0xff]   ;;  %29 = vst.msk [vmem:[#allocation2 + $0x48] sm:$0xff] %vm19_vm1, %v1089_v60  ;;  %30 = vst.msk [vmem:[#allocation2 + $0x50] sm:$0xff] %vm19_vm1, %v1089_v60 }
   0xc   :  { %952 = vmatpush3.bf16.msra.mxu0 %v1022_v9  ;;  %v1043_v33 = vld [vmem:[%s1424_s0 + $0x8] ss:$16 sps:$4 sm:$0xff]   ;;  %v1052_v34 = vld [vmem:[%s1424_s0 + $0x44] ss:$16 sps:$4 sm:$0xff]   ;;  %v1049_v35 = vld [vmem:[%s1424_s0 + $0x2c] ss:$16 sps:$4 sm:$0xff]  }
   0xd   :  { %953 = vmatprep.subr.bf16.mxu0 %v1024_v11  ;;  %v1054_v36 = vld [vmem:[%s1424_s0 + $0x40] ss:$16 sps:$4 sm:$0xff]   ;;  %v1051_v37 = vld [vmem:[%s1424_s0 + $0x28] ss:$16 sps:$4 sm:$0xff]   ;;  %v1058_v38 = vld [vmem:[%s1424_s0 + $0x64] ss:$16 sps:$4 sm:$0xff]  }
   0xe   :  { %581 = vmatpush1.bf16.msra.mxu1 %v1020_v10  ;;  %v1055_v39 = vld [vmem:[%s1424_s0 + $0x4c] ss:$16 sps:$4 sm:$0xff]   ;;  %v1060_v40 = vld [vmem:[%s1424_s0 + $0x60] ss:$16 sps:$4 sm:$0xff]   ;;  %v1057_v41 = vld [vmem:[%s1424_s0 + $0x48] ss:$16 sps:$4 sm:$0xff]  }
   0xf   :  { %582 = vmatprep.subr.bf16.mxu1 %v1088_v0  ;;  %v1064_v42 = vld [vmem:[%s1424_s0 + $0x84] ss:$16 sps:$4 sm:$0xff]   ;;  %v1061_v43 = vld [vmem:[%s1424_s0 + $0x6c] ss:$16 sps:$4 sm:$0xff]   ;;  %v1066_v44 = vld [vmem:[%s1424_s0 + $0x80] ss:$16 sps:$4 sm:$0xff]  }
  0x10   :  { %954 = vmatpush3.bf16.msra.mxu0 %v1025_v13  ;;  %v1063_v45 = vld [vmem:[%s1424_s0 + $0x68] ss:$16 sps:$4 sm:$0xff]   ;;  %v1070_v46 = vld [vmem:[%s1424_s0 + $0xa4] ss:$16 sps:$4 sm:$0xff]   ;;  %v1067_v47 = vld [vmem:[%s1424_s0 + $0x8c] ss:$16 sps:$4 sm:$0xff]  }
  0x11   :  { %955 = vmatprep.subr.bf16.mxu0 %v1027_v14  ;;  %v1072_v48 = vld [vmem:[%s1424_s0 + $0xa0] ss:$16 sps:$4 sm:$0xff]   ;;  %v1069_v49 = vld [vmem:[%s1424_s0 + $0x88] ss:$16 sps:$4 sm:$0xff]   ;;  %v1076_v50 = vld [vmem:[%s1424_s0 + $0xc4] ss:$16 sps:$4 sm:$0xff]  }
  0x12   :  { %583 = vmatpush1.bf16.msra.mxu1 %v1023_v12  ;;  %v1073_v51 = vld [vmem:[%s1424_s0 + $0xac] ss:$16 sps:$4 sm:$0xff]   ;;  %v1078_v52 = vld [vmem:[%s1424_s0 + $0xc0] ss:$16 sps:$4 sm:$0xff]   ;;  %v1075_v53 = vld [vmem:[%s1424_s0 + $0xa8] ss:$16 sps:$4 sm:$0xff]  }
  0x13   :  { %584 = vmatprep.subr.bf16.mxu1 %v1088_v0  ;;  %v1082_v54 = vld [vmem:[%s1424_s0 + $0xe4] ss:$16 sps:$4 sm:$0xff]   ;;  %v1079_v55 = vld [vmem:[%s1424_s0 + $0xcc] ss:$16 sps:$4 sm:$0xff]   ;;  %v1084_v56 = vld [vmem:[%s1424_s0 + $0xe0] ss:$16 sps:$4 sm:$0xff]  }
  0x14   :  { %956 = vmatpush3.bf16.msra.mxu0 %v1028_v16  ;;  %v1081_v57 = vld [vmem:[%s1424_s0 + $0xc8] ss:$16 sps:$4 sm:$0xff]   ;;  %v1085_v58 = vld [vmem:[%s1424_s0 + $0xec] ss:$16 sps:$4 sm:$0xff]   ;;  %31 = vst.msk [vmem:[#allocation2 + $0x58] sm:$0xff] %vm19_vm1, %v1089_v60  ;;  %32 = vst.msk [vmem:[#allocation2 + $0x60] sm:$0xff] %vm19_vm1, %v1089_v60 }
  0x15   :  { %957 = vmatprep.subr.bf16.mxu0 %v1030_v17  ;;  %v1087_v59 = vld [vmem:[%s1424_s0 + $0xe8] ss:$16 sps:$4 sm:$0xff]   ;;  %33 = vst.msk [vmem:[#allocation2 + $0x68] sm:$0xff] %vm19_vm1, %v1089_v60  ;;  %34 = vst.msk [vmem:[#allocation2 + $0x70] sm:$0xff] %vm19_vm1, %v1089_v60  ;;  %v36_v4 = vld [vmem:[#allocation2] sm:$0xff] }
  0x16   :  { %585 = vmatpush1.bf16.msra.mxu1 %v1026_v15  ;;  %35 = vst.msk [vmem:[#allocation2 + $0x78] sm:$0xff] %vm19_vm1, %v1089_v60  ;;  %v37_v11 = vld [vmem:[#allocation2 + $0x8] sm:$0xff] }
  0x17   :  { %586 = vmatprep.subr.bf16.mxu1 %v1088_v0 }
  0x18   :  { %958 = vmatpush3.bf16.msra.mxu0 %v1031_v19 }
  0x19   :  { %959 = vmatprep.subr.bf16.mxu0 %v1033_v20  ;;  %v38_v20 = vld [vmem:[#allocation2 + $0x10] sm:$0xff] }
  0x1a   :  { %587 = vmatpush1.bf16.msra.mxu1 %v1029_v18 }
  0x1b   :  { %588 = vmatprep.subr.bf16.mxu1 %v1088_v0 }
  0x1c   :  { %960 = vmatpush3.bf16.msra.mxu0 %v1034_v22 }
  0x1d   :  { %961 = vmatprep.subr.bf16.mxu0 %v1036_v23 }
  0x1e   :  { %589 = vmatpush1.bf16.msra.mxu1 %v1032_v21 }
  0x1f   :  { %590 = vmatprep.subr.bf16.mxu1 %v1088_v0 }
  0x20   :  { %962 = vmatpush3.bf16.msra.mxu0 %v1037_v25 }
  0x22   :  { %591 = vmatpush1.bf16.msra.mxu1 %v1035_v27  ;;  %v1327_v27 = vld [vmem:[%s1425_s2] ss:$0 sm:$0xff] }
  0x23   :  { %592 = vmatprep.subr.bf16.mxu1 %v1088_v0  ;;  %510 = vmatmul.mubr.bf16.vlgmr.msra.gmra.mrb[0].mxu0 %v1038_v28  ;;  %v39_v28 = vld [vmem:[#allocation2 + $0x18] sm:$0xff] }
  0x24   :  { %517 = vmatprep.mubr.bf16.mxu0 %v1046_v29 }
  0x26   :  { %593 = vmatpush1.bf16.msra.mxu1 %v1041_v30 }
  0x27   :  { %594 = vmatprep.subr.bf16.mxu1 %v1088_v0 }
  0x2a   :  { %595 = vmatpush1.bf16.msra.mxu1 %v1042_v31 }
  0x2b   :  { %518 = vmatmul.mubr.bf16.gmra.mrb[4].mxu0 %v1048_v32 }
  0x2c   :  { %525 = vmatprep.mubr.bf16.mxu0 %v1052_v34 }
  0x2d   :  { %607 = vmatmul.mubr.bf16.vlgmr.msra.gmra.mrb[0].mxu1 %v1043_v33 }
  0x2e   :  { %907 = vmatprep.mubr.msk.bf16.mxu1 %vm452_vm0, %v1049_v35 }
  0x33   :  { %526 = vmatmul.mubr.bf16.gmra.mrb[8].mxu0 %v1054_v36 }
  0x34   :  { %533 = vmatprep.mubr.bf16.mxu0 %v1058_v38 }
  0x35   :  { %615 = vmatmul.mubr.bf16.gmra.mrb[4].mxu1 %v1051_v37 }
  0x36   :  { %908 = vmatprep.mubr.msk.bf16.mxu1 %vm452_vm0, %v1055_v39 }
  0x3b   :  { %534 = vmatmul.mubr.bf16.gmra.mrb[12].mxu0 %v1060_v40 }
  0x3c   :  { %541 = vmatprep.mubr.bf16.mxu0 %v1064_v42  ;;  %v40_v42 = vld [vmem:[#allocation2 + $0x20] sm:$0xff] }
  0x3d   :  { %623 = vmatmul.mubr.bf16.gmra.mrb[8].mxu1 %v1057_v41 }
  0x3e   :  { %909 = vmatprep.mubr.msk.bf16.mxu1 %vm452_vm0, %v1061_v43 }
  0x43   :  { %542 = vmatmul.mubr.bf16.gmra.mrb[16].mxu0 %v1066_v44 }
  0x44   :  { %549 = vmatprep.mubr.bf16.mxu0 %v1070_v46 }
  0x45   :  { %631 = vmatmul.mubr.bf16.gmra.mrb[12].mxu1 %v1063_v45 }
  0x46   :  { %910 = vmatprep.mubr.msk.bf16.mxu1 %vm452_vm0, %v1067_v47 }
  0x4b   :  { %550 = vmatmul.mubr.bf16.gmra.mrb[20].mxu0 %v1072_v48 }
  0x4c   :  { %557 = vmatprep.mubr.bf16.mxu0 %v1076_v50 }
  0x4d   :  { %639 = vmatmul.mubr.bf16.gmra.mrb[16].mxu1 %v1069_v49 }
  0x4e   :  { %911 = vmatprep.mubr.msk.bf16.mxu1 %vm452_vm0, %v1073_v51  ;;  %v41_v51 = vld [vmem:[#allocation2 + $0x28] sm:$0xff] }
  0x53   :  { %558 = vmatmul.mubr.bf16.gmra.mrb[24].mxu0 %v1078_v52 }
  0x54   :  { %565 = vmatprep.mubr.bf16.mxu0 %v1082_v54 }
  0x55   :  { %647 = vmatmul.mubr.bf16.gmra.mrb[20].mxu1 %v1075_v53 }
  0x56   :  { %912 = vmatprep.mubr.msk.bf16.mxu1 %vm452_vm0, %v1079_v55 }
  0x5b   :  { %566 = vmatmul.mubr.bf16.gmra.mrb[28].mxu0 %v1084_v56 }
  0x5d   :  { %655 = vmatmul.mubr.bf16.gmra.mrb[24].mxu1 %v1081_v57 }
  0x5e   :  { %913 = vmatprep.mubr.msk.bf16.mxu1 %vm452_vm0, %v1085_v58 }
  0x65   :  { %663 = vmatmul.mubr.bf16.gmra.mrb[28].mxu1 %v1087_v59 }
  0xf6   :  { %v963_v61 = vpop.f32.mrb[0].mxu0 }
  0xf7   :  { %v964_v62 = vpop.f32.mrb[1].mxu0 }
  0xf8   :  { %v965_v63 = vadd.f32 %v964_v62, %v963_v61  ;;  %v966_v0 = vpop.f32.mrb[2].mxu0 }
  0xf9   :  { %v967_v1 = vpop.f32.mrb[3].mxu0 }
  0xfa   :  { %v968_v2 = vadd.f32 %v967_v1, %v966_v0 }
  0xfe   :  { %v969_v3 = vpop.f32.mrb[4].mxu0 }
  0xff   :  { %v970_v6 = vpop.f32.mrb[5].mxu0 }
 0x100   :  { %v608_v5 = vpop.f32.mrb[0].mxu1  ;;  %v971_v9 = vadd.f32 %v970_v6, %v969_v3  ;;  %v972_v10 = vpop.f32.mrb[6].mxu0 }
 0x101   :  { %v609_v7 = vadd.f32 %v965_v63, %v608_v5  ;;  %v610_v8 = vpop.f32.mrb[1].mxu1  ;;  %v973_v13 = vpop.f32.mrb[7].mxu0 }
 0x102   :  { %v611_v12 = vpop.f32.mrb[2].mxu1  ;;  %v974_v17 = vadd.f32 %v973_v13, %v972_v10 }
 0x103   :  { %v671_v14 = vadd.f32 %v609_v7, %v36_v4  ;;  %v612_v15 = vadd.f32 %v968_v2, %v611_v12  ;;  %v613_v16 = vpop.f32.mrb[3].mxu1  ;;  %v42_v2 = vld [vmem:[#allocation2 + $0x30] sm:$0xff] }
 0x105   :  { %688 = vst.msk [vmem:[#allocation2] sm:$0xff] %vm19_vm1, %v671_v14  ;;  %v672_v18 = vadd.f32 %v612_v15, %v37_v11  ;;  %v43_v11 = vld [vmem:[#allocation2 + $0x38] sm:$0xff] }
 0x106   :  { %v975_v19 = vpop.f32.mrb[8].mxu0 }
 0x107   :  { %689 = vst.msk [vmem:[#allocation2 + $0x8] sm:$0xff] %vm19_vm1, %v672_v18  ;;  %v976_v22 = vpop.f32.mrb[9].mxu0 }
 0x108   :  { %v616_v21 = vpop.f32.mrb[4].mxu1  ;;  %v977_v25 = vadd.f32 %v976_v22, %v975_v19  ;;  %v978_v26 = vpop.f32.mrb[10].mxu0 }
 0x109   :  { %v617_v23 = vadd.f32 %v971_v9, %v616_v21  ;;  %v618_v24 = vpop.f32.mrb[5].mxu1  ;;  %v979_v30 = vpop.f32.mrb[11].mxu0 }
 0x10a   :  { %v619_v29 = vpop.f32.mrb[6].mxu1  ;;  %v980_v34 = vadd.f32 %v979_v30, %v978_v26  ;;  %v44_v26 = vld [vmem:[#allocation2 + $0x40] sm:$0xff] }
 0x10b   :  { %v673_v31 = vadd.f32 %v617_v23, %v38_v20  ;;  %v620_v32 = vadd.f32 %v974_v17, %v619_v29  ;;  %v621_v33 = vpop.f32.mrb[7].mxu1 }
 0x10c   :  { %v707_v35 = vld [vmem:[#allocation2] sm:$0xff] }
 0x10d   :  { %v730_v36 = vadd.f32 %v1327_v27, %v707_v35  ;;  %690 = vst.msk [vmem:[#allocation2 + $0x10] sm:$0xff] %vm19_vm1, %v673_v31  ;;  %v674_v37 = vadd.f32 %v620_v32, %v39_v28 }
 0x10e   :  { %v708_v38 = vld [vmem:[#allocation2 + $0x8] sm:$0xff]  ;;  %v981_v41 = vpop.f32.mrb[12].mxu0 }
 0x10f   :  { %v746_v39 = vmax.f32 %v730_v36, 0.0  ;;  %v731_v40 = vadd.f32 %v1327_v27, %v708_v38  ;;  %691 = vst.msk [vmem:[#allocation2 + $0x18] sm:$0xff] %vm19_vm1, %v674_v37  ;;  %v982_v44 = vpop.f32.mrb[13].mxu0  ;;  %v45_v36 = vld [vmem:[#allocation2 + $0x48] sm:$0xff] }
 0x110   :  { %v624_v43 = vpop.f32.mrb[8].mxu1  ;;  %v983_v49 = vadd.f32 %v982_v44, %v981_v41  ;;  %v984_v50 = vpop.f32.mrb[14].mxu0 }
 0x111   :  { %v931_v45 = vpack.c.bf16 %v746_v39, %v746_v39  ;;  %v747_v46 = vmax.f32 %v731_v40, 0.0  ;;  %v625_v47 = vadd.f32 %v977_v25, %v624_v43  ;;  %v626_v48 = vpop.f32.mrb[9].mxu1  ;;  %v985_v53 = vpop.f32.mrb[15].mxu0 }
 0x112   :  { %v627_v52 = vpop.f32.mrb[10].mxu1  ;;  %v986_v58 = vadd.f32 %v985_v53, %v984_v50 }
 0x113   :  { %827 = vst.msk [vmem:[%s1426_s3] sm:$0xf] %vm826_vm2, %v931_v45  ;;  %v932_v54 = vpack.c.bf16 %v747_v46, %v747_v46  ;;  %v675_v55 = vadd.f32 %v625_v47, %v40_v42  ;;  %v628_v56 = vadd.f32 %v980_v34, %v627_v52  ;;  %v629_v57 = vpop.f32.mrb[11].mxu1 }
 0x114   :  { %v709_v59 = vld [vmem:[#allocation2 + $0x10] sm:$0xff] }
 0x115   :  { %828 = vst.msk [vmem:[%s1426_s3 + $0x4] sm:$0xf] %vm826_vm2, %v932_v54  ;;  %v732_v60 = vadd.f32 %v1327_v27, %v709_v59  ;;  %v676_v61 = vadd.f32 %v628_v56, %v41_v51  ;;  %v46_v51 = vld [vmem:[#allocation2 + $0x50] sm:$0xff] }
 0x116   :  { %692 = vst.msk [vmem:[#allocation2 + $0x20] sm:$0xff] %vm19_vm1, %v675_v55  ;;  %v710_v62 = vld [vmem:[#allocation2 + $0x18] sm:$0xff]  ;;  %v987_v1 = vpop.f32.mrb[16].mxu0 }
 0x117   :  { %v748_v63 = vmax.f32 %v732_v60, 0.0  ;;  %v733_v0 = vadd.f32 %v1327_v27, %v710_v62  ;;  %693 = vst.msk [vmem:[#allocation2 + $0x28] sm:$0xff] %vm19_vm1, %v676_v61  ;;  %v988_v4 = vpop.f32.mrb[17].mxu0  ;;  %v47_v60 = vld [vmem:[#allocation2 + $0x58] sm:$0xff] }
 0x118   :  { %v632_v3 = vpop.f32.mrb[12].mxu1  ;;  %v989_v9 = vadd.f32 %v988_v4, %v987_v1  ;;  %v990_v10 = vpop.f32.mrb[18].mxu0 }
 0x119   :  { %v933_v5 = vpack.c.bf16 %v748_v63, %v748_v63  ;;  %v749_v6 = vmax.f32 %v733_v0, 0.0  ;;  %v633_v7 = vadd.f32 %v983_v49, %v632_v3  ;;  %v634_v8 = vpop.f32.mrb[13].mxu1  ;;  %v991_v13 = vpop.f32.mrb[19].mxu0 }
 0x11a   :  { %v635_v12 = vpop.f32.mrb[14].mxu1  ;;  %v992_v18 = vadd.f32 %v991_v13, %v990_v10 }
 0x11b   :  { %829 = vst.msk [vmem:[%s1426_s3 + $0x8] sm:$0xf] %vm826_vm2, %v933_v5  ;;  %v934_v14 = vpack.c.bf16 %v749_v6, %v749_v6  ;;  %v677_v15 = vadd.f32 %v633_v7, %v42_v2  ;;  %v636_v16 = vadd.f32 %v986_v58, %v635_v12  ;;  %v637_v17 = vpop.f32.mrb[15].mxu1 }
 0x11d   :  { %v711_v19 = vld [vmem:[#allocation2 + $0x20] sm:$0xff]  ;;  %830 = vst.msk [vmem:[%s1426_s3 + $0xc] sm:$0xf] %vm826_vm2, %v934_v14  ;;  %v678_v21 = vadd.f32 %v636_v16, %v43_v11 }
 0x11e   :  { %v734_v20 = vadd.f32 %v1327_v27, %v711_v19  ;;  %694 = vst.msk [vmem:[#allocation2 + $0x30] sm:$0xff] %vm19_vm1, %v677_v15  ;;  %v712_v22 = vld [vmem:[#allocation2 + $0x28] sm:$0xff]  ;;  %v993_v25 = vpop.f32.mrb[20].mxu0  ;;  %v48_v11 = vld [vmem:[#allocation2 + $0x60] sm:$0xff] }
 0x11f   :  { %v735_v24 = vadd.f32 %v1327_v27, %v712_v22  ;;  %695 = vst.msk [vmem:[#allocation2 + $0x38] sm:$0xff] %vm19_vm1, %v678_v21  ;;  %v994_v29 = vpop.f32.mrb[21].mxu0 }
 0x120   :  { %v750_v23 = vmax.f32 %v734_v20, 0.0  ;;  %v640_v28 = vpop.f32.mrb[16].mxu1  ;;  %v995_v34 = vadd.f32 %v994_v29, %v993_v25  ;;  %v996_v35 = vpop.f32.mrb[22].mxu0  ;;  %v49_v20 = vld [vmem:[#allocation2 + $0x68] sm:$0xff] }
 0x121   :  { %v751_v31 = vmax.f32 %v735_v24, 0.0  ;;  %v641_v32 = vadd.f32 %v989_v9, %v640_v28  ;;  %v642_v33 = vpop.f32.mrb[17].mxu1  ;;  %v997_v38 = vpop.f32.mrb[23].mxu0 }
 0x122   :  { %v935_v30 = vpack.c.bf16 %v750_v23, %v750_v23  ;;  %v643_v37 = vpop.f32.mrb[18].mxu1  ;;  %v998_v43 = vadd.f32 %v997_v38, %v996_v35  ;;  %v50_v35 = vld [vmem:[#allocation2 + $0x70] sm:$0xff] }
 0x123   :  { %v936_v39 = vpack.c.bf16 %v751_v31, %v751_v31  ;;  %v679_v40 = vadd.f32 %v641_v32, %v44_v26  ;;  %v644_v41 = vadd.f32 %v992_v18, %v643_v37  ;;  %v645_v42 = vpop.f32.mrb[19].mxu1 }
 0x124   :  { %831 = vst.msk [vmem:[%s1426_s3 + $0x10] sm:$0xf] %vm826_vm2, %v935_v30 }
 0x125   :  { %v713_v44 = vld [vmem:[#allocation2 + $0x30] sm:$0xff]  ;;  %832 = vst.msk [vmem:[%s1426_s3 + $0x14] sm:$0xf] %vm826_vm2, %v936_v39  ;;  %v680_v46 = vadd.f32 %v644_v41, %v45_v36  ;;  %v51_v41 = vld [vmem:[#allocation2 + $0x78] sm:$0xff] }
 0x126   :  { %v736_v45 = vadd.f32 %v1327_v27, %v713_v44  ;;  %696 = vst.msk [vmem:[#allocation2 + $0x40] sm:$0xff] %vm19_vm1, %v679_v40  ;;  %v714_v47 = vld [vmem:[#allocation2 + $0x38] sm:$0xff]  ;;  %v999_v50 = vpop.f32.mrb[24].mxu0 }
 0x127   :  { %v737_v49 = vadd.f32 %v1327_v27, %v714_v47  ;;  %697 = vst.msk [vmem:[#allocation2 + $0x48] sm:$0xff] %vm19_vm1, %v680_v46  ;;  %v1000_v53 = vpop.f32.mrb[25].mxu0 }
 0x128   :  { %v752_v48 = vmax.f32 %v736_v45, 0.0  ;;  %v648_v52 = vpop.f32.mrb[20].mxu1  ;;  %v1001_v58 = vadd.f32 %v1000_v53, %v999_v50  ;;  %v1002_v59 = vpop.f32.mrb[26].mxu0 }
 0x129   :  { %v753_v55 = vmax.f32 %v737_v49, 0.0  ;;  %v649_v56 = vadd.f32 %v995_v34, %v648_v52  ;;  %v650_v57 = vpop.f32.mrb[21].mxu1  ;;  %v1003_v62 = vpop.f32.mrb[27].mxu0 }
 0x12a   :  { %v937_v54 = vpack.c.bf16 %v752_v48, %v752_v48  ;;  %v651_v61 = vpop.f32.mrb[22].mxu1  ;;  %v1004_v3 = vadd.f32 %v1003_v62, %v1002_v59 }
 0x12b   :  { %v938_v63 = vpack.c.bf16 %v753_v55, %v753_v55  ;;  %v681_v0 = vadd.f32 %v649_v56, %v46_v51  ;;  %v652_v1 = vadd.f32 %v998_v43, %v651_v61  ;;  %v653_v2 = vpop.f32.mrb[23].mxu1 }
 0x12c   :  { %833 = vst.msk [vmem:[%s1426_s3 + $0x18] sm:$0xf] %vm826_vm2, %v937_v54 }
 0x12d   :  { %v715_v4 = vld [vmem:[#allocation2 + $0x40] sm:$0xff]  ;;  %834 = vst.msk [vmem:[%s1426_s3 + $0x1c] sm:$0xf] %vm826_vm2, %v938_v63  ;;  %v682_v6 = vadd.f32 %v652_v1, %v47_v60 }
 0x12e   :  { %v738_v5 = vadd.f32 %v1327_v27, %v715_v4  ;;  %698 = vst.msk [vmem:[#allocation2 + $0x50] sm:$0xff] %vm19_vm1, %v681_v0  ;;  %v716_v7 = vld [vmem:[#allocation2 + $0x48] sm:$0xff]  ;;  %v1005_v10 = vpop.f32.mrb[28].mxu0 }
 0x12f   :  { %v739_v9 = vadd.f32 %v1327_v27, %v716_v7  ;;  %699 = vst.msk [vmem:[#allocation2 + $0x58] sm:$0xff] %vm19_vm1, %v682_v6  ;;  %v1006_v13 = vpop.f32.mrb[29].mxu0 }
 0x130   :  { %v754_v8 = vmax.f32 %v738_v5, 0.0  ;;  %v656_v12 = vpop.f32.mrb[24].mxu1  ;;  %v1007_v18 = vadd.f32 %v1006_v13, %v1005_v10  ;;  %v1008_v19 = vpop.f32.mrb[30].mxu0 }
 0x131   :  { %v755_v15 = vmax.f32 %v739_v9, 0.0  ;;  %v657_v16 = vadd.f32 %v1001_v58, %v656_v12  ;;  %v658_v17 = vpop.f32.mrb[25].mxu1  ;;  %v1009_v22 = vpop.f32.mrb[31].mxu0 }
 0x132   :  { %v939_v14 = vpack.c.bf16 %v754_v8, %v754_v8  ;;  %v659_v21 = vpop.f32.mrb[26].mxu1  ;;  %v1010_v28 = vadd.f32 %v1009_v22, %v1008_v19 }
 0x133   :  { %v940_v23 = vpack.c.bf16 %v755_v15, %v755_v15  ;;  %v683_v24 = vadd.f32 %v657_v16, %v48_v11  ;;  %v660_v25 = vadd.f32 %v1004_v3, %v659_v21  ;;  %v661_v26 = vpop.f32.mrb[27].mxu1 }
 0x134   :  { %835 = vst.msk [vmem:[%s1426_s3 + $0x20] sm:$0xf] %vm826_vm2, %v939_v14 }
 0x135   :  { %v717_v29 = vld [vmem:[#allocation2 + $0x50] sm:$0xff]  ;;  %836 = vst.msk [vmem:[%s1426_s3 + $0x24] sm:$0xf] %vm826_vm2, %v940_v23  ;;  %v684_v31 = vadd.f32 %v660_v25, %v49_v20 }
 0x136   :  { %v740_v30 = vadd.f32 %v1327_v27, %v717_v29  ;;  %700 = vst.msk [vmem:[#allocation2 + $0x60] sm:$0xff] %vm19_vm1, %v683_v24  ;;  %v718_v32 = vld [vmem:[#allocation2 + $0x58] sm:$0xff] }
 0x137   :  { %v741_v34 = vadd.f32 %v1327_v27, %v718_v32  ;;  %701 = vst.msk [vmem:[#allocation2 + $0x68] sm:$0xff] %vm19_vm1, %v684_v31 }
 0x138   :  { %v756_v33 = vmax.f32 %v740_v30, 0.0  ;;  %v664_v36 = vpop.f32.mrb[28].mxu1 }
 0x139   :  { %v757_v38 = vmax.f32 %v741_v34, 0.0  ;;  %v665_v39 = vadd.f32 %v1007_v18, %v664_v36  ;;  %v666_v40 = vpop.f32.mrb[29].mxu1 }
 0x13a   :  { %v941_v37 = vpack.c.bf16 %v756_v33, %v756_v33  ;;  %v667_v42 = vpop.f32.mrb[30].mxu1 }
 0x13b   :  { %v942_v43 = vpack.c.bf16 %v757_v38, %v757_v38  ;;  %v685_v44 = vadd.f32 %v665_v39, %v50_v35  ;;  %v668_v45 = vadd.f32 %v1010_v28, %v667_v42  ;;  %v669_v46 = vpop.f32.mrb[31].mxu1 }
 0x13c   :  { %837 = vst.msk [vmem:[%s1426_s3 + $0x28] sm:$0xf] %vm826_vm2, %v941_v37 }
 0x13d   :  { %v719_v47 = vld [vmem:[#allocation2 + $0x60] sm:$0xff]  ;;  %838 = vst.msk [vmem:[%s1426_s3 + $0x2c] sm:$0xf] %vm826_vm2, %v942_v43  ;;  %v686_v49 = vadd.f32 %v668_v45, %v51_v41 }
 0x13e   :  { %v742_v48 = vadd.f32 %v1327_v27, %v719_v47  ;;  %702 = vst.msk [vmem:[#allocation2 + $0x70] sm:$0xff] %vm19_vm1, %v685_v44  ;;  %v720_v50 = vld [vmem:[#allocation2 + $0x68] sm:$0xff] }
 0x13f   :  { %v743_v52 = vadd.f32 %v1327_v27, %v720_v50  ;;  %703 = vst.msk [vmem:[#allocation2 + $0x78] sm:$0xff] %vm19_vm1, %v686_v49 }
 0x140   :  { %v758_v51 = vmax.f32 %v742_v48, 0.0 }
 0x141   :  { %v759_v54 = vmax.f32 %v743_v52, 0.0 }
 0x142   :  { %v943_v53 = vpack.c.bf16 %v758_v51, %v758_v51 }
 0x143   :  { %v944_v55 = vpack.c.bf16 %v759_v54, %v759_v54 }
 0x144   :  { %839 = vst.msk [vmem:[%s1426_s3 + $0x30] sm:$0xf] %vm826_vm2, %v943_v53 }
 0x145   :  { %v721_v56 = vld [vmem:[#allocation2 + $0x70] sm:$0xff]  ;;  %840 = vst.msk [vmem:[%s1426_s3 + $0x34] sm:$0xf] %vm826_vm2, %v944_v55 }
 0x146   :  { %v744_v57 = vadd.f32 %v1327_v27, %v721_v56  ;;  %v722_v58 = vld [vmem:[#allocation2 + $0x78] sm:$0xff] }
 0x147   :  { %v745_v60 = vadd.f32 %v1327_v27, %v722_v58 }
 0x148   :  { %v760_v59 = vmax.f32 %v744_v57, 0.0 }
 0x149   :  { %v761_v62 = vmax.f32 %v745_v60, 0.0 }
 0x14a   :  { %v945_v61 = vpack.c.bf16 %v760_v59, %v760_v59 }
 0x14b   :  { %v946_v63 = vpack.c.bf16 %v761_v62, %v761_v62 }
 0x14c   :  { %841 = vst.msk [vmem:[%s1426_s3 + $0x38] sm:$0xf] %vm826_vm2, %v945_v61 }
 0x14d   :  { %842 = vst.msk [vmem:[%s1426_s3 + $0x3c] sm:$0xf] %vm826_vm2, %v946_v63 }

// kernel: forward.31
= control target key start
LH: loop header
LB: loop body
LE: loop exit
PB: predicated region body
PF: predicated region fallthrough
CT: control target
= control target key end

     0   :  { %s2715_s23 = smov 0   ;;  %s3116_s0 = inlined_call_operand.vmem [shape: bf16[512,288], index: 0, kind: input, shape index: {}]   ;;  %s3117_s1 = inlined_call_operand.vmem [shape: bf16[288,8], index: 1, kind: input, shape index: {}]   ;;  %s3118_s2 = inlined_call_operand.vmem [shape: f32[1,8], index: 2, kind: input, shape index: {}]   ;;  %s3119_s3 = inlined_call_operand.vmem [shape: bf16[1,8], index: 3, kind: input, shape index: {}]   ;;  %s3120_s4 = inlined_call_operand.<no memory space> [shape: f32[1,1], index: 4, kind: input, shape index: {}]   ;;  %s3121_s5 = inlined_call_operand.vmem [shape: bf16[512,4], index: 5, kind: input, shape index: {}]   ;;  %s3122_s6 = inlined_call_operand.vmem [shape: bf16[512,4], index: 6, kind: output, shape index: {}]  }
   0x1   :  { %v11_v0 = vstv %s3120_s4 }
   0x2   :  { %12 = vst [vmem:[#allocation2] sm:$0x1] %v11_v0 }
   0x3 LB: > { %s1992_s24 = sadd.s32 4294967295, %s2674_s23   ;;  %p1996_p0 = scmp.ge.s32.totalorder %s2674_s23, 1  ;;  %s2674_s23 = sphi %s2715_s23, %s18_s23  }
   0x4   : > { %p227_p1 = scmp.lt.s32.totalorder %s2674_s23, 3 }
   0x6   : > { %p228_p2 = pnand %p1996_p0, %p227_p1 }
   0x7   : > { %v2458_v1 = vld [vmem:[%s3117_s1 + $0x40] sm:$0xff] (!%p228_p2)   ;;  %s1997_s4 = sshll.u32 (!%p228_p2), %s1992_s24, 5  ;;  %v2460_v3 = vld [vmem:[%s3117_s1 + $0x48] sm:$0xff] (!%p228_p2)   ;;  %v2462_v5 = vld [vmem:[%s3117_s1 + $0x50] sm:$0xff] (!%p228_p2)   ;;  %vm738_vm0 = vcmask (!%p228_p2), 261120   ;;  %vm1179_vm1 = vcmask (!%p228_p2), 64512  }
   0x8   : > { %231 = sbr.rel (%p228_p2) target bundleno = 672 (0x2a0), region = 44  ;;  %v2459_v2 = vld [vmem:[%s3117_s1] sm:$0xff] (!%p228_p2)   ;;  %2264 = vmatprep.subr.bf16.mxu0 (!%p228_p2), %v2458_v1  ;;  %2430 = vmatprep.subr.bf16.mxu1 (!%p228_p2), %v2458_v1  ;;  %p264_p3 = scmp.lt.s32.totalorder (!%p228_p2), %s1997_s4, 63  ;;  %v2461_v4 = vld [vmem:[%s3117_s1 + $0x8] sm:$0xff] (!%p228_p2)   ;;  %v2463_v6 = vld [vmem:[%s3117_s1 + $0x10] sm:$0xff] (!%p228_p2)   ;;  %vm1891_vm2 = vcmask (!%p228_p2), 27648  }
   0x9   : > { %2265 = vmatpush3.bf16.msra.mxu0 (!%p228_p2), %v2459_v2  ;;  %2438 = vmatpush3.bf16.msra.mxu1 (!%p228_p2), %v2459_v2  ;;  %v2464_v7 = vld [vmem:[%s3117_s1 + $0x58] sm:$0xff] (!%p228_p2)   ;;  %v2466_v9 = vld [vmem:[%s3117_s1 + $0x60] sm:$0xff] (!%p228_p2)   ;;  %v2468_v11 = vld [vmem:[%s3117_s1 + $0x68] sm:$0xff] (!%p228_p2)  }
   0xa   : > { %2266 = vmatprep.subr.bf16.mxu0 (!%p228_p2), %v2460_v3  ;;  %2431 = vmatprep.subr.bf16.mxu1 (!%p228_p2), %v2460_v3  ;;  %v2465_v8 = vld [vmem:[%s3117_s1 + $0x18] sm:$0xff] (!%p228_p2)   ;;  %v2467_v10 = vld [vmem:[%s3117_s1 + $0x20] sm:$0xff] (!%p228_p2)   ;;  %v2469_v14 = vld [vmem:[%s3117_s1 + $0x28] sm:$0xff] (!%p228_p2)  }
   0xb   : > { %v2470_v15 = vld [vmem:[%s3117_s1 + $0x70] sm:$0xff] (!%p228_p2)   ;;  %v2472_v17 = vld [vmem:[%s3117_s1 + $0x78] sm:$0xff] (!%p228_p2)   ;;  %v2480_v19 = vld [vmem:[%s3117_s1 + $0x80] sm:$0xff] (!%p228_p2)  }
   0xc   : > { %v2471_v16 = vld [vmem:[%s3117_s1 + $0x30] sm:$0xff] (!%p228_p2)   ;;  %v2473_v18 = vld [vmem:[%s3117_s1 + $0x38] sm:$0xff] (!%p228_p2)   ;;  %v2493_v24 = vld [vmem:[%s3117_s1 + $0x88] sm:$0xff] (!%p228_p2)  }
   0xd   : > { %2267 = vmatpush3.bf16.msra.mxu0 (!%p228_p2), %v2461_v4  ;;  %2439 = vmatpush3.bf16.msra.mxu1 (!%p228_p2), %v2461_v4 }
   0xe   : > { %2268 = vmatprep.subr.bf16.mxu0 (!%p228_p2), %v2462_v5  ;;  %2432 = vmatprep.subr.bf16.mxu1 (!%p228_p2), %v2462_v5 }
   0xf   : > { %s3124_s4 = smov (!%p264_p3, %s1997_s4), 63 }
  0x10   : > { %s2446_s15 = smul.u32 12, %s3124_s4 }
  0x11   : > { %2269 = vmatpush3.bf16.msra.mxu0 %v2463_v6  ;;  %2440 = vmatpush3.bf16.msra.mxu1 %v2463_v6 }
  0x12   : > { %2270 = vmatprep.subr.bf16.mxu0 %v2464_v7  ;;  %2433 = vmatprep.subr.bf16.mxu1 %v2464_v7  ;;  %s2756_s22 = scalar_lea.vmem %s3116_s0, %s2446_s15 }
  0x13   : > { %v2476_v12 = vld [vmem:[%s2756_s22 + $0x4] ss:$12 sps:$4 sm:$0xff]   ;;  %v2474_v20 = vld [vmem:[%s2756_s22] ss:$12 sps:$4 sm:$0xff]   ;;  %v2481_v22 = vld [vmem:[%s2756_s22 + $0x1c] ss:$12 sps:$4 sm:$0xff]  }
  0x14   : > { %v2479_v13 = vld [vmem:[%s2756_s22 + $0x124] ss:$12 sps:$4 sm:$0xff]   ;;  %819 = vmatprep.mubr.bf16.mxu0 %v2476_v12  ;;  %v2477_v21 = vld [vmem:[%s2756_s22 + $0x120] ss:$12 sps:$4 sm:$0xff]   ;;  %v2483_v23 = vld [vmem:[%s2756_s22 + $0x13c] ss:$12 sps:$4 sm:$0xff]  }
  0x15   : > { %2271 = vmatpush3.bf16.msra.mxu0 %v2465_v8  ;;  %2441 = vmatpush3.bf16.msra.mxu1 %v2465_v8  ;;  %v2485_v25 = vld [vmem:[%s2756_s22 + $0x18] ss:$12 sps:$4 sm:$0xff]   ;;  %v2487_v27 = vld [vmem:[%s2756_s22 + $0x34] ss:$12 sps:$4 sm:$0xff]   ;;  %v2491_v29 = vld [vmem:[%s2756_s22 + $0x30] ss:$12 sps:$4 sm:$0xff]  }
  0x16   : > { %2272 = vmatprep.subr.bf16.mxu0 %v2466_v9  ;;  %2434 = vmatprep.subr.bf16.mxu1 %v2466_v9  ;;  %v2486_v26 = vld [vmem:[%s2756_s22 + $0x138] ss:$12 sps:$4 sm:$0xff]   ;;  %v2489_v28 = vld [vmem:[%s2756_s22 + $0x154] ss:$12 sps:$4 sm:$0xff]   ;;  %v2492_v30 = vld [vmem:[%s2756_s22 + $0x150] ss:$12 sps:$4 sm:$0xff]  }
  0x17   : > { %915 = vmatprep.mubr.bf16.mxu1 %v2479_v13  ;;  %v2494_v31 = vld [vmem:[%s2756_s22 + $0x4c] ss:$12 sps:$4 sm:$0xff]   ;;  %v2498_v33 = vld [vmem:[%s2756_s22 + $0x48] ss:$12 sps:$4 sm:$0xff]   ;;  %v2500_v35 = vld [vmem:[%s2756_s22 + $0x64] ss:$12 sps:$4 sm:$0xff]  }
  0x18   : > { %v2496_v32 = vld [vmem:[%s2756_s22 + $0x16c] ss:$12 sps:$4 sm:$0xff]   ;;  %v2499_v34 = vld [vmem:[%s2756_s22 + $0x168] ss:$12 sps:$4 sm:$0xff]   ;;  %v2509_v42 = vld [vmem:[%s2756_s22 + $0x50] ss:$12 sps:$4 sm:$0xff]  }
  0x19   : > { %2273 = vmatpush3.bf16.msra.mxu0 %v2467_v10  ;;  %2442 = vmatpush3.bf16.msra.mxu1 %v2467_v10  ;;  %v2502_v36 = vld [vmem:[%s2756_s22 + $0x8] ss:$12 sps:$4 sm:$0xff]   ;;  %v2503_v37 = vld [vmem:[%s2756_s22 + $0x60] ss:$12 sps:$4 sm:$0xff]   ;;  %v2507_v40 = vld [vmem:[%s2756_s22 + $0x38] ss:$12 sps:$4 sm:$0xff]  }
  0x1a   : > { %2274 = vmatprep.subr.bf16.mxu0 %v2468_v11  ;;  %2435 = vmatprep.subr.bf16.mxu1 %v2468_v11  ;;  %v2504_v38 = vld [vmem:[%s2756_s22 + $0x20] ss:$12 sps:$4 sm:$0xff]   ;;  %v2505_v39 = vld [vmem:[%s2756_s22 + $0x7c] ss:$12 sps:$4 sm:$0xff]   ;;  %v2508_v41 = vld [vmem:[%s2756_s22 + $0x78] ss:$12 sps:$4 sm:$0xff]  }
  0x1b   : > { %v2510_v43 = vld [vmem:[%s2756_s22 + $0x94] ss:$12 sps:$4 sm:$0xff]   ;;  %v2513_v45 = vld [vmem:[%s2756_s22 + $0x90] ss:$12 sps:$4 sm:$0xff]   ;;  %v2515_v47 = vld [vmem:[%s2756_s22 + $0xac] ss:$12 sps:$4 sm:$0xff]  }
  0x1c   : > { %v2512_v44 = vld [vmem:[%s2756_s22 + $0x68] ss:$12 sps:$4 sm:$0xff]   ;;  %v2514_v46 = vld [vmem:[%s2756_s22 + $0x80] ss:$12 sps:$4 sm:$0xff]   ;;  %v2517_v48 = vld [vmem:[%s2756_s22 + $0x98] ss:$12 sps:$4 sm:$0xff]  }
  0x1d   : > { %2275 = vmatpush3.bf16.msra.mxu0 %v2469_v14  ;;  %2443 = vmatpush3.bf16.msra.mxu1 %v2469_v14  ;;  %v2518_v49 = vld [vmem:[%s2756_s22 + $0xa8] ss:$12 sps:$4 sm:$0xff]   ;;  %v2519_v50 = vld [vmem:[%s2756_s22 + $0xb0] ss:$12 sps:$4 sm:$0xff]   ;;  %v2523_v53 = vld [vmem:[%s2756_s22 + $0xc0] ss:$12 sps:$4 sm:$0xff]  }
  0x1e   : > { %2276 = vmatprep.subr.bf16.mxu0 %v2470_v15  ;;  %2436 = vmatprep.subr.bf16.mxu1 %v2470_v15  ;;  %v2520_v51 = vld [vmem:[%s2756_s22 + $0xc4] ss:$12 sps:$4 sm:$0xff]   ;;  %v2522_v52 = vld [vmem:[%s2756_s22 + $0xc8] ss:$12 sps:$4 sm:$0xff]   ;;  %v2524_v54 = vld [vmem:[%s2756_s22 + $0xe0] ss:$12 sps:$4 sm:$0xff]  }
  0x1f   : > { %v2525_v55 = vld [vmem:[%s2756_s22 + $0xdc] ss:$12 sps:$4 sm:$0xff]   ;;  %v2527_v56 = vld [vmem:[%s2756_s22 + $0xf8] ss:$12 sps:$4 sm:$0xff]   ;;  %v2530_v59 = vld [vmem:[%s2756_s22 + $0xf4] ss:$12 sps:$4 sm:$0xff]  }
  0x20   : > { %v2528_v57 = vld [vmem:[%s2756_s22 + $0xd8] ss:$12 sps:$4 sm:$0xff]   ;;  %v2529_v58 = vld [vmem:[%s2756_s22 + $0x110] ss:$12 sps:$4 sm:$0xff]   ;;  %v2532_v60 = vld [vmem:[%s2756_s22 + $0x128] ss:$12 sps:$4 sm:$0xff]  }
  0x21   : > { %2277 = vmatpush3.bf16.msra.mxu0 %v2471_v16  ;;  %2444 = vmatpush3.bf16.msra.mxu1 %v2471_v16  ;;  %v2533_v61 = vld [vmem:[%s2756_s22 + $0xf0] ss:$12 sps:$4 sm:$0xff]   ;;  %v2534_v62 = vld [vmem:[%s2756_s22 + $0x140] ss:$12 sps:$4 sm:$0xff]   ;;  %v2537_v0 = vld [vmem:[%s2756_s22 + $0x158] ss:$12 sps:$4 sm:$0xff]  }
  0x22   : > { %2278 = vmatprep.subr.bf16.mxu0 %v2472_v17  ;;  %2437 = vmatprep.subr.bf16.mxu1 %v2472_v17  ;;  %v2535_v63 = vld [vmem:[%s2756_s22 + $0x10c] ss:$12 sps:$4 sm:$0xff]   ;;  %v2538_v1 = vld [vmem:[%s2756_s22 + $0x108] ss:$12 sps:$4 sm:$0xff]   ;;  %v2539_v2 = vld [vmem:[%s2756_s22 + $0x170] ss:$12 sps:$4 sm:$0xff]  }
  0x23   : > { %s2000_s22 = sshll.u32 %s3124_s4, 2 }
  0x24   : > { %s3026_s26 = scalar_lea.vmem %s3121_s5, %s2000_s22  ;;  %s3033_s4 = scalar_lea.vmem %s3122_s6, %s2000_s22 }
  0x25   : > { %2279 = vmatpush3.bf16.msra.mxu0 %v2473_v18  ;;  %2445 = vmatpush3.bf16.msra.mxu1 %v2473_v18 }
  0x26   : > { %2394 = vmatprep.subr.bf16.mxu1 %v2480_v19 }
  0x28   : > { %820 = vmatmul.mubr.bf16.vlgmr.msra.gmra.mrb[0].mxu0 %v2474_v20  ;;  %916 = vmatmul.mubr.bf16.vlgmr.msra.gmra.mrb[0].mxu1 %v2477_v21 }
  0x29   : > { %2395 = vmatpush3.bf16.msra.mxu1 %v2480_v19  ;;  %827 = vmatprep.mubr.bf16.mxu0 %v2481_v22 }
  0x2a   : > { %923 = vmatprep.mubr.bf16.mxu1 %v2483_v23  ;;  %2396 = vmatprep.subr.bf16.mxu1 %v2493_v24 }
  0x2d   : > { %2397 = vmatpush3.bf16.msra.mxu1 %v2493_v24 }
  0x30   : > { %828 = vmatmul.mubr.bf16.gmra.mrb[4].mxu0 %v2485_v25  ;;  %924 = vmatmul.mubr.bf16.gmra.mrb[4].mxu1 %v2486_v26 }
  0x31   : > { %835 = vmatprep.mubr.bf16.mxu0 %v2487_v27  ;;  %931 = vmatprep.mubr.bf16.mxu1 %v2489_v28 }
  0x38   : > { %836 = vmatmul.mubr.bf16.gmra.mrb[8].mxu0 %v2491_v29  ;;  %932 = vmatmul.mubr.bf16.gmra.mrb[8].mxu1 %v2492_v30 }
  0x39   : > { %843 = vmatprep.mubr.bf16.mxu0 %v2494_v31  ;;  %939 = vmatprep.mubr.bf16.mxu1 %v2496_v32 }
  0x40   : > { %844 = vmatmul.mubr.bf16.gmra.mrb[12].mxu0 %v2498_v33  ;;  %940 = vmatmul.mubr.bf16.gmra.mrb[12].mxu1 %v2499_v34 }
  0x41   : > { %851 = vmatprep.mubr.bf16.mxu0 %v2500_v35  ;;  %2398 = vmatprep.mubr.msk.bf16.mxu1 %vm738_vm0, %v2502_v36 }
  0x48   : > { %852 = vmatmul.mubr.bf16.gmra.mrb[16].mxu0 %v2503_v37  ;;  %2399 = vmatmul.mubr.msk.bf16.vlgmr.msra.gmra.mrb[16].mxu1 %vm738_vm0, %v2504_v38 }
  0x49   : > { %859 = vmatprep.mubr.bf16.mxu0 %v2505_v39  ;;  %2402 = vmatprep.mubr.msk.bf16.mxu1 %vm738_vm0, %v2507_v40  ;;  %v1143_v39 = vlaneseq }
  0x50   : > { %860 = vmatmul.mubr.bf16.gmra.mrb[20].mxu0 %v2508_v41  ;;  %2403 = vmatmul.mubr.msk.bf16.gmra.mrb[20].mxu1 %vm738_vm0, %v2509_v42 }
  0x51   : > { %867 = vmatprep.mubr.bf16.mxu0 %v2510_v43  ;;  %2406 = vmatprep.mubr.msk.bf16.mxu1 %vm738_vm0, %v2512_v44  ;;  %v1144_v44 = vshrl.u32 %v1143_v39, 7 }
  0x58   : > { %868 = vmatmul.mubr.bf16.gmra.mrb[24].mxu0 %v2513_v45  ;;  %2407 = vmatmul.mubr.msk.bf16.gmra.mrb[24].mxu1 %vm738_vm0, %v2514_v46 }
  0x59   : > { %875 = vmatprep.mubr.bf16.mxu0 %v2515_v47  ;;  %2410 = vmatprep.mubr.msk.bf16.mxu1 %vm738_vm0, %v2517_v48 }
  0x60   : > { %876 = vmatmul.mubr.bf16.gmra.mrb[28].mxu0 %v2518_v49  ;;  %2411 = vmatmul.mubr.msk.bf16.gmra.mrb[28].mxu1 %vm738_vm0, %v2519_v50  ;;  %v1141_v49 = vld [vmem:[%s3119_s3] sm:$0x1] }
  0x61   : > { %883 = vmatprep.mubr.bf16.mxu0 %v2520_v51  ;;  %2414 = vmatprep.mubr.msk.bf16.mxu1 %vm738_vm0, %v2522_v52 }
  0x68   : > { %884 = vmatmul.mubr.bf16.gmra.mrb[32].mxu0 %v2523_v53  ;;  %2415 = vmatmul.mubr.msk.bf16.gmra.mrb[32].mxu1 %vm738_vm0, %v2524_v54  ;;  %v2873_v54 = vld [vmem:[%s3118_s2] ss:$0 sm:$0xff] }
  0x69   : > { %891 = vmatprep.mubr.bf16.mxu0 %v2525_v55  ;;  %2418 = vmatprep.mubr.msk.bf16.mxu1 %vm738_vm0, %v2527_v56  ;;  %v1142_v55 = vunpack.c.l.bf16 %v1141_v49  ;;  %v1145_v56 = vsub.s32 0, %v1144_v44 }
  0x70   : > { %892 = vmatmul.mubr.bf16.gmra.mrb[36].mxu0 %v2528_v57  ;;  %2419 = vmatmul.mubr.msk.bf16.gmra.mrb[36].mxu1 %vm738_vm0, %v2529_v58 }
  0x71   : > { %899 = vmatprep.mubr.bf16.mxu0 %v2530_v59  ;;  %2422 = vmatprep.mubr.msk.bf16.mxu1 %vm738_vm0, %v2532_v60 }
  0x78   : > { %900 = vmatmul.mubr.bf16.gmra.mrb[40].mxu0 %v2533_v61  ;;  %2423 = vmatmul.mubr.msk.bf16.gmra.mrb[40].mxu1 %vm738_vm0, %v2534_v62 }
  0x79   : > { %907 = vmatprep.mubr.bf16.mxu0 %v2535_v63  ;;  %2426 = vmatprep.mubr.msk.bf16.mxu1 %vm738_vm0, %v2537_v0 }
  0x80   : > { %908 = vmatmul.mubr.bf16.gmra.mrb[44].mxu0 %v2538_v1  ;;  %2427 = vmatmul.mubr.msk.bf16.gmra.mrb[44].mxu1 %vm738_vm0, %v2539_v2  ;;  %v2878_v1 = vrot.slane %v1142_v55, %v1145_v56 }
  0xfb   : > { %v2280_v3 = vpop.f32.mrb[0].mxu0  ;;  %v2352_v4 = vpop.f32.mrb[0].mxu1 }
  0xfc   : > { %v2281_v5 = vpop.f32.mrb[1].mxu0  ;;  %v2353_v6 = vpop.f32.mrb[1].mxu1 }
  0xfd   : > { %v2282_v7 = vadd.f32 %v2281_v5, %v2280_v3  ;;  %v2849_v8 = vadd.f32 %v2353_v6, %v2352_v4  ;;  %v2283_v9 = vpop.f32.mrb[2].mxu0  ;;  %v2355_v10 = vpop.f32.mrb[2].mxu1 }
  0xfe   : > { %v2284_v11 = vpop.f32.mrb[3].mxu0  ;;  %v2356_v12 = vpop.f32.mrb[3].mxu1 }
  0xff   : > { %v2285_v13 = vadd.f32 %v2284_v11, %v2283_v9  ;;  %v2851_v14 = vadd.f32 %v2356_v12, %v2355_v10  ;;  %v822_v60 = vadd.f32 %v2282_v7, %v2873_v54 }
 0x101   : > { %v825_v6 = vadd.f32 %v2285_v13, %v2873_v54 }
 0x103   : > { %v2286_v15 = vpop.f32.mrb[4].mxu0  ;;  %v2358_v16 = vpop.f32.mrb[4].mxu1 }
 0x104   : > { %v2287_v17 = vpop.f32.mrb[5].mxu0  ;;  %v2359_v18 = vpop.f32.mrb[5].mxu1 }
 0x105   : > { %v2288_v19 = vadd.f32 %v2287_v17, %v2286_v15  ;;  %v2853_v20 = vadd.f32 %v2359_v18, %v2358_v16  ;;  %v2289_v21 = vpop.f32.mrb[6].mxu0  ;;  %v2361_v22 = vpop.f32.mrb[6].mxu1 }
 0x106   : > { %v2290_v23 = vpop.f32.mrb[7].mxu0  ;;  %v2362_v24 = vpop.f32.mrb[7].mxu1 }
 0x107   : > { %v2291_v25 = vadd.f32 %v2290_v23, %v2289_v21  ;;  %v2855_v26 = vadd.f32 %v2362_v24, %v2361_v22  ;;  %v830_v57 = vadd.f32 %v2288_v19, %v2873_v54 }
 0x109   : > { %v833_v0 = vadd.f32 %v2291_v25, %v2873_v54 }
 0x10b   : > { %v2292_v27 = vpop.f32.mrb[8].mxu0  ;;  %v2364_v28 = vpop.f32.mrb[8].mxu1 }
 0x10c   : > { %v2293_v29 = vpop.f32.mrb[9].mxu0  ;;  %v2365_v30 = vpop.f32.mrb[9].mxu1 }
 0x10d   : > { %v2294_v31 = vadd.f32 %v2293_v29, %v2292_v27  ;;  %v2857_v32 = vadd.f32 %v2365_v30, %v2364_v28  ;;  %v2295_v33 = vpop.f32.mrb[10].mxu0  ;;  %v2367_v34 = vpop.f32.mrb[10].mxu1 }
 0x10e   : > { %v2296_v35 = vpop.f32.mrb[11].mxu0  ;;  %v2368_v36 = vpop.f32.mrb[11].mxu1 }
 0x10f   : > { %v2859_v37 = vadd.f32 %v2296_v35, %v2295_v33  ;;  %v2861_v38 = vadd.f32 %v2368_v36, %v2367_v34  ;;  %v838_v27 = vadd.f32 %v2294_v31, %v2873_v54 }
 0x113   : > { %v2298_v40 = vpop.f32.mrb[12].mxu0  ;;  %v2370_v41 = vpop.f32.mrb[12].mxu1 }
 0x114   : > { %v2299_v42 = vpop.f32.mrb[13].mxu0  ;;  %v2371_v43 = vpop.f32.mrb[13].mxu1 }
 0x115   : > { %v2300_v45 = vadd.f32 %v2299_v42, %v2298_v40  ;;  %v2863_v46 = vadd.f32 %v2371_v43, %v2370_v41  ;;  %v2301_v47 = vpop.f32.mrb[14].mxu0  ;;  %v2373_v48 = vpop.f32.mrb[14].mxu1  ;;  %v841_v42 = vadd.f32 %v2859_v37, %v2873_v54 }
 0x116   : > { %v2302_v50 = vpop.f32.mrb[15].mxu0  ;;  %v2374_v51 = vpop.f32.mrb[15].mxu1 }
 0x117   : > { %v2303_v52 = vadd.f32 %v2302_v50, %v2301_v47  ;;  %v2868_v53 = vadd.f32 %v2374_v51, %v2373_v48  ;;  %v846_v22 = vadd.f32 %v2300_v45, %v2873_v54 }
 0x119   : > { %v849_v35 = vadd.f32 %v2303_v52, %v2873_v54 }
 0x11b   : > { %v2304_v58 = vpop.f32.mrb[16].mxu0  ;;  %v2400_v59 = vpop.f32.mrb[16].mxu1 }
 0x11c   : > { %v991_v61 = vadd.f32 %v2400_v59, %v830_v57  ;;  %v2305_v62 = vpop.f32.mrb[17].mxu0  ;;  %v982_v63 = vpop.f32.mrb[17].mxu1 }
 0x11d   : > { %v2306_v2 = vadd.f32 %v2305_v62, %v2304_v58  ;;  %v983_v3 = vadd.f32 %v982_v63, %v822_v60  ;;  %v2307_v4 = vpop.f32.mrb[18].mxu0  ;;  %v2401_v5 = vpop.f32.mrb[18].mxu1 }
 0x11e   : > { %v1111_v9 = vmax.f32 %v991_v61, 0.0  ;;  %v994_v10 = vadd.f32 %v2401_v5, %v833_v0  ;;  %v2308_v11 = vpop.f32.mrb[19].mxu0  ;;  %v985_v12 = vpop.f32.mrb[19].mxu1 }
 0x11f   : > { %v1109_v15 = vmax.f32 %v983_v3, 0.0  ;;  %v2309_v16 = vadd.f32 %v2308_v11, %v2307_v4  ;;  %v986_v7 = vadd.f32 %v985_v12, %v825_v6  ;;  %v854_v61 = vadd.f32 %v2306_v2, %v2873_v54 }
 0x120   : > { %v1112_v17 = vmax.f32 %v994_v10, 0.0  ;;  %v1149_v18 = vmul.f32 %v2878_v1, %v1111_v9 }
 0x121   : > { %v1110_v19 = vmax.f32 %v986_v7, 0.0  ;;  %v1147_v21 = vmul.f32 %v2878_v1, %v1109_v15  ;;  %v857_v15 = vadd.f32 %v2309_v16, %v2873_v54 }
 0x122   : > { %v1186_v23 = vsel %vm1179_vm1, %v1149_v18, 0.0  ;;  %v1150_v13 = vmul.f32 %v2878_v1, %v1112_v17 }
 0x123   : > { %v2310_v24 = vpop.f32.mrb[20].mxu0  ;;  %v2404_v25 = vpop.f32.mrb[20].mxu1  ;;  %1187 = vadd.xlane.f32.xlu1 %v1186_v23  ;;  %v1180_v28 = vsel %vm1179_vm1, %v1147_v21, 0.0  ;;  %v1148_v29 = vmul.f32 %v2878_v1, %v1110_v19 }
 0x124   : > { %v1007_v30 = vadd.f32 %v2404_v25, %v846_v22  ;;  %v2311_v33 = vpop.f32.mrb[21].mxu0  ;;  %v998_v34 = vpop.f32.mrb[21].mxu1  ;;  %1181 = vadd.xlane.f32.xlu0 %v1180_v28  ;;  %v1189_v47 = vsel %vm1179_vm1, %v1150_v13, 0.0 }
 0x125   : > { %v2312_v36 = vadd.f32 %v2311_v33, %v2310_v24  ;;  %v999_v39 = vadd.f32 %v998_v34, %v838_v27  ;;  %v2313_v40 = vpop.f32.mrb[22].mxu0  ;;  %v2405_v41 = vpop.f32.mrb[22].mxu1  ;;  %v1183_v51 = vsel %vm1179_vm1, %v1148_v29, 0.0 }
 0x126   : > { %v1115_v43 = vmax.f32 %v1007_v30, 0.0  ;;  %v1010_v44 = vadd.f32 %v2405_v41, %v849_v35  ;;  %v2314_v31 = vpop.f32.mrb[23].mxu0  ;;  %v1001_v45 = vpop.f32.mrb[23].mxu1 }
 0x127   : > { %v1113_v48 = vmax.f32 %v999_v39, 0.0  ;;  %v2315_v49 = vadd.f32 %v2314_v31, %v2313_v40  ;;  %v1002_v50 = vadd.f32 %v1001_v45, %v841_v42  ;;  %1190 = vadd.xlane.f32.xlu1 %v1189_v47  ;;  %v862_v57 = vadd.f32 %v2312_v36, %v2873_v54 }
 0x128   : > { %v1116_v52 = vmax.f32 %v1010_v44, 0.0  ;;  %1184 = vadd.xlane.f32.xlu0 %v1183_v51  ;;  %v1153_v55 = vmul.f32 %v2878_v1, %v1115_v43 }
 0x129   : > { %v1114_v56 = vmax.f32 %v1002_v50, 0.0  ;;  %v1151_v62 = vmul.f32 %v2878_v1, %v1113_v48  ;;  %v865_v4 = vadd.f32 %v2315_v49, %v2873_v54 }
 0x12a   : > { %v1198_v37 = vsel %vm1179_vm1, %v1153_v55, 0.0  ;;  %v1154_v58 = vmul.f32 %v2878_v1, %v1116_v52 }
 0x12b   : > { %v2316_v59 = vpop.f32.mrb[24].mxu0  ;;  %v2408_v60 = vpop.f32.mrb[24].mxu1  ;;  %v1152_v6 = vmul.f32 %v2878_v1, %v1114_v56  ;;  %v1192_v23 = vsel %vm1179_vm1, %v1151_v62, 0.0 }
 0x12c   : > { %v1023_v63 = vadd.f32 %v2408_v60, %v862_v57  ;;  %v2317_v0 = vpop.f32.mrb[25].mxu0  ;;  %v1014_v3 = vpop.f32.mrb[25].mxu1  ;;  %1199 = vadd.xlane.f32.xlu0 %v1198_v37  ;;  %v1201_v5 = vsel %vm1179_vm1, %v1154_v58, 0.0 }
 0x12d   : > { %v2318_v9 = vadd.f32 %v2317_v0, %v2316_v59  ;;  %v1015_v10 = vadd.f32 %v1014_v3, %v854_v61  ;;  %v2319_v11 = vpop.f32.mrb[26].mxu0  ;;  %v2409_v12 = vpop.f32.mrb[26].mxu1  ;;  %1202 = vadd.xlane.f32.xlu1 %v1201_v5  ;;  %v1195_v24 = vsel %vm1179_vm1, %v1152_v6, 0.0 }
 0x12e   : > { %v1119_v2 = vmax.f32 %v1023_v63, 0.0  ;;  %v1026_v7 = vadd.f32 %v2409_v12, %v865_v4  ;;  %v2320_v17 = vpop.f32.mrb[27].mxu0  ;;  %v1017_v18 = vpop.f32.mrb[27].mxu1 }
 0x12f   : > { %v1117_v19 = vmax.f32 %v1015_v10, 0.0  ;;  %v2321_v21 = vadd.f32 %v2320_v17, %v2319_v11  ;;  %v1018_v22 = vadd.f32 %v1017_v18, %v857_v15  ;;  %v870_v34 = vadd.f32 %v2318_v9, %v2873_v54 }
 0x130   : > { %v1120_v13 = vmax.f32 %v1026_v7, 0.0  ;;  %1193 = vadd.xlane.f32.xlu0 %v1192_v23  ;;  %v1157_v25 = vmul.f32 %v2878_v1, %v1119_v2 }
 0x131   : > { %v1118_v27 = vmax.f32 %v1018_v22, 0.0  ;;  %1196 = vadd.xlane.f32.xlu1 %v1195_v24  ;;  %v1155_v29 = vmul.f32 %v2878_v1, %v1117_v19  ;;  %v873_v31 = vadd.f32 %v2321_v21, %v2873_v54 }
 0x132   : > { %v1210_v28 = vsel %vm1179_vm1, %v1157_v25, 0.0  ;;  %v1158_v16 = vmul.f32 %v2878_v1, %v1120_v13 }
 0x133   : > { %v2322_v30 = vpop.f32.mrb[28].mxu0  ;;  %v2412_v33 = vpop.f32.mrb[28].mxu1  ;;  %v1156_v40 = vmul.f32 %v2878_v1, %v1118_v27  ;;  %v1204_v48 = vsel %vm1179_vm1, %v1155_v29, 0.0 }
 0x134   : > { %v2323_v35 = vpop.f32.mrb[29].mxu0  ;;  %v1030_v36 = vpop.f32.mrb[29].mxu1  ;;  %1211 = vadd.xlane.f32.xlu0 %v1210_v28  ;;  %v1213_v39 = vsel %vm1179_vm1, %v1158_v16, 0.0 }
 0x135   : > { %v2324_v41 = vadd.f32 %v2323_v35, %v2322_v30  ;;  %v1031_v42 = vadd.f32 %v1030_v36, %v870_v34  ;;  %v2325_v43 = vpop.f32.mrb[30].mxu0  ;;  %v2413_v44 = vpop.f32.mrb[30].mxu1  ;;  %1214 = vadd.xlane.f32.xlu1 %v1213_v39  ;;  %v1207_v55 = vsel %vm1179_vm1, %v1156_v40, 0.0 }
 0x136   : > { %v2326_v45 = vpop.f32.mrb[31].mxu0  ;;  %v1033_v47 = vpop.f32.mrb[31].mxu1 }
 0x137   : > { %v878_v49 = vadd.f32 %v2324_v41, %v2873_v54  ;;  %v1121_v50 = vmax.f32 %v1031_v42, 0.0  ;;  %v2327_v51 = vadd.f32 %v2326_v45, %v2325_v43  ;;  %v1034_v52 = vadd.f32 %v1033_v47, %v873_v31 }
 0x138   : > { %1205 = vadd.xlane.f32.xlu0 %v1204_v48  ;;  %v926_v47 = vadd.f32 %v2853_v20, %v2873_v54 }
 0x139   : > { %v1039_v56 = vadd.f32 %v2412_v33, %v878_v49  ;;  %v881_v57 = vadd.f32 %v2327_v51, %v2873_v54  ;;  %v1122_v37 = vmax.f32 %v1034_v52, 0.0  ;;  %1208 = vadd.xlane.f32.xlu1 %v1207_v55  ;;  %v1159_v58 = vmul.f32 %v2878_v1, %v1121_v50 }
 0x13a   : > { %v918_v51 = vadd.f32 %v2849_v8, %v2873_v54 }
 0x13b   : > { %v1042_v59 = vadd.f32 %v2413_v44, %v881_v57  ;;  %v2328_v60 = vpop.f32.mrb[32].mxu0  ;;  %v2416_v61 = vpop.f32.mrb[32].mxu1  ;;  %v1216_v62 = vsel %vm1179_vm1, %v1159_v58, 0.0  ;;  %v1160_v63 = vmul.f32 %v2878_v1, %v1122_v37  ;;  %v1123_v0 = vmax.f32 %v1039_v56, 0.0 }
 0x13c   : > { %v2329_v3 = vpop.f32.mrb[33].mxu0  ;;  %v1046_v4 = vpop.f32.mrb[33].mxu1  ;;  %1217 = vadd.xlane.f32.xlu0 %v1216_v62  ;;  %v929_v37 = vadd.f32 %v2855_v26, %v2873_v54  ;;  %v921_v58 = vadd.f32 %v2851_v14, %v2873_v54  ;;  %v2676_v26 = vmov 0  }
 0x13d   : > { %v2330_v5 = vadd.f32 %v2329_v3, %v2328_v60  ;;  %v2331_v6 = vpop.f32.mrb[34].mxu0  ;;  %v2417_v9 = vpop.f32.mrb[34].mxu1  ;;  %v1219_v10 = vsel %vm1179_vm1, %v1160_v63, 0.0  ;;  %v1161_v11 = vmul.f32 %v2878_v1, %v1123_v0  ;;  %v1124_v12 = vmax.f32 %v1042_v59, 0.0  ;;  %2456 = vset.pattern.permute.xlu1 %v2676_v26  ;;  %2457 = vset.pattern.permute.xlu0 %v2676_v26  ;;  %v2988_v26 = vld [vmem:[#allocation2] ss:$0 sm:$0xff] }
 0x13e   : > { %v2332_v15 = vpop.f32.mrb[35].mxu0  ;;  %v1049_v2 = vpop.f32.mrb[35].mxu1  ;;  %1220 = vadd.xlane.f32.xlu1 %v1219_v10 }
 0x13f   : > { %v886_v7 = vadd.f32 %v2330_v5, %v2873_v54  ;;  %v2333_v17 = vadd.f32 %v2332_v15, %v2331_v6  ;;  %v1222_v18 = vsel %vm1179_vm1, %v1161_v11, 0.0  ;;  %v1162_v19 = vmul.f32 %v2878_v1, %v1124_v12 }
 0x140   : > { %1223 = vadd.xlane.f32.xlu0 %v1222_v18 }
 0x141   : > { %v1047_v21 = vadd.f32 %v1046_v4, %v886_v7  ;;  %v889_v22 = vadd.f32 %v2333_v17, %v2873_v54  ;;  %v1225_v23 = vsel %vm1179_vm1, %v1162_v19, 0.0  ;;  %v942_v17 = vadd.f32 %v2863_v46, %v2873_v54 }
 0x142   : > { %1226 = vadd.xlane.f32.xlu1 %v1225_v23  ;;  %v945_v46 = vadd.f32 %v2868_v53, %v2873_v54 }
 0x143   : > { %v1125_v13 = vmax.f32 %v1047_v21, 0.0  ;;  %v1050_v24 = vadd.f32 %v1049_v2, %v889_v22  ;;  %v2334_v25 = vpop.f32.mrb[36].mxu0  ;;  %v2928_v27 = vpop.f32.mrb[36].mxu1 }
 0x144   : > { %v2335_v28 = vpop.f32.mrb[37].mxu0  ;;  %v1062_v16 = vpop.f32.mrb[37].mxu1 }
 0x145   : > { %v1126_v29 = vmax.f32 %v1050_v24, 0.0  ;;  %v2336_v30 = vadd.f32 %v2335_v28, %v2334_v25  ;;  %v2337_v33 = vpop.f32.mrb[38].mxu0  ;;  %v2930_v34 = vpop.f32.mrb[38].mxu1  ;;  %v1163_v35 = vmul.f32 %v2878_v1, %v1125_v13  ;;  %v934_v25 = vadd.f32 %v2857_v32, %v2873_v54 }
 0x146   : > { %v2338_v36 = vpop.f32.mrb[39].mxu0  ;;  %v1065_v39 = vpop.f32.mrb[39].mxu1 }
 0x147   : > { %v894_v40 = vadd.f32 %v2336_v30, %v2873_v54  ;;  %v2339_v41 = vadd.f32 %v2338_v36, %v2337_v33  ;;  %v1228_v42 = vsel %vm1179_vm1, %v1163_v35, 0.0  ;;  %v1164_v43 = vmul.f32 %v2878_v1, %v1126_v29 }
 0x148   : > { %1229 = vadd.xlane.f32.xlu0 %v1228_v42  ;;  %v937_v42 = vadd.f32 %v2861_v38, %v2873_v54 }
 0x149   : > { %v1055_v44 = vadd.f32 %v2416_v61, %v894_v40  ;;  %v897_v31 = vadd.f32 %v2339_v41, %v2873_v54  ;;  %v1231_v45 = vsel %vm1179_vm1, %v1164_v43, 0.0 }
 0x14a   : > { %1232 = vadd.xlane.f32.xlu1 %v1231_v45 }
 0x14b   : > { %v1058_v48 = vadd.f32 %v2417_v9, %v897_v31  ;;  %v2340_v49 = vpop.f32.mrb[40].mxu0  ;;  %v2424_v50 = vpop.f32.mrb[40].mxu1  ;;  %v1127_v52 = vmax.f32 %v1055_v44, 0.0 }
 0x14c   : > { %v1087_v55 = vadd.f32 %v2424_v50, %v926_v47  ;;  %v2341_v56 = vpop.f32.mrb[41].mxu0  ;;  %v1078_v57 = vpop.f32.mrb[41].mxu1 }
 0x14d   : > { %v2342_v59 = vadd.f32 %v2341_v56, %v2340_v49  ;;  %v1079_v60 = vadd.f32 %v1078_v57, %v918_v51  ;;  %v2343_v61 = vpop.f32.mrb[42].mxu0  ;;  %v2425_v20 = vpop.f32.mrb[42].mxu1  ;;  %v1165_v62 = vmul.f32 %v2878_v1, %v1127_v52  ;;  %v1128_v63 = vmax.f32 %v1058_v48, 0.0 }
 0x14e   : > { %v1135_v0 = vmax.f32 %v1087_v55, 0.0  ;;  %v1090_v3 = vadd.f32 %v2425_v20, %v929_v37  ;;  %v2344_v8 = vpop.f32.mrb[43].mxu0  ;;  %v1081_v4 = vpop.f32.mrb[43].mxu1 }
 0x14f   : > { %v902_v5 = vadd.f32 %v2342_v59, %v2873_v54  ;;  %v1133_v6 = vmax.f32 %v1079_v60, 0.0  ;;  %v2345_v9 = vadd.f32 %v2344_v8, %v2343_v61  ;;  %v1082_v10 = vadd.f32 %v1081_v4, %v921_v58 }
 0x150   : > { %v1136_v14 = vmax.f32 %v1090_v3, 0.0  ;;  %v1234_v11 = vsel %vm1179_vm1, %v1165_v62, 0.0  ;;  %v1166_v12 = vmul.f32 %v2878_v1, %v1128_v63  ;;  %v1173_v15 = vmul.f32 %v2878_v1, %v1135_v0 }
 0x151   : > { %v1063_v2 = vadd.f32 %v1062_v16, %v902_v5  ;;  %v905_v7 = vadd.f32 %v2345_v9, %v2873_v54  ;;  %1235 = vadd.xlane.f32.xlu0 %v1234_v11  ;;  %v1134_v18 = vmax.f32 %v1082_v10, 0.0  ;;  %v1171_v28 = vmul.f32 %v2878_v1, %v1133_v6 }
 0x152   : > { %v1237_v19 = vsel %vm1179_vm1, %v1166_v12, 0.0  ;;  %v1258_v21 = vsel %vm1179_vm1, %v1173_v15, 0.0  ;;  %v1174_v22 = vmul.f32 %v2878_v1, %v1136_v14 }
 0x153   : > { %v1066_v23 = vadd.f32 %v1065_v39, %v905_v7  ;;  %1238 = vadd.xlane.f32.xlu1 %v1237_v19  ;;  %v2346_v13 = vpop.f32.mrb[44].mxu0  ;;  %v2428_v24 = vpop.f32.mrb[44].mxu1  ;;  %v1129_v35 = vmax.f32 %v1063_v2, 0.0  ;;  %v1172_v45 = vmul.f32 %v2878_v1, %v1134_v18  ;;  %v1252_v50 = vsel %vm1179_vm1, %v1171_v28, 0.0 }
 0x154   : > { %v1103_v16 = vadd.f32 %v2428_v24, %v942_v17  ;;  %v2347_v29 = vpop.f32.mrb[45].mxu0  ;;  %v1094_v30 = vpop.f32.mrb[45].mxu1  ;;  %v1261_v33 = vsel %vm1179_vm1, %v1174_v22, 0.0 }
 0x155   : > { %v2348_v36 = vadd.f32 %v2347_v29, %v2346_v13  ;;  %v1095_v40 = vadd.f32 %v1094_v30, %v934_v25  ;;  %1259 = vadd.xlane.f32.xlu0 %v1258_v21  ;;  %v2349_v39 = vpop.f32.mrb[46].mxu0  ;;  %v2429_v41 = vpop.f32.mrb[46].mxu1  ;;  %v1130_v47 = vmax.f32 %v1066_v23, 0.0  ;;  %v1167_v55 = vmul.f32 %v2878_v1, %v1129_v35 }
 0x156   : > { %v1139_v32 = vmax.f32 %v1103_v16, 0.0  ;;  %v1106_v43 = vadd.f32 %v2429_v41, %v945_v46  ;;  %v2350_v44 = vpop.f32.mrb[47].mxu0  ;;  %v1097_v31 = vpop.f32.mrb[47].mxu1  ;;  %v1255_v58 = vsel %vm1179_vm1, %v1172_v45, 0.0 }
 0x157   : > { %v910_v53 = vadd.f32 %v2348_v36, %v2873_v54  ;;  %v2351_v48 = vadd.f32 %v2350_v44, %v2349_v39  ;;  %v1098_v49 = vadd.f32 %v1097_v31, %v937_v42  ;;  %1262 = vadd.xlane.f32.xlu1 %v1261_v33  ;;  %v1137_v51 = vmax.f32 %v1095_v40, 0.0 }
 0x158   : > { %v1140_v52 = vmax.f32 %v1106_v43, 0.0  ;;  %v1177_v38 = vmul.f32 %v2878_v1, %v1139_v32  ;;  %v1168_v59 = vmul.f32 %v2878_v1, %v1130_v47 }
 0x159   : > { %v1071_v56 = vadd.f32 %v2928_v27, %v910_v53  ;;  %v913_v57 = vadd.f32 %v2351_v48, %v2873_v54  ;;  %v1138_v37 = vmax.f32 %v1098_v49, 0.0  ;;  %1253 = vadd.xlane.f32.xlu0 %v1252_v50  ;;  %v1240_v27 = vsel %vm1179_vm1, %v1167_v55, 0.0 }
 0x15a   : > { %v1178_v60 = vmul.f32 %v2878_v1, %v1140_v52  ;;  %v1270_v61 = vsel %vm1179_vm1, %v1177_v38, 0.0  ;;  %v1175_v54 = vmul.f32 %v2878_v1, %v1137_v51  ;;  %v1243_v5 = vsel %vm1179_vm1, %v1168_v59, 0.0 }
 0x15b   : > { %v1074_v20 = vadd.f32 %v2930_v34, %v913_v57  ;;  %1256 = vadd.xlane.f32.xlu1 %v1255_v58  ;;  %v1176_v62 = vmul.f32 %v2878_v1, %v1138_v37  ;;  %v1131_v63 = vmax.f32 %v1071_v56, 0.0 }
 0x15c   : > { %v1273_v0 = vsel %vm1179_vm1, %v1178_v60, 0.0  ;;  %v1264_v9 = vsel %vm1179_vm1, %v1175_v54, 0.0 }
 0x15d   : > { %1241 = vadd.xlane.f32.xlu0 %v1240_v27  ;;  %v1267_v3 = vsel %vm1179_vm1, %v1176_v62, 0.0  ;;  %v1169_v8 = vmul.f32 %v2878_v1, %v1131_v63  ;;  %v1132_v4 = vmax.f32 %v1074_v20, 0.0 }
 0x15f   : > { %1244 = vadd.xlane.f32.xlu1 %v1243_v5  ;;  %v1246_v34 = vsel %vm1179_vm1, %v1169_v8, 0.0  ;;  %v1170_v6 = vmul.f32 %v2878_v1, %v1132_v4 }
 0x161   : > { %1265 = vadd.xlane.f32.xlu0 %v1264_v9  ;;  %v1249_v10 = vsel %vm1179_vm1, %v1170_v6, 0.0 }
 0x163   : > { %1268 = vadd.xlane.f32.xlu1 %v1267_v3 }
 0x165   : > { %1247 = vadd.xlane.f32.xlu0 %v1246_v34 }
 0x167   : > { %1274 = vadd.xlane.f32.xlu1 %v1273_v0 }
 0x169   : > { %1271 = vadd.xlane.f32.xlu0 %v1270_v61 }
 0x16b   : > { %1250 = vadd.xlane.f32.xlu1 %v1249_v10 }
 0x1b0   : > { %v1188_v14 = vpop.xlane.xlu1 %1187 }
 0x1b1   : > { %v1285_v11 = vadd.f32 %v2988_v26, %v1188_v14  ;;  %v1182_v12 = vpop.xlane.xlu0 %1181 }
 0x1b2   : > { %v1283_v15 = vadd.f32 %v2988_v26, %v1182_v12 }
 0x1b3   : > { %v2089_v2 = vmul.f32 -1.442695, %v1285_v11 }
 0x1b4   : > { %v2087_v1 = vmul.f32 -1.442695, %v1283_v15  ;;  %v1191_v7 = vpop.xlane.xlu1 %1190 }
 0x1b5   : > { %2540 = vpow2.f32 %v2089_v2  ;;  %v1286_v17 = vadd.f32 %v2988_v26, %v1191_v7  ;;  %v1185_v18 = vpop.xlane.xlu0 %1184 }
 0x1b6   : > { %2542 = vpow2.f32 %v2087_v1  ;;  %v1284_v19 = vadd.f32 %v2988_v26, %v1185_v18 }
 0x1b7   : > { %v2090_v21 = vmul.f32 -1.442695, %v1286_v17 }
 0x1b8   : > { %v2088_v22 = vmul.f32 -1.442695, %v1284_v19 }
 0x1b9   : > { %2544 = vpow2.f32 %v2090_v21  ;;  %v1200_v23 = vpop.xlane.xlu0 %1199 }
 0x1ba   : > { %2546 = vpow2.f32 %v2088_v22  ;;  %v1289_v13 = vadd.f32 %v2988_v26, %v1200_v23  ;;  %v1203_v24 = vpop.xlane.xlu1 %1202 }
 0x1bb   : > { %v1290_v25 = vadd.f32 %v2988_v26, %v1203_v24 }
 0x1bc   : > { %v2093_v28 = vmul.f32 -1.442695, %v1289_v13 }
 0x1bd   : > { %v2094_v16 = vmul.f32 -1.442695, %v1290_v25  ;;  %v1194_v29 = vpop.xlane.xlu0 %1193 }
 0x1be   : > { %2548 = vpow2.f32 %v2093_v28  ;;  %v1287_v30 = vadd.f32 %v2988_v26, %v1194_v29  ;;  %v1197_v46 = vpop.xlane.xlu1 %1196 }
 0x1bf   : > { %v2541_v33 = vpop.eup %2540  ;;  %v1288_v35 = vadd.f32 %v2988_v26, %v1197_v46  ;;  %2550 = vpow2.f32 %v2094_v16 }
 0x1c0   : > { %v2543_v36 = vpop.eup %2542  ;;  %v1413_v40 = vadd.f32 1.0, %v2541_v33  ;;  %v2091_v39 = vmul.f32 -1.442695, %v1287_v30 }
 0x1c1   : > { %v1411_v41 = vadd.f32 1.0, %v2543_v36  ;;  %v1212_v42 = vpop.xlane.xlu0 %1211  ;;  %v2092_v31 = vmul.f32 -1.442695, %v1288_v35 }
 0x1c2   : > { %2552 = vrcp.f32 %v1413_v40  ;;  %v1293_v32 = vadd.f32 %v2988_v26, %v1212_v42  ;;  %v1215_v43 = vpop.xlane.xlu1 %1214 }
 0x1c3   : > { %v2545_v44 = vpop.eup %2544  ;;  %2554 = vrcp.f32 %v1411_v41  ;;  %v1294_v45 = vadd.f32 %v2988_v26, %v1215_v43 }
 0x1c4   : > { %v2547_v47 = vpop.eup %2546  ;;  %v1414_v53 = vadd.f32 1.0, %v2545_v44  ;;  %2556 = vpow2.f32 %v2091_v39  ;;  %v2097_v51 = vmul.f32 -1.442695, %v1293_v32 }
 0x1c5   : > { %v1412_v48 = vadd.f32 1.0, %v2547_v47  ;;  %v2098_v49 = vmul.f32 -1.442695, %v1294_v45  ;;  %v1206_v50 = vpop.xlane.xlu0 %1205 }
 0x1c6   : > { %2558 = vrcp.f32 %v1414_v53  ;;  %v1209_v52 = vpop.xlane.xlu1 %1208  ;;  %v1291_v56 = vadd.f32 %v2988_v26, %v1206_v50 }
 0x1c7   : > { %2560 = vpow2.f32 %v2092_v31  ;;  %v1292_v55 = vadd.f32 %v2988_v26, %v1209_v52 }
 0x1c8   : > { %v2549_v38 = vpop.eup %2548  ;;  %2562 = vrcp.f32 %v1412_v48  ;;  %v2095_v63 = vmul.f32 -1.442695, %v1291_v56 }
 0x1c9   : > { %2564 = vpow2.f32 %v2098_v49  ;;  %v2096_v57 = vmul.f32 -1.442695, %v1292_v55  ;;  %v1218_v37 = vpop.xlane.xlu0 %1217  ;;  %v1417_v58 = vadd.f32 1.0, %v2549_v38  ;;  %v2551_v59 = vpop.eup %2550 }
 0x1ca   : > { %2566 = vpow2.f32 %v2097_v51  ;;  %v1295_v27 = vadd.f32 %v2988_v26, %v1218_v37  ;;  %v1418_v8 = vadd.f32 1.0, %v2551_v59 }
 0x1cb   : > { %v1221_v60 = vpop.xlane.xlu1 %1220  ;;  %2568 = vpow2.f32 %v2096_v57 }
 0x1cc   : > { %v2553_v61 = vpop.eup %2552  ;;  %v1296_v20 = vadd.f32 %v2988_v26, %v1221_v60  ;;  %2570 = vrcp.f32 %v1417_v58  ;;  %v2099_v14 = vmul.f32 -1.442695, %v1295_v27 }
 0x1cd   : > { %v2555_v62 = vpop.eup %2554  ;;  %1583 = vperm.xlu1 %2456, %v2553_v61   ;;  %v1224_v54 = vpop.xlane.xlu0 %1223 }
 0x1ce   : > { %v2557_v0 = vpop.eup %2556  ;;  %v2100_v3 = vmul.f32 -1.442695, %v1296_v20  ;;  %1573 = vperm.xlu0 %2457, %v2555_v62   ;;  %v1297_v6 = vadd.f32 %v2988_v26, %v1224_v54 }
 0x1cf   : > { %v1415_v4 = vadd.f32 1.0, %v2557_v0  ;;  %v1227_v5 = vpop.xlane.xlu1 %1226 }
 0x1d0   : > { %v2559_v34 = vpop.eup %2558  ;;  %2572 = vpow2.f32 %v2100_v3  ;;  %v1298_v9 = vadd.f32 %v2988_v26, %v1227_v5  ;;  %v2101_v7 = vmul.f32 -1.442695, %v1297_v6 }
 0x1d1   : > { %v2561_v10 = vpop.eup %2560  ;;  %2574 = vpow2.f32 %v2095_v63  ;;  %1588 = vperm.xlu1 %2456, %v2559_v34  }
 0x1d2   : > { %v2563_v11 = vpop.eup %2562  ;;  %2576 = vrcp.f32 %v1415_v4  ;;  %v2102_v12 = vmul.f32 -1.442695, %v1298_v9  ;;  %v1416_v17 = vadd.f32 1.0, %v2561_v10 }
 0x1d3   : > { %v2565_v15 = vpop.eup %2564  ;;  %2578 = vrcp.f32 %v1418_v8 }
 0x1d4   : > { %v2567_v2 = vpop.eup %2566  ;;  %v1422_v1 = vadd.f32 1.0, %v2565_v15  ;;  %2580 = vpow2.f32 %v2102_v12 }
 0x1d5   : > { %2582 = vpow2.f32 %v2099_v14  ;;  %1578 = vperm.xlu1 %2456, %v2563_v11   ;;  %v1230_v18 = vpop.xlane.xlu0 %1229  ;;  %v2569_v21 = vpop.eup %2568  ;;  %v1421_v22 = vadd.f32 1.0, %v2567_v2 }
 0x1d6   : > { %2584 = vrcp.f32 %v1422_v1  ;;  %v1299_v19 = vadd.f32 %v2988_v26, %v1230_v18  ;;  %v2571_v13 = vpop.eup %2570  ;;  %v1420_v24 = vadd.f32 1.0, %v2569_v21 }
 0x1d7   : > { %v1233_v23 = vpop.xlane.xlu1 %1232  ;;  %2586 = vpow2.f32 %v2101_v7 }
 0x1d8   : > { %v2103_v25 = vmul.f32 -1.442695, %v1299_v19  ;;  %v1300_v28 = vadd.f32 %v2988_v26, %v1233_v23  ;;  %2588 = vrcp.f32 %v1416_v17 }
 0x1d9   : > { %1603 = vperm.xlu1 %2456, %v2571_v13   ;;  %2590 = vrcp.f32 %v1420_v24 }
 0x1da   : > { %v2573_v16 = vpop.eup %2572  ;;  %v2104_v29 = vmul.f32 -1.442695, %v1300_v28  ;;  %2592 = vrcp.f32 %v1421_v22 }
 0x1db   : > { %v2575_v30 = vpop.eup %2574  ;;  %v1424_v46 = vadd.f32 1.0, %v2573_v16  ;;  %2594 = vpow2.f32 %v2103_v25 }
 0x1dc   : > { %v2577_v33 = vpop.eup %2576  ;;  %v1419_v40 = vadd.f32 1.0, %v2575_v30 }
 0x1dd   : > { %v2579_v35 = vpop.eup %2578  ;;  %2596 = vrcp.f32 %v1424_v46  ;;  %1593 = vperm.xlu1 %2456, %v2577_v33  }
 0x1de   : > { %v2581_v36 = vpop.eup %2580  ;;  %2598 = vpow2.f32 %v2104_v29  ;;  %v1236_v39 = vpop.xlane.xlu0 %1235 }
 0x1df   : > { %v2583_v41 = vpop.eup %2582  ;;  %v1426_v42 = vadd.f32 1.0, %v2581_v36  ;;  %v1301_v32 = vadd.f32 %v2988_v26, %v1236_v39 }
 0x1e0   : > { %v2585_v43 = vpop.eup %2584  ;;  %v1239_v44 = vpop.xlane.xlu1 %1238  ;;  %v1423_v53 = vadd.f32 1.0, %v2583_v41 }
 0x1e1   : > { %2600 = vrcp.f32 %v1426_v42  ;;  %v2105_v31 = vmul.f32 -1.442695, %v1301_v32  ;;  %v1302_v45 = vadd.f32 %v2988_v26, %v1239_v44  ;;  %1628 = vperm.xlu0 %2457, %v2585_v43   ;;  %1608 = vperm.xlu1 %2456, %v2579_v35   ;;  %v2587_v47 = vpop.eup %2586 }
 0x1e2   : > { %2602 = vrcp.f32 %v1419_v40  ;;  %v1260_v48 = vpop.xlane.xlu0 %1259  ;;  %v2589_v49 = vpop.eup %2588  ;;  %v1425_v56 = vadd.f32 1.0, %v2587_v47 }
 0x1e3   : > { %2604 = vpow2.f32 %v2105_v31  ;;  %v2106_v50 = vmul.f32 -1.442695, %v1302_v45  ;;  %v1309_v51 = vadd.f32 %v2988_v26, %v1260_v48  ;;  %v2591_v52 = vpop.eup %2590 }
 0x1e4   : > { %v1263_v55 = vpop.xlane.xlu1 %1262  ;;  %v2593_v38 = vpop.eup %2592 }
 0x1e5   : > { %2606 = vpow2.f32 %v2106_v50  ;;  %v2113_v57 = vmul.f32 -1.442695, %v1309_v51  ;;  %v1310_v37 = vadd.f32 %v2988_v26, %v1263_v55  ;;  %1618 = vperm.xlu0 %2457, %v2591_v52   ;;  %1598 = vperm.xlu1 %2456, %v2589_v49   ;;  %v2595_v58 = vpop.eup %2594 }
 0x1e6   : > { %2608 = vrcp.f32 %v1423_v53  ;;  %v1254_v59 = vpop.xlane.xlu0 %1253  ;;  %v1427_v3 = vadd.f32 1.0, %v2595_v58 }
 0x1e7   : > { %v2597_v60 = vpop.eup %2596  ;;  %2610 = vpow2.f32 %v2113_v57  ;;  %v2114_v61 = vmul.f32 -1.442695, %v1310_v37  ;;  %v1307_v20 = vadd.f32 %v2988_v26, %v1254_v59 }
 0x1e8   : > { %v2599_v62 = vpop.eup %2598  ;;  %v1257_v63 = vpop.xlane.xlu1 %1256  ;;  %2612 = vrcp.f32 %v1425_v56 }
 0x1e9   : > { %v1428_v27 = vadd.f32 1.0, %v2599_v62  ;;  %v2111_v54 = vmul.f32 -1.442695, %v1307_v20  ;;  %v1308_v0 = vadd.f32 %v2988_v26, %v1257_v63  ;;  %1638 = vperm.xlu0 %2457, %v2597_v60   ;;  %1623 = vperm.xlu1 %2456, %v2593_v38   ;;  %2614 = vpow2.f32 %v2114_v61 }
 0x1ea   : > { %v1242_v8 = vpop.xlane.xlu0 %1241 }
 0x1eb   : > { %v2601_v4 = vpop.eup %2600  ;;  %2616 = vrcp.f32 %v1428_v27  ;;  %v2112_v5 = vmul.f32 -1.442695, %v1308_v0  ;;  %v1303_v34 = vadd.f32 %v2988_v26, %v1242_v8 }
 0x1ec   : > { %v2603_v6 = vpop.eup %2602  ;;  %2618 = vpow2.f32 %v2111_v54  ;;  %v1245_v9 = vpop.xlane.xlu1 %1244 }
 0x1ed   : > { %v2605_v10 = vpop.eup %2604  ;;  %2620 = vpow2.f32 %v2112_v5  ;;  %v2107_v14 = vmul.f32 -1.442695, %v1303_v34  ;;  %v1304_v11 = vadd.f32 %v2988_v26, %v1245_v9  ;;  %1648 = vperm.xlu0 %2457, %v2601_v4   ;;  %1613 = vperm.xlu1 %2456, %v2603_v6  }
 0x1ee   : > { %2622 = vrcp.f32 %v1427_v3  ;;  %v1429_v12 = vadd.f32 1.0, %v2605_v10  ;;  %v1266_v15 = vpop.xlane.xlu0 %1265 }
 0x1ef   : > { %v2607_v2 = vpop.eup %2606  ;;  %2624 = vpow2.f32 %v2107_v14  ;;  %v2108_v1 = vmul.f32 -1.442695, %v1304_v11  ;;  %v1311_v7 = vadd.f32 %v2988_v26, %v1266_v15  ;;  %v2186_v15 = vld [vmem:[%s3026_s26] sm:$0xff]  }
 0x1f0   : > { %v2609_v17 = vpop.eup %2608  ;;  %2626 = vrcp.f32 %v1429_v12  ;;  %v1430_v18 = vadd.f32 1.0, %v2607_v2  ;;  %v1269_v19 = vpop.xlane.xlu1 %1268  ;;  %v2249_v12 = vld [vmem:[%s3026_s26 + $0x8] sm:$0xff]  }
 0x1f1   : > { %v2611_v21 = vpop.eup %2610  ;;  %2628 = vpow2.f32 %v2108_v1  ;;  %v2115_v22 = vmul.f32 -1.442695, %v1311_v7  ;;  %v1312_v23 = vadd.f32 %v2988_v26, %v1269_v19  ;;  %1633 = vperm.xlu1 %2456, %v2609_v17   ;;  %v2191_v2 = vunpack.c.l.bf16 %v2249_v12 }
 0x1f2   : > { %2630 = vrcp.f32 %v1430_v18  ;;  %v1437_v13 = vadd.f32 1.0, %v2611_v21  ;;  %v1248_v24 = vpop.xlane.xlu0 %1247  ;;  %v2613_v25 = vpop.eup %2612  ;;  %v2187_v1 = vunpack.c.l.bf16 %v2186_v15  ;;  %v2192_v19 = vunpack.c.h.bf16 %v2249_v12 }
 0x1f3   : > { %2632 = vpow2.f32 %v2115_v22  ;;  %v2116_v28 = vmul.f32 -1.442695, %v1312_v23  ;;  %v1305_v16 = vadd.f32 %v2988_v26, %v1248_v24  ;;  %v2615_v29 = vpop.eup %2614 }
 0x1f4   : > { %v1275_v30 = vpop.xlane.xlu1 %1274  ;;  %v1438_v33 = vadd.f32 1.0, %v2615_v29 }
 0x1f5   : > { %v2617_v46 = vpop.eup %2616  ;;  %2634 = vpow2.f32 %v2116_v28  ;;  %v2109_v35 = vmul.f32 -1.442695, %v1305_v16  ;;  %v1314_v36 = vadd.f32 %v2988_v26, %v1275_v30  ;;  %1643 = vperm.xlu1 %2456, %v2613_v25   ;;  %v2188_v25 = vunpack.c.h.bf16 %v2186_v15  ;;  %v2251_v28 = vld [vmem:[%s3026_s26 + $0x18] sm:$0xff]   ;;  %v2256_v15 = vld [vmem:[%s3026_s26 + $0x40] sm:$0xff]  }
 0x1f6   : > { %v2619_v40 = vpop.eup %2618  ;;  %2636 = vrcp.f32 %v1437_v13  ;;  %1658 = vperm.xlu0 %2457, %v2617_v46   ;;  %v1272_v39 = vpop.xlane.xlu0 %1271  ;;  %v2199_v46 = vunpack.c.l.bf16 %v2251_v28 }
 0x1f7   : > { %v2621_v41 = vpop.eup %2620  ;;  %2638 = vrcp.f32 %v1438_v33  ;;  %v1435_v42 = vadd.f32 1.0, %v2619_v40  ;;  %v2118_v32 = vmul.f32 -1.442695, %v1314_v36  ;;  %v1313_v43 = vadd.f32 %v2988_v26, %v1272_v39  ;;  %v2250_v33 = vld [vmem:[%s3026_s26 + $0x10] sm:$0xff]  }
 0x1f8   : > { %v2623_v44 = vpop.eup %2622  ;;  %v1436_v31 = vadd.f32 1.0, %v2621_v41  ;;  %2640 = vpow2.f32 %v2109_v35  ;;  %v1251_v45 = vpop.xlane.xlu1 %1250  ;;  %v2195_v39 = vunpack.c.l.bf16 %v2250_v33  ;;  %v2253_v41 = vld [vmem:[%s3026_s26 + $0x28] sm:$0xff]  }
 0x1f9   : > { %v2625_v47 = vpop.eup %2624  ;;  %2642 = vrcp.f32 %v1435_v42  ;;  %v2117_v53 = vmul.f32 -1.442695, %v1313_v43  ;;  %v1306_v48 = vadd.f32 %v2988_v26, %v1251_v45  ;;  %1653 = vperm.xlu1 %2456, %v2623_v44   ;;  %v2208_v44 = vunpack.c.h.bf16 %v2253_v41  ;;  %v2252_v45 = vld [vmem:[%s3026_s26 + $0x20] sm:$0xff]  }
 0x1fa   : > { %v2627_v49 = vpop.eup %2626  ;;  %2644 = vrcp.f32 %v1436_v31  ;;  %v1431_v50 = vadd.f32 1.0, %v2625_v47  ;;  %v2200_v31 = vunpack.c.h.bf16 %v2251_v28 }
 0x1fb   : > { %v2629_v51 = vpop.eup %2628  ;;  %2646 = vpow2.f32 %v2118_v32  ;;  %v2110_v52 = vmul.f32 -1.442695, %v1306_v48 }
 0x1fc   : > { %v2631_v55 = vpop.eup %2630  ;;  %2648 = vrcp.f32 %v1431_v50  ;;  %v1432_v38 = vadd.f32 1.0, %v2629_v51  ;;  %v2204_v51 = vunpack.c.h.bf16 %v2252_v45 }
 0x1fd   : > { %v2633_v56 = vpop.eup %2632  ;;  %2650 = vpow2.f32 %v2117_v53  ;;  %1668 = vperm.xlu0 %2457, %v2631_v55   ;;  %1663 = vperm.xlu1 %2456, %v2627_v49   ;;  %v2254_v55 = vld [vmem:[%s3026_s26 + $0x30] sm:$0xff]  }
 0x1fe   : > { %2652 = vrcp.f32 %v1432_v38  ;;  %v1439_v57 = vadd.f32 1.0, %v2633_v56 }
 0x1ff   : > { %v2635_v37 = vpop.eup %2634  ;;  %2654 = vpow2.f32 %v2110_v52  ;;  %v2196_v52 = vunpack.c.h.bf16 %v2250_v33  ;;  %v2261_v33 = vld [vmem:[%s3026_s26 + $0x68] sm:$0xff]  }
 0x200   : > { %v2637_v58 = vpop.eup %2636  ;;  %v1440_v26 = vadd.f32 1.0, %v2635_v37  ;;  %2656 = vrcp.f32 %v1439_v57 }
 0x201   : > { %v2639_v59 = vpop.eup %2638  ;;  %1703 = vperm.xlu1 %2456, %v2637_v58  }
 0x202   : > { %v2641_v60 = vpop.eup %2640  ;;  %2658 = vrcp.f32 %v1440_v26  ;;  %1708 = vperm.xlu0 %2457, %v2639_v59   ;;  %v2212_v59 = vunpack.c.h.bf16 %v2254_v55 }
 0x203   : > { %v2643_v61 = vpop.eup %2642  ;;  %v1433_v20 = vadd.f32 1.0, %v2641_v60  ;;  %v2207_v60 = vunpack.c.l.bf16 %v2253_v41 }
 0x204   : > { %v2645_v62 = vpop.eup %2644 }
 0x205   : > { %v2647_v63 = vpop.eup %2646  ;;  %1693 = vperm.xlu1 %2456, %v2643_v61   ;;  %2660 = vrcp.f32 %v1433_v20  ;;  %v2255_v61 = vld [vmem:[%s3026_s26 + $0x38] sm:$0xff]  }
 0x206   : > { %v2649_v27 = vpop.eup %2648  ;;  %1698 = vperm.xlu0 %2457, %v2645_v62   ;;  %v1442_v6 = vadd.f32 1.0, %v2647_v63 }
 0x207   : > { %v2651_v54 = vpop.eup %2650 }
 0x208   : > { %v2653_v0 = vpop.eup %2652  ;;  %v1441_v3 = vadd.f32 1.0, %v2651_v54 }
 0x209   : > { %v2655_v8 = vpop.eup %2654  ;;  %1673 = vperm.xlu1 %2456, %v2649_v27  }
 0x20a   : > { %2662 = vrcp.f32 %v1441_v3  ;;  %v1434_v4 = vadd.f32 1.0, %v2655_v8  ;;  %1678 = vperm.xlu0 %2457, %v2653_v0   ;;  %v2657_v5 = vpop.eup %2656  ;;  %v2216_v3 = vunpack.c.h.bf16 %v2255_v61  ;;  %v2203_v8 = vunpack.c.l.bf16 %v2252_v45 }
 0x20c   : > { %v2659_v34 = vpop.eup %2658  ;;  %2664 = vrcp.f32 %v1434_v4 }
 0x20d   : > { %1713 = vperm.xlu1 %2456, %v2657_v5   ;;  %2666 = vrcp.f32 %v1442_v6 }
 0x20e   : > { %1718 = vperm.xlu0 %2457, %v2659_v34  }
 0x20f   : > { %v2661_v9 = vpop.eup %2660 }
 0x211   : > { %1683 = vperm.xlu1 %2456, %v2661_v9  }
 0x214   : > { %v2663_v10 = vpop.eup %2662 }
 0x215   : > { %1723 = vperm.xlu1 %2456, %v2663_v10  }
 0x216   : > { %v2665_v14 = vpop.eup %2664 }
 0x217   : > { %1688 = vperm.xlu0 %2457, %v2665_v14   ;;  %v2667_v11 = vpop.eup %2666  ;;  %v2211_v14 = vunpack.c.l.bf16 %v2254_v55 }
 0x21b   : > { %1728 = vperm.xlu0 %2457, %v2667_v11  }
 0x24c   : > { %v1584_v7 = vpop.permute.xlu1 %1583 }
 0x24d   : > { %v1733_v17 = vmul.f32 %v2191_v2, %v1584_v7  ;;  %v1574_v18 = vpop.permute.xlu0 %1573  ;;  %v2215_v7 = vunpack.c.l.bf16 %v2255_v61 }
 0x24e   : > { %v1731_v21 = vmul.f32 %v2187_v1, %v1574_v18 }
 0x24f   : > { %v2155_v22 = vpack.c.bf16 %v1733_v17, %v1733_v17  ;;  %v2220_v17 = vunpack.c.h.bf16 %v2256_v15 }
 0x250   : > { %v2153_v23 = vpack.c.bf16 %v1731_v21, %v1731_v21  ;;  %v1589_v13 = vpop.permute.xlu1 %1588 }
 0x251   : > { %1894 = vst.msk [vmem:[%s3033_s4 + $0x8] sm:$0xf] %vm1891_vm2, %v2155_v22  ;;  %v1734_v24 = vmul.f32 %v2192_v19, %v1589_v13 }
 0x252   : > { %1892 = vst.msk [vmem:[%s3033_s4] sm:$0xf] %vm1891_vm2, %v2153_v23  ;;  %v2219_v23 = vunpack.c.l.bf16 %v2256_v15 }
 0x253   : > { %v2156_v16 = vpack.c.bf16 %v1734_v24, %v1734_v24  ;;  %v2257_v24 = vld [vmem:[%s3026_s26 + $0x48] sm:$0xff]  }
 0x254   : > { %v1579_v29 = vpop.permute.xlu1 %1578 }
 0x255   : > { %1895 = vst.msk [vmem:[%s3033_s4 + $0xc] sm:$0xf] %vm1891_vm2, %v2156_v16  ;;  %v1732_v30 = vmul.f32 %v2188_v25, %v1579_v29 }
 0x257   : > { %v2154_v35 = vpack.c.bf16 %v1732_v30, %v1732_v30  ;;  %v2224_v30 = vunpack.c.h.bf16 %v2257_v24 }
 0x258   : > { %v1604_v36 = vpop.permute.xlu1 %1603 }
 0x259   : > { %1893 = vst.msk [vmem:[%s3033_s4 + $0x4] sm:$0xf] %vm1891_vm2, %v2154_v35  ;;  %v1737_v40 = vmul.f32 %v2199_v46, %v1604_v36  ;;  %v2223_v46 = vunpack.c.l.bf16 %v2257_v24 }
 0x25b   : > { %v2159_v42 = vpack.c.bf16 %v1737_v40, %v1737_v40 }
 0x25c   : > { %v1594_v32 = vpop.permute.xlu1 %1593 }
 0x25d   : > { %1898 = vst.msk [vmem:[%s3033_s4 + $0x18] sm:$0xf] %vm1891_vm2, %v2159_v42  ;;  %v1735_v43 = vmul.f32 %v2195_v39, %v1594_v32  ;;  %v2239_v42 = vunpack.c.l.bf16 %v2261_v33  ;;  %v2240_v32 = vunpack.c.h.bf16 %v2261_v33 }
 0x25f   : > { %v2157_v47 = vpack.c.bf16 %v1735_v43, %v1735_v43  ;;  %v2260_v43 = vld [vmem:[%s3026_s26 + $0x60] sm:$0xff]  }
 0x260   : > { %v1629_v53 = vpop.permute.xlu0 %1628  ;;  %v1609_v48 = vpop.permute.xlu1 %1608 }
 0x261   : > { %1896 = vst.msk [vmem:[%s3033_s4 + $0x10] sm:$0xf] %vm1891_vm2, %v2157_v47  ;;  %v1742_v49 = vmul.f32 %v2208_v44, %v1629_v53  ;;  %v1738_v50 = vmul.f32 %v2200_v31, %v1609_v48  ;;  %v2235_v48 = vunpack.c.l.bf16 %v2260_v43 }
 0x263   : > { %v2164_v38 = vpack.c.bf16 %v1742_v49, %v1742_v49  ;;  %v2160_v56 = vpack.c.bf16 %v1738_v50, %v1738_v50  ;;  %v2236_v50 = vunpack.c.h.bf16 %v2260_v43 }
 0x264   : > { %v1619_v57 = vpop.permute.xlu0 %1618  ;;  %v1599_v37 = vpop.permute.xlu1 %1598 }
 0x265   : > { %1903 = vst.msk [vmem:[%s3033_s4 + $0x2c] sm:$0xf] %vm1891_vm2, %v2164_v38  ;;  %1899 = vst.msk [vmem:[%s3033_s4 + $0x1c] sm:$0xf] %vm1891_vm2, %v2160_v56  ;;  %v1740_v58 = vmul.f32 %v2204_v51, %v1619_v57  ;;  %v1736_v26 = vmul.f32 %v2196_v52, %v1599_v37  ;;  %v2258_v51 = vld [vmem:[%s3026_s26 + $0x50] sm:$0xff]  }
 0x266   : > { %v2227_v37 = vunpack.c.l.bf16 %v2258_v51 }
 0x267   : > { %v2162_v20 = vpack.c.bf16 %v1740_v58, %v1740_v58  ;;  %v2158_v62 = vpack.c.bf16 %v1736_v26, %v1736_v26  ;;  %v2228_v26 = vunpack.c.h.bf16 %v2258_v51 }
 0x268   : > { %v1639_v63 = vpop.permute.xlu0 %1638  ;;  %v1624_v27 = vpop.permute.xlu1 %1623 }
 0x269   : > { %1901 = vst.msk [vmem:[%s3033_s4 + $0x24] sm:$0xf] %vm1891_vm2, %v2162_v20  ;;  %1897 = vst.msk [vmem:[%s3033_s4 + $0x14] sm:$0xf] %vm1891_vm2, %v2158_v62  ;;  %v1744_v54 = vmul.f32 %v2212_v59, %v1639_v63  ;;  %v1741_v0 = vmul.f32 %v2207_v60, %v1624_v27  ;;  %v2262_v59 = vld [vmem:[%s3026_s26 + $0x70] sm:$0xff]  }
 0x26a   : > { %v2243_v27 = vunpack.c.l.bf16 %v2262_v59 }
 0x26b   : > { %v2166_v4 = vpack.c.bf16 %v1744_v54, %v1744_v54  ;;  %v2163_v5 = vpack.c.bf16 %v1741_v0, %v1741_v0  ;;  %v2244_v0 = vunpack.c.h.bf16 %v2262_v59 }
 0x26c   : > { %v1649_v34 = vpop.permute.xlu0 %1648  ;;  %v1614_v6 = vpop.permute.xlu1 %1613 }
 0x26d   : > { %1905 = vst.msk [vmem:[%s3033_s4 + $0x34] sm:$0xf] %vm1891_vm2, %v2166_v4  ;;  %1902 = vst.msk [vmem:[%s3033_s4 + $0x28] sm:$0xf] %vm1891_vm2, %v2163_v5  ;;  %v1746_v9 = vmul.f32 %v2216_v3, %v1649_v34  ;;  %v1739_v10 = vmul.f32 %v2203_v8, %v1614_v6  ;;  %v2259_v3 = vld [vmem:[%s3026_s26 + $0x58] sm:$0xff]  }
 0x26f   : > { %v2168_v11 = vpack.c.bf16 %v1746_v9, %v1746_v9  ;;  %v2161_v12 = vpack.c.bf16 %v1739_v10, %v1739_v10  ;;  %v2231_v9 = vunpack.c.l.bf16 %v2259_v3 }
 0x270   : > { %v1634_v2 = vpop.permute.xlu1 %1633 }
 0x271   : > { %1907 = vst.msk [vmem:[%s3033_s4 + $0x3c] sm:$0xf] %vm1891_vm2, %v2168_v11  ;;  %1900 = vst.msk [vmem:[%s3033_s4 + $0x20] sm:$0xf] %vm1891_vm2, %v2161_v12  ;;  %v1743_v1 = vmul.f32 %v2211_v14, %v1634_v2  ;;  %v2263_v14 = vld [vmem:[%s3026_s26 + $0x78] sm:$0xff]  }
 0x273   : > { %v2165_v18 = vpack.c.bf16 %v1743_v1, %v1743_v1  ;;  %v2247_v1 = vunpack.c.l.bf16 %v2263_v14 }
 0x274   : > { %v1644_v19 = vpop.permute.xlu1 %1643 }
 0x275   : > { %1904 = vst.msk [vmem:[%s3033_s4 + $0x30] sm:$0xf] %vm1891_vm2, %v2165_v18  ;;  %v1659_v21 = vpop.permute.xlu0 %1658  ;;  %v1745_v22 = vmul.f32 %v2215_v7, %v1644_v19 }
 0x276   : > { %v1748_v13 = vmul.f32 %v2220_v17, %v1659_v21  ;;  %v2232_v17 = vunpack.c.h.bf16 %v2259_v3 }
 0x277   : > { %v2167_v25 = vpack.c.bf16 %v1745_v22, %v1745_v22 }
 0x278   : > { %v2170_v28 = vpack.c.bf16 %v1748_v13, %v1748_v13  ;;  %v1654_v16 = vpop.permute.xlu1 %1653  ;;  %v2248_v13 = vunpack.c.h.bf16 %v2263_v14 }
 0x279   : > { %1906 = vst.msk [vmem:[%s3033_s4 + $0x38] sm:$0xf] %vm1891_vm2, %v2167_v25  ;;  %v1747_v29 = vmul.f32 %v2219_v23, %v1654_v16 }
 0x27a   : > { %1909 = vst.msk [vmem:[%s3033_s4 + $0x44] sm:$0xf] %vm1891_vm2, %v2170_v28 }
 0x27b   : > { %v2169_v35 = vpack.c.bf16 %v1747_v29, %v1747_v29 }
 0x27c   : > { %v1669_v36 = vpop.permute.xlu0 %1668  ;;  %v1664_v40 = vpop.permute.xlu1 %1663 }
 0x27d   : > { %1908 = vst.msk [vmem:[%s3033_s4 + $0x40] sm:$0xf] %vm1891_vm2, %v2169_v35  ;;  %v1750_v39 = vmul.f32 %v2224_v30, %v1669_v36  ;;  %v1749_v41 = vmul.f32 %v2223_v46, %v1664_v40 }
 0x27f   : > { %v2172_v44 = vpack.c.bf16 %v1750_v39, %v1750_v39  ;;  %v2171_v31 = vpack.c.bf16 %v1749_v41, %v1749_v41 }
 0x280   : > { %v1704_v45 = vpop.permute.xlu1 %1703 }
 0x281   : > { %1911 = vst.msk [vmem:[%s3033_s4 + $0x4c] sm:$0xf] %vm1891_vm2, %v2172_v44  ;;  %1910 = vst.msk [vmem:[%s3033_s4 + $0x48] sm:$0xf] %vm1891_vm2, %v2171_v31  ;;  %v1709_v47 = vpop.permute.xlu0 %1708  ;;  %v1757_v53 = vmul.f32 %v2239_v42, %v1704_v45 }
 0x282   : > { %v1758_v49 = vmul.f32 %v2240_v32, %v1709_v47 }
 0x283   : > { %v2179_v52 = vpack.c.bf16 %v1757_v53, %v1757_v53 }
 0x284   : > { %v2180_v55 = vpack.c.bf16 %v1758_v49, %v1758_v49  ;;  %v1694_v38 = vpop.permute.xlu1 %1693 }
 0x285   : > { %1918 = vst.msk [vmem:[%s3033_s4 + $0x68] sm:$0xf] %vm1891_vm2, %v2179_v52  ;;  %v1699_v56 = vpop.permute.xlu0 %1698  ;;  %v1755_v57 = vmul.f32 %v2235_v48, %v1694_v38 }
 0x286   : > { %1919 = vst.msk [vmem:[%s3033_s4 + $0x6c] sm:$0xf] %vm1891_vm2, %v2180_v55  ;;  %v1756_v58 = vmul.f32 %v2236_v50, %v1699_v56 }
 0x287   : > { %v2177_v60 = vpack.c.bf16 %v1755_v57, %v1755_v57 }
 0x288   : > { %v2178_v61 = vpack.c.bf16 %v1756_v58, %v1756_v58  ;;  %v1674_v20 = vpop.permute.xlu1 %1673 }
 0x289   : > { %1916 = vst.msk [vmem:[%s3033_s4 + $0x60] sm:$0xf] %vm1891_vm2, %v2177_v60  ;;  %v1679_v62 = vpop.permute.xlu0 %1678  ;;  %v1751_v63 = vmul.f32 %v2227_v37, %v1674_v20 }
 0x28a   : > { %1917 = vst.msk [vmem:[%s3033_s4 + $0x64] sm:$0xf] %vm1891_vm2, %v2178_v61  ;;  %v1752_v54 = vmul.f32 %v2228_v26, %v1679_v62 }
 0x28b   : > { %v2173_v8 = vpack.c.bf16 %v1751_v63, %v1751_v63 }
 0x28c   : > { %v2174_v4 = vpack.c.bf16 %v1752_v54, %v1752_v54  ;;  %v1714_v5 = vpop.permute.xlu1 %1713 }
 0x28d   : > { %1912 = vst.msk [vmem:[%s3033_s4 + $0x50] sm:$0xf] %vm1891_vm2, %v2173_v8  ;;  %v1719_v34 = vpop.permute.xlu0 %1718  ;;  %v1759_v6 = vmul.f32 %v2243_v27, %v1714_v5 }
 0x28e   : > { %1913 = vst.msk [vmem:[%s3033_s4 + $0x54] sm:$0xf] %vm1891_vm2, %v2174_v4  ;;  %v1760_v10 = vmul.f32 %v2244_v0, %v1719_v34 }
 0x28f   : > { %v2181_v11 = vpack.c.bf16 %v1759_v6, %v1759_v6 }
 0x290   : > { %v2182_v12 = vpack.c.bf16 %v1760_v10, %v1760_v10  ;;  %v1684_v15 = vpop.permute.xlu1 %1683 }
 0x291   : > { %1920 = vst.msk [vmem:[%s3033_s4 + $0x70] sm:$0xf] %vm1891_vm2, %v2181_v11  ;;  %v1753_v2 = vmul.f32 %v2231_v9, %v1684_v15 }
 0x292   : > { %1921 = vst.msk [vmem:[%s3033_s4 + $0x74] sm:$0xf] %vm1891_vm2, %v2182_v12 }
 0x293   : > { %v2175_v7 = vpack.c.bf16 %v1753_v2, %v1753_v2 }
 0x294   : > { %v1724_v18 = vpop.permute.xlu1 %1723 }
 0x295   : > { %1914 = vst.msk [vmem:[%s3033_s4 + $0x58] sm:$0xf] %vm1891_vm2, %v2175_v7  ;;  %v1761_v19 = vmul.f32 %v2247_v1, %v1724_v18 }
 0x296   : > { %v1689_v21 = vpop.permute.xlu0 %1688 }
 0x297   : > { %v1754_v22 = vmul.f32 %v2232_v17, %v1689_v21  ;;  %v2183_v23 = vpack.c.bf16 %v1761_v19, %v1761_v19 }
 0x299   : > { %v2176_v24 = vpack.c.bf16 %v1754_v22, %v1754_v22  ;;  %1922 = vst.msk [vmem:[%s3033_s4 + $0x78] sm:$0xf] %vm1891_vm2, %v2183_v23 }
 0x29a   : > { %v1729_v25 = vpop.permute.xlu0 %1728 }
 0x29b   : > { %1915 = vst.msk [vmem:[%s3033_s4 + $0x5c] sm:$0xf] %vm1891_vm2, %v2176_v24  ;;  %v1762_v28 = vmul.f32 %v2248_v13, %v1729_v25 }
 0x29d   : > { %v2184_v16 = vpack.c.bf16 %v1762_v28, %v1762_v28 }
 0x29f   : > { %1923 = vst.msk [vmem:[%s3033_s4 + $0x7c] sm:$0xf] %vm1891_vm2, %v2184_v16 }
 0x2a0 PF: > { %s18_s23 = sadd.s32 1, %s2674_s23  }
 0x2a1   : > { %p15_p4 = scmp.ge.s32.totalorder %s18_s23, 4  }
 0x2a3   :  { %17 = sbr.rel (!%p15_p4) target bundleno = 3 (0x3), region = 77 }

// kernel: forward.35
= control target key start
LH: loop header
LB: loop body
LE: loop exit
PB: predicated region body
PF: predicated region fallthrough
CT: control target
= control target key end

     0   :  { %vm210_vm0 = vcmask 261120   ;;  %vm19_vm1 = vcmask 130048   ;;  %v473_v24 = vmov 0.0   ;;  %vm362_vm2 = vcmask 125952   ;;  %s589_s1 = inlined_call_operand.vmem [shape: bf16[288,16], index: 1, kind: input, shape index: {}]   ;;  %s590_s0 = inlined_call_operand.vmem [shape: bf16[32,288], index: 0, kind: input, shape index: {}]   ;;  %s591_s2 = inlined_call_operand.vmem [shape: f32[1,16], index: 2, kind: input, shape index: {}]   ;;  %s592_s3 = inlined_call_operand.vmem [shape: bf16[32,16], index: 3, kind: output, shape index: {}]  }
   0x1   :  { %v447_v0 = vld [vmem:[%s589_s1 + $0x40] sm:$0xff]   ;;  %v449_v2 = vld [vmem:[%s589_s1 + $0x48] sm:$0xff]   ;;  %v451_v4 = vld [vmem:[%s589_s1 + $0x50] sm:$0xff]   ;;  %20 = vst.msk [vmem:[#allocation2] sm:$0xff] %vm19_vm1, %v473_v24 }
   0x2   :  { %v448_v1 = vld [vmem:[%s589_s1] sm:$0xff]   ;;  %406 = vmatprep.subr.bf16.mxu0 %v447_v0  ;;  %v450_v3 = vld [vmem:[%s589_s1 + $0x8] sm:$0xff]   ;;  %v452_v5 = vld [vmem:[%s589_s1 + $0x10] sm:$0xff]   ;;  %21 = vst.msk [vmem:[#allocation2 + $0x8] sm:$0xff] %vm19_vm1, %v473_v24 }
   0x3   :  { %407 = vmatpush3.bf16.msra.mxu0 %v448_v1  ;;  %v453_v6 = vld [vmem:[%s589_s1 + $0x58] sm:$0xff]   ;;  %v455_v8 = vld [vmem:[%s589_s1 + $0x60] sm:$0xff]   ;;  %v457_v11 = vld [vmem:[%s589_s1 + $0x68] sm:$0xff]   ;;  %22 = vst.msk [vmem:[#allocation2 + $0x10] sm:$0xff] %vm19_vm1, %v473_v24 }
   0x4   :  { %408 = vmatprep.subr.bf16.mxu0 %v449_v2  ;;  %v454_v7 = vld [vmem:[%s589_s1 + $0x18] sm:$0xff]   ;;  %v461_v9 = vld [vmem:[%s589_s1 + $0x80] sm:$0xff]   ;;  %v458_v12 = vld [vmem:[%s589_s1 + $0x28] sm:$0xff]   ;;  %23 = vst.msk [vmem:[#allocation2 + $0x18] sm:$0xff] %vm19_vm1, %v473_v24 }
   0x5   :  { %v456_v10 = vld [vmem:[%s589_s1 + $0x20] sm:$0xff]   ;;  %438 = vmatprep.subr.bf16.mxu1 %v461_v9  ;;  %v464_v13 = vld [vmem:[%s589_s1 + $0x88] sm:$0xff]   ;;  %v459_v14 = vld [vmem:[%s589_s1 + $0x70] sm:$0xff]  }
   0x6   :  { %439 = vmatpush3.bf16.msra.mxu1 %v461_v9  ;;  %v467_v15 = vld [vmem:[%s590_s0 + $0x4] ss:$12 sps:$4 sm:$0xff]   ;;  %v468_v16 = vld [vmem:[%s590_s0 + $0x8] ss:$12 sps:$4 sm:$0xff]   ;;  %v469_v17 = vld [vmem:[%s590_s0 + $0x20] ss:$12 sps:$4 sm:$0xff]  }
   0x7   :  { %409 = vmatpush3.bf16.msra.mxu0 %v450_v3  ;;  %440 = vmatprep.subr.bf16.mxu1 %v464_v13  ;;  %v460_v18 = vld [vmem:[%s589_s1 + $0x30] sm:$0xff]   ;;  %v462_v19 = vld [vmem:[%s589_s1 + $0x78] sm:$0xff]   ;;  %v465_v21 = vld [vmem:[%s590_s0] ss:$12 sps:$4 sm:$0xff]  }
   0x8   :  { %410 = vmatprep.subr.bf16.mxu0 %v451_v4  ;;  %249 = vmatprep.mubr.bf16.mxu0 %v467_v15  ;;  %v463_v20 = vld [vmem:[%s589_s1 + $0x38] sm:$0xff]   ;;  %v24_v34 = vld [vmem:[#allocation2] sm:$0xff] }
   0x9   :  { %442 = vmatprep.mubr.msk.bf16.mxu1 %vm210_vm0, %v468_v16  ;;  %v470_v22 = vld [vmem:[%s590_s0 + $0x1c] ss:$12 sps:$4 sm:$0xff]   ;;  %v472_v23 = vld [vmem:[%s590_s0 + $0x18] ss:$12 sps:$4 sm:$0xff]   ;;  %v397_v49 = vld [vmem:[%s591_s2] ss:$0 sm:$0xff] }
   0xa   :  { %441 = vmatpush3.bf16.msra.mxu1 %v464_v13  ;;  %v25_v37 = vld [vmem:[#allocation2 + $0x8] sm:$0xff]  ;;  %v26_v45 = vld [vmem:[#allocation2 + $0x10] sm:$0xff] }
   0xb   :  { %411 = vmatpush3.bf16.msra.mxu0 %v452_v5  ;;  %v27_v50 = vld [vmem:[#allocation2 + $0x18] sm:$0xff] }
   0xc   :  { %412 = vmatprep.subr.bf16.mxu0 %v453_v6 }
   0xd   :  { %443 = vmatmul.mubr.msk.bf16.vlgmr.msra.gmra.mrb[0].mxu1 %vm210_vm0, %v469_v17 }
   0xf   :  { %413 = vmatpush3.bf16.msra.mxu0 %v454_v7 }
  0x10   :  { %414 = vmatprep.subr.bf16.mxu0 %v455_v8 }
  0x13   :  { %415 = vmatpush3.bf16.msra.mxu0 %v456_v10 }
  0x14   :  { %416 = vmatprep.subr.bf16.mxu0 %v457_v11 }
  0x17   :  { %417 = vmatpush3.bf16.msra.mxu0 %v458_v12 }
  0x18   :  { %418 = vmatprep.subr.bf16.mxu0 %v459_v14 }
  0x1b   :  { %419 = vmatpush3.bf16.msra.mxu0 %v460_v18 }
  0x1c   :  { %420 = vmatprep.subr.bf16.mxu0 %v462_v19 }
  0x1f   :  { %421 = vmatpush3.bf16.msra.mxu0 %v463_v20 }
  0x22   :  { %250 = vmatmul.mubr.bf16.vlgmr.msra.gmra.mrb[0].mxu0 %v465_v21 }
  0x23   :  { %257 = vmatprep.mubr.bf16.mxu0 %v470_v22 }
  0x2a   :  { %258 = vmatmul.mubr.bf16.gmra.mrb[4].mxu0 %v472_v23 }
  0xe0   :  { %v444_v25 = vpop.f32.mrb[0].mxu1 }
  0xe1   :  { %v300_v26 = vpop.f32.mrb[1].mxu1 }
  0xe2   :  { %v445_v27 = vpop.f32.mrb[2].mxu1 }
  0xe3   :  { %v303_v28 = vpop.f32.mrb[3].mxu1 }
  0xf5   :  { %v422_v29 = vpop.f32.mrb[0].mxu0 }
  0xf6   :  { %v423_v30 = vpop.f32.mrb[1].mxu0 }
  0xf7   :  { %v424_v31 = vadd.f32 %v423_v30, %v422_v29  ;;  %v425_v32 = vpop.f32.mrb[2].mxu0 }
  0xf8   :  { %v426_v33 = vpop.f32.mrb[3].mxu0 }
  0xf9   :  { %v427_v35 = vadd.f32 %v426_v33, %v425_v32  ;;  %v301_v36 = vadd.f32 %v424_v31, %v300_v26 }
  0xfb   :  { %v315_v38 = vadd.f32 %v301_v36, %v24_v34  ;;  %v304_v39 = vadd.f32 %v427_v35, %v303_v28 }
  0xfd   :  { %320 = vst.msk [vmem:[#allocation2] sm:$0xff] %vm19_vm1, %v315_v38  ;;  %v316_v40 = vadd.f32 %v304_v39, %v25_v37  ;;  %v428_v41 = vpop.f32.mrb[4].mxu0 }
  0xfe   :  { %v429_v42 = vpop.f32.mrb[5].mxu0 }
  0xff   :  { %321 = vst.msk [vmem:[#allocation2 + $0x8] sm:$0xff] %vm19_vm1, %v316_v40  ;;  %v430_v43 = vadd.f32 %v429_v42, %v428_v41  ;;  %v431_v44 = vpop.f32.mrb[6].mxu0 }
 0x100   :  { %v432_v46 = vpop.f32.mrb[7].mxu0 }
 0x101   :  { %v309_v47 = vadd.f32 %v444_v25, %v430_v43  ;;  %v433_v48 = vadd.f32 %v432_v46, %v431_v44 }
 0x103   :  { %v317_v51 = vadd.f32 %v309_v47, %v26_v45  ;;  %v312_v52 = vadd.f32 %v445_v27, %v433_v48 }
 0x104   :  { %v327_v53 = vld [vmem:[#allocation2] sm:$0xff] }
 0x105   :  { %v338_v54 = vadd.f32 %v397_v49, %v327_v53  ;;  %322 = vst.msk [vmem:[#allocation2 + $0x10] sm:$0xff] %vm19_vm1, %v317_v51  ;;  %v318_v55 = vadd.f32 %v312_v52, %v27_v50 }
 0x106   :  { %v328_v56 = vld [vmem:[#allocation2 + $0x8] sm:$0xff] }
 0x107   :  { %v342_v57 = vmax.f32 %v338_v54, 0.0  ;;  %v339_v58 = vadd.f32 %v397_v49, %v328_v56  ;;  %323 = vst.msk [vmem:[#allocation2 + $0x18] sm:$0xff] %vm19_vm1, %v318_v55 }
 0x109   :  { %v402_v59 = vpack.c.bf16 %v342_v57, %v342_v57  ;;  %v343_v60 = vmax.f32 %v339_v58, 0.0 }
 0x10b   :  { %363 = vst.msk [vmem:[%s592_s3] sm:$0xf] %vm362_vm2, %v402_v59  ;;  %v403_v61 = vpack.c.bf16 %v343_v60, %v343_v60 }
 0x10c   :  { %v329_v62 = vld [vmem:[#allocation2 + $0x10] sm:$0xff] }
 0x10d   :  { %364 = vst.msk [vmem:[%s592_s3 + $0x4] sm:$0xf] %vm362_vm2, %v403_v61  ;;  %v340_v63 = vadd.f32 %v397_v49, %v329_v62 }
 0x10e   :  { %v330_v0 = vld [vmem:[#allocation2 + $0x18] sm:$0xff] }
 0x10f   :  { %v344_v1 = vmax.f32 %v340_v63, 0.0  ;;  %v341_v2 = vadd.f32 %v397_v49, %v330_v0 }
 0x111   :  { %v404_v3 = vpack.c.bf16 %v344_v1, %v344_v1  ;;  %v345_v4 = vmax.f32 %v341_v2, 0.0 }
 0x113   :  { %365 = vst.msk [vmem:[%s592_s3 + $0x8] sm:$0xf] %vm362_vm2, %v404_v3  ;;  %v405_v5 = vpack.c.bf16 %v345_v4, %v345_v4 }
 0x115   :  { %366 = vst.msk [vmem:[%s592_s3 + $0xc] sm:$0xf] %vm362_vm2, %v405_v5 }

// kernel: forward.37
= control target key start
LH: loop header
LB: loop body
LE: loop exit
PB: predicated region body
PF: predicated region fallthrough
CT: control target
= control target key end

     0   :  { %vm19_vm0 = vcmask 123904   ;;  %v125_v0 = vmov 0.0   ;;  %vm126_vm1 = vmmov 0   ;;  %vm39_vm2 = vcmask 261120   ;;  %s164_s1 = inlined_call_operand.vmem [shape: bf16[32,16], index: 1, kind: input, shape index: {}]   ;;  %s165_s0 = inlined_call_operand.vmem [shape: bf16[2,32], index: 0, kind: input, shape index: {}]   ;;  %s166_s2 = inlined_call_operand.vmem [shape: f32[1,16], index: 2, kind: input, shape index: {}]   ;;  %s167_s3 = inlined_call_operand.vmem [shape: bf16[2,16], index: 3, kind: output, shape index: {}]  }
   0x1   :  { %20 = vst.msk [vmem:[#allocation2] sm:$0x3] %vm19_vm0, %v125_v0  ;;  %113 = vmatprep.subr.bf16.mxu0 %v125_v0  ;;  %v123_v1 = vld [vmem:[%s164_s1] sm:$0xff]   ;;  %117 = vmatprep.mubr.msk.bf16.mxu0 %vm126_vm1, %v125_v0  ;;  %v124_v2 = vld [vmem:[%s164_s1 + $0x8] sm:$0xff]   ;;  %vm100_vm3 = vcmask 122880  }
   0x2   :  { %114 = vmatpush3.bf16.msra.mxu0 %v123_v1  ;;  %v22_v3 = vld [vmem:[%s165_s0] sm:$0x1] }
   0x3   :  { %115 = vmatprep.subr.bf16.mxu0 %v125_v0  ;;  %v109_v10 = vld [vmem:[%s166_s2] ss:$0 sm:$0xff] }
   0x6   :  { %116 = vmatpush3.bf16.msra.mxu0 %v124_v2 }
   0x8   :  { %v21_v4 = vld [vmem:[#allocation2] sm:$0x3] }
   0x9   :  { %118 = vmatmul.mubr.msk.bf16.vlgmr.msra.gmra.mrb[0].mxu0 %vm39_vm2, %v22_v3 }
  0xdc   :  { %v77_v5 = vpop.f32.mrb[0].mxu0 }
  0xdd   :  { %v83_v6 = vadd.f32 %v77_v5, %v21_v4  ;;  %v119_v7 = vpop.f32.mrb[1].mxu0 }
  0xde   :  { %v80_v8 = vpop.f32.mrb[2].mxu0 }
  0xdf   :  { %85 = vst.msk [vmem:[#allocation2] sm:$0x3] %vm19_vm0, %v83_v6  ;;  %v120_v9 = vpop.f32.mrb[3].mxu0 }
  0xe6   :  { %v89_v11 = vld [vmem:[#allocation2] sm:$0x3] }
  0xe7   :  { %v97_v12 = vadd.f32 %v109_v10, %v89_v11 }
  0xe9   :  { %v98_v13 = vmax.f32 %v97_v12, 0.0 }
  0xeb   :  { %v99_v14 = vpack.c.bf16 %v98_v13, %v98_v13 }
  0xed   :  { %101 = vst.msk [vmem:[%s167_s3] sm:$0x1] %vm100_vm3, %v99_v14 }

// kernel: forward.34
= control target key start
LH: loop header
LB: loop body
LE: loop exit
PB: predicated region body
PF: predicated region fallthrough
CT: control target
= control target key end

     0   :  { %vm19_vm0 = vcmask 130048   ;;  %v202_v1 = vmov 0.0   ;;  %vm58_vm1 = vcmask 261120   ;;  %vm161_vm2 = vcmask 125952   ;;  %s258_s1 = inlined_call_operand.vmem [shape: bf16[32,16], index: 1, kind: input, shape index: {}]   ;;  %s259_s0 = inlined_call_operand.vmem [shape: bf16[32,32], index: 0, kind: input, shape index: {}]   ;;  %s260_s2 = inlined_call_operand.vmem [shape: f32[1,16], index: 2, kind: input, shape index: {}]   ;;  %s261_s3 = inlined_call_operand.vmem [shape: bf16[32,16], index: 3, kind: output, shape index: {}]  }
   0x1   :  { %v198_v0 = vld [vmem:[%s258_s1] sm:$0xff]   ;;  %22 = vst.msk [vmem:[#allocation2 + $0x10] sm:$0xff] %vm19_vm0, %v202_v1  ;;  %20 = vst.msk [vmem:[#allocation2] sm:$0xff] %vm19_vm0, %v202_v1  ;;  %v199_v2 = vld [vmem:[%s258_s1 + $0x8] sm:$0xff]  }
   0x2   :  { %21 = vst.msk [vmem:[#allocation2 + $0x8] sm:$0xff] %vm19_vm0, %v202_v1  ;;  %23 = vst.msk [vmem:[#allocation2 + $0x18] sm:$0xff] %vm19_vm0, %v202_v1  ;;  %189 = vmatprep.subr.bf16.mxu0 %v198_v0  ;;  %v200_v3 = vld [vmem:[%s259_s0] sm:$0xff]   ;;  %v201_v4 = vld [vmem:[%s259_s0 + $0x8] sm:$0xff]  }
   0x3   :  { %190 = vmatpush3.bf16.msra.mxu0 %v198_v0  ;;  %193 = vmatprep.mubr.msk.bf16.mxu0 %vm58_vm1, %v200_v3  ;;  %v176_v17 = vld [vmem:[%s260_s2] ss:$0 sm:$0xff] }
   0x4   :  { %191 = vmatprep.subr.bf16.mxu0 %v199_v2 }
   0x7   :  { %192 = vmatpush3.bf16.msra.mxu0 %v199_v2 }
   0x8   :  { %v26_v5 = vld [vmem:[#allocation2 + $0x10] sm:$0xff]  ;;  %v24_v6 = vld [vmem:[#allocation2] sm:$0xff] }
   0x9   :  { %v27_v8 = vld [vmem:[#allocation2 + $0x18] sm:$0xff]  ;;  %v25_v11 = vld [vmem:[#allocation2 + $0x8] sm:$0xff] }
   0xa   :  { %194 = vmatmul.mubr.msk.bf16.vlgmr.msra.gmra.mrb[0].mxu0 %vm58_vm1, %v201_v4 }
  0xdd   :  { %v195_v7 = vpop.f32.mrb[0].mxu0 }
  0xde   :  { %v116_v9 = vadd.f32 %v195_v7, %v26_v5  ;;  %v99_v10 = vpop.f32.mrb[1].mxu0 }
  0xdf   :  { %v114_v12 = vadd.f32 %v99_v10, %v24_v6  ;;  %v196_v13 = vpop.f32.mrb[2].mxu0 }
  0xe0   :  { %121 = vst.msk [vmem:[#allocation2 + $0x10] sm:$0xff] %vm19_vm0, %v116_v9  ;;  %v117_v14 = vadd.f32 %v196_v13, %v27_v8  ;;  %v102_v15 = vpop.f32.mrb[3].mxu0 }
  0xe1   :  { %119 = vst.msk [vmem:[#allocation2] sm:$0xff] %vm19_vm0, %v114_v12  ;;  %v115_v16 = vadd.f32 %v102_v15, %v25_v11 }
  0xe2   :  { %122 = vst.msk [vmem:[#allocation2 + $0x18] sm:$0xff] %vm19_vm0, %v117_v14 }
  0xe3   :  { %120 = vst.msk [vmem:[#allocation2 + $0x8] sm:$0xff] %vm19_vm0, %v115_v16 }
  0xe7   :  { %v128_v18 = vld [vmem:[#allocation2 + $0x10] sm:$0xff] }
  0xe8   :  { %v139_v19 = vadd.f32 %v176_v17, %v128_v18  ;;  %v126_v20 = vld [vmem:[#allocation2] sm:$0xff] }
  0xe9   :  { %v137_v21 = vadd.f32 %v176_v17, %v126_v20  ;;  %v129_v22 = vld [vmem:[#allocation2 + $0x18] sm:$0xff] }
  0xea   :  { %v143_v23 = vmax.f32 %v139_v19, 0.0  ;;  %v140_v24 = vadd.f32 %v176_v17, %v129_v22  ;;  %v127_v25 = vld [vmem:[#allocation2 + $0x8] sm:$0xff] }
  0xeb   :  { %v141_v26 = vmax.f32 %v137_v21, 0.0  ;;  %v138_v27 = vadd.f32 %v176_v17, %v127_v25 }
  0xec   :  { %v183_v28 = vpack.c.bf16 %v143_v23, %v143_v23  ;;  %v144_v29 = vmax.f32 %v140_v24, 0.0 }
  0xed   :  { %v181_v30 = vpack.c.bf16 %v141_v26, %v141_v26  ;;  %v142_v31 = vmax.f32 %v138_v27, 0.0 }
  0xee   :  { %164 = vst.msk [vmem:[%s261_s3 + $0x8] sm:$0xf] %vm161_vm2, %v183_v28  ;;  %v184_v32 = vpack.c.bf16 %v144_v29, %v144_v29 }
  0xef   :  { %162 = vst.msk [vmem:[%s261_s3] sm:$0xf] %vm161_vm2, %v181_v30  ;;  %v182_v33 = vpack.c.bf16 %v142_v31, %v142_v31 }
  0xf0   :  { %165 = vst.msk [vmem:[%s261_s3 + $0xc] sm:$0xf] %vm161_vm2, %v184_v32 }
  0xf1   :  { %163 = vst.msk [vmem:[%s261_s3 + $0x4] sm:$0xf] %vm161_vm2, %v182_v33 }

// kernel: forward.39
= control target key start
LH: loop header
LB: loop body
LE: loop exit
PB: predicated region body
PF: predicated region fallthrough
CT: control target
= control target key end

     0   :  { %v1591_v34 = vmov 0   ;;  %vm692_vm0 = vcmask 654336   ;;  %vm19_vm1 = vcmask 130048   ;;  %vm1163_vm2 = vcmask 125952   ;;  %s2082_s1 = inlined_call_operand.vmem [shape: bf16[720,16], index: 1, kind: input, shape index: {}]   ;;  %s2083_s0 = inlined_call_operand.vmem [shape: bf16[128,720], index: 0, kind: input, shape index: {}]   ;;  %s2084_s2 = inlined_call_operand.vmem [shape: f32[1,16], index: 2, kind: input, shape index: {}]   ;;  %s2085_s3 = inlined_call_operand.vmem [shape: bf16[128,16], index: 3, kind: output, shape index: {}]  }
   0x1   :  { %v1474_v0 = vld [vmem:[%s2082_s1 + $0x40] sm:$0xff]   ;;  %v1478_v4 = vld [vmem:[%s2082_s1 + $0x48] sm:$0xff]   ;;  %v1482_v8 = vld [vmem:[%s2082_s1 + $0x50] sm:$0xff]  }
   0x2   :  { %v1475_v1 = vld [vmem:[%s2082_s1 + $0xc0] sm:$0xff]   ;;  %1318 = vmatprep.subr.bf16.mxu0 %v1474_v0  ;;  %v1479_v5 = vld [vmem:[%s2082_s1 + $0xc8] sm:$0xff]   ;;  %v1483_v9 = vld [vmem:[%s2082_s1 + $0xd0] sm:$0xff]  }
   0x3   :  { %v1476_v2 = vld [vmem:[%s2082_s1] sm:$0xff]   ;;  %1382 = vmatprep.subr.bf16.mxu1 %v1475_v1  ;;  %v1480_v6 = vld [vmem:[%s2082_s1 + $0x8] sm:$0xff]   ;;  %v1484_v10 = vld [vmem:[%s2082_s1 + $0x10] sm:$0xff]  }
   0x4   :  { %v1477_v3 = vld [vmem:[%s2082_s1 + $0x80] sm:$0xff]   ;;  %1319 = vmatpush3.bf16.msra.mxu0 %v1476_v2  ;;  %v1481_v7 = vld [vmem:[%s2082_s1 + $0x88] sm:$0xff]   ;;  %v1485_v11 = vld [vmem:[%s2082_s1 + $0x90] sm:$0xff]  }
   0x5   :  { %1383 = vmatpush3.bf16.msra.mxu1 %v1477_v3  ;;  %1320 = vmatprep.subr.bf16.mxu0 %v1478_v4  ;;  %v1486_v12 = vld [vmem:[%s2082_s1 + $0x58] sm:$0xff]   ;;  %v1490_v16 = vld [vmem:[%s2082_s1 + $0x60] sm:$0xff]   ;;  %v1494_v20 = vld [vmem:[%s2082_s1 + $0x68] sm:$0xff]  }
   0x6   :  { %1384 = vmatprep.subr.bf16.mxu1 %v1479_v5  ;;  %v1487_v13 = vld [vmem:[%s2082_s1 + $0xd8] sm:$0xff]   ;;  %v1491_v17 = vld [vmem:[%s2082_s1 + $0xe0] sm:$0xff]   ;;  %v1495_v21 = vld [vmem:[%s2082_s1 + $0xe8] sm:$0xff]  }
   0x7   :  { %v1488_v14 = vld [vmem:[%s2082_s1 + $0x18] sm:$0xff]   ;;  %v1492_v18 = vld [vmem:[%s2082_s1 + $0x20] sm:$0xff]   ;;  %v1496_v22 = vld [vmem:[%s2082_s1 + $0x28] sm:$0xff]  }
   0x8   :  { %1321 = vmatpush3.bf16.msra.mxu0 %v1480_v6  ;;  %v1489_v15 = vld [vmem:[%s2082_s1 + $0x98] sm:$0xff]   ;;  %v1493_v19 = vld [vmem:[%s2082_s1 + $0xa0] sm:$0xff]   ;;  %v1497_v23 = vld [vmem:[%s2082_s1 + $0xa8] sm:$0xff]  }
   0x9   :  { %1385 = vmatpush3.bf16.msra.mxu1 %v1481_v7  ;;  %1322 = vmatprep.subr.bf16.mxu0 %v1482_v8  ;;  %v1498_v24 = vld [vmem:[%s2082_s1 + $0x70] sm:$0xff]   ;;  %v1502_v28 = vld [vmem:[%s2082_s1 + $0x78] sm:$0xff]   ;;  %v1509_v35 = vld [vmem:[%s2083_s0 + $0x8] ss:$24 sps:$4 sm:$0xff]  }
   0xa   :  { %1386 = vmatprep.subr.bf16.mxu1 %v1483_v9  ;;  %v1499_v25 = vld [vmem:[%s2082_s1 + $0xf0] sm:$0xff]   ;;  %v1503_v29 = vld [vmem:[%s2082_s1 + $0xf8] sm:$0xff]   ;;  %v1511_v36 = vld [vmem:[%s2083_s0 + $0xc] ss:$24 sps:$4 sm:$0xff]  }
   0xb   :  { %v1500_v26 = vld [vmem:[%s2082_s1 + $0x30] sm:$0xff]   ;;  %v1504_v30 = vld [vmem:[%s2082_s1 + $0x38] sm:$0xff]   ;;  %v1512_v37 = vld [vmem:[%s2082_s1 + $0x100] sm:$0xff]   ;;  %846 = vmatprep.mubr.bf16.mxu1 %v1511_v36 }
   0xc   :  { %1323 = vmatpush3.bf16.msra.mxu0 %v1484_v10  ;;  %v1501_v27 = vld [vmem:[%s2082_s1 + $0xb0] sm:$0xff]   ;;  %v1505_v31 = vld [vmem:[%s2082_s1 + $0xb8] sm:$0xff]   ;;  %v1513_v38 = vld [vmem:[%s2082_s1 + $0x108] sm:$0xff]  }
   0xd   :  { %1387 = vmatpush3.bf16.msra.mxu1 %v1485_v11  ;;  %1324 = vmatprep.subr.bf16.mxu0 %v1486_v12  ;;  %v1506_v32 = vld [vmem:[%s2083_s0] ss:$24 sps:$4 sm:$0xff]   ;;  %v1508_v33 = vld [vmem:[%s2083_s0 + $0x4] ss:$24 sps:$4 sm:$0xff]   ;;  %v1514_v39 = vld [vmem:[%s2083_s0 + $0x34] ss:$24 sps:$4 sm:$0xff]  }
   0xe   :  { %1388 = vmatprep.subr.bf16.mxu1 %v1487_v13  ;;  %749 = vmatprep.mubr.bf16.mxu0 %v1508_v33  ;;  %v1516_v40 = vld [vmem:[%s2083_s0 + $0x3c] ss:$24 sps:$4 sm:$0xff]   ;;  %v1518_v41 = vld [vmem:[%s2083_s0 + $0x30] ss:$24 sps:$4 sm:$0xff]   ;;  %v1523_v45 = vld [vmem:[%s2083_s0 + $0x6c] ss:$24 sps:$4 sm:$0xff]  }
   0xf   :  { %v1519_v42 = vld [vmem:[%s2083_s0 + $0x38] ss:$24 sps:$4 sm:$0xff]   ;;  %v1521_v44 = vld [vmem:[%s2083_s0 + $0x64] ss:$24 sps:$4 sm:$0xff]   ;;  %v1526_v48 = vld [vmem:[%s2083_s0 + $0x68] ss:$24 sps:$4 sm:$0xff]  }
  0x10   :  { %1325 = vmatpush3.bf16.msra.mxu0 %v1488_v14  ;;  %v1520_v43 = vld [vmem:[%s2082_s1 + $0x110] sm:$0xff]   ;;  %v1527_v46 = vld [vmem:[%s2082_s1 + $0x118] sm:$0xff]   ;;  %v1528_v49 = vld [vmem:[%s2082_s1 + $0x120] sm:$0xff]  }
  0x11   :  { %1389 = vmatpush3.bf16.msra.mxu1 %v1489_v15  ;;  %1326 = vmatprep.subr.bf16.mxu0 %v1490_v16  ;;  %v1525_v47 = vld [vmem:[%s2083_s0 + $0x60] ss:$24 sps:$4 sm:$0xff]   ;;  %v1529_v50 = vld [vmem:[%s2083_s0 + $0x94] ss:$24 sps:$4 sm:$0xff]   ;;  %v1533_v53 = vld [vmem:[%s2083_s0 + $0x90] ss:$24 sps:$4 sm:$0xff]  }
  0x12   :  { %1390 = vmatprep.subr.bf16.mxu1 %v1491_v17  ;;  %v1531_v51 = vld [vmem:[%s2083_s0 + $0x9c] ss:$24 sps:$4 sm:$0xff]   ;;  %v1535_v52 = vld [vmem:[%s2082_s1 + $0x128] sm:$0xff]   ;;  %v1534_v54 = vld [vmem:[%s2083_s0 + $0x98] ss:$24 sps:$4 sm:$0xff]  }
  0x13   :  { %v1536_v55 = vld [vmem:[%s2083_s0 + $0xc4] ss:$24 sps:$4 sm:$0xff]   ;;  %v1540_v57 = vld [vmem:[%s2082_s1 + $0x130] sm:$0xff]   ;;  %v1541_v59 = vld [vmem:[%s2083_s0 + $0xc0] ss:$24 sps:$4 sm:$0xff]  }
  0x14   :  { %1327 = vmatpush3.bf16.msra.mxu0 %v1492_v18  ;;  %v1538_v56 = vld [vmem:[%s2083_s0 + $0xcc] ss:$24 sps:$4 sm:$0xff]   ;;  %v1543_v58 = vld [vmem:[%s2082_s1 + $0x138] sm:$0xff]   ;;  %v1542_v60 = vld [vmem:[%s2083_s0 + $0xc8] ss:$24 sps:$4 sm:$0xff]  }
  0x15   :  { %1391 = vmatpush3.bf16.msra.mxu1 %v1493_v19  ;;  %1328 = vmatprep.subr.bf16.mxu0 %v1494_v20  ;;  %v1544_v61 = vld [vmem:[%s2083_s0 + $0xf4] ss:$24 sps:$4 sm:$0xff]   ;;  %v1550_v63 = vld [vmem:[%s2082_s1 + $0x140] sm:$0xff]   ;;  %v1548_v1 = vld [vmem:[%s2083_s0 + $0xf0] ss:$24 sps:$4 sm:$0xff]  }
  0x16   :  { %1392 = vmatprep.subr.bf16.mxu1 %v1495_v21  ;;  %v1546_v62 = vld [vmem:[%s2083_s0 + $0xfc] ss:$24 sps:$4 sm:$0xff]   ;;  %v1551_v0 = vld [vmem:[%s2082_s1 + $0x148] sm:$0xff]   ;;  %v1549_v2 = vld [vmem:[%s2083_s0 + $0xf8] ss:$24 sps:$4 sm:$0xff]  }
  0x17   :  { %v1552_v3 = vld [vmem:[%s2083_s0 + $0x124] ss:$24 sps:$4 sm:$0xff]   ;;  %v1558_v5 = vld [vmem:[%s2082_s1 + $0x150] sm:$0xff]   ;;  %v1556_v7 = vld [vmem:[%s2083_s0 + $0x120] ss:$24 sps:$4 sm:$0xff]  }
  0x18   :  { %1329 = vmatpush3.bf16.msra.mxu0 %v1496_v22  ;;  %v1554_v4 = vld [vmem:[%s2083_s0 + $0x12c] ss:$24 sps:$4 sm:$0xff]   ;;  %v1565_v6 = vld [vmem:[%s2082_s1 + $0x158] sm:$0xff]   ;;  %v1557_v8 = vld [vmem:[%s2083_s0 + $0x128] ss:$24 sps:$4 sm:$0xff]  }
  0x19   :  { %1393 = vmatpush3.bf16.msra.mxu1 %v1497_v23  ;;  %1330 = vmatprep.subr.bf16.mxu0 %v1498_v24  ;;  %v1559_v9 = vld [vmem:[%s2083_s0 + $0x154] ss:$24 sps:$4 sm:$0xff]   ;;  %v1566_v11 = vld [vmem:[%s2082_s1 + $0x160] sm:$0xff]   ;;  %v1563_v12 = vld [vmem:[%s2083_s0 + $0x150] ss:$24 sps:$4 sm:$0xff]  }
  0x1a   :  { %1394 = vmatprep.subr.bf16.mxu1 %v1499_v25  ;;  %v1561_v10 = vld [vmem:[%s2083_s0 + $0x15c] ss:$24 sps:$4 sm:$0xff]   ;;  %v1564_v13 = vld [vmem:[%s2083_s0 + $0x158] ss:$24 sps:$4 sm:$0xff]  }
  0x1b   :  { %v1569_v14 = vld [vmem:[%s2083_s0 + $0x14] ss:$24 sps:$4 sm:$0xff]   ;;  %v1567_v16 = vld [vmem:[%s2083_s0 + $0x10] ss:$24 sps:$4 sm:$0xff]   ;;  %v1573_v18 = vld [vmem:[%s2083_s0 + $0x44] ss:$24 sps:$4 sm:$0xff]  }
  0x1c   :  { %1331 = vmatpush3.bf16.msra.mxu0 %v1500_v26  ;;  %v1572_v15 = vld [vmem:[%s2083_s0 + $0xd4] ss:$24 sps:$4 sm:$0xff]   ;;  %v1570_v17 = vld [vmem:[%s2083_s0 + $0xd0] ss:$24 sps:$4 sm:$0xff]   ;;  %v1575_v19 = vld [vmem:[%s2083_s0 + $0x104] ss:$24 sps:$4 sm:$0xff]  }
  0x1d   :  { %1395 = vmatpush3.bf16.msra.mxu1 %v1501_v27  ;;  %1332 = vmatprep.subr.bf16.mxu0 %v1502_v28  ;;  %v1577_v20 = vld [vmem:[%s2083_s0 + $0x40] ss:$24 sps:$4 sm:$0xff]   ;;  %v1579_v22 = vld [vmem:[%s2083_s0 + $0x74] ss:$24 sps:$4 sm:$0xff]   ;;  %v1583_v24 = vld [vmem:[%s2083_s0 + $0x70] ss:$24 sps:$4 sm:$0xff]  }
  0x1e   :  { %1396 = vmatprep.subr.bf16.mxu1 %v1503_v29  ;;  %v1578_v21 = vld [vmem:[%s2083_s0 + $0x100] ss:$24 sps:$4 sm:$0xff]   ;;  %v1581_v23 = vld [vmem:[%s2083_s0 + $0x134] ss:$24 sps:$4 sm:$0xff]   ;;  %v1584_v25 = vld [vmem:[%s2083_s0 + $0x130] ss:$24 sps:$4 sm:$0xff]  }
  0x1f   :  { %v1585_v26 = vld [vmem:[%s2083_s0 + $0xa4] ss:$24 sps:$4 sm:$0xff]   ;;  %v1589_v28 = vld [vmem:[%s2083_s0 + $0xa0] ss:$24 sps:$4 sm:$0xff]  }
  0x20   :  { %1333 = vmatpush3.bf16.msra.mxu0 %v1504_v30  ;;  %v1587_v27 = vld [vmem:[%s2083_s0 + $0x164] ss:$24 sps:$4 sm:$0xff]   ;;  %v1590_v29 = vld [vmem:[%s2083_s0 + $0x160] ss:$24 sps:$4 sm:$0xff]   ;;  %v1592_v30 = vmov 0.0  }
  0x21   :  { %1397 = vmatpush3.bf16.msra.mxu1 %v1505_v31  ;;  %911 = vmatprep.subr.bf16.mxu0 %v1591_v34  ;;  %20 = vst.msk [vmem:[#allocation2] sm:$0xff] %vm19_vm1, %v1592_v30  ;;  %21 = vst.msk [vmem:[#allocation2 + $0x8] sm:$0xff] %vm19_vm1, %v1592_v30 }
  0x22   :  { %1446 = vmatprep.subr.bf16.mxu1 %v1591_v34  ;;  %22 = vst.msk [vmem:[#allocation2 + $0x10] sm:$0xff] %vm19_vm1, %v1592_v30  ;;  %23 = vst.msk [vmem:[#allocation2 + $0x18] sm:$0xff] %vm19_vm1, %v1592_v30 }
  0x23   :  { %750 = vmatmul.mubr.bf16.vlgmr.msra.gmra.mrb[0].mxu0 %v1506_v32  ;;  %24 = vst.msk [vmem:[#allocation2 + $0x20] sm:$0xff] %vm19_vm1, %v1592_v30  ;;  %25 = vst.msk [vmem:[#allocation2 + $0x28] sm:$0xff] %vm19_vm1, %v1592_v30 }
  0x24   :  { %847 = vmatmul.mubr.bf16.vlgmr.msra.gmra.mrb[0].mxu1 %v1509_v35  ;;  %912 = vmatpush1.bf16.msra.mxu0 %v1512_v37  ;;  %26 = vst.msk [vmem:[#allocation2 + $0x30] sm:$0xff] %vm19_vm1, %v1592_v30  ;;  %27 = vst.msk [vmem:[#allocation2 + $0x38] sm:$0xff] %vm19_vm1, %v1592_v30 }
  0x25   :  { %1459 = vmatpush1.bf16.msra.mxu1 %v1512_v37  ;;  %913 = vmatprep.subr.bf16.mxu0 %v1591_v34  ;;  %28 = vst.msk [vmem:[#allocation2 + $0x40] sm:$0xff] %vm19_vm1, %v1592_v30  ;;  %29 = vst.msk [vmem:[#allocation2 + $0x48] sm:$0xff] %vm19_vm1, %v1592_v30 }
  0x26   :  { %1447 = vmatprep.subr.bf16.mxu1 %v1591_v34  ;;  %757 = vmatprep.mubr.bf16.mxu0 %v1514_v39  ;;  %30 = vst.msk [vmem:[#allocation2 + $0x50] sm:$0xff] %vm19_vm1, %v1592_v30  ;;  %31 = vst.msk [vmem:[#allocation2 + $0x58] sm:$0xff] %vm19_vm1, %v1592_v30 }
  0x27   :  { %854 = vmatprep.mubr.bf16.mxu1 %v1516_v40  ;;  %32 = vst.msk [vmem:[#allocation2 + $0x60] sm:$0xff] %vm19_vm1, %v1592_v30  ;;  %33 = vst.msk [vmem:[#allocation2 + $0x68] sm:$0xff] %vm19_vm1, %v1592_v30 }
  0x28   :  { %914 = vmatpush1.bf16.msra.mxu0 %v1513_v38  ;;  %34 = vst.msk [vmem:[#allocation2 + $0x70] sm:$0xff] %vm19_vm1, %v1592_v30  ;;  %35 = vst.msk [vmem:[#allocation2 + $0x78] sm:$0xff] %vm19_vm1, %v1592_v30 }
  0x29   :  { %1460 = vmatpush1.bf16.msra.mxu1 %v1513_v38  ;;  %915 = vmatprep.subr.bf16.mxu0 %v1591_v34 }
  0x2a   :  { %1448 = vmatprep.subr.bf16.mxu1 %v1591_v34 }
  0x2b   :  { %758 = vmatmul.mubr.bf16.gmra.mrb[4].mxu0 %v1518_v41 }
  0x2c   :  { %855 = vmatmul.mubr.bf16.gmra.mrb[4].mxu1 %v1519_v42  ;;  %916 = vmatpush1.bf16.msra.mxu0 %v1520_v43 }
  0x2d   :  { %1461 = vmatpush1.bf16.msra.mxu1 %v1520_v43  ;;  %765 = vmatprep.mubr.bf16.mxu0 %v1521_v44 }
  0x2e   :  { %862 = vmatprep.mubr.bf16.mxu1 %v1523_v45  ;;  %917 = vmatprep.subr.bf16.mxu0 %v1591_v34 }
  0x2f   :  { %1449 = vmatprep.subr.bf16.mxu1 %v1591_v34 }
  0x30   :  { %918 = vmatpush1.bf16.msra.mxu0 %v1527_v46 }
  0x31   :  { %1462 = vmatpush1.bf16.msra.mxu1 %v1527_v46  ;;  %919 = vmatprep.subr.bf16.mxu0 %v1591_v34 }
  0x32   :  { %1450 = vmatprep.subr.bf16.mxu1 %v1591_v34 }
  0x33   :  { %766 = vmatmul.mubr.bf16.gmra.mrb[8].mxu0 %v1525_v47 }
  0x34   :  { %863 = vmatmul.mubr.bf16.gmra.mrb[8].mxu1 %v1526_v48  ;;  %920 = vmatpush1.bf16.msra.mxu0 %v1528_v49 }
  0x35   :  { %1463 = vmatpush1.bf16.msra.mxu1 %v1528_v49  ;;  %773 = vmatprep.mubr.bf16.mxu0 %v1529_v50 }
  0x36   :  { %870 = vmatprep.mubr.bf16.mxu1 %v1531_v51  ;;  %921 = vmatprep.subr.bf16.mxu0 %v1591_v34 }
  0x37   :  { %1451 = vmatprep.subr.bf16.mxu1 %v1591_v34 }
  0x38   :  { %922 = vmatpush1.bf16.msra.mxu0 %v1535_v52 }
  0x39   :  { %1464 = vmatpush1.bf16.msra.mxu1 %v1535_v52  ;;  %923 = vmatprep.subr.bf16.mxu0 %v1591_v34 }
  0x3a   :  { %1452 = vmatprep.subr.bf16.mxu1 %v1591_v34 }
  0x3b   :  { %774 = vmatmul.mubr.bf16.gmra.mrb[12].mxu0 %v1533_v53 }
  0x3c   :  { %871 = vmatmul.mubr.bf16.gmra.mrb[12].mxu1 %v1534_v54  ;;  %781 = vmatprep.mubr.bf16.mxu0 %v1536_v55 }
  0x3d   :  { %878 = vmatprep.mubr.bf16.mxu1 %v1538_v56  ;;  %924 = vmatpush1.bf16.msra.mxu0 %v1540_v57 }
  0x3e   :  { %1465 = vmatpush1.bf16.msra.mxu1 %v1540_v57  ;;  %925 = vmatprep.subr.bf16.mxu0 %v1591_v34 }
  0x3f   :  { %1453 = vmatprep.subr.bf16.mxu1 %v1591_v34 }
  0x41   :  { %926 = vmatpush1.bf16.msra.mxu0 %v1543_v58 }
  0x42   :  { %1466 = vmatpush1.bf16.msra.mxu1 %v1543_v58  ;;  %927 = vmatprep.subr.bf16.mxu0 %v1591_v34 }
  0x43   :  { %782 = vmatmul.mubr.bf16.gmra.mrb[16].mxu0 %v1541_v59  ;;  %1454 = vmatprep.subr.bf16.mxu1 %v1591_v34 }
  0x44   :  { %879 = vmatmul.mubr.bf16.gmra.mrb[16].mxu1 %v1542_v60  ;;  %789 = vmatprep.mubr.bf16.mxu0 %v1544_v61 }
  0x45   :  { %886 = vmatprep.mubr.bf16.mxu1 %v1546_v62  ;;  %928 = vmatpush1.bf16.msra.mxu0 %v1550_v63 }
  0x46   :  { %1467 = vmatpush1.bf16.msra.mxu1 %v1550_v63  ;;  %929 = vmatprep.subr.bf16.mxu0 %v1591_v34 }
  0x47   :  { %1455 = vmatprep.subr.bf16.mxu1 %v1591_v34 }
  0x49   :  { %930 = vmatpush1.bf16.msra.mxu0 %v1551_v0 }
  0x4a   :  { %1468 = vmatpush1.bf16.msra.mxu1 %v1551_v0  ;;  %931 = vmatprep.subr.bf16.mxu0 %v1591_v34 }
  0x4b   :  { %790 = vmatmul.mubr.bf16.gmra.mrb[20].mxu0 %v1548_v1  ;;  %1456 = vmatprep.subr.bf16.mxu1 %v1591_v34 }
  0x4c   :  { %887 = vmatmul.mubr.bf16.gmra.mrb[20].mxu1 %v1549_v2  ;;  %797 = vmatprep.mubr.bf16.mxu0 %v1552_v3 }
  0x4d   :  { %894 = vmatprep.mubr.bf16.mxu1 %v1554_v4  ;;  %932 = vmatpush1.bf16.msra.mxu0 %v1558_v5 }
  0x4e   :  { %1469 = vmatpush1.bf16.msra.mxu1 %v1558_v5  ;;  %933 = vmatprep.subr.bf16.mxu0 %v1591_v34 }
  0x4f   :  { %1457 = vmatprep.subr.bf16.mxu1 %v1591_v34 }
  0x51   :  { %934 = vmatpush1.bf16.msra.mxu0 %v1565_v6 }
  0x52   :  { %1470 = vmatpush1.bf16.msra.mxu1 %v1565_v6  ;;  %935 = vmatprep.subr.bf16.mxu0 %v1591_v34 }
  0x53   :  { %798 = vmatmul.mubr.bf16.gmra.mrb[24].mxu0 %v1556_v7  ;;  %1458 = vmatprep.subr.bf16.mxu1 %v1591_v34 }
  0x54   :  { %895 = vmatmul.mubr.bf16.gmra.mrb[24].mxu1 %v1557_v8  ;;  %805 = vmatprep.mubr.bf16.mxu0 %v1559_v9 }
  0x55   :  { %902 = vmatprep.mubr.bf16.mxu1 %v1561_v10  ;;  %936 = vmatpush1.bf16.msra.mxu0 %v1566_v11 }
  0x56   :  { %1471 = vmatpush1.bf16.msra.mxu1 %v1566_v11 }
  0x5b   :  { %806 = vmatmul.mubr.bf16.gmra.mrb[28].mxu0 %v1563_v12 }
  0x5c   :  { %903 = vmatmul.mubr.bf16.gmra.mrb[28].mxu1 %v1564_v13  ;;  %1277 = vmatprep.mubr.msk.bf16.mxu0 %vm692_vm0, %v1569_v14 }
  0x5d   :  { %1281 = vmatprep.mubr.msk.bf16.mxu1 %vm692_vm0, %v1572_v15 }
  0x63   :  { %944 = vmatmul.mubr.bf16.vlgmr.msra.gmra.mrb[32].mxu0 %v1567_v16 }
  0x64   :  { %976 = vmatmul.mubr.bf16.vlgmr.msra.gmra.mrb[32].mxu1 %v1570_v17  ;;  %1278 = vmatprep.mubr.msk.bf16.mxu0 %vm692_vm0, %v1573_v18 }
  0x65   :  { %1282 = vmatprep.mubr.msk.bf16.mxu1 %vm692_vm0, %v1575_v19 }
  0x6b   :  { %952 = vmatmul.mubr.bf16.gmra.mrb[36].mxu0 %v1577_v20 }
  0x6c   :  { %984 = vmatmul.mubr.bf16.gmra.mrb[36].mxu1 %v1578_v21  ;;  %1279 = vmatprep.mubr.msk.bf16.mxu0 %vm692_vm0, %v1579_v22 }
  0x6d   :  { %1283 = vmatprep.mubr.msk.bf16.mxu1 %vm692_vm0, %v1581_v23 }
  0x73   :  { %960 = vmatmul.mubr.bf16.gmra.mrb[40].mxu0 %v1583_v24 }
  0x74   :  { %992 = vmatmul.mubr.bf16.gmra.mrb[40].mxu1 %v1584_v25  ;;  %1280 = vmatprep.mubr.msk.bf16.mxu0 %vm692_vm0, %v1585_v26 }
  0x75   :  { %1284 = vmatprep.mubr.msk.bf16.mxu1 %vm692_vm0, %v1587_v27 }
  0x7b   :  { %968 = vmatmul.mubr.bf16.gmra.mrb[44].mxu0 %v1589_v28 }
  0x7c   :  { %1000 = vmatmul.mubr.bf16.gmra.mrb[44].mxu1 %v1590_v29 }
  0xf6   :  { %v1334_v31 = vpop.f32.mrb[0].mxu0 }
  0xf7   :  { %v1398_v32 = vpop.f32.mrb[0].mxu1  ;;  %v1335_v33 = vpop.f32.mrb[1].mxu0 }
  0xf8   :  { %v1336_v34 = vadd.f32 %v1335_v33, %v1334_v31  ;;  %v1399_v35 = vpop.f32.mrb[1].mxu1  ;;  %v1337_v36 = vpop.f32.mrb[2].mxu0 }
  0xf9   :  { %v1400_v37 = vadd.f32 %v1399_v35, %v1398_v32  ;;  %v1401_v38 = vpop.f32.mrb[2].mxu1  ;;  %v1338_v39 = vpop.f32.mrb[3].mxu0 }
  0xfa   :  { %v1339_v40 = vadd.f32 %v1338_v39, %v1337_v36  ;;  %v1402_v41 = vpop.f32.mrb[3].mxu1 }
  0xfb   :  { %v1403_v42 = vadd.f32 %v1402_v41, %v1401_v38  ;;  %v1942_v43 = vadd.f32 %v1400_v37, %v1336_v34 }
  0xfd   :  { %v1944_v44 = vadd.f32 %v1403_v42, %v1339_v40 }
  0xfe   :  { %v1340_v45 = vpop.f32.mrb[4].mxu0 }
  0xff   :  { %v1404_v46 = vpop.f32.mrb[4].mxu1  ;;  %v1341_v47 = vpop.f32.mrb[5].mxu0 }
 0x100   :  { %v1342_v48 = vadd.f32 %v1341_v47, %v1340_v45  ;;  %v1405_v49 = vpop.f32.mrb[5].mxu1  ;;  %v1343_v50 = vpop.f32.mrb[6].mxu0 }
 0x101   :  { %v1406_v51 = vadd.f32 %v1405_v49, %v1404_v46  ;;  %v1407_v52 = vpop.f32.mrb[6].mxu1  ;;  %v1344_v53 = vpop.f32.mrb[7].mxu0 }
 0x102   :  { %v1345_v54 = vadd.f32 %v1344_v53, %v1343_v50  ;;  %v1408_v55 = vpop.f32.mrb[7].mxu1 }
 0x103   :  { %v1409_v56 = vadd.f32 %v1408_v55, %v1407_v52  ;;  %v1946_v57 = vadd.f32 %v1406_v51, %v1342_v48 }
 0x105   :  { %v1948_v58 = vadd.f32 %v1409_v56, %v1345_v54 }
 0x106   :  { %v1346_v59 = vpop.f32.mrb[8].mxu0 }
 0x107   :  { %v1410_v60 = vpop.f32.mrb[8].mxu1  ;;  %v1347_v61 = vpop.f32.mrb[9].mxu0 }
 0x108   :  { %v1348_v62 = vadd.f32 %v1347_v61, %v1346_v59  ;;  %v1411_v63 = vpop.f32.mrb[9].mxu1  ;;  %v1349_v0 = vpop.f32.mrb[10].mxu0 }
 0x109   :  { %v1412_v1 = vadd.f32 %v1411_v63, %v1410_v60  ;;  %v1413_v2 = vpop.f32.mrb[10].mxu1  ;;  %v1350_v3 = vpop.f32.mrb[11].mxu0 }
 0x10a   :  { %v1351_v4 = vadd.f32 %v1350_v3, %v1349_v0  ;;  %v1414_v5 = vpop.f32.mrb[11].mxu1 }
 0x10b   :  { %v1415_v6 = vadd.f32 %v1414_v5, %v1413_v2  ;;  %v1950_v7 = vadd.f32 %v1412_v1, %v1348_v62 }
 0x10d   :  { %v1952_v8 = vadd.f32 %v1415_v6, %v1351_v4 }
 0x10e   :  { %v1352_v9 = vpop.f32.mrb[12].mxu0 }
 0x10f   :  { %v1416_v10 = vpop.f32.mrb[12].mxu1  ;;  %v1353_v11 = vpop.f32.mrb[13].mxu0 }
 0x110   :  { %v1354_v12 = vadd.f32 %v1353_v11, %v1352_v9  ;;  %v1417_v13 = vpop.f32.mrb[13].mxu1  ;;  %v1355_v14 = vpop.f32.mrb[14].mxu0 }
 0x111   :  { %v1418_v15 = vadd.f32 %v1417_v13, %v1416_v10  ;;  %v1419_v16 = vpop.f32.mrb[14].mxu1  ;;  %v1356_v17 = vpop.f32.mrb[15].mxu0 }
 0x112   :  { %v1357_v18 = vadd.f32 %v1356_v17, %v1355_v14  ;;  %v1420_v19 = vpop.f32.mrb[15].mxu1 }
 0x113   :  { %v1421_v20 = vadd.f32 %v1420_v19, %v1419_v16  ;;  %v1954_v21 = vadd.f32 %v1418_v15, %v1354_v12 }
 0x115   :  { %v1956_v22 = vadd.f32 %v1421_v20, %v1357_v18 }
 0x116   :  { %v1358_v23 = vpop.f32.mrb[16].mxu0 }
 0x117   :  { %v1422_v24 = vpop.f32.mrb[16].mxu1  ;;  %v1359_v25 = vpop.f32.mrb[17].mxu0 }
 0x118   :  { %v1360_v26 = vadd.f32 %v1359_v25, %v1358_v23  ;;  %v1423_v27 = vpop.f32.mrb[17].mxu1  ;;  %v1361_v28 = vpop.f32.mrb[18].mxu0  ;;  %v36_v23 = vld [vmem:[#allocation2] sm:$0xff] }
 0x119   :  { %v1424_v29 = vadd.f32 %v1423_v27, %v1422_v24  ;;  %v1425_v30 = vpop.f32.mrb[18].mxu1  ;;  %v1362_v31 = vpop.f32.mrb[19].mxu0 }
 0x11a   :  { %v1363_v32 = vadd.f32 %v1362_v31, %v1361_v28  ;;  %v1426_v33 = vpop.f32.mrb[19].mxu1  ;;  %v37_v31 = vld [vmem:[#allocation2 + $0x8] sm:$0xff] }
 0x11b   :  { %v1427_v34 = vadd.f32 %v1426_v33, %v1425_v30  ;;  %v881_v35 = vadd.f32 %v1424_v29, %v1360_v26  ;;  %v44_v26 = vld [vmem:[#allocation2 + $0x40] sm:$0xff] }
 0x11d   :  { %v884_v36 = vadd.f32 %v1427_v34, %v1363_v32 }
 0x11e   :  { %v1364_v37 = vpop.f32.mrb[20].mxu0 }
 0x11f   :  { %v1428_v38 = vpop.f32.mrb[20].mxu1  ;;  %v1365_v39 = vpop.f32.mrb[21].mxu0 }
 0x120   :  { %v1366_v40 = vadd.f32 %v1365_v39, %v1364_v37  ;;  %v1429_v41 = vpop.f32.mrb[21].mxu1  ;;  %v1367_v42 = vpop.f32.mrb[22].mxu0  ;;  %v45_v37 = vld [vmem:[#allocation2 + $0x48] sm:$0xff] }
 0x121   :  { %v1430_v45 = vadd.f32 %v1429_v41, %v1428_v38  ;;  %v1431_v46 = vpop.f32.mrb[22].mxu1  ;;  %v1368_v47 = vpop.f32.mrb[23].mxu0 }
 0x122   :  { %v1369_v48 = vadd.f32 %v1368_v47, %v1367_v42  ;;  %v1432_v49 = vpop.f32.mrb[23].mxu1  ;;  %v46_v47 = vld [vmem:[#allocation2 + $0x50] sm:$0xff] }
 0x123   :  { %v1433_v50 = vadd.f32 %v1432_v49, %v1431_v46  ;;  %v889_v51 = vadd.f32 %v1430_v45, %v1366_v40 }
 0x125   :  { %v1958_v52 = vadd.f32 %v1433_v50, %v1369_v48 }
 0x126   :  { %v1370_v53 = vpop.f32.mrb[24].mxu0 }
 0x127   :  { %v1434_v54 = vpop.f32.mrb[24].mxu1  ;;  %v1371_v55 = vpop.f32.mrb[25].mxu0 }
 0x128   :  { %v1372_v56 = vadd.f32 %v1371_v55, %v1370_v53  ;;  %v1435_v59 = vpop.f32.mrb[25].mxu1  ;;  %v1373_v60 = vpop.f32.mrb[26].mxu0 }
 0x129   :  { %v1436_v61 = vadd.f32 %v1435_v59, %v1434_v54  ;;  %v1437_v62 = vpop.f32.mrb[26].mxu1  ;;  %v1374_v63 = vpop.f32.mrb[27].mxu0  ;;  %v39_v54 = vld [vmem:[#allocation2 + $0x18] sm:$0xff] }
 0x12a   :  { %v1375_v0 = vadd.f32 %v1374_v63, %v1373_v60  ;;  %v1438_v1 = vpop.f32.mrb[27].mxu1  ;;  %v47_v60 = vld [vmem:[#allocation2 + $0x58] sm:$0xff] }
 0x12b   :  { %v1439_v2 = vadd.f32 %v1438_v1, %v1437_v62  ;;  %v1960_v3 = vadd.f32 %v1436_v61, %v1372_v56 }
 0x12d   :  { %v1962_v4 = vadd.f32 %v1439_v2, %v1375_v0 }
 0x12e   :  { %v1376_v5 = vpop.f32.mrb[28].mxu0 }
 0x12f   :  { %v1440_v6 = vpop.f32.mrb[28].mxu1  ;;  %v1377_v9 = vpop.f32.mrb[29].mxu0 }
 0x130   :  { %v1378_v10 = vadd.f32 %v1377_v9, %v1376_v5  ;;  %v1441_v11 = vpop.f32.mrb[29].mxu1  ;;  %v1379_v12 = vpop.f32.mrb[30].mxu0 }
 0x131   :  { %v1442_v13 = vadd.f32 %v1441_v11, %v1440_v6  ;;  %v1443_v14 = vpop.f32.mrb[30].mxu1  ;;  %v1380_v15 = vpop.f32.mrb[31].mxu0 }
 0x132   :  { %v1381_v16 = vadd.f32 %v1380_v15, %v1379_v12  ;;  %v1444_v17 = vpop.f32.mrb[31].mxu1 }
 0x133   :  { %v1445_v18 = vadd.f32 %v1444_v17, %v1443_v14  ;;  %v1964_v19 = vadd.f32 %v1442_v13, %v1378_v10  ;;  %v40_v14 = vld [vmem:[#allocation2 + $0x20] sm:$0xff] }
 0x135   :  { %v1966_v20 = vadd.f32 %v1445_v18, %v1381_v16 }
 0x136   :  { %v945_v24 = vpop.f32.mrb[32].mxu0 }
 0x137   :  { %v946_v25 = vadd.f32 %v945_v24, %v1942_v43  ;;  %v977_v27 = vpop.f32.mrb[32].mxu1  ;;  %v947_v28 = vpop.f32.mrb[33].mxu0 }
 0x138   :  { %v978_v29 = vadd.f32 %v977_v27, %v881_v35  ;;  %v979_v30 = vpop.f32.mrb[33].mxu1  ;;  %v948_v32 = vpop.f32.mrb[34].mxu0  ;;  %v38_v35 = vld [vmem:[#allocation2 + $0x10] sm:$0xff] }
 0x139   :  { %v1008_v33 = vadd.f32 %v946_v25, %v36_v23  ;;  %v949_v34 = vadd.f32 %v948_v32, %v1944_v44  ;;  %v980_v38 = vpop.f32.mrb[34].mxu1  ;;  %v950_v39 = vpop.f32.mrb[35].mxu0  ;;  %v48_v23 = vld [vmem:[#allocation2 + $0x60] sm:$0xff]  ;;  %v41_v30 = vld [vmem:[#allocation2 + $0x28] sm:$0xff] }
 0x13a   :  { %v1016_v40 = vadd.f32 %v978_v29, %v44_v26  ;;  %v981_v41 = vadd.f32 %v980_v38, %v884_v36  ;;  %v982_v42 = vpop.f32.mrb[35].mxu1  ;;  %v1978_v36 = vld [vmem:[%s2084_s2] ss:$0 sm:$0xff] }
 0x13b   :  { %1025 = vst.msk [vmem:[#allocation2] sm:$0xff] %vm19_vm1, %v1008_v33  ;;  %v1009_v45 = vadd.f32 %v949_v34, %v37_v31 }
 0x13c   :  { %1033 = vst.msk [vmem:[#allocation2 + $0x40] sm:$0xff] %vm19_vm1, %v1016_v40  ;;  %v1017_v43 = vadd.f32 %v981_v41, %v45_v37 }
 0x13d   :  { %1026 = vst.msk [vmem:[#allocation2 + $0x8] sm:$0xff] %vm19_vm1, %v1009_v45 }
 0x13e   :  { %1034 = vst.msk [vmem:[#allocation2 + $0x48] sm:$0xff] %vm19_vm1, %v1017_v43  ;;  %v953_v46 = vpop.f32.mrb[36].mxu0 }
 0x13f   :  { %v954_v44 = vadd.f32 %v953_v46, %v1946_v57  ;;  %v985_v48 = vpop.f32.mrb[36].mxu1  ;;  %v955_v49 = vpop.f32.mrb[37].mxu0 }
 0x140   :  { %v986_v50 = vadd.f32 %v985_v48, %v889_v51  ;;  %v987_v53 = vpop.f32.mrb[37].mxu1  ;;  %v956_v55 = vpop.f32.mrb[38].mxu0 }
 0x141   :  { %v1010_v56 = vadd.f32 %v954_v44, %v38_v35  ;;  %v957_v59 = vadd.f32 %v956_v55, %v1948_v58  ;;  %v988_v61 = vpop.f32.mrb[38].mxu1  ;;  %v958_v62 = vpop.f32.mrb[39].mxu0  ;;  %v42_v53 = vld [vmem:[#allocation2 + $0x30] sm:$0xff] }
 0x142   :  { %v1044_v63 = vld [vmem:[#allocation2] sm:$0xff]  ;;  %v1018_v57 = vadd.f32 %v986_v50, %v46_v47  ;;  %v989_v0 = vadd.f32 %v988_v61, %v1958_v52  ;;  %v990_v1 = vpop.f32.mrb[39].mxu1 }
 0x143   :  { %v1067_v2 = vadd.f32 %v1978_v36, %v1044_v63  ;;  %v1052_v5 = vld [vmem:[#allocation2 + $0x40] sm:$0xff]  ;;  %1027 = vst.msk [vmem:[#allocation2 + $0x10] sm:$0xff] %vm19_vm1, %v1010_v56  ;;  %v1011_v51 = vadd.f32 %v957_v59, %v39_v54 }
 0x144   :  { %v1075_v6 = vadd.f32 %v1978_v36, %v1052_v5  ;;  %v1045_v9 = vld [vmem:[#allocation2 + $0x8] sm:$0xff]  ;;  %1035 = vst.msk [vmem:[#allocation2 + $0x50] sm:$0xff] %vm19_vm1, %v1018_v57  ;;  %v1019_v58 = vadd.f32 %v989_v0, %v47_v60  ;;  %v50_v60 = vld [vmem:[#allocation2 + $0x70] sm:$0xff] }
 0x145   :  { %v1083_v10 = vmax.f32 %v1067_v2, 0.0  ;;  %v1068_v11 = vadd.f32 %v1978_v36, %v1045_v9  ;;  %v1053_v12 = vld [vmem:[#allocation2 + $0x48] sm:$0xff]  ;;  %1028 = vst.msk [vmem:[#allocation2 + $0x18] sm:$0xff] %vm19_vm1, %v1011_v51  ;;  %v43_v2 = vld [vmem:[#allocation2 + $0x38] sm:$0xff] }
 0x146   :  { %v1091_v52 = vmax.f32 %v1075_v6, 0.0  ;;  %v1076_v13 = vadd.f32 %v1978_v36, %v1053_v12  ;;  %1036 = vst.msk [vmem:[#allocation2 + $0x58] sm:$0xff] %vm19_vm1, %v1019_v58  ;;  %v961_v15 = vpop.f32.mrb[40].mxu0 }
 0x147   :  { %v1302_v16 = vpack.c.bf16 %v1083_v10, %v1083_v10  ;;  %v1084_v17 = vmax.f32 %v1068_v11, 0.0  ;;  %v962_v18 = vadd.f32 %v961_v15, %v1950_v7  ;;  %v993_v24 = vpop.f32.mrb[40].mxu1  ;;  %v963_v25 = vpop.f32.mrb[41].mxu0  ;;  %v49_v7 = vld [vmem:[#allocation2 + $0x68] sm:$0xff] }
 0x148   :  { %v1310_v26 = vpack.c.bf16 %v1091_v52, %v1091_v52  ;;  %v1092_v27 = vmax.f32 %v1076_v13, 0.0  ;;  %v994_v28 = vadd.f32 %v993_v24, %v1960_v3  ;;  %v995_v29 = vpop.f32.mrb[41].mxu1  ;;  %v964_v31 = vpop.f32.mrb[42].mxu0 }
 0x149   :  { %1164 = vst.msk [vmem:[%s2085_s3] sm:$0xf] %vm1163_vm2, %v1302_v16  ;;  %v1303_v32 = vpack.c.bf16 %v1084_v17, %v1084_v17  ;;  %v1012_v33 = vadd.f32 %v962_v18, %v40_v14  ;;  %v965_v34 = vadd.f32 %v964_v31, %v1952_v8  ;;  %v996_v37 = vpop.f32.mrb[42].mxu1  ;;  %v966_v38 = vpop.f32.mrb[43].mxu0 }
 0x14a   :  { %1172 = vst.msk [vmem:[%s2085_s3 + $0x20] sm:$0xf] %vm1163_vm2, %v1310_v26  ;;  %v1311_v3 = vpack.c.bf16 %v1092_v27, %v1092_v27  ;;  %v1046_v39 = vld [vmem:[#allocation2 + $0x10] sm:$0xff]  ;;  %v1020_v40 = vadd.f32 %v994_v28, %v48_v23  ;;  %v997_v41 = vadd.f32 %v996_v37, %v1962_v4  ;;  %v998_v42 = vpop.f32.mrb[43].mxu1 }
 0x14b   :  { %1165 = vst.msk [vmem:[%s2085_s3 + $0x4] sm:$0xf] %vm1163_vm2, %v1303_v32  ;;  %v1069_v8 = vadd.f32 %v1978_v36, %v1046_v39  ;;  %v1054_v45 = vld [vmem:[#allocation2 + $0x50] sm:$0xff]  ;;  %v1013_v43 = vadd.f32 %v965_v34, %v41_v30 }
 0x14c   :  { %1029 = vst.msk [vmem:[#allocation2 + $0x20] sm:$0xff] %vm19_vm1, %v1012_v33  ;;  %v1077_v35 = vadd.f32 %v1978_v36, %v1054_v45  ;;  %v1047_v4 = vld [vmem:[#allocation2 + $0x18] sm:$0xff]  ;;  %1037 = vst.msk [vmem:[#allocation2 + $0x60] sm:$0xff] %vm19_vm1, %v1020_v40  ;;  %v1021_v46 = vadd.f32 %v997_v41, %v49_v7 }
 0x14d   :  { %1173 = vst.msk [vmem:[%s2085_s3 + $0x24] sm:$0xf] %vm1163_vm2, %v1311_v3  ;;  %v1085_v44 = vmax.f32 %v1069_v8, 0.0  ;;  %v1070_v47 = vadd.f32 %v1978_v36, %v1047_v4  ;;  %v1055_v48 = vld [vmem:[#allocation2 + $0x58] sm:$0xff] }
 0x14e   :  { %1030 = vst.msk [vmem:[#allocation2 + $0x28] sm:$0xff] %vm19_vm1, %v1013_v43  ;;  %v1093_v49 = vmax.f32 %v1077_v35, 0.0  ;;  %v1078_v50 = vadd.f32 %v1978_v36, %v1055_v48  ;;  %1038 = vst.msk [vmem:[#allocation2 + $0x68] sm:$0xff] %vm19_vm1, %v1021_v46  ;;  %v969_v54 = vpop.f32.mrb[44].mxu0 }
 0x14f   :  { %v1304_v55 = vpack.c.bf16 %v1085_v44, %v1085_v44  ;;  %v1086_v56 = vmax.f32 %v1070_v47, 0.0  ;;  %v970_v59 = vadd.f32 %v969_v54, %v1954_v21  ;;  %v1001_v61 = vpop.f32.mrb[44].mxu1  ;;  %v971_v62 = vpop.f32.mrb[45].mxu0  ;;  %v51_v21 = vld [vmem:[#allocation2 + $0x78] sm:$0xff] }
 0x150   :  { %v1312_v63 = vpack.c.bf16 %v1093_v49, %v1093_v49  ;;  %v1094_v57 = vmax.f32 %v1078_v50, 0.0  ;;  %v1002_v0 = vadd.f32 %v1001_v61, %v1964_v19  ;;  %v1003_v1 = vpop.f32.mrb[45].mxu1  ;;  %v972_v5 = vpop.f32.mrb[46].mxu0 }
 0x151   :  { %1166 = vst.msk [vmem:[%s2085_s3 + $0x8] sm:$0xf] %vm1163_vm2, %v1304_v55  ;;  %v1305_v51 = vpack.c.bf16 %v1086_v56, %v1086_v56  ;;  %v1014_v6 = vadd.f32 %v970_v59, %v42_v53  ;;  %v973_v9 = vadd.f32 %v972_v5, %v1956_v22  ;;  %v1004_v58 = vpop.f32.mrb[46].mxu1  ;;  %v974_v10 = vpop.f32.mrb[47].mxu0 }
 0x152   :  { %1174 = vst.msk [vmem:[%s2085_s3 + $0x28] sm:$0xf] %vm1163_vm2, %v1312_v63  ;;  %v1313_v19 = vpack.c.bf16 %v1094_v57, %v1094_v57  ;;  %v1022_v12 = vadd.f32 %v1002_v0, %v50_v60  ;;  %v1005_v52 = vadd.f32 %v1004_v58, %v1966_v20  ;;  %v1006_v13 = vpop.f32.mrb[47].mxu1 }
 0x153   :  { %v1048_v11 = vld [vmem:[#allocation2 + $0x20] sm:$0xff]  ;;  %1167 = vst.msk [vmem:[%s2085_s3 + $0xc] sm:$0xf] %vm1163_vm2, %v1305_v51  ;;  %v1015_v15 = vadd.f32 %v973_v9, %v43_v2 }
 0x154   :  { %v1071_v22 = vadd.f32 %v1978_v36, %v1048_v11  ;;  %v1056_v14 = vld [vmem:[#allocation2 + $0x60] sm:$0xff]  ;;  %1031 = vst.msk [vmem:[#allocation2 + $0x30] sm:$0xff] %vm19_vm1, %v1014_v6  ;;  %1039 = vst.msk [vmem:[#allocation2 + $0x70] sm:$0xff] %vm19_vm1, %v1022_v12  ;;  %v1023_v17 = vadd.f32 %v1005_v52, %v51_v21 }
 0x155   :  { %1175 = vst.msk [vmem:[%s2085_s3 + $0x2c] sm:$0xf] %vm1163_vm2, %v1313_v19  ;;  %v1079_v16 = vadd.f32 %v1978_v36, %v1056_v14  ;;  %v1049_v20 = vld [vmem:[#allocation2 + $0x28] sm:$0xff] }
 0x156   :  { %v1087_v18 = vmax.f32 %v1071_v22, 0.0  ;;  %v1072_v23 = vadd.f32 %v1978_v36, %v1049_v20  ;;  %v1057_v24 = vld [vmem:[#allocation2 + $0x68] sm:$0xff]  ;;  %1032 = vst.msk [vmem:[#allocation2 + $0x38] sm:$0xff] %vm19_vm1, %v1015_v15  ;;  %1040 = vst.msk [vmem:[#allocation2 + $0x78] sm:$0xff] %vm19_vm1, %v1023_v17 }
 0x157   :  { %v1095_v25 = vmax.f32 %v1079_v16, 0.0  ;;  %v1080_v26 = vadd.f32 %v1978_v36, %v1057_v24 }
 0x158   :  { %v1306_v27 = vpack.c.bf16 %v1087_v18, %v1087_v18  ;;  %v1088_v28 = vmax.f32 %v1072_v23, 0.0 }
 0x159   :  { %v1314_v29 = vpack.c.bf16 %v1095_v25, %v1095_v25  ;;  %v1096_v30 = vmax.f32 %v1080_v26, 0.0 }
 0x15a   :  { %1168 = vst.msk [vmem:[%s2085_s3 + $0x10] sm:$0xf] %vm1163_vm2, %v1306_v27  ;;  %v1307_v31 = vpack.c.bf16 %v1088_v28, %v1088_v28 }
 0x15b   :  { %1176 = vst.msk [vmem:[%s2085_s3 + $0x30] sm:$0xf] %vm1163_vm2, %v1314_v29  ;;  %v1315_v32 = vpack.c.bf16 %v1096_v30, %v1096_v30  ;;  %v1050_v33 = vld [vmem:[#allocation2 + $0x30] sm:$0xff] }
 0x15c   :  { %1169 = vst.msk [vmem:[%s2085_s3 + $0x14] sm:$0xf] %vm1163_vm2, %v1307_v31  ;;  %v1073_v34 = vadd.f32 %v1978_v36, %v1050_v33  ;;  %v1058_v7 = vld [vmem:[#allocation2 + $0x70] sm:$0xff] }
 0x15d   :  { %1177 = vst.msk [vmem:[%s2085_s3 + $0x34] sm:$0xf] %vm1163_vm2, %v1315_v32  ;;  %v1081_v37 = vadd.f32 %v1978_v36, %v1058_v7  ;;  %v1051_v38 = vld [vmem:[#allocation2 + $0x38] sm:$0xff] }
 0x15e   :  { %v1089_v3 = vmax.f32 %v1073_v34, 0.0  ;;  %v1074_v39 = vadd.f32 %v1978_v36, %v1051_v38  ;;  %v1059_v40 = vld [vmem:[#allocation2 + $0x78] sm:$0xff] }
 0x15f   :  { %v1097_v41 = vmax.f32 %v1081_v37, 0.0  ;;  %v1082_v42 = vadd.f32 %v1978_v36, %v1059_v40 }
 0x160   :  { %v1308_v8 = vpack.c.bf16 %v1089_v3, %v1089_v3  ;;  %v1090_v45 = vmax.f32 %v1074_v39, 0.0 }
 0x161   :  { %v1316_v43 = vpack.c.bf16 %v1097_v41, %v1097_v41  ;;  %v1098_v35 = vmax.f32 %v1082_v42, 0.0 }
 0x162   :  { %1170 = vst.msk [vmem:[%s2085_s3 + $0x18] sm:$0xf] %vm1163_vm2, %v1308_v8  ;;  %v1309_v4 = vpack.c.bf16 %v1090_v45, %v1090_v45 }
 0x163   :  { %1178 = vst.msk [vmem:[%s2085_s3 + $0x38] sm:$0xf] %vm1163_vm2, %v1316_v43  ;;  %v1317_v46 = vpack.c.bf16 %v1098_v35, %v1098_v35 }
 0x164   :  { %1171 = vst.msk [vmem:[%s2085_s3 + $0x1c] sm:$0xf] %vm1163_vm2, %v1309_v4 }
 0x165   :  { %1179 = vst.msk [vmem:[%s2085_s3 + $0x3c] sm:$0xf] %vm1163_vm2, %v1317_v46 }

// kernel: forward.40
= control target key start
LH: loop header
LB: loop body
LE: loop exit
PB: predicated region body
PF: predicated region fallthrough
CT: control target
= control target key end

     0   :  { %s3414_s26 = smov 0   ;;  %s4128_s0 = inlined_call_operand.vmem [shape: bf16[512,432], index: 0, kind: input, shape index: {}]   ;;  %s4129_s1 = inlined_call_operand.vmem [shape: bf16[432,8], index: 1, kind: input, shape index: {}]   ;;  %s4130_s2 = inlined_call_operand.vmem [shape: f32[1,8], index: 2, kind: input, shape index: {}]   ;;  %s4131_s3 = inlined_call_operand.vmem [shape: bf16[1,8], index: 3, kind: input, shape index: {}]   ;;  %s4132_s4 = inlined_call_operand.<no memory space> [shape: f32[1,1], index: 4, kind: input, shape index: {}]   ;;  %s4133_s5 = inlined_call_operand.vmem [shape: bf16[512,4], index: 5, kind: input, shape index: {}]   ;;  %s4134_s6 = inlined_call_operand.vmem [shape: bf16[512,4], index: 6, kind: output, shape index: {0}]   ;;  %s4135_s7 = inlined_call_operand.vmem [shape: bf16[512,2], index: 7, kind: output, shape index: {1}]  }
   0x1   :  { %v13_v0 = vstv %s4132_s4 }
   0x2   :  { %14 = vst [vmem:[#allocation2] sm:$0x1] %v13_v0 }
   0x3 LB: > { %s2623_s27 = sadd.s32 4294967295, %s3368_s26   ;;  %p2627_p0 = scmp.ge.s32.totalorder %s3368_s26, 1  ;;  %s3368_s26 = sphi %s3414_s26, %s20_s26  }
   0x4   : > { %p255_p1 = scmp.lt.s32.totalorder %s3368_s26, 3 }
   0x6   : > { %p256_p2 = pnand %p2627_p0, %p255_p1 }
   0x7   : > { %v3111_v1 = vld [vmem:[%s4129_s1 + $0x80] sm:$0xff] (!%p256_p2)   ;;  %v3370_v2 = vmov (!%p256_p2), 0   ;;  %v3114_v5 = vld [vmem:[%s4129_s1 + $0x88] sm:$0xff] (!%p256_p2)   ;;  %v3117_v8 = vld [vmem:[%s4129_s1 + $0x90] sm:$0xff] (!%p256_p2)   ;;  %s2628_s24 = sshll.u32 (!%p256_p2), %s2623_s27, 5  ;;  %vm915_vm0 = vcmask (!%p256_p2), 392192  }
   0x8   : > { %259 = sbr.rel (%p256_p2) target bundleno = 867 (0x363), region = 44  ;;  %1125 = vmatprep.subr.bf16.mxu1 (!%p256_p2), %v3370_v2  ;;  %v3112_v3 = vld [vmem:[%s4129_s1 + $0x40] sm:$0xff] (!%p256_p2)   ;;  %3109 = vset.pattern.permute.xlu0 (!%p256_p2), %v3370_v2  ;;  %v3115_v6 = vld [vmem:[%s4129_s1 + $0x48] sm:$0xff] (!%p256_p2)   ;;  %v3118_v9 = vld [vmem:[%s4129_s1 + $0x50] sm:$0xff] (!%p256_p2)   ;;  %p299_p3 = scmp.lt.s32.totalorder (!%p256_p2), %s2628_s24, 63  ;;  %vm1356_vm1 = vcmask (!%p256_p2), 64512  }
   0x9   : > { %1126 = vmatpush1.bf16.msra.mxu1 (!%p256_p2), %v3111_v1  ;;  %v3113_v4 = vld [vmem:[%s4129_s1] sm:$0xff] (!%p256_p2)   ;;  %3110 = vset.pattern.permute.xlu1 (!%p256_p2), %v3370_v2  ;;  %v3116_v7 = vld [vmem:[%s4129_s1 + $0x8] sm:$0xff] (!%p256_p2)   ;;  %v3119_v10 = vld [vmem:[%s4129_s1 + $0x10] sm:$0xff] (!%p256_p2)   ;;  %vm2068_vm2 = vcmask (!%p256_p2), 27648   ;;  %vm2101_vm3 = vcmask (!%p256_p2), 31744   ;;  %vm2327_vm4 = vcmask (!%p256_p2), 7168  }
   0xa   : > { %2988 = vmatprep.subr.bf16.mxu0 (!%p256_p2), %v3112_v3  ;;  %1127 = vmatprep.subr.bf16.mxu1 (!%p256_p2), %v3370_v2  ;;  %v3120_v11 = vld [vmem:[%s4129_s1 + $0x98] sm:$0xff] (!%p256_p2)   ;;  %v3124_v14 = vld [vmem:[%s4129_s1 + $0x60] sm:$0xff] (!%p256_p2)   ;;  %v3127_v17 = vld [vmem:[%s4129_s1 + $0x68] sm:$0xff] (!%p256_p2)   ;;  %vm2488_vm5 = vcmask (!%p256_p2), 11264  }
   0xb   : > { %2989 = vmatpush3.bf16.msra.mxu0 (!%p256_p2), %v3113_v4  ;;  %v3121_v12 = vld [vmem:[%s4129_s1 + $0x58] sm:$0xff] (!%p256_p2)   ;;  %v3123_v15 = vld [vmem:[%s4129_s1 + $0xa0] sm:$0xff] (!%p256_p2)   ;;  %v3126_v18 = vld [vmem:[%s4129_s1 + $0xa8] sm:$0xff] (!%p256_p2)  }
   0xc   : > { %2990 = vmatprep.subr.bf16.mxu0 (!%p256_p2), %v3115_v6  ;;  %v3122_v13 = vld [vmem:[%s4129_s1 + $0x18] sm:$0xff] (!%p256_p2)   ;;  %v3125_v16 = vld [vmem:[%s4129_s1 + $0x20] sm:$0xff] (!%p256_p2)   ;;  %v3128_v19 = vld [vmem:[%s4129_s1 + $0x28] sm:$0xff] (!%p256_p2)  }
   0xd   : > { %1128 = vmatpush1.bf16.msra.mxu1 (!%p256_p2), %v3114_v5  ;;  %v3130_v20 = vld [vmem:[%s4129_s1 + $0x70] sm:$0xff] (!%p256_p2)   ;;  %v3132_v23 = vld [vmem:[%s4129_s1 + $0xb8] sm:$0xff] (!%p256_p2)   ;;  %v3135_v27 = vld [vmem:[%s4129_s1 + $0xc0] sm:$0xff] (!%p256_p2)  }
   0xe   : > { %1129 = vmatprep.subr.bf16.mxu1 (!%p256_p2), %v3370_v2  ;;  %v3129_v21 = vld [vmem:[%s4129_s1 + $0xb0] sm:$0xff] (!%p256_p2)   ;;  %v3133_v24 = vld [vmem:[%s4129_s1 + $0x78] sm:$0xff] (!%p256_p2)   ;;  %v3139_v31 = vld [vmem:[%s4129_s1 + $0xc8] sm:$0xff] (!%p256_p2)  }
   0xf   : > { %2991 = vmatpush3.bf16.msra.mxu0 %v3116_v7  ;;  %s4137_s24 = smov (!%p299_p3, %s2628_s24), 63  ;;  %v3131_v22 = vld [vmem:[%s4129_s1 + $0x30] sm:$0xff]   ;;  %v3134_v26 = vld [vmem:[%s4129_s1 + $0x38] sm:$0xff]  }
  0x10   : > { %2992 = vmatprep.subr.bf16.mxu0 %v3118_v9  ;;  %s2844_s18 = sshll.u32 %s4137_s24, 4  ;;  %v3140_v32 = vld [vmem:[%s4129_s1 + $0xd0] sm:$0xff]   ;;  %s3745_s22 = sshll.u32 %s4137_s24, 2 }
  0x11   : > { %1130 = vmatpush1.bf16.msra.mxu1 %v3117_v8  ;;  %s3500_s4 = scalar_lea.vmem %s4128_s0, %s2844_s18  ;;  %s3751_s28 = scalar_lea.vmem %s4133_s5, %s3745_s22 }
  0x12   : > { %1131 = vmatprep.subr.bf16.mxu1 %v3370_v2  ;;  %v3138_v25 = vld [vmem:[%s3500_s4 + $0x4] ss:$16 sps:$4 sm:$0xff]   ;;  %v3145_v28 = vld [vmem:[%s3500_s4 + $0xc] ss:$16 sps:$4 sm:$0xff]   ;;  %v3136_v29 = vld [vmem:[%s3500_s4] ss:$16 sps:$4 sm:$0xff]   ;;  %s4027_s27 = scalar_lea.vmem %s4135_s7, %s3745_s22 }
  0x13   : > { %2993 = vmatpush3.bf16.msra.mxu0 %v3119_v10  ;;  %996 = vmatprep.mubr.bf16.mxu0 %v3138_v25  ;;  %v3141_v30 = vld [vmem:[%s3500_s4 + $0x24] ss:$16 sps:$4 sm:$0xff]   ;;  %v3146_v33 = vld [vmem:[%s3500_s4 + $0x20] ss:$16 sps:$4 sm:$0xff]   ;;  %v3143_v35 = vld [vmem:[%s3500_s4 + $0x8] ss:$16 sps:$4 sm:$0xff]  }
  0x14   : > { %2994 = vmatprep.subr.bf16.mxu0 %v3121_v12  ;;  %2729 = vmatprep.mubr.msk.bf16.mxu1 %vm915_vm0, %v3145_v28  ;;  %v3147_v34 = vld [vmem:[%s3500_s4 + $0x44] ss:$16 sps:$4 sm:$0xff]   ;;  %v3149_v36 = vld [vmem:[%s3500_s4 + $0x2c] ss:$16 sps:$4 sm:$0xff]   ;;  %v3151_v37 = vld [vmem:[%s3500_s4 + $0x40] ss:$16 sps:$4 sm:$0xff]  }
  0x15   : > { %1132 = vmatpush1.bf16.msra.mxu1 %v3120_v11  ;;  %v3153_v38 = vld [vmem:[%s3500_s4 + $0x64] ss:$16 sps:$4 sm:$0xff]   ;;  %v3152_v39 = vld [vmem:[%s3500_s4 + $0x28] ss:$16 sps:$4 sm:$0xff]   ;;  %v3155_v40 = vld [vmem:[%s3500_s4 + $0x4c] ss:$16 sps:$4 sm:$0xff]  }
  0x16   : > { %1133 = vmatprep.subr.bf16.mxu1 %v3370_v2  ;;  %v3157_v41 = vld [vmem:[%s3500_s4 + $0x60] ss:$16 sps:$4 sm:$0xff]   ;;  %v3159_v42 = vld [vmem:[%s3500_s4 + $0x84] ss:$16 sps:$4 sm:$0xff]   ;;  %v3158_v43 = vld [vmem:[%s3500_s4 + $0x48] ss:$16 sps:$4 sm:$0xff]  }
  0x17   : > { %2995 = vmatpush3.bf16.msra.mxu0 %v3122_v13  ;;  %v3161_v44 = vld [vmem:[%s3500_s4 + $0x6c] ss:$16 sps:$4 sm:$0xff]   ;;  %v3163_v45 = vld [vmem:[%s3500_s4 + $0x80] ss:$16 sps:$4 sm:$0xff]   ;;  %v3165_v46 = vld [vmem:[%s3500_s4 + $0xa4] ss:$16 sps:$4 sm:$0xff]  }
  0x18   : > { %2996 = vmatprep.subr.bf16.mxu0 %v3124_v14  ;;  %v3164_v47 = vld [vmem:[%s3500_s4 + $0x68] ss:$16 sps:$4 sm:$0xff]   ;;  %v3167_v48 = vld [vmem:[%s3500_s4 + $0x8c] ss:$16 sps:$4 sm:$0xff]   ;;  %v3169_v49 = vld [vmem:[%s3500_s4 + $0xa0] ss:$16 sps:$4 sm:$0xff]  }
  0x19   : > { %1134 = vmatpush1.bf16.msra.mxu1 %v3123_v15  ;;  %v3171_v50 = vld [vmem:[%s3500_s4 + $0xc4] ss:$16 sps:$4 sm:$0xff]   ;;  %v3170_v51 = vld [vmem:[%s3500_s4 + $0x88] ss:$16 sps:$4 sm:$0xff]   ;;  %v3173_v52 = vld [vmem:[%s3500_s4 + $0xac] ss:$16 sps:$4 sm:$0xff]  }
  0x1a   : > { %1135 = vmatprep.subr.bf16.mxu1 %v3370_v2  ;;  %v3175_v53 = vld [vmem:[%s3500_s4 + $0xc0] ss:$16 sps:$4 sm:$0xff]   ;;  %v3177_v54 = vld [vmem:[%s3500_s4 + $0xe4] ss:$16 sps:$4 sm:$0xff]   ;;  %v3176_v55 = vld [vmem:[%s3500_s4 + $0xa8] ss:$16 sps:$4 sm:$0xff]  }
  0x1b   : > { %2997 = vmatpush3.bf16.msra.mxu0 %v3125_v16  ;;  %v3179_v56 = vld [vmem:[%s3500_s4 + $0xcc] ss:$16 sps:$4 sm:$0xff]   ;;  %v3181_v57 = vld [vmem:[%s3500_s4 + $0xe0] ss:$16 sps:$4 sm:$0xff]   ;;  %v3183_v58 = vld [vmem:[%s3500_s4 + $0x104] ss:$16 sps:$4 sm:$0xff]  }
  0x1c   : > { %2998 = vmatprep.subr.bf16.mxu0 %v3127_v17  ;;  %v3182_v59 = vld [vmem:[%s3500_s4 + $0xc8] ss:$16 sps:$4 sm:$0xff]   ;;  %v3185_v60 = vld [vmem:[%s3500_s4 + $0xec] ss:$16 sps:$4 sm:$0xff]   ;;  %v3187_v61 = vld [vmem:[%s3500_s4 + $0x100] ss:$16 sps:$4 sm:$0xff]  }
  0x1d   : > { %1136 = vmatpush1.bf16.msra.mxu1 %v3126_v18  ;;  %v3189_v62 = vld [vmem:[%s3500_s4 + $0x124] ss:$16 sps:$4 sm:$0xff]   ;;  %v3188_v63 = vld [vmem:[%s3500_s4 + $0xe8] ss:$16 sps:$4 sm:$0xff]   ;;  %v3191_v0 = vld [vmem:[%s3500_s4 + $0x10c] ss:$16 sps:$4 sm:$0xff]  }
  0x1e   : > { %1137 = vmatprep.subr.bf16.mxu1 %v3370_v2  ;;  %v3193_v1 = vld [vmem:[%s3500_s4 + $0x120] ss:$16 sps:$4 sm:$0xff]   ;;  %v3194_v3 = vld [vmem:[%s3500_s4 + $0x108] ss:$16 sps:$4 sm:$0xff]   ;;  %v3197_v4 = vld [vmem:[%s3500_s4 + $0x12c] ss:$16 sps:$4 sm:$0xff]  }
  0x1f   : > { %2999 = vmatpush3.bf16.msra.mxu0 %v3128_v19  ;;  %v3199_v5 = vld [vmem:[%s3500_s4 + $0x140] ss:$16 sps:$4 sm:$0xff]   ;;  %v3201_v6 = vld [vmem:[%s3500_s4 + $0x164] ss:$16 sps:$4 sm:$0xff]   ;;  %v3200_v7 = vld [vmem:[%s3500_s4 + $0x128] ss:$16 sps:$4 sm:$0xff]  }
  0x20   : > { %3000 = vmatprep.subr.bf16.mxu0 %v3130_v20  ;;  %v3203_v8 = vld [vmem:[%s3500_s4 + $0x14c] ss:$16 sps:$4 sm:$0xff]   ;;  %v3205_v9 = vld [vmem:[%s3500_s4 + $0x160] ss:$16 sps:$4 sm:$0xff]   ;;  %v3207_v10 = vld [vmem:[%s3500_s4 + $0x184] ss:$16 sps:$4 sm:$0xff]  }
  0x21   : > { %1138 = vmatpush1.bf16.msra.mxu1 %v3129_v21  ;;  %v3206_v11 = vld [vmem:[%s3500_s4 + $0x148] ss:$16 sps:$4 sm:$0xff]   ;;  %v3209_v12 = vld [vmem:[%s3500_s4 + $0x16c] ss:$16 sps:$4 sm:$0xff]   ;;  %v3211_v13 = vld [vmem:[%s3500_s4 + $0x180] ss:$16 sps:$4 sm:$0xff]  }
  0x22   : > { %1139 = vmatprep.subr.bf16.mxu1 %v3370_v2  ;;  %v3213_v14 = vld [vmem:[%s3500_s4 + $0x1a4] ss:$16 sps:$4 sm:$0xff]   ;;  %v3212_v15 = vld [vmem:[%s3500_s4 + $0x168] ss:$16 sps:$4 sm:$0xff]   ;;  %v3215_v16 = vld [vmem:[%s3500_s4 + $0x18c] ss:$16 sps:$4 sm:$0xff]  }
  0x23   : > { %3001 = vmatpush3.bf16.msra.mxu0 %v3131_v22  ;;  %v3217_v17 = vld [vmem:[%s3500_s4 + $0x1a0] ss:$16 sps:$4 sm:$0xff]   ;;  %v3219_v18 = vld [vmem:[%s3500_s4 + $0x1c4] ss:$16 sps:$4 sm:$0xff]   ;;  %v3218_v19 = vld [vmem:[%s3500_s4 + $0x188] ss:$16 sps:$4 sm:$0xff]  }
  0x24   : > { %3002 = vmatprep.subr.bf16.mxu0 %v3133_v24  ;;  %v3221_v20 = vld [vmem:[%s3500_s4 + $0x1ac] ss:$16 sps:$4 sm:$0xff]   ;;  %v3223_v21 = vld [vmem:[%s3500_s4 + $0x1c0] ss:$16 sps:$4 sm:$0xff]   ;;  %v3225_v22 = vld [vmem:[%s3500_s4 + $0x1e4] ss:$16 sps:$4 sm:$0xff]  }
  0x25   : > { %1140 = vmatpush1.bf16.msra.mxu1 %v3132_v23  ;;  %v3224_v23 = vld [vmem:[%s3500_s4 + $0x1a8] ss:$16 sps:$4 sm:$0xff]   ;;  %v3227_v24 = vld [vmem:[%s3500_s4 + $0x1cc] ss:$16 sps:$4 sm:$0xff]   ;;  %v3229_v25 = vld [vmem:[%s3500_s4 + $0x1e0] ss:$16 sps:$4 sm:$0xff]  }
  0x26   : > { %1141 = vmatprep.subr.bf16.mxu1 %v3370_v2  ;;  %v3233_v28 = vld [vmem:[%s3500_s4 + $0x1e8] ss:$16 sps:$4 sm:$0xff]  }
  0x27   : > { %3003 = vmatpush3.bf16.msra.mxu0 %v3134_v26  ;;  %v3230_v26 = vld [vmem:[%s3500_s4 + $0x1c8] ss:$16 sps:$4 sm:$0xff]  }
  0x29   : > { %1142 = vmatpush1.bf16.msra.mxu1 %v3135_v27  ;;  %v3231_v27 = vld [vmem:[%s3500_s4 + $0x1ec] ss:$16 sps:$4 sm:$0xff]  }
  0x2a   : > { %997 = vmatmul.mubr.bf16.vlgmr.msra.gmra.mrb[0].mxu0 %v3136_v29  ;;  %1143 = vmatprep.subr.bf16.mxu1 %v3370_v2  ;;  %v1320_v29 = vlaneseq }
  0x2b   : > { %1004 = vmatprep.mubr.bf16.mxu0 %v3141_v30 }
  0x2d   : > { %1144 = vmatpush1.bf16.msra.mxu1 %v3139_v31 }
  0x2e   : > { %1145 = vmatprep.subr.bf16.mxu1 %v3370_v2  ;;  %v3195_v2 = vld [vmem:[%s3500_s4 + $0x144] ss:$16 sps:$4 sm:$0xff]   ;;  %s3758_s4 = scalar_lea.vmem %s4134_s6, %s3745_s22 }
  0x31   : > { %1146 = vmatpush1.bf16.msra.mxu1 %v3140_v32 }
  0x32   : > { %1005 = vmatmul.mubr.bf16.gmra.mrb[4].mxu0 %v3146_v33 }
  0x33   : > { %1012 = vmatprep.mubr.bf16.mxu0 %v3147_v34 }
  0x34   : > { %1158 = vmatmul.mubr.bf16.vlgmr.msra.gmra.mrb[0].mxu1 %v3143_v35  ;;  %v1321_v35 = vshrl.u32 %v1320_v29, 7 }
  0x35   : > { %2730 = vmatprep.mubr.msk.bf16.mxu1 %vm915_vm0, %v3149_v36 }
  0x3a   : > { %1013 = vmatmul.mubr.bf16.gmra.mrb[8].mxu0 %v3151_v37  ;;  %v3607_v37 = vld [vmem:[%s4130_s2] ss:$0 sm:$0xff] }
  0x3b   : > { %1020 = vmatprep.mubr.bf16.mxu0 %v3153_v38  ;;  %v1318_v38 = vld [vmem:[%s4131_s3] sm:$0x1] }
  0x3c   : > { %1166 = vmatmul.mubr.bf16.gmra.mrb[4].mxu1 %v3152_v39 }
  0x3d   : > { %2731 = vmatprep.mubr.msk.bf16.mxu1 %vm915_vm0, %v3155_v40  ;;  %v1319_v40 = vunpack.c.l.bf16 %v1318_v38 }
  0x42   : > { %1021 = vmatmul.mubr.bf16.gmra.mrb[12].mxu0 %v3157_v41  ;;  %v1322_v41 = vsub.s32 0, %v1321_v35 }
  0x43   : > { %1028 = vmatprep.mubr.bf16.mxu0 %v3159_v42 }
  0x44   : > { %1174 = vmatmul.mubr.bf16.gmra.mrb[8].mxu1 %v3158_v43 }
  0x45   : > { %2732 = vmatprep.mubr.msk.bf16.mxu1 %vm915_vm0, %v3161_v44 }
  0x4a   : > { %1029 = vmatmul.mubr.bf16.gmra.mrb[16].mxu0 %v3163_v45 }
  0x4b   : > { %1036 = vmatprep.mubr.bf16.mxu0 %v3165_v46 }
  0x4c   : > { %1182 = vmatmul.mubr.bf16.gmra.mrb[12].mxu1 %v3164_v47 }
  0x4d   : > { %2733 = vmatprep.mubr.msk.bf16.mxu1 %vm915_vm0, %v3167_v48 }
  0x52   : > { %1037 = vmatmul.mubr.bf16.gmra.mrb[20].mxu0 %v3169_v49 }
  0x53   : > { %1044 = vmatprep.mubr.bf16.mxu0 %v3171_v50 }
  0x54   : > { %1190 = vmatmul.mubr.bf16.gmra.mrb[16].mxu1 %v3170_v51  ;;  %v3614_v51 = vrot.slane %v1319_v40, %v1322_v41 }
  0x55   : > { %2734 = vmatprep.mubr.msk.bf16.mxu1 %vm915_vm0, %v3173_v52 }
  0x5a   : > { %1045 = vmatmul.mubr.bf16.gmra.mrb[24].mxu0 %v3175_v53 }
  0x5b   : > { %1052 = vmatprep.mubr.bf16.mxu0 %v3177_v54 }
  0x5c   : > { %1198 = vmatmul.mubr.bf16.gmra.mrb[20].mxu1 %v3176_v55 }
  0x5d   : > { %2735 = vmatprep.mubr.msk.bf16.mxu1 %vm915_vm0, %v3179_v56 }
  0x62   : > { %1053 = vmatmul.mubr.bf16.gmra.mrb[28].mxu0 %v3181_v57 }
  0x63   : > { %1060 = vmatprep.mubr.bf16.mxu0 %v3183_v58 }
  0x64   : > { %1206 = vmatmul.mubr.bf16.gmra.mrb[24].mxu1 %v3182_v59 }
  0x65   : > { %2736 = vmatprep.mubr.msk.bf16.mxu1 %vm915_vm0, %v3185_v60 }
  0x6a   : > { %1061 = vmatmul.mubr.bf16.gmra.mrb[32].mxu0 %v3187_v61 }
  0x6b   : > { %1068 = vmatprep.mubr.bf16.mxu0 %v3189_v62 }
  0x6c   : > { %1214 = vmatmul.mubr.bf16.gmra.mrb[28].mxu1 %v3188_v63 }
  0x6d   : > { %2737 = vmatprep.mubr.msk.bf16.mxu1 %vm915_vm0, %v3191_v0 }
  0x72   : > { %1069 = vmatmul.mubr.bf16.gmra.mrb[36].mxu0 %v3193_v1 }
  0x73   : > { %1076 = vmatprep.mubr.bf16.mxu0 %v3195_v2 }
  0x74   : > { %1222 = vmatmul.mubr.bf16.gmra.mrb[32].mxu1 %v3194_v3 }
  0x75   : > { %2738 = vmatprep.mubr.msk.bf16.mxu1 %vm915_vm0, %v3197_v4 }
  0x7a   : > { %1077 = vmatmul.mubr.bf16.gmra.mrb[40].mxu0 %v3199_v5 }
  0x7b   : > { %1084 = vmatprep.mubr.bf16.mxu0 %v3201_v6 }
  0x7c   : > { %1230 = vmatmul.mubr.bf16.gmra.mrb[36].mxu1 %v3200_v7 }
  0x7d   : > { %2739 = vmatprep.mubr.msk.bf16.mxu1 %vm915_vm0, %v3203_v8 }
  0x82   : > { %1085 = vmatmul.mubr.bf16.gmra.mrb[44].mxu0 %v3205_v9 }
  0x83   : > { %1092 = vmatprep.mubr.bf16.mxu0 %v3207_v10 }
  0x84   : > { %1238 = vmatmul.mubr.bf16.gmra.mrb[40].mxu1 %v3206_v11 }
  0x85   : > { %2740 = vmatprep.mubr.msk.bf16.mxu1 %vm915_vm0, %v3209_v12 }
  0x8a   : > { %1093 = vmatmul.mubr.bf16.gmra.mrb[48].mxu0 %v3211_v13 }
  0x8b   : > { %1100 = vmatprep.mubr.bf16.mxu0 %v3213_v14 }
  0x8c   : > { %1246 = vmatmul.mubr.bf16.gmra.mrb[44].mxu1 %v3212_v15 }
  0x8d   : > { %2741 = vmatprep.mubr.msk.bf16.mxu1 %vm915_vm0, %v3215_v16 }
  0x92   : > { %1101 = vmatmul.mubr.bf16.gmra.mrb[52].mxu0 %v3217_v17 }
  0x93   : > { %1108 = vmatprep.mubr.bf16.mxu0 %v3219_v18 }
  0x94   : > { %1254 = vmatmul.mubr.bf16.gmra.mrb[48].mxu1 %v3218_v19 }
  0x95   : > { %2742 = vmatprep.mubr.msk.bf16.mxu1 %vm915_vm0, %v3221_v20 }
  0x9a   : > { %1109 = vmatmul.mubr.bf16.gmra.mrb[56].mxu0 %v3223_v21 }
  0x9b   : > { %1116 = vmatprep.mubr.bf16.mxu0 %v3225_v22 }
  0x9c   : > { %1262 = vmatmul.mubr.bf16.gmra.mrb[52].mxu1 %v3224_v23 }
  0x9d   : > { %2743 = vmatprep.mubr.msk.bf16.mxu1 %vm915_vm0, %v3227_v24 }
  0xa2   : > { %1117 = vmatmul.mubr.bf16.gmra.mrb[60].mxu0 %v3229_v25 }
  0xa4   : > { %1270 = vmatmul.mubr.bf16.gmra.mrb[56].mxu1 %v3230_v26 }
  0xa5   : > { %2744 = vmatprep.mubr.msk.bf16.mxu1 %vm915_vm0, %v3231_v27 }
  0xac   : > { %1278 = vmatmul.mubr.bf16.gmra.mrb[60].mxu1 %v3233_v28 }
  0xfd   : > { %v3004_v30 = vpop.f32.mrb[0].mxu0 }
  0xfe   : > { %v3005_v31 = vpop.f32.mrb[1].mxu0 }
  0xff   : > { %v3006_v32 = vadd.f32 %v3005_v31, %v3004_v30  ;;  %v3007_v33 = vpop.f32.mrb[2].mxu0 }
 0x100   : > { %v3008_v34 = vpop.f32.mrb[3].mxu0 }
 0x101   : > { %v3009_v36 = vadd.f32 %v3008_v34, %v3007_v33  ;;  %v999_v39 = vadd.f32 %v3006_v32, %v3607_v37 }
 0x103   : > { %v1002_v49 = vadd.f32 %v3009_v36, %v3607_v37 }
 0x105   : > { %v3010_v42 = vpop.f32.mrb[4].mxu0 }
 0x106   : > { %v3011_v43 = vpop.f32.mrb[5].mxu0 }
 0x107   : > { %v1159_v44 = vpop.f32.mrb[0].mxu1  ;;  %v3012_v45 = vadd.f32 %v3011_v43, %v3010_v42  ;;  %v3013_v46 = vpop.f32.mrb[6].mxu0 }
 0x108   : > { %v1160_v47 = vadd.f32 %v1159_v44, %v999_v39  ;;  %v1161_v48 = vpop.f32.mrb[1].mxu1  ;;  %v3014_v50 = vpop.f32.mrb[7].mxu0 }
 0x109   : > { %v1162_v52 = vpop.f32.mrb[2].mxu1  ;;  %v3015_v53 = vadd.f32 %v3014_v50, %v3013_v46  ;;  %v1007_v58 = vadd.f32 %v3012_v45, %v3607_v37 }
 0x10a   : > { %v1286_v54 = vmax.f32 %v1160_v47, 0.0  ;;  %v1163_v55 = vadd.f32 %v1162_v52, %v1002_v49  ;;  %v1164_v56 = vpop.f32.mrb[3].mxu1 }
 0x10b   : > { %v1010_v5 = vadd.f32 %v3015_v53, %v3607_v37 }
 0x10c   : > { %v1287_v57 = vmax.f32 %v1163_v55, 0.0  ;;  %v1324_v59 = vmul.f32 %v3614_v51, %v1286_v54 }
 0x10d   : > { %v3016_v60 = vpop.f32.mrb[8].mxu0 }
 0x10e   : > { %v1357_v61 = vsel %vm1356_vm1, %v1324_v59, 0.0  ;;  %v3017_v62 = vpop.f32.mrb[9].mxu0  ;;  %v1325_v63 = vmul.f32 %v3614_v51, %v1287_v57 }
 0x10f   : > { %v1167_v0 = vpop.f32.mrb[4].mxu1  ;;  %1358 = vadd.xlane.f32.xlu0 %v1357_v61  ;;  %v3018_v1 = vadd.f32 %v3017_v62, %v3016_v60  ;;  %v3019_v2 = vpop.f32.mrb[10].mxu0 }
 0x110   : > { %v1168_v3 = vadd.f32 %v1167_v0, %v1007_v58  ;;  %v1169_v4 = vpop.f32.mrb[5].mxu1  ;;  %v3020_v6 = vpop.f32.mrb[11].mxu0  ;;  %v1360_v12 = vsel %vm1356_vm1, %v1325_v63, 0.0 }
 0x111   : > { %v1170_v7 = vpop.f32.mrb[6].mxu1  ;;  %v3021_v8 = vadd.f32 %v3020_v6, %v3019_v2  ;;  %v1015_v14 = vadd.f32 %v3018_v1, %v3607_v37 }
 0x112   : > { %v1288_v9 = vmax.f32 %v1168_v3, 0.0  ;;  %v1171_v10 = vadd.f32 %v1170_v7, %v1010_v5  ;;  %v1172_v11 = vpop.f32.mrb[7].mxu1 }
 0x113   : > { %1361 = vadd.xlane.f32.xlu0 %v1360_v12  ;;  %v1018_v25 = vadd.f32 %v3021_v8, %v3607_v37 }
 0x114   : > { %v1289_v13 = vmax.f32 %v1171_v10, 0.0  ;;  %v1326_v15 = vmul.f32 %v3614_v51, %v1288_v9 }
 0x115   : > { %v3022_v16 = vpop.f32.mrb[12].mxu0 }
 0x116   : > { %v1363_v17 = vsel %vm1356_vm1, %v1326_v15, 0.0  ;;  %v3023_v18 = vpop.f32.mrb[13].mxu0  ;;  %v1327_v19 = vmul.f32 %v3614_v51, %v1289_v13 }
 0x117   : > { %v1175_v20 = vpop.f32.mrb[8].mxu1  ;;  %1364 = vadd.xlane.f32.xlu1 %v1363_v17  ;;  %v3024_v21 = vadd.f32 %v3023_v18, %v3022_v16  ;;  %v3025_v22 = vpop.f32.mrb[14].mxu0 }
 0x118   : > { %v1176_v23 = vadd.f32 %v1175_v20, %v1015_v14  ;;  %v1177_v24 = vpop.f32.mrb[9].mxu1  ;;  %v3026_v26 = vpop.f32.mrb[15].mxu0  ;;  %v1366_v32 = vsel %vm1356_vm1, %v1327_v19, 0.0 }
 0x119   : > { %v1178_v27 = vpop.f32.mrb[10].mxu1  ;;  %v3027_v28 = vadd.f32 %v3026_v26, %v3025_v22  ;;  %v1023_v34 = vadd.f32 %v3024_v21, %v3607_v37 }
 0x11a   : > { %v1290_v29 = vmax.f32 %v1176_v23, 0.0  ;;  %v1179_v30 = vadd.f32 %v1178_v27, %v1018_v25  ;;  %v1180_v31 = vpop.f32.mrb[11].mxu1 }
 0x11b   : > { %1367 = vadd.xlane.f32.xlu1 %v1366_v32  ;;  %v1026_v46 = vadd.f32 %v3027_v28, %v3607_v37 }
 0x11c   : > { %v1291_v33 = vmax.f32 %v1179_v30, 0.0  ;;  %v1328_v35 = vmul.f32 %v3614_v51, %v1290_v29 }
 0x11d   : > { %v3028_v36 = vpop.f32.mrb[16].mxu0 }
 0x11e   : > { %v1369_v38 = vsel %vm1356_vm1, %v1328_v35, 0.0  ;;  %v3029_v39 = vpop.f32.mrb[17].mxu0  ;;  %v1329_v40 = vmul.f32 %v3614_v51, %v1291_v33 }
 0x11f   : > { %v1183_v41 = vpop.f32.mrb[12].mxu1  ;;  %1370 = vadd.xlane.f32.xlu0 %v1369_v38  ;;  %v3030_v42 = vadd.f32 %v3029_v39, %v3028_v36  ;;  %v3031_v43 = vpop.f32.mrb[18].mxu0 }
 0x120   : > { %v1184_v44 = vadd.f32 %v1183_v41, %v1023_v34  ;;  %v1185_v45 = vpop.f32.mrb[13].mxu1  ;;  %v1372_v47 = vsel %vm1356_vm1, %v1329_v40, 0.0  ;;  %v3032_v48 = vpop.f32.mrb[19].mxu0 }
 0x121   : > { %v1186_v49 = vpop.f32.mrb[14].mxu1  ;;  %1373 = vadd.xlane.f32.xlu1 %v1372_v47  ;;  %v3033_v50 = vadd.f32 %v3032_v48, %v3031_v43  ;;  %v1031_v56 = vadd.f32 %v3030_v42, %v3607_v37 }
 0x122   : > { %v1292_v52 = vmax.f32 %v1184_v44, 0.0  ;;  %v1187_v53 = vadd.f32 %v1186_v49, %v1026_v46  ;;  %v1188_v54 = vpop.f32.mrb[15].mxu1 }
 0x123   : > { %v1034_v3 = vadd.f32 %v3033_v50, %v3607_v37 }
 0x124   : > { %v1293_v55 = vmax.f32 %v1187_v53, 0.0  ;;  %v1330_v57 = vmul.f32 %v3614_v51, %v1292_v52 }
 0x125   : > { %v3034_v58 = vpop.f32.mrb[20].mxu0 }
 0x126   : > { %v1375_v59 = vsel %vm1356_vm1, %v1330_v57, 0.0  ;;  %v3035_v60 = vpop.f32.mrb[21].mxu0  ;;  %v1331_v61 = vmul.f32 %v3614_v51, %v1293_v55 }
 0x127   : > { %v1191_v62 = vpop.f32.mrb[16].mxu1  ;;  %1376 = vadd.xlane.f32.xlu0 %v1375_v59  ;;  %v3036_v63 = vadd.f32 %v3035_v60, %v3034_v58  ;;  %v3037_v0 = vpop.f32.mrb[22].mxu0 }
 0x128   : > { %v1192_v1 = vadd.f32 %v1191_v62, %v1031_v56  ;;  %v1193_v2 = vpop.f32.mrb[17].mxu1  ;;  %v1378_v4 = vsel %vm1356_vm1, %v1331_v61, 0.0  ;;  %v3038_v5 = vpop.f32.mrb[23].mxu0 }
 0x129   : > { %v1194_v6 = vpop.f32.mrb[18].mxu1  ;;  %1379 = vadd.xlane.f32.xlu1 %v1378_v4  ;;  %v3039_v7 = vadd.f32 %v3038_v5, %v3037_v0  ;;  %v1039_v12 = vadd.f32 %v3036_v63, %v3607_v37 }
 0x12a   : > { %v1294_v8 = vmax.f32 %v1192_v1, 0.0  ;;  %v1195_v9 = vadd.f32 %v1194_v6, %v1034_v3  ;;  %v1196_v10 = vpop.f32.mrb[19].mxu1 }
 0x12b   : > { %v1042_v23 = vadd.f32 %v3039_v7, %v3607_v37 }
 0x12c   : > { %v1295_v11 = vmax.f32 %v1195_v9, 0.0  ;;  %v1332_v13 = vmul.f32 %v3614_v51, %v1294_v8 }
 0x12d   : > { %v3040_v14 = vpop.f32.mrb[24].mxu0 }
 0x12e   : > { %v1381_v15 = vsel %vm1356_vm1, %v1332_v13, 0.0  ;;  %v3041_v16 = vpop.f32.mrb[25].mxu0  ;;  %v1333_v17 = vmul.f32 %v3614_v51, %v1295_v11 }
 0x12f   : > { %v1199_v18 = vpop.f32.mrb[20].mxu1  ;;  %1382 = vadd.xlane.f32.xlu0 %v1381_v15  ;;  %v3042_v19 = vadd.f32 %v3041_v16, %v3040_v14  ;;  %v3043_v20 = vpop.f32.mrb[26].mxu0 }
 0x130   : > { %v1200_v21 = vadd.f32 %v1199_v18, %v1039_v12  ;;  %v1201_v22 = vpop.f32.mrb[21].mxu1  ;;  %v1384_v24 = vsel %vm1356_vm1, %v1333_v17, 0.0  ;;  %v3044_v25 = vpop.f32.mrb[27].mxu0 }
 0x131   : > { %v1202_v26 = vpop.f32.mrb[22].mxu1  ;;  %1385 = vadd.xlane.f32.xlu1 %v1384_v24  ;;  %v3045_v27 = vadd.f32 %v3044_v25, %v3043_v20  ;;  %v1047_v32 = vadd.f32 %v3042_v19, %v3607_v37 }
 0x132   : > { %v1296_v28 = vmax.f32 %v1200_v21, 0.0  ;;  %v1203_v29 = vadd.f32 %v1202_v26, %v1042_v23  ;;  %v1204_v30 = vpop.f32.mrb[23].mxu1 }
 0x133   : > { %v1050_v44 = vadd.f32 %v3045_v27, %v3607_v37 }
 0x134   : > { %v1297_v31 = vmax.f32 %v1203_v29, 0.0  ;;  %v1334_v33 = vmul.f32 %v3614_v51, %v1296_v28 }
 0x135   : > { %v3046_v34 = vpop.f32.mrb[28].mxu0 }
 0x136   : > { %v1387_v35 = vsel %vm1356_vm1, %v1334_v33, 0.0  ;;  %v3047_v36 = vpop.f32.mrb[29].mxu0  ;;  %v1335_v38 = vmul.f32 %v3614_v51, %v1297_v31 }
 0x137   : > { %v1207_v39 = vpop.f32.mrb[24].mxu1  ;;  %1388 = vadd.xlane.f32.xlu0 %v1387_v35  ;;  %v3048_v40 = vadd.f32 %v3047_v36, %v3046_v34  ;;  %v3049_v41 = vpop.f32.mrb[30].mxu0 }
 0x138   : > { %v1208_v42 = vadd.f32 %v1207_v39, %v1047_v32  ;;  %v1209_v43 = vpop.f32.mrb[25].mxu1  ;;  %v1390_v45 = vsel %vm1356_vm1, %v1335_v38, 0.0  ;;  %v3050_v46 = vpop.f32.mrb[31].mxu0 }
 0x139   : > { %v1210_v47 = vpop.f32.mrb[26].mxu1  ;;  %1391 = vadd.xlane.f32.xlu1 %v1390_v45  ;;  %v3051_v48 = vadd.f32 %v3050_v46, %v3049_v41  ;;  %v1055_v54 = vadd.f32 %v3048_v40, %v3607_v37 }
 0x13a   : > { %v1298_v49 = vmax.f32 %v1208_v42, 0.0  ;;  %v1211_v50 = vadd.f32 %v1210_v47, %v1050_v44  ;;  %v1212_v52 = vpop.f32.mrb[27].mxu1 }
 0x13b   : > { %v1058_v1 = vadd.f32 %v3051_v48, %v3607_v37 }
 0x13c   : > { %v1299_v53 = vmax.f32 %v1211_v50, 0.0  ;;  %v1336_v55 = vmul.f32 %v3614_v51, %v1298_v49 }
 0x13d   : > { %v3052_v56 = vpop.f32.mrb[32].mxu0 }
 0x13e   : > { %v1393_v57 = vsel %vm1356_vm1, %v1336_v55, 0.0  ;;  %v3053_v58 = vpop.f32.mrb[33].mxu0  ;;  %v1337_v59 = vmul.f32 %v3614_v51, %v1299_v53 }
 0x13f   : > { %v1215_v60 = vpop.f32.mrb[28].mxu1  ;;  %1394 = vadd.xlane.f32.xlu0 %v1393_v57  ;;  %v3054_v61 = vadd.f32 %v3053_v58, %v3052_v56  ;;  %v3055_v62 = vpop.f32.mrb[34].mxu0 }
 0x140   : > { %v1216_v63 = vadd.f32 %v1215_v60, %v1055_v54  ;;  %v1217_v0 = vpop.f32.mrb[29].mxu1  ;;  %v1396_v2 = vsel %vm1356_vm1, %v1337_v59, 0.0  ;;  %v3056_v3 = vpop.f32.mrb[35].mxu0 }
 0x141   : > { %v1218_v4 = vpop.f32.mrb[30].mxu1  ;;  %1397 = vadd.xlane.f32.xlu1 %v1396_v2  ;;  %v3057_v5 = vadd.f32 %v3056_v3, %v3055_v62  ;;  %v1063_v10 = vadd.f32 %v3054_v61, %v3607_v37 }
 0x142   : > { %v1300_v6 = vmax.f32 %v1216_v63, 0.0  ;;  %v1219_v7 = vadd.f32 %v1218_v4, %v1058_v1  ;;  %v1220_v8 = vpop.f32.mrb[31].mxu1 }
 0x143   : > { %v1066_v21 = vadd.f32 %v3057_v5, %v3607_v37 }
 0x144   : > { %v1301_v9 = vmax.f32 %v1219_v7, 0.0  ;;  %v1338_v11 = vmul.f32 %v3614_v51, %v1300_v6 }
 0x145   : > { %v3058_v12 = vpop.f32.mrb[36].mxu0 }
 0x146   : > { %v1399_v13 = vsel %vm1356_vm1, %v1338_v11, 0.0  ;;  %v3059_v14 = vpop.f32.mrb[37].mxu0  ;;  %v1339_v15 = vmul.f32 %v3614_v51, %v1301_v9 }
 0x147   : > { %v1223_v16 = vpop.f32.mrb[32].mxu1  ;;  %1400 = vadd.xlane.f32.xlu0 %v1399_v13  ;;  %v3060_v17 = vadd.f32 %v3059_v14, %v3058_v12  ;;  %v3061_v18 = vpop.f32.mrb[38].mxu0 }
 0x148   : > { %v1224_v19 = vadd.f32 %v1223_v16, %v1063_v10  ;;  %v1225_v20 = vpop.f32.mrb[33].mxu1  ;;  %v1402_v22 = vsel %vm1356_vm1, %v1339_v15, 0.0  ;;  %v3062_v23 = vpop.f32.mrb[39].mxu0 }
 0x149   : > { %v1226_v24 = vpop.f32.mrb[34].mxu1  ;;  %1403 = vadd.xlane.f32.xlu1 %v1402_v22  ;;  %v3063_v25 = vadd.f32 %v3062_v23, %v3061_v18  ;;  %v1071_v30 = vadd.f32 %v3060_v17, %v3607_v37 }
 0x14a   : > { %v1302_v26 = vmax.f32 %v1224_v19, 0.0  ;;  %v1227_v27 = vadd.f32 %v1226_v24, %v1066_v21  ;;  %v1228_v28 = vpop.f32.mrb[35].mxu1 }
 0x14b   : > { %v1074_v42 = vadd.f32 %v3063_v25, %v3607_v37 }
 0x14c   : > { %v1303_v29 = vmax.f32 %v1227_v27, 0.0  ;;  %v1340_v31 = vmul.f32 %v3614_v51, %v1302_v26 }
 0x14d   : > { %v3064_v32 = vpop.f32.mrb[40].mxu0 }
 0x14e   : > { %v1405_v33 = vsel %vm1356_vm1, %v1340_v31, 0.0  ;;  %v3065_v34 = vpop.f32.mrb[41].mxu0  ;;  %v1341_v35 = vmul.f32 %v3614_v51, %v1303_v29 }
 0x14f   : > { %v1231_v36 = vpop.f32.mrb[36].mxu1  ;;  %1406 = vadd.xlane.f32.xlu0 %v1405_v33  ;;  %v3066_v38 = vadd.f32 %v3065_v34, %v3064_v32  ;;  %v3067_v39 = vpop.f32.mrb[42].mxu0 }
 0x150   : > { %v1232_v40 = vadd.f32 %v1231_v36, %v1071_v30  ;;  %v1233_v41 = vpop.f32.mrb[37].mxu1  ;;  %v1408_v43 = vsel %vm1356_vm1, %v1341_v35, 0.0  ;;  %v3068_v44 = vpop.f32.mrb[43].mxu0 }
 0x151   : > { %v1234_v45 = vpop.f32.mrb[38].mxu1  ;;  %1409 = vadd.xlane.f32.xlu1 %v1408_v43  ;;  %v3069_v46 = vadd.f32 %v3068_v44, %v3067_v39  ;;  %v1079_v52 = vadd.f32 %v3066_v38, %v3607_v37 }
 0x152   : > { %v1304_v47 = vmax.f32 %v1232_v40, 0.0  ;;  %v1235_v48 = vadd.f32 %v1234_v45, %v1074_v42  ;;  %v1236_v49 = vpop.f32.mrb[39].mxu1 }
 0x153   : > { %v1082_v63 = vadd.f32 %v3069_v46, %v3607_v37 }
 0x154   : > { %v1305_v50 = vmax.f32 %v1235_v48, 0.0  ;;  %v1342_v53 = vmul.f32 %v3614_v51, %v1304_v47 }
 0x155   : > { %v3070_v54 = vpop.f32.mrb[44].mxu0 }
 0x156   : > { %v1411_v55 = vsel %vm1356_vm1, %v1342_v53, 0.0  ;;  %v3071_v56 = vpop.f32.mrb[45].mxu0  ;;  %v1343_v57 = vmul.f32 %v3614_v51, %v1305_v50 }
 0x157   : > { %v1239_v58 = vpop.f32.mrb[40].mxu1  ;;  %1412 = vadd.xlane.f32.xlu0 %v1411_v55  ;;  %v3072_v59 = vadd.f32 %v3071_v56, %v3070_v54  ;;  %v3073_v60 = vpop.f32.mrb[46].mxu0 }
 0x158   : > { %v1240_v61 = vadd.f32 %v1239_v58, %v1079_v52  ;;  %v1241_v62 = vpop.f32.mrb[41].mxu1  ;;  %v1414_v0 = vsel %vm1356_vm1, %v1343_v57, 0.0  ;;  %v3074_v1 = vpop.f32.mrb[47].mxu0 }
 0x159   : > { %v1242_v2 = vpop.f32.mrb[42].mxu1  ;;  %1415 = vadd.xlane.f32.xlu1 %v1414_v0  ;;  %v3075_v3 = vadd.f32 %v3074_v1, %v3073_v60  ;;  %v1087_v8 = vadd.f32 %v3072_v59, %v3607_v37 }
 0x15a   : > { %v1306_v4 = vmax.f32 %v1240_v61, 0.0  ;;  %v1243_v5 = vadd.f32 %v1242_v2, %v1082_v63  ;;  %v1244_v6 = vpop.f32.mrb[43].mxu1 }
 0x15b   : > { %v1090_v19 = vadd.f32 %v3075_v3, %v3607_v37 }
 0x15c   : > { %v1307_v7 = vmax.f32 %v1243_v5, 0.0  ;;  %v1344_v9 = vmul.f32 %v3614_v51, %v1306_v4 }
 0x15d   : > { %v3076_v10 = vpop.f32.mrb[48].mxu0 }
 0x15e   : > { %v1417_v11 = vsel %vm1356_vm1, %v1344_v9, 0.0  ;;  %v3077_v12 = vpop.f32.mrb[49].mxu0  ;;  %v1345_v13 = vmul.f32 %v3614_v51, %v1307_v7 }
 0x15f   : > { %v1247_v14 = vpop.f32.mrb[44].mxu1  ;;  %1418 = vadd.xlane.f32.xlu0 %v1417_v11  ;;  %v3078_v15 = vadd.f32 %v3077_v12, %v3076_v10  ;;  %v3079_v16 = vpop.f32.mrb[50].mxu0 }
 0x160   : > { %v1248_v17 = vadd.f32 %v1247_v14, %v1087_v8  ;;  %v1249_v18 = vpop.f32.mrb[45].mxu1  ;;  %v1420_v20 = vsel %vm1356_vm1, %v1345_v13, 0.0  ;;  %v3080_v21 = vpop.f32.mrb[51].mxu0 }
 0x161   : > { %v1250_v22 = vpop.f32.mrb[46].mxu1  ;;  %1421 = vadd.xlane.f32.xlu1 %v1420_v20  ;;  %v3081_v23 = vadd.f32 %v3080_v21, %v3079_v16  ;;  %v1095_v28 = vadd.f32 %v3078_v15, %v3607_v37 }
 0x162   : > { %v1308_v24 = vmax.f32 %v1248_v17, 0.0  ;;  %v1251_v25 = vadd.f32 %v1250_v22, %v1090_v19  ;;  %v1252_v26 = vpop.f32.mrb[47].mxu1 }
 0x163   : > { %v1098_v40 = vadd.f32 %v3081_v23, %v3607_v37 }
 0x164   : > { %v1309_v27 = vmax.f32 %v1251_v25, 0.0  ;;  %v1346_v29 = vmul.f32 %v3614_v51, %v1308_v24 }
 0x165   : > { %v3082_v30 = vpop.f32.mrb[52].mxu0 }
 0x166   : > { %v1423_v31 = vsel %vm1356_vm1, %v1346_v29, 0.0  ;;  %v3083_v32 = vpop.f32.mrb[53].mxu0  ;;  %v1347_v33 = vmul.f32 %v3614_v51, %v1309_v27 }
 0x167   : > { %v1255_v34 = vpop.f32.mrb[48].mxu1  ;;  %1424 = vadd.xlane.f32.xlu0 %v1423_v31  ;;  %v3084_v35 = vadd.f32 %v3083_v32, %v3082_v30  ;;  %v3085_v36 = vpop.f32.mrb[54].mxu0 }
 0x168   : > { %v1256_v38 = vadd.f32 %v1255_v34, %v1095_v28  ;;  %v1257_v39 = vpop.f32.mrb[49].mxu1  ;;  %v1426_v41 = vsel %vm1356_vm1, %v1347_v33, 0.0  ;;  %v3086_v42 = vpop.f32.mrb[55].mxu0 }
 0x169   : > { %v1258_v43 = vpop.f32.mrb[50].mxu1  ;;  %1427 = vadd.xlane.f32.xlu1 %v1426_v41  ;;  %v3087_v44 = vadd.f32 %v3086_v42, %v3085_v36  ;;  %v1103_v49 = vadd.f32 %v3084_v35, %v3607_v37 }
 0x16a   : > { %v1310_v45 = vmax.f32 %v1256_v38, 0.0  ;;  %v1259_v46 = vadd.f32 %v1258_v43, %v1098_v40  ;;  %v1260_v47 = vpop.f32.mrb[51].mxu1 }
 0x16b   : > { %v1106_v61 = vadd.f32 %v3087_v44, %v3607_v37 }
 0x16c   : > { %v1311_v48 = vmax.f32 %v1259_v46, 0.0  ;;  %v1348_v50 = vmul.f32 %v3614_v51, %v1310_v45  ;;  %v3710_v45 = vld [vmem:[#allocation2] ss:$0 sm:$0xff] }
 0x16d   : > { %v3088_v52 = vpop.f32.mrb[56].mxu0 }
 0x16e   : > { %v1429_v53 = vsel %vm1356_vm1, %v1348_v50, 0.0  ;;  %v3089_v54 = vpop.f32.mrb[57].mxu0  ;;  %v1349_v55 = vmul.f32 %v3614_v51, %v1311_v48 }
 0x16f   : > { %v1263_v56 = vpop.f32.mrb[52].mxu1  ;;  %1430 = vadd.xlane.f32.xlu0 %v1429_v53  ;;  %v3090_v57 = vadd.f32 %v3089_v54, %v3088_v52  ;;  %v3091_v58 = vpop.f32.mrb[58].mxu0 }
 0x170   : > { %v1264_v59 = vadd.f32 %v1263_v56, %v1103_v49  ;;  %v1265_v60 = vpop.f32.mrb[53].mxu1  ;;  %v1432_v62 = vsel %vm1356_vm1, %v1349_v55, 0.0  ;;  %v3092_v63 = vpop.f32.mrb[59].mxu0 }
 0x171   : > { %v1266_v0 = vpop.f32.mrb[54].mxu1  ;;  %1433 = vadd.xlane.f32.xlu1 %v1432_v62  ;;  %v3093_v1 = vadd.f32 %v3092_v63, %v3091_v58  ;;  %v1111_v6 = vadd.f32 %v3090_v57, %v3607_v37 }
 0x172   : > { %v1312_v2 = vmax.f32 %v1264_v59, 0.0  ;;  %v1267_v3 = vadd.f32 %v1266_v0, %v1106_v61  ;;  %v1268_v4 = vpop.f32.mrb[55].mxu1 }
 0x173   : > { %v1114_v17 = vadd.f32 %v3093_v1, %v3607_v37 }
 0x174   : > { %v1313_v5 = vmax.f32 %v1267_v3, 0.0  ;;  %v1350_v7 = vmul.f32 %v3614_v51, %v1312_v2 }
 0x175   : > { %v3094_v8 = vpop.f32.mrb[60].mxu0 }
 0x176   : > { %v1435_v9 = vsel %vm1356_vm1, %v1350_v7, 0.0  ;;  %v3095_v10 = vpop.f32.mrb[61].mxu0  ;;  %v1351_v11 = vmul.f32 %v3614_v51, %v1313_v5 }
 0x177   : > { %v1271_v12 = vpop.f32.mrb[56].mxu1  ;;  %1436 = vadd.xlane.f32.xlu0 %v1435_v9  ;;  %v3096_v13 = vadd.f32 %v3095_v10, %v3094_v8  ;;  %v3097_v14 = vpop.f32.mrb[62].mxu0 }
 0x178   : > { %v1272_v15 = vadd.f32 %v1271_v12, %v1111_v6  ;;  %v1273_v16 = vpop.f32.mrb[57].mxu1  ;;  %v1438_v18 = vsel %vm1356_vm1, %v1351_v11, 0.0  ;;  %v3098_v19 = vpop.f32.mrb[63].mxu0 }
 0x179   : > { %v1274_v20 = vpop.f32.mrb[58].mxu1  ;;  %1439 = vadd.xlane.f32.xlu1 %v1438_v18  ;;  %v3099_v21 = vadd.f32 %v3098_v19, %v3097_v14  ;;  %v1119_v26 = vadd.f32 %v3096_v13, %v3607_v37 }
 0x17a   : > { %v1314_v22 = vmax.f32 %v1272_v15, 0.0  ;;  %v1275_v23 = vadd.f32 %v1274_v20, %v1114_v17  ;;  %v1276_v24 = vpop.f32.mrb[59].mxu1 }
 0x17b   : > { %v1122_v33 = vadd.f32 %v3099_v21, %v3607_v37 }
 0x17c   : > { %v1315_v25 = vmax.f32 %v1275_v23, 0.0  ;;  %v1352_v27 = vmul.f32 %v3614_v51, %v1314_v22 }
 0x17e   : > { %v1441_v28 = vsel %vm1356_vm1, %v1352_v27, 0.0  ;;  %v1353_v29 = vmul.f32 %v3614_v51, %v1315_v25 }
 0x17f   : > { %v1279_v30 = vpop.f32.mrb[60].mxu1  ;;  %1442 = vadd.xlane.f32.xlu0 %v1441_v28 }
 0x180   : > { %v1280_v31 = vadd.f32 %v1279_v30, %v1119_v26  ;;  %v1281_v32 = vpop.f32.mrb[61].mxu1  ;;  %v1444_v34 = vsel %vm1356_vm1, %v1353_v29, 0.0 }
 0x181   : > { %v1282_v35 = vpop.f32.mrb[62].mxu1  ;;  %1445 = vadd.xlane.f32.xlu1 %v1444_v34 }
 0x182   : > { %v1316_v36 = vmax.f32 %v1280_v31, 0.0  ;;  %v1283_v38 = vadd.f32 %v1282_v35, %v1122_v33  ;;  %v1284_v39 = vpop.f32.mrb[63].mxu1 }
 0x184   : > { %v1317_v40 = vmax.f32 %v1283_v38, 0.0  ;;  %v1354_v41 = vmul.f32 %v3614_v51, %v1316_v36 }
 0x186   : > { %v1447_v42 = vsel %vm1356_vm1, %v1354_v41, 0.0  ;;  %v1355_v43 = vmul.f32 %v3614_v51, %v1317_v40 }
 0x187   : > { %1448 = vadd.xlane.f32.xlu0 %v1447_v42 }
 0x188   : > { %v1450_v44 = vsel %vm1356_vm1, %v1355_v43, 0.0 }
 0x189   : > { %1451 = vadd.xlane.f32.xlu1 %v1450_v44 }
 0x19c   : > { %v1359_v37 = vpop.xlane.xlu0 %1358 }
 0x19d   : > { %v1460_v46 = vadd.f32 %v3710_v45, %v1359_v37 }
 0x19f   : > { %v2746_v47 = vmul.f32 -1.442695, %v1460_v46 }
 0x1a0   : > { %v1362_v48 = vpop.xlane.xlu0 %1361 }
 0x1a1   : > { %3234 = vpow2.f32 %v2746_v47  ;;  %v1461_v49 = vadd.f32 %v3710_v45, %v1362_v48 }
 0x1a3   : > { %v2747_v50 = vmul.f32 -1.442695, %v1461_v49 }
 0x1a4   : > { %v1365_v52 = vpop.xlane.xlu1 %1364 }
 0x1a5   : > { %3236 = vpow2.f32 %v2747_v50  ;;  %v1462_v53 = vadd.f32 %v3710_v45, %v1365_v52 }
 0x1a7   : > { %v2748_v51 = vmul.f32 -1.442695, %v1462_v53 }
 0x1a8   : > { %v1368_v54 = vpop.xlane.xlu1 %1367 }
 0x1a9   : > { %3238 = vpow2.f32 %v2748_v51  ;;  %v1463_v55 = vadd.f32 %v3710_v45, %v1368_v54 }
 0x1ab   : > { %v3235_v56 = vpop.eup %3234  ;;  %v2749_v57 = vmul.f32 -1.442695, %v1463_v55 }
 0x1ac   : > { %v1588_v58 = vadd.f32 1.0, %v3235_v56  ;;  %v1371_v59 = vpop.xlane.xlu0 %1370 }
 0x1ad   : > { %3240 = vpow2.f32 %v2749_v57  ;;  %v1464_v60 = vadd.f32 %v3710_v45, %v1371_v59 }
 0x1ae   : > { %3242 = vrcp.f32 %v1588_v58  ;;  %v1374_v61 = vpop.xlane.xlu1 %1373 }
 0x1af   : > { %v3237_v62 = vpop.eup %3236  ;;  %v2750_v63 = vmul.f32 -1.442695, %v1464_v60  ;;  %v1465_v0 = vadd.f32 %v3710_v45, %v1374_v61 }
 0x1b0   : > { %v1589_v1 = vadd.f32 1.0, %v3237_v62 }
 0x1b1   : > { %3244 = vpow2.f32 %v2750_v63  ;;  %v2751_v2 = vmul.f32 -1.442695, %v1465_v0 }
 0x1b2   : > { %3246 = vrcp.f32 %v1589_v1 }
 0x1b3   : > { %v3239_v3 = vpop.eup %3238  ;;  %3248 = vpow2.f32 %v2751_v2 }
 0x1b4   : > { %v1590_v4 = vadd.f32 1.0, %v3239_v3  ;;  %v1377_v5 = vpop.xlane.xlu0 %1376 }
 0x1b5   : > { %v1466_v6 = vadd.f32 %v3710_v45, %v1377_v5 }
 0x1b6   : > { %3250 = vrcp.f32 %v1590_v4  ;;  %v1380_v7 = vpop.xlane.xlu1 %1379 }
 0x1b7   : > { %v3241_v8 = vpop.eup %3240  ;;  %v2752_v9 = vmul.f32 -1.442695, %v1466_v6  ;;  %v1467_v10 = vadd.f32 %v3710_v45, %v1380_v7 }
 0x1b8   : > { %v3243_v11 = vpop.eup %3242  ;;  %v1591_v12 = vadd.f32 1.0, %v3241_v8 }
 0x1b9   : > { %3252 = vpow2.f32 %v2752_v9  ;;  %v2753_v13 = vmul.f32 -1.442695, %v1467_v10  ;;  %1750 = vperm.xlu0 %3109, %v3243_v11  }
 0x1ba   : > { %3254 = vrcp.f32 %v1591_v12 }
 0x1bb   : > { %v3245_v14 = vpop.eup %3244  ;;  %3256 = vpow2.f32 %v2753_v13 }
 0x1bc   : > { %v3247_v15 = vpop.eup %3246  ;;  %v1592_v16 = vadd.f32 1.0, %v3245_v14  ;;  %v1383_v17 = vpop.xlane.xlu0 %1382 }
 0x1bd   : > { %v3249_v18 = vpop.eup %3248  ;;  %v1468_v19 = vadd.f32 %v3710_v45, %v1383_v17  ;;  %1755 = vperm.xlu1 %3110, %v3247_v15  }
 0x1be   : > { %3258 = vrcp.f32 %v1592_v16  ;;  %v1593_v20 = vadd.f32 1.0, %v3249_v18  ;;  %v1386_v21 = vpop.xlane.xlu1 %1385 }
 0x1bf   : > { %v2754_v22 = vmul.f32 -1.442695, %v1468_v19  ;;  %v1469_v23 = vadd.f32 %v3710_v45, %v1386_v21 }
 0x1c0   : > { %v3251_v24 = vpop.eup %3250 }
 0x1c1   : > { %3260 = vpow2.f32 %v2754_v22  ;;  %v2755_v25 = vmul.f32 -1.442695, %v1469_v23  ;;  %1760 = vperm.xlu1 %3110, %v3251_v24  }
 0x1c2   : > { %3262 = vrcp.f32 %v1593_v20 }
 0x1c3   : > { %v3253_v26 = vpop.eup %3252  ;;  %3264 = vpow2.f32 %v2755_v25 }
 0x1c4   : > { %v3255_v27 = vpop.eup %3254  ;;  %v1594_v28 = vadd.f32 1.0, %v3253_v26  ;;  %v1389_v29 = vpop.xlane.xlu0 %1388 }
 0x1c5   : > { %v3257_v30 = vpop.eup %3256  ;;  %v1470_v31 = vadd.f32 %v3710_v45, %v1389_v29  ;;  %1765 = vperm.xlu1 %3110, %v3255_v27  }
 0x1c6   : > { %3266 = vrcp.f32 %v1594_v28  ;;  %v1595_v32 = vadd.f32 1.0, %v3257_v30  ;;  %v1392_v33 = vpop.xlane.xlu1 %1391 }
 0x1c7   : > { %v2756_v34 = vmul.f32 -1.442695, %v1470_v31  ;;  %v1471_v35 = vadd.f32 %v3710_v45, %v1392_v33 }
 0x1c8   : > { %v3259_v36 = vpop.eup %3258 }
 0x1c9   : > { %3268 = vpow2.f32 %v2756_v34  ;;  %v2757_v38 = vmul.f32 -1.442695, %v1471_v35  ;;  %1770 = vperm.xlu1 %3110, %v3259_v36  }
 0x1ca   : > { %3270 = vrcp.f32 %v1595_v32 }
 0x1cb   : > { %v3261_v39 = vpop.eup %3260  ;;  %3272 = vpow2.f32 %v2757_v38 }
 0x1cc   : > { %v3263_v40 = vpop.eup %3262  ;;  %v1596_v41 = vadd.f32 1.0, %v3261_v39  ;;  %v1395_v42 = vpop.xlane.xlu0 %1394 }
 0x1cd   : > { %v3265_v43 = vpop.eup %3264  ;;  %v1472_v44 = vadd.f32 %v3710_v45, %v1395_v42  ;;  %1775 = vperm.xlu1 %3110, %v3263_v40  }
 0x1ce   : > { %3274 = vrcp.f32 %v1596_v41  ;;  %v1597_v37 = vadd.f32 1.0, %v3265_v43  ;;  %v1398_v46 = vpop.xlane.xlu1 %1397 }
 0x1cf   : > { %v2758_v47 = vmul.f32 -1.442695, %v1472_v44  ;;  %v1473_v48 = vadd.f32 %v3710_v45, %v1398_v46 }
 0x1d0   : > { %v3267_v49 = vpop.eup %3266  ;;  %3276 = vrcp.f32 %v1597_v37 }
 0x1d1   : > { %3278 = vpow2.f32 %v2758_v47  ;;  %v2759_v50 = vmul.f32 -1.442695, %v1473_v48  ;;  %1780 = vperm.xlu1 %3110, %v3267_v49  }
 0x1d3   : > { %v3269_v52 = vpop.eup %3268  ;;  %3280 = vpow2.f32 %v2759_v50 }
 0x1d4   : > { %v3271_v53 = vpop.eup %3270  ;;  %v1598_v51 = vadd.f32 1.0, %v3269_v52  ;;  %v1401_v54 = vpop.xlane.xlu0 %1400 }
 0x1d5   : > { %v3273_v55 = vpop.eup %3272  ;;  %v1474_v56 = vadd.f32 %v3710_v45, %v1401_v54  ;;  %1785 = vperm.xlu1 %3110, %v3271_v53  }
 0x1d6   : > { %3282 = vrcp.f32 %v1598_v51  ;;  %v1599_v57 = vadd.f32 1.0, %v3273_v55  ;;  %v1404_v58 = vpop.xlane.xlu1 %1403 }
 0x1d7   : > { %v2760_v59 = vmul.f32 -1.442695, %v1474_v56  ;;  %v1475_v60 = vadd.f32 %v3710_v45, %v1404_v58 }
 0x1d8   : > { %v3275_v61 = vpop.eup %3274  ;;  %3284 = vrcp.f32 %v1599_v57 }
 0x1d9   : > { %3286 = vpow2.f32 %v2760_v59  ;;  %v2761_v62 = vmul.f32 -1.442695, %v1475_v60  ;;  %1790 = vperm.xlu1 %3110, %v3275_v61  }
 0x1da   : > { %v3277_v63 = vpop.eup %3276 }
 0x1db   : > { %v3279_v0 = vpop.eup %3278  ;;  %3288 = vpow2.f32 %v2761_v62  ;;  %1795 = vperm.xlu0 %3109, %v3277_v63  }
 0x1dc   : > { %v1600_v1 = vadd.f32 1.0, %v3279_v0  ;;  %v1407_v2 = vpop.xlane.xlu0 %1406 }
 0x1dd   : > { %v3281_v3 = vpop.eup %3280  ;;  %v1476_v4 = vadd.f32 %v3710_v45, %v1407_v2 }
 0x1de   : > { %3290 = vrcp.f32 %v1600_v1  ;;  %v1601_v5 = vadd.f32 1.0, %v3281_v3  ;;  %v1410_v6 = vpop.xlane.xlu1 %1409 }
 0x1df   : > { %v2762_v7 = vmul.f32 -1.442695, %v1476_v4  ;;  %v1477_v8 = vadd.f32 %v3710_v45, %v1410_v6 }
 0x1e0   : > { %v3283_v9 = vpop.eup %3282  ;;  %3292 = vrcp.f32 %v1601_v5 }
 0x1e1   : > { %3294 = vpow2.f32 %v2762_v7  ;;  %v2763_v10 = vmul.f32 -1.442695, %v1477_v8  ;;  %1800 = vperm.xlu1 %3110, %v3283_v9  }
 0x1e2   : > { %v3285_v11 = vpop.eup %3284 }
 0x1e3   : > { %v3287_v12 = vpop.eup %3286  ;;  %3296 = vpow2.f32 %v2763_v10  ;;  %1805 = vperm.xlu0 %3109, %v3285_v11  }
 0x1e4   : > { %v1602_v13 = vadd.f32 1.0, %v3287_v12  ;;  %v1413_v14 = vpop.xlane.xlu0 %1412 }
 0x1e5   : > { %v3289_v15 = vpop.eup %3288  ;;  %v1478_v16 = vadd.f32 %v3710_v45, %v1413_v14 }
 0x1e6   : > { %3298 = vrcp.f32 %v1602_v13  ;;  %v1603_v17 = vadd.f32 1.0, %v3289_v15  ;;  %v1416_v18 = vpop.xlane.xlu1 %1415 }
 0x1e7   : > { %v2764_v19 = vmul.f32 -1.442695, %v1478_v16  ;;  %v1479_v20 = vadd.f32 %v3710_v45, %v1416_v18 }
 0x1e8   : > { %v3291_v21 = vpop.eup %3290  ;;  %3300 = vrcp.f32 %v1603_v17 }
 0x1e9   : > { %3302 = vpow2.f32 %v2764_v19  ;;  %v2765_v22 = vmul.f32 -1.442695, %v1479_v20  ;;  %1810 = vperm.xlu1 %3110, %v3291_v21  }
 0x1ea   : > { %v3293_v23 = vpop.eup %3292 }
 0x1eb   : > { %v3295_v24 = vpop.eup %3294  ;;  %3304 = vpow2.f32 %v2765_v22  ;;  %1815 = vperm.xlu0 %3109, %v3293_v23  }
 0x1ec   : > { %v1604_v25 = vadd.f32 1.0, %v3295_v24  ;;  %v1419_v26 = vpop.xlane.xlu0 %1418 }
 0x1ed   : > { %v3297_v27 = vpop.eup %3296  ;;  %v1480_v28 = vadd.f32 %v3710_v45, %v1419_v26 }
 0x1ee   : > { %3306 = vrcp.f32 %v1604_v25  ;;  %v1605_v29 = vadd.f32 1.0, %v3297_v27  ;;  %v1422_v30 = vpop.xlane.xlu1 %1421 }
 0x1ef   : > { %v2766_v31 = vmul.f32 -1.442695, %v1480_v28  ;;  %v1481_v32 = vadd.f32 %v3710_v45, %v1422_v30 }
 0x1f0   : > { %v3299_v33 = vpop.eup %3298  ;;  %3308 = vrcp.f32 %v1605_v29 }
 0x1f1   : > { %3310 = vpow2.f32 %v2766_v31  ;;  %v2767_v34 = vmul.f32 -1.442695, %v1481_v32  ;;  %1820 = vperm.xlu1 %3110, %v3299_v33  }
 0x1f2   : > { %v3301_v35 = vpop.eup %3300 }
 0x1f3   : > { %v3303_v36 = vpop.eup %3302  ;;  %3312 = vpow2.f32 %v2767_v34  ;;  %1825 = vperm.xlu0 %3109, %v3301_v35  }
 0x1f4   : > { %v1606_v38 = vadd.f32 1.0, %v3303_v36  ;;  %v1425_v39 = vpop.xlane.xlu0 %1424 }
 0x1f5   : > { %v3305_v40 = vpop.eup %3304  ;;  %v1482_v41 = vadd.f32 %v3710_v45, %v1425_v39 }
 0x1f6   : > { %3314 = vrcp.f32 %v1606_v38  ;;  %v1607_v42 = vadd.f32 1.0, %v3305_v40  ;;  %v1428_v43 = vpop.xlane.xlu1 %1427 }
 0x1f7   : > { %v2768_v44 = vmul.f32 -1.442695, %v1482_v41  ;;  %v1483_v37 = vadd.f32 %v3710_v45, %v1428_v43 }
 0x1f8   : > { %v3307_v46 = vpop.eup %3306  ;;  %3316 = vrcp.f32 %v1607_v42 }
 0x1f9   : > { %3318 = vpow2.f32 %v2768_v44  ;;  %v2769_v47 = vmul.f32 -1.442695, %v1483_v37  ;;  %1830 = vperm.xlu1 %3110, %v3307_v46  }
 0x1fa   : > { %v3309_v48 = vpop.eup %3308 }
 0x1fb   : > { %v3311_v49 = vpop.eup %3310  ;;  %3320 = vpow2.f32 %v2769_v47  ;;  %1835 = vperm.xlu0 %3109, %v3309_v48   ;;  %v2910_v47 = vld [vmem:[%s3751_s28] sm:$0xff]  }
 0x1fc   : > { %v1608_v50 = vadd.f32 1.0, %v3311_v49  ;;  %v1431_v52 = vpop.xlane.xlu0 %1430  ;;  %v2911_v48 = vunpack.c.l.bf16 %v2910_v47 }
 0x1fd   : > { %v3313_v53 = vpop.eup %3312  ;;  %v1484_v51 = vadd.f32 %v3710_v45, %v1431_v52  ;;  %v2912_v52 = vunpack.c.h.bf16 %v2910_v47 }
 0x1fe   : > { %3322 = vrcp.f32 %v1608_v50  ;;  %v1609_v54 = vadd.f32 1.0, %v3313_v53  ;;  %v1434_v55 = vpop.xlane.xlu1 %1433  ;;  %v2973_v53 = vld [vmem:[%s3751_s28 + $0x8] sm:$0xff]  }
 0x1ff   : > { %v2770_v56 = vmul.f32 -1.442695, %v1484_v51  ;;  %v1485_v57 = vadd.f32 %v3710_v45, %v1434_v55 }
 0x200   : > { %v3315_v58 = vpop.eup %3314  ;;  %3324 = vrcp.f32 %v1609_v54 }
 0x201   : > { %3326 = vpow2.f32 %v2770_v56  ;;  %v2771_v59 = vmul.f32 -1.442695, %v1485_v57  ;;  %1840 = vperm.xlu1 %3110, %v3315_v58   ;;  %v2915_v56 = vunpack.c.l.bf16 %v2973_v53 }
 0x202   : > { %v3317_v60 = vpop.eup %3316 }
 0x203   : > { %v3319_v61 = vpop.eup %3318  ;;  %3328 = vpow2.f32 %v2771_v59  ;;  %1845 = vperm.xlu0 %3109, %v3317_v60   ;;  %v2916_v60 = vunpack.c.h.bf16 %v2973_v53 }
 0x204   : > { %v1610_v62 = vadd.f32 1.0, %v3319_v61  ;;  %v1437_v63 = vpop.xlane.xlu0 %1436  ;;  %v2974_v61 = vld [vmem:[%s3751_s28 + $0x10] sm:$0xff]  }
 0x205   : > { %v3321_v0 = vpop.eup %3320  ;;  %v1486_v1 = vadd.f32 %v3710_v45, %v1437_v63 }
 0x206   : > { %3330 = vrcp.f32 %v1610_v62  ;;  %v1611_v2 = vadd.f32 1.0, %v3321_v0  ;;  %v1440_v3 = vpop.xlane.xlu1 %1439 }
 0x207   : > { %v2772_v4 = vmul.f32 -1.442695, %v1486_v1  ;;  %v1487_v5 = vadd.f32 %v3710_v45, %v1440_v3  ;;  %v2919_v1 = vunpack.c.l.bf16 %v2974_v61 }
 0x208   : > { %v3323_v6 = vpop.eup %3322  ;;  %3332 = vrcp.f32 %v1611_v2 }
 0x209   : > { %3334 = vpow2.f32 %v2772_v4  ;;  %v2773_v7 = vmul.f32 -1.442695, %v1487_v5  ;;  %1850 = vperm.xlu1 %3110, %v3323_v6   ;;  %v2920_v5 = vunpack.c.h.bf16 %v2974_v61  ;;  %v2975_v6 = vld [vmem:[%s3751_s28 + $0x18] sm:$0xff]  }
 0x20a   : > { %v3325_v8 = vpop.eup %3324 }
 0x20b   : > { %v3327_v9 = vpop.eup %3326  ;;  %3336 = vpow2.f32 %v2773_v7  ;;  %1855 = vperm.xlu0 %3109, %v3325_v8  }
 0x20c   : > { %v1612_v10 = vadd.f32 1.0, %v3327_v9  ;;  %v1443_v11 = vpop.xlane.xlu0 %1442 }
 0x20d   : > { %v3329_v12 = vpop.eup %3328  ;;  %v1488_v13 = vadd.f32 %v3710_v45, %v1443_v11 }
 0x20e   : > { %3338 = vrcp.f32 %v1612_v10  ;;  %v1613_v14 = vadd.f32 1.0, %v3329_v12  ;;  %v1446_v15 = vpop.xlane.xlu1 %1445  ;;  %v2923_v10 = vunpack.c.l.bf16 %v2975_v6 }
 0x20f   : > { %v2774_v16 = vmul.f32 -1.442695, %v1488_v13  ;;  %v1489_v17 = vadd.f32 %v3710_v45, %v1446_v15  ;;  %v2924_v15 = vunpack.c.h.bf16 %v2975_v6 }
 0x210   : > { %v3331_v18 = vpop.eup %3330  ;;  %3340 = vrcp.f32 %v1613_v14 }
 0x211   : > { %3342 = vpow2.f32 %v2774_v16  ;;  %v2775_v19 = vmul.f32 -1.442695, %v1489_v17  ;;  %1860 = vperm.xlu1 %3110, %v3331_v18   ;;  %v2976_v16 = vld [vmem:[%s3751_s28 + $0x20] sm:$0xff]  }
 0x212   : > { %v3333_v20 = vpop.eup %3332 }
 0x213   : > { %v3335_v21 = vpop.eup %3334  ;;  %3344 = vpow2.f32 %v2775_v19  ;;  %1865 = vperm.xlu0 %3109, %v3333_v20  }
 0x214   : > { %v1614_v22 = vadd.f32 1.0, %v3335_v21  ;;  %v1449_v23 = vpop.xlane.xlu0 %1448 }
 0x215   : > { %v3337_v24 = vpop.eup %3336  ;;  %v1490_v25 = vadd.f32 %v3710_v45, %v1449_v23 }
 0x216   : > { %3346 = vrcp.f32 %v1614_v22  ;;  %v1615_v26 = vadd.f32 1.0, %v3337_v24  ;;  %v1452_v27 = vpop.xlane.xlu1 %1451  ;;  %v2927_v22 = vunpack.c.l.bf16 %v2976_v16  ;;  %v2928_v24 = vunpack.c.h.bf16 %v2976_v16 }
 0x217   : > { %v2776_v28 = vmul.f32 -1.442695, %v1490_v25  ;;  %v1491_v29 = vadd.f32 %v3710_v45, %v1452_v27 }
 0x218   : > { %v3339_v30 = vpop.eup %3338  ;;  %3348 = vrcp.f32 %v1615_v26 }
 0x219   : > { %3350 = vpow2.f32 %v2776_v28  ;;  %v2777_v31 = vmul.f32 -1.442695, %v1491_v29  ;;  %1870 = vperm.xlu1 %3110, %v3339_v30   ;;  %v2977_v30 = vld [vmem:[%s3751_s28 + $0x28] sm:$0xff]  }
 0x21a   : > { %v3341_v32 = vpop.eup %3340 }
 0x21b   : > { %v3343_v33 = vpop.eup %3342  ;;  %3352 = vpow2.f32 %v2777_v31  ;;  %1875 = vperm.xlu0 %3109, %v3341_v32  }
 0x21c   : > { %v1616_v34 = vadd.f32 1.0, %v3343_v33 }
 0x21d   : > { %v3345_v35 = vpop.eup %3344 }
 0x21e   : > { %3354 = vrcp.f32 %v1616_v34  ;;  %v1617_v36 = vadd.f32 1.0, %v3345_v35 }
 0x220   : > { %v3347_v38 = vpop.eup %3346  ;;  %3356 = vrcp.f32 %v1617_v36  ;;  %v2931_v36 = vunpack.c.l.bf16 %v2977_v30 }
 0x221   : > { %1880 = vperm.xlu1 %3110, %v3347_v38   ;;  %v2932_v38 = vunpack.c.h.bf16 %v2977_v30 }
 0x222   : > { %v3349_v39 = vpop.eup %3348 }
 0x223   : > { %v3351_v40 = vpop.eup %3350  ;;  %1885 = vperm.xlu0 %3109, %v3349_v39  }
 0x224   : > { %v1618_v45 = vadd.f32 1.0, %v3351_v40 }
 0x225   : > { %v3353_v41 = vpop.eup %3352 }
 0x226   : > { %3358 = vrcp.f32 %v1618_v45  ;;  %v1619_v42 = vadd.f32 1.0, %v3353_v41 }
 0x228   : > { %v3355_v43 = vpop.eup %3354  ;;  %3360 = vrcp.f32 %v1619_v42 }
 0x229   : > { %1890 = vperm.xlu1 %3110, %v3355_v43   ;;  %v2978_v43 = vld [vmem:[%s3751_s28 + $0x30] sm:$0xff]  }
 0x22a   : > { %v3357_v44 = vpop.eup %3356 }
 0x22b   : > { %1895 = vperm.xlu0 %3109, %v3357_v44  }
 0x230   : > { %v3359_v37 = vpop.eup %3358 }
 0x231   : > { %1900 = vperm.xlu1 %3110, %v3359_v37  }
 0x232   : > { %v3361_v46 = vpop.eup %3360 }
 0x233   : > { %1905 = vperm.xlu0 %3109, %v3361_v46  }
 0x238   : > { %v1751_v49 = vpop.permute.xlu0 %1750 }
 0x239   : > { %v1908_v50 = vmul.f32 %v2911_v48, %v1751_v49  ;;  %v2935_v49 = vunpack.c.l.bf16 %v2978_v43 }
 0x23b   : > { %v2845_v51 = vpack.c.bf16 %v1908_v50, %v1908_v50  ;;  %v2198_v14 = vsel %vm2101_vm3, %v1908_v50, 0.0  ;;  %v2102_v19 = vsel %vm2101_vm3, %v1908_v50, -inf  ;;  %v2936_v50 = vunpack.c.h.bf16 %v2978_v43 }
 0x23c   : > { %v1756_v54 = vpop.permute.xlu1 %1755 }
 0x23d   : > { %2069 = vst.msk [vmem:[%s3758_s4] sm:$0xf] %vm2068_vm2, %v2845_v51  ;;  %v1909_v55 = vmul.f32 %v2912_v52, %v1756_v54 }
 0x23f   : > { %v2846_v57 = vpack.c.bf16 %v1909_v55, %v1909_v55  ;;  %v2105_v21 = vsel %vm2101_vm3, %v1909_v55, -inf  ;;  %v2201_v26 = vsel %vm2101_vm3, %v1909_v55, 0.0 }
 0x240   : > { %v1761_v58 = vpop.permute.xlu1 %1760 }
 0x241   : > { %2070 = vst.msk [vmem:[%s3758_s4 + $0x4] sm:$0xf] %vm2068_vm2, %v2846_v57  ;;  %v1910_v59 = vmul.f32 %v2915_v56, %v1761_v58  ;;  %v2979_v56 = vld [vmem:[%s3751_s28 + $0x38] sm:$0xff]  }
 0x243   : > { %v2847_v62 = vpack.c.bf16 %v1910_v59, %v1910_v59  ;;  %v2108_v28 = vsel %vm2101_vm3, %v1910_v59, -inf  ;;  %v2204_v35 = vsel %vm2101_vm3, %v1910_v59, 0.0 }
 0x244   : > { %v1766_v63 = vpop.permute.xlu1 %1765 }
 0x245   : > { %2071 = vst.msk [vmem:[%s3758_s4 + $0x8] sm:$0xf] %vm2068_vm2, %v2847_v62  ;;  %v1911_v0 = vmul.f32 %v2916_v60, %v1766_v63  ;;  %v2939_v62 = vunpack.c.l.bf16 %v2979_v56  ;;  %v2940_v63 = vunpack.c.h.bf16 %v2979_v56 }
 0x247   : > { %v2848_v2 = vpack.c.bf16 %v1911_v0, %v1911_v0  ;;  %v2111_v33 = vsel %vm2101_vm3, %v1911_v0, -inf  ;;  %v2207_v40 = vsel %vm2101_vm3, %v1911_v0, 0.0 }
 0x248   : > { %v1771_v3 = vpop.permute.xlu1 %1770 }
 0x249   : > { %2072 = vst.msk [vmem:[%s3758_s4 + $0xc] sm:$0xf] %vm2068_vm2, %v2848_v2  ;;  %v1912_v4 = vmul.f32 %v2919_v1, %v1771_v3 }
 0x24b   : > { %v2849_v7 = vpack.c.bf16 %v1912_v4, %v1912_v4  ;;  %v2114_v41 = vsel %vm2101_vm3, %v1912_v4, -inf  ;;  %v2210_v48 = vsel %vm2101_vm3, %v1912_v4, 0.0 }
 0x24c   : > { %v1776_v8 = vpop.permute.xlu1 %1775 }
 0x24d   : > { %2073 = vst.msk [vmem:[%s3758_s4 + $0x10] sm:$0xf] %vm2068_vm2, %v2849_v7  ;;  %v1913_v9 = vmul.f32 %v2920_v5, %v1776_v8  ;;  %v2980_v5 = vld [vmem:[%s3751_s28 + $0x40] sm:$0xff]  }
 0x24f   : > { %v2850_v11 = vpack.c.bf16 %v1913_v9, %v1913_v9  ;;  %v2117_v46 = vsel %vm2101_vm3, %v1913_v9, -inf  ;;  %v2213_v53 = vsel %vm2101_vm3, %v1913_v9, 0.0 }
 0x250   : > { %v1781_v12 = vpop.permute.xlu1 %1780 }
 0x251   : > { %2074 = vst.msk [vmem:[%s3758_s4 + $0x14] sm:$0xf] %vm2068_vm2, %v2850_v11  ;;  %v3775_v13 = vmul.f32 %v2923_v10, %v1781_v12  ;;  %v2943_v11 = vunpack.c.l.bf16 %v2980_v5  ;;  %v2944_v12 = vunpack.c.h.bf16 %v2980_v5 }
 0x252   : > { %2199 = vadd.xlane.f32.xlu0 %v2198_v14 }
 0x253   : > { %v2851_v17 = vpack.c.bf16 %v3775_v13, %v3775_v13  ;;  %v2120_v54 = vsel %vm2101_vm3, %v3775_v13, -inf  ;;  %v2216_v61 = vsel %vm2101_vm3, %v3775_v13, 0.0 }
 0x254   : > { %v1786_v18 = vpop.permute.xlu1 %1785 }
 0x255   : > { %2075 = vst.msk [vmem:[%s3758_s4 + $0x18] sm:$0xf] %vm2068_vm2, %v2851_v17  ;;  %v3784_v20 = vmul.f32 %v2924_v15, %v1786_v18  ;;  %2103 = vmax.xlane.f32.xlu1 %v2102_v19  ;;  %v2981_v18 = vld [vmem:[%s3751_s28 + $0x48] sm:$0xff]  }
 0x256   : > { %2106 = vmax.xlane.f32.xlu0 %v2105_v21 }
 0x257   : > { %v2852_v23 = vpack.c.bf16 %v3784_v20, %v3784_v20  ;;  %v2123_v59 = vsel %vm2101_vm3, %v3784_v20, -inf  ;;  %v2219_v1 = vsel %vm2101_vm3, %v3784_v20, 0.0 }
 0x258   : > { %v1791_v25 = vpop.permute.xlu1 %1790 }
 0x259   : > { %2076 = vst.msk [vmem:[%s3758_s4 + $0x1c] sm:$0xf] %vm2068_vm2, %v2852_v23  ;;  %v3792_v27 = vmul.f32 %v2927_v22, %v1791_v25  ;;  %2202 = vadd.xlane.f32.xlu1 %v2201_v26  ;;  %v2948_v25 = vunpack.c.h.bf16 %v2981_v18 }
 0x25a   : > { %2109 = vmax.xlane.f32.xlu0 %v2108_v28  ;;  %v1796_v29 = vpop.permute.xlu0 %1795 }
 0x25b   : > { %v2853_v31 = vpack.c.bf16 %v3792_v27, %v3792_v27  ;;  %v3798_v32 = vmul.f32 %v2928_v24, %v1796_v29  ;;  %v2126_v3 = vsel %vm2101_vm3, %v3792_v27, -inf  ;;  %v2222_v10 = vsel %vm2101_vm3, %v3792_v27, 0.0 }
 0x25c   : > { %v2947_v24 = vunpack.c.l.bf16 %v2981_v18 }
 0x25d   : > { %2077 = vst.msk [vmem:[%s3758_s4 + $0x20] sm:$0xf] %vm2068_vm2, %v2853_v31  ;;  %v2854_v34 = vpack.c.bf16 %v3798_v32, %v3798_v32  ;;  %2112 = vmax.xlane.f32.xlu1 %v2111_v33  ;;  %v2129_v8 = vsel %vm2101_vm3, %v3798_v32, -inf  ;;  %v2225_v14 = vsel %vm2101_vm3, %v3798_v32, 0.0  ;;  %v2982_v31 = vld [vmem:[%s3751_s28 + $0x50] sm:$0xff]  }
 0x25e   : > { %2205 = vadd.xlane.f32.xlu0 %v2204_v35 }
 0x25f   : > { %2078 = vst.msk [vmem:[%s3758_s4 + $0x24] sm:$0xf] %vm2068_vm2, %v2854_v34 }
 0x260   : > { %v1801_v39 = vpop.permute.xlu1 %1800 }
 0x261   : > { %v3809_v45 = vmul.f32 %v2931_v36, %v1801_v39  ;;  %2208 = vadd.xlane.f32.xlu1 %v2207_v40  ;;  %v2952_v39 = vunpack.c.h.bf16 %v2982_v31 }
 0x262   : > { %2115 = vmax.xlane.f32.xlu0 %v2114_v41  ;;  %v1806_v42 = vpop.permute.xlu0 %1805 }
 0x263   : > { %v2855_v44 = vpack.c.bf16 %v3809_v45, %v3809_v45  ;;  %v3815_v37 = vmul.f32 %v2932_v38, %v1806_v42  ;;  %v2132_v16 = vsel %vm2101_vm3, %v3809_v45, -inf  ;;  %v2228_v23 = vsel %vm2101_vm3, %v3809_v45, 0.0 }
 0x264   : > { %v2951_v38 = vunpack.c.l.bf16 %v2982_v31 }
 0x265   : > { %2079 = vst.msk [vmem:[%s3758_s4 + $0x28] sm:$0xf] %vm2068_vm2, %v2855_v44  ;;  %v2856_v47 = vpack.c.bf16 %v3815_v37, %v3815_v37  ;;  %2118 = vmax.xlane.f32.xlu1 %v2117_v46  ;;  %v2135_v21 = vsel %vm2101_vm3, %v3815_v37, -inf  ;;  %v2231_v27 = vsel %vm2101_vm3, %v3815_v37, 0.0  ;;  %v2983_v44 = vld [vmem:[%s3751_s28 + $0x58] sm:$0xff]  }
 0x266   : > { %2211 = vadd.xlane.f32.xlu0 %v2210_v48 }
 0x267   : > { %2080 = vst.msk [vmem:[%s3758_s4 + $0x2c] sm:$0xf] %vm2068_vm2, %v2856_v47 }
 0x268   : > { %v1811_v52 = vpop.permute.xlu1 %1810 }
 0x269   : > { %v3826_v51 = vmul.f32 %v2935_v49, %v1811_v52  ;;  %2214 = vadd.xlane.f32.xlu1 %v2213_v53  ;;  %v2956_v52 = vunpack.c.h.bf16 %v2983_v44 }
 0x26a   : > { %2121 = vmax.xlane.f32.xlu0 %v2120_v54  ;;  %v1816_v55 = vpop.permute.xlu0 %1815 }
 0x26b   : > { %v2857_v57 = vpack.c.bf16 %v3826_v51, %v3826_v51  ;;  %v3833_v58 = vmul.f32 %v2936_v50, %v1816_v55  ;;  %v2138_v29 = vsel %vm2101_vm3, %v3826_v51, -inf  ;;  %v2234_v36 = vsel %vm2101_vm3, %v3826_v51, 0.0 }
 0x26c   : > { %v2955_v50 = vunpack.c.l.bf16 %v2983_v44 }
 0x26d   : > { %2081 = vst.msk [vmem:[%s3758_s4 + $0x30] sm:$0xf] %vm2068_vm2, %v2857_v57  ;;  %v2858_v60 = vpack.c.bf16 %v3833_v58, %v3833_v58  ;;  %2124 = vmax.xlane.f32.xlu1 %v2123_v59  ;;  %v2141_v34 = vsel %vm2101_vm3, %v3833_v58, -inf  ;;  %v2237_v45 = vsel %vm2101_vm3, %v3833_v58, 0.0  ;;  %v2984_v57 = vld [vmem:[%s3751_s28 + $0x60] sm:$0xff]  }
 0x26e   : > { %2217 = vadd.xlane.f32.xlu0 %v2216_v61 }
 0x26f   : > { %2082 = vst.msk [vmem:[%s3758_s4 + $0x34] sm:$0xf] %vm2068_vm2, %v2858_v60 }
 0x270   : > { %v1821_v0 = vpop.permute.xlu1 %1820 }
 0x271   : > { %v3847_v2 = vmul.f32 %v2939_v62, %v1821_v0  ;;  %2220 = vadd.xlane.f32.xlu1 %v2219_v1  ;;  %v2960_v0 = vunpack.c.h.bf16 %v2984_v57 }
 0x272   : > { %2127 = vmax.xlane.f32.xlu0 %v2126_v3  ;;  %v1826_v4 = vpop.permute.xlu0 %1825 }
 0x273   : > { %v2859_v6 = vpack.c.bf16 %v3847_v2, %v3847_v2  ;;  %v3854_v7 = vmul.f32 %v2940_v63, %v1826_v4  ;;  %v2144_v42 = vsel %vm2101_vm3, %v3847_v2, -inf  ;;  %v2240_v49 = vsel %vm2101_vm3, %v3847_v2, 0.0 }
 0x274   : > { %v2959_v63 = vunpack.c.l.bf16 %v2984_v57 }
 0x275   : > { %2083 = vst.msk [vmem:[%s3758_s4 + $0x38] sm:$0xf] %vm2068_vm2, %v2859_v6  ;;  %v2860_v9 = vpack.c.bf16 %v3854_v7, %v3854_v7  ;;  %2130 = vmax.xlane.f32.xlu1 %v2129_v8  ;;  %v2147_v47 = vsel %vm2101_vm3, %v3854_v7, -inf  ;;  %v2243_v51 = vsel %vm2101_vm3, %v3854_v7, 0.0  ;;  %v2985_v6 = vld [vmem:[%s3751_s28 + $0x68] sm:$0xff]  }
 0x276   : > { %2223 = vadd.xlane.f32.xlu0 %v2222_v10 }
 0x277   : > { %2084 = vst.msk [vmem:[%s3758_s4 + $0x3c] sm:$0xf] %vm2068_vm2, %v2860_v9 }
 0x278   : > { %v1831_v13 = vpop.permute.xlu1 %1830 }
 0x279   : > { %v3868_v15 = vmul.f32 %v2943_v11, %v1831_v13  ;;  %2226 = vadd.xlane.f32.xlu1 %v2225_v14  ;;  %v2964_v13 = vunpack.c.h.bf16 %v2985_v6 }
 0x27a   : > { %2133 = vmax.xlane.f32.xlu0 %v2132_v16  ;;  %v1836_v17 = vpop.permute.xlu0 %1835 }
 0x27b   : > { %v2861_v19 = vpack.c.bf16 %v3868_v15, %v3868_v15  ;;  %v3875_v20 = vmul.f32 %v2944_v12, %v1836_v17  ;;  %v2150_v55 = vsel %vm2101_vm3, %v3868_v15, -inf  ;;  %v2246_v62 = vsel %vm2101_vm3, %v3868_v15, 0.0 }
 0x27c   : > { %v2963_v12 = vunpack.c.l.bf16 %v2985_v6 }
 0x27d   : > { %2085 = vst.msk [vmem:[%s3758_s4 + $0x40] sm:$0xf] %vm2068_vm2, %v2861_v19  ;;  %v2862_v22 = vpack.c.bf16 %v3875_v20, %v3875_v20  ;;  %2136 = vmax.xlane.f32.xlu1 %v2135_v21  ;;  %v2153_v60 = vsel %vm2101_vm3, %v3875_v20, -inf  ;;  %v2249_v2 = vsel %vm2101_vm3, %v3875_v20, 0.0  ;;  %v2986_v19 = vld [vmem:[%s3751_s28 + $0x70] sm:$0xff]  }
 0x27e   : > { %2229 = vadd.xlane.f32.xlu0 %v2228_v23 }
 0x27f   : > { %2086 = vst.msk [vmem:[%s3758_s4 + $0x44] sm:$0xf] %vm2068_vm2, %v2862_v22 }
 0x280   : > { %v1841_v26 = vpop.permute.xlu1 %1840 }
 0x281   : > { %v3889_v28 = vmul.f32 %v2947_v24, %v1841_v26  ;;  %2232 = vadd.xlane.f32.xlu1 %v2231_v27  ;;  %v2968_v26 = vunpack.c.h.bf16 %v2986_v19 }
 0x282   : > { %2139 = vmax.xlane.f32.xlu0 %v2138_v29  ;;  %v1846_v30 = vpop.permute.xlu0 %1845 }
 0x283   : > { %v2863_v32 = vpack.c.bf16 %v3889_v28, %v3889_v28  ;;  %v3896_v33 = vmul.f32 %v2948_v25, %v1846_v30  ;;  %v2156_v4 = vsel %vm2101_vm3, %v3889_v28, -inf  ;;  %v2252_v11 = vsel %vm2101_vm3, %v3889_v28, 0.0 }
 0x284   : > { %v2967_v25 = vunpack.c.l.bf16 %v2986_v19 }
 0x285   : > { %2087 = vst.msk [vmem:[%s3758_s4 + $0x48] sm:$0xf] %vm2068_vm2, %v2863_v32  ;;  %v2864_v35 = vpack.c.bf16 %v3896_v33, %v3896_v33  ;;  %2142 = vmax.xlane.f32.xlu1 %v2141_v34  ;;  %v2159_v9 = vsel %vm2101_vm3, %v3896_v33, -inf  ;;  %v2255_v15 = vsel %vm2101_vm3, %v3896_v33, 0.0  ;;  %v2987_v32 = vld [vmem:[%s3751_s28 + $0x78] sm:$0xff]  }
 0x286   : > { %2235 = vadd.xlane.f32.xlu0 %v2234_v36 }
 0x287   : > { %2088 = vst.msk [vmem:[%s3758_s4 + $0x4c] sm:$0xf] %vm2068_vm2, %v2864_v35 }
 0x288   : > { %v1851_v40 = vpop.permute.xlu1 %1850 }
 0x289   : > { %v3910_v41 = vmul.f32 %v2951_v38, %v1851_v40  ;;  %2238 = vadd.xlane.f32.xlu1 %v2237_v45  ;;  %v2972_v40 = vunpack.c.h.bf16 %v2987_v32 }
 0x28a   : > { %2145 = vmax.xlane.f32.xlu0 %v2144_v42  ;;  %v1856_v43 = vpop.permute.xlu0 %1855 }
 0x28b   : > { %v2865_v37 = vpack.c.bf16 %v3910_v41, %v3910_v41  ;;  %v3917_v46 = vmul.f32 %v2952_v39, %v1856_v43  ;;  %v2162_v17 = vsel %vm2101_vm3, %v3910_v41, -inf  ;;  %v2258_v24 = vsel %vm2101_vm3, %v3910_v41, 0.0 }
 0x28c   : > { %v2971_v39 = vunpack.c.l.bf16 %v2987_v32 }
 0x28d   : > { %2089 = vst.msk [vmem:[%s3758_s4 + $0x50] sm:$0xf] %vm2068_vm2, %v2865_v37  ;;  %v2866_v48 = vpack.c.bf16 %v3917_v46, %v3917_v46  ;;  %2148 = vmax.xlane.f32.xlu1 %v2147_v47  ;;  %v2165_v22 = vsel %vm2101_vm3, %v3917_v46, -inf  ;;  %v2261_v28 = vsel %vm2101_vm3, %v3917_v46, 0.0 }
 0x28e   : > { %2241 = vadd.xlane.f32.xlu0 %v2240_v49 }
 0x28f   : > { %2090 = vst.msk [vmem:[%s3758_s4 + $0x54] sm:$0xf] %vm2068_vm2, %v2866_v48 }
 0x290   : > { %v1861_v53 = vpop.permute.xlu1 %1860 }
 0x291   : > { %v3931_v54 = vmul.f32 %v2955_v50, %v1861_v53  ;;  %2244 = vadd.xlane.f32.xlu1 %v2243_v51 }
 0x292   : > { %2151 = vmax.xlane.f32.xlu0 %v2150_v55  ;;  %v1866_v56 = vpop.permute.xlu0 %1865 }
 0x293   : > { %v2867_v58 = vpack.c.bf16 %v3931_v54, %v3931_v54  ;;  %v3938_v59 = vmul.f32 %v2956_v52, %v1866_v56  ;;  %v2168_v30 = vsel %vm2101_vm3, %v3931_v54, -inf  ;;  %v2264_v38 = vsel %vm2101_vm3, %v3931_v54, 0.0 }
 0x295   : > { %2091 = vst.msk [vmem:[%s3758_s4 + $0x58] sm:$0xf] %vm2068_vm2, %v2867_v58  ;;  %v2868_v61 = vpack.c.bf16 %v3938_v59, %v3938_v59  ;;  %2154 = vmax.xlane.f32.xlu1 %v2153_v60  ;;  %v2171_v35 = vsel %vm2101_vm3, %v3938_v59, -inf  ;;  %v2267_v41 = vsel %vm2101_vm3, %v3938_v59, 0.0 }
 0x296   : > { %2247 = vadd.xlane.f32.xlu0 %v2246_v62 }
 0x297   : > { %2092 = vst.msk [vmem:[%s3758_s4 + $0x5c] sm:$0xf] %vm2068_vm2, %v2868_v61 }
 0x298   : > { %v1871_v1 = vpop.permute.xlu1 %1870 }
 0x299   : > { %v3952_v3 = vmul.f32 %v2959_v63, %v1871_v1  ;;  %2250 = vadd.xlane.f32.xlu1 %v2249_v2 }
 0x29a   : > { %2157 = vmax.xlane.f32.xlu0 %v2156_v4  ;;  %v1876_v5 = vpop.permute.xlu0 %1875 }
 0x29b   : > { %v2869_v7 = vpack.c.bf16 %v3952_v3, %v3952_v3  ;;  %v3959_v8 = vmul.f32 %v2960_v0, %v1876_v5  ;;  %v2174_v43 = vsel %vm2101_vm3, %v3952_v3, -inf  ;;  %v2270_v49 = vsel %vm2101_vm3, %v3952_v3, 0.0 }
 0x29d   : > { %2093 = vst.msk [vmem:[%s3758_s4 + $0x60] sm:$0xf] %vm2068_vm2, %v2869_v7  ;;  %v2870_v10 = vpack.c.bf16 %v3959_v8, %v3959_v8  ;;  %2160 = vmax.xlane.f32.xlu1 %v2159_v9  ;;  %v2177_v47 = vsel %vm2101_vm3, %v3959_v8, -inf  ;;  %v2273_v50 = vsel %vm2101_vm3, %v3959_v8, 0.0 }
 0x29e   : > { %2253 = vadd.xlane.f32.xlu0 %v2252_v11 }
 0x29f   : > { %2094 = vst.msk [vmem:[%s3758_s4 + $0x64] sm:$0xf] %vm2068_vm2, %v2870_v10 }
 0x2a0   : > { %v1881_v14 = vpop.permute.xlu1 %1880 }
 0x2a1   : > { %v1934_v16 = vmul.f32 %v2963_v12, %v1881_v14  ;;  %2256 = vadd.xlane.f32.xlu1 %v2255_v15 }
 0x2a2   : > { %2163 = vmax.xlane.f32.xlu0 %v2162_v17  ;;  %v1886_v18 = vpop.permute.xlu0 %1885 }
 0x2a3   : > { %v2871_v20 = vpack.c.bf16 %v1934_v16, %v1934_v16  ;;  %v1935_v21 = vmul.f32 %v2964_v13, %v1886_v18  ;;  %v2276_v52 = vsel %vm2101_vm3, %v1934_v16, 0.0  ;;  %v2180_v51 = vsel %vm2101_vm3, %v1934_v16, -inf }
 0x2a5   : > { %2095 = vst.msk [vmem:[%s3758_s4 + $0x68] sm:$0xf] %vm2068_vm2, %v2871_v20  ;;  %v2872_v23 = vpack.c.bf16 %v1935_v21, %v1935_v21  ;;  %2166 = vmax.xlane.f32.xlu1 %v2165_v22  ;;  %v2279_v53 = vsel %vm2101_vm3, %v1935_v21, 0.0  ;;  %v2183_v54 = vsel %vm2101_vm3, %v1935_v21, -inf }
 0x2a6   : > { %2259 = vadd.xlane.f32.xlu0 %v2258_v24 }
 0x2a7   : > { %2096 = vst.msk [vmem:[%s3758_s4 + $0x6c] sm:$0xf] %vm2068_vm2, %v2872_v23 }
 0x2a8   : > { %v1891_v27 = vpop.permute.xlu1 %1890 }
 0x2a9   : > { %v1936_v29 = vmul.f32 %v2967_v25, %v1891_v27  ;;  %2262 = vadd.xlane.f32.xlu1 %v2261_v28 }
 0x2aa   : > { %2169 = vmax.xlane.f32.xlu0 %v2168_v30  ;;  %v1896_v31 = vpop.permute.xlu0 %1895 }
 0x2ab   : > { %v2873_v33 = vpack.c.bf16 %v1936_v29, %v1936_v29  ;;  %v1937_v34 = vmul.f32 %v2968_v26, %v1896_v31  ;;  %v2282_v55 = vsel %vm2101_vm3, %v1936_v29, 0.0  ;;  %v2186_v57 = vsel %vm2101_vm3, %v1936_v29, -inf }
 0x2ad   : > { %2097 = vst.msk [vmem:[%s3758_s4 + $0x70] sm:$0xf] %vm2068_vm2, %v2873_v33  ;;  %v2874_v36 = vpack.c.bf16 %v1937_v34, %v1937_v34  ;;  %2172 = vmax.xlane.f32.xlu1 %v2171_v35  ;;  %v2285_v56 = vsel %vm2101_vm3, %v1937_v34, 0.0  ;;  %v2189_v58 = vsel %vm2101_vm3, %v1937_v34, -inf }
 0x2ae   : > { %2265 = vadd.xlane.f32.xlu0 %v2264_v38 }
 0x2af   : > { %2098 = vst.msk [vmem:[%s3758_s4 + $0x74] sm:$0xf] %vm2068_vm2, %v2874_v36 }
 0x2b0   : > { %v1901_v45 = vpop.permute.xlu1 %1900 }
 0x2b1   : > { %v1938_v42 = vmul.f32 %v2971_v39, %v1901_v45  ;;  %2268 = vadd.xlane.f32.xlu1 %v2267_v41 }
 0x2b2   : > { %2175 = vmax.xlane.f32.xlu0 %v2174_v43  ;;  %v1906_v44 = vpop.permute.xlu0 %1905 }
 0x2b3   : > { %v2875_v37 = vpack.c.bf16 %v1938_v42, %v1938_v42  ;;  %v1939_v46 = vmul.f32 %v2972_v40, %v1906_v44  ;;  %v2288_v59 = vsel %vm2101_vm3, %v1938_v42, 0.0  ;;  %v2192_v61 = vsel %vm2101_vm3, %v1938_v42, -inf }
 0x2b5   : > { %2099 = vst.msk [vmem:[%s3758_s4 + $0x78] sm:$0xf] %vm2068_vm2, %v2875_v37  ;;  %v2876_v48 = vpack.c.bf16 %v1939_v46, %v1939_v46  ;;  %2178 = vmax.xlane.f32.xlu1 %v2177_v47  ;;  %v2291_v60 = vsel %vm2101_vm3, %v1939_v46, 0.0  ;;  %v2195_v62 = vsel %vm2101_vm3, %v1939_v46, -inf }
 0x2b6   : > { %2271 = vadd.xlane.f32.xlu0 %v2270_v49 }
 0x2b7   : > { %2100 = vst.msk [vmem:[%s3758_s4 + $0x7c] sm:$0xf] %vm2068_vm2, %v2876_v48 }
 0x2b9   : > { %2274 = vadd.xlane.f32.xlu1 %v2273_v50 }
 0x2ba   : > { %2277 = vadd.xlane.f32.xlu0 %v2276_v52 }
 0x2bd   : > { %2280 = vadd.xlane.f32.xlu1 %v2279_v53 }
 0x2be   : > { %2181 = vmax.xlane.f32.xlu0 %v2180_v51 }
 0x2c1   : > { %2184 = vmax.xlane.f32.xlu1 %v2183_v54 }
 0x2c2   : > { %2283 = vadd.xlane.f32.xlu0 %v2282_v55 }
 0x2c5   : > { %2286 = vadd.xlane.f32.xlu1 %v2285_v56 }
 0x2c6   : > { %2187 = vmax.xlane.f32.xlu0 %v2186_v57 }
 0x2c9   : > { %2190 = vmax.xlane.f32.xlu1 %v2189_v58 }
 0x2ca   : > { %2289 = vadd.xlane.f32.xlu0 %v2288_v59 }
 0x2cd   : > { %2292 = vadd.xlane.f32.xlu1 %v2291_v60 }
 0x2ce   : > { %2193 = vmax.xlane.f32.xlu0 %v2192_v61 }
 0x2d1   : > { %2196 = vmax.xlane.f32.xlu1 %v2195_v62 }
 0x2df   : > { %v2200_v63 = vpop.xlane.xlu0 %2199 }
 0x2e0   : > { %v2295_v0 = vmul.f32 0.25, %v2200_v63 }
 0x2e2   : > { %v2104_v1 = vpop.xlane.xlu1 %2103 }
 0x2e3   : > { %v2328_v2 = vsel %vm2327_vm4, %v2104_v1, %v2295_v0  ;;  %v2107_v3 = vpop.xlane.xlu0 %2106 }
 0x2e4   : > { %v2877_v4 = vpack.c.bf16 %v2328_v2, %v2328_v2 }
 0x2e6   : > { %2489 = vst.msk [vmem:[%s4027_s27] sm:$0xf] %vm2488_vm5, %v2877_v4  ;;  %v2203_v5 = vpop.xlane.xlu1 %2202 }
 0x2e7   : > { %v2296_v6 = vmul.f32 0.25, %v2203_v5  ;;  %v2110_v7 = vpop.xlane.xlu0 %2109 }
 0x2e9   : > { %v2329_v8 = vsel %vm2327_vm4, %v2107_v3, %v2296_v6 }
 0x2ea   : > { %v2878_v9 = vpack.c.bf16 %v2329_v8, %v2329_v8  ;;  %v2113_v10 = vpop.xlane.xlu1 %2112 }
 0x2eb   : > { %v2206_v11 = vpop.xlane.xlu0 %2205 }
 0x2ec   : > { %2490 = vst.msk [vmem:[%s4027_s27 + $0x4] sm:$0xf] %vm2488_vm5, %v2878_v9  ;;  %v2297_v12 = vmul.f32 0.25, %v2206_v11 }
 0x2ee   : > { %v2330_v13 = vsel %vm2327_vm4, %v2110_v7, %v2297_v12  ;;  %v2209_v14 = vpop.xlane.xlu1 %2208 }
 0x2ef   : > { %v2879_v15 = vpack.c.bf16 %v2330_v13, %v2330_v13  ;;  %v2298_v16 = vmul.f32 0.25, %v2209_v14  ;;  %v2116_v17 = vpop.xlane.xlu0 %2115 }
 0x2f1   : > { %2491 = vst.msk [vmem:[%s4027_s27 + $0x8] sm:$0xf] %vm2488_vm5, %v2879_v15  ;;  %v2331_v18 = vsel %vm2327_vm4, %v2113_v10, %v2298_v16 }
 0x2f2   : > { %v2880_v19 = vpack.c.bf16 %v2331_v18, %v2331_v18  ;;  %v2119_v20 = vpop.xlane.xlu1 %2118 }
 0x2f3   : > { %v2212_v21 = vpop.xlane.xlu0 %2211 }
 0x2f4   : > { %2492 = vst.msk [vmem:[%s4027_s27 + $0xc] sm:$0xf] %vm2488_vm5, %v2880_v19  ;;  %v2299_v22 = vmul.f32 0.25, %v2212_v21 }
 0x2f6   : > { %v2332_v23 = vsel %vm2327_vm4, %v2116_v17, %v2299_v22  ;;  %v2215_v24 = vpop.xlane.xlu1 %2214 }
 0x2f7   : > { %v2881_v25 = vpack.c.bf16 %v2332_v23, %v2332_v23  ;;  %v2300_v26 = vmul.f32 0.25, %v2215_v24  ;;  %v2122_v27 = vpop.xlane.xlu0 %2121 }
 0x2f9   : > { %2493 = vst.msk [vmem:[%s4027_s27 + $0x10] sm:$0xf] %vm2488_vm5, %v2881_v25  ;;  %v2333_v28 = vsel %vm2327_vm4, %v2119_v20, %v2300_v26 }
 0x2fa   : > { %v2882_v29 = vpack.c.bf16 %v2333_v28, %v2333_v28  ;;  %v2125_v30 = vpop.xlane.xlu1 %2124 }
 0x2fb   : > { %v2218_v31 = vpop.xlane.xlu0 %2217 }
 0x2fc   : > { %2494 = vst.msk [vmem:[%s4027_s27 + $0x14] sm:$0xf] %vm2488_vm5, %v2882_v29  ;;  %v2301_v32 = vmul.f32 0.25, %v2218_v31 }
 0x2fe   : > { %v2334_v33 = vsel %vm2327_vm4, %v2122_v27, %v2301_v32  ;;  %v2221_v34 = vpop.xlane.xlu1 %2220 }
 0x2ff   : > { %v2883_v35 = vpack.c.bf16 %v2334_v33, %v2334_v33  ;;  %v2302_v36 = vmul.f32 0.25, %v2221_v34  ;;  %v2128_v38 = vpop.xlane.xlu0 %2127 }
 0x301   : > { %2495 = vst.msk [vmem:[%s4027_s27 + $0x18] sm:$0xf] %vm2488_vm5, %v2883_v35  ;;  %v2335_v39 = vsel %vm2327_vm4, %v2125_v30, %v2302_v36 }
 0x302   : > { %v2884_v40 = vpack.c.bf16 %v2335_v39, %v2335_v39  ;;  %v2131_v45 = vpop.xlane.xlu1 %2130 }
 0x303   : > { %v2224_v41 = vpop.xlane.xlu0 %2223 }
 0x304   : > { %2496 = vst.msk [vmem:[%s4027_s27 + $0x1c] sm:$0xf] %vm2488_vm5, %v2884_v40  ;;  %v2303_v42 = vmul.f32 0.25, %v2224_v41 }
 0x306   : > { %v2336_v43 = vsel %vm2327_vm4, %v2128_v38, %v2303_v42  ;;  %v2227_v44 = vpop.xlane.xlu1 %2226 }
 0x307   : > { %v2885_v37 = vpack.c.bf16 %v2336_v43, %v2336_v43  ;;  %v2304_v46 = vmul.f32 0.25, %v2227_v44  ;;  %v2134_v47 = vpop.xlane.xlu0 %2133 }
 0x309   : > { %2497 = vst.msk [vmem:[%s4027_s27 + $0x20] sm:$0xf] %vm2488_vm5, %v2885_v37  ;;  %v2337_v48 = vsel %vm2327_vm4, %v2131_v45, %v2304_v46 }
 0x30a   : > { %v2886_v49 = vpack.c.bf16 %v2337_v48, %v2337_v48  ;;  %v2137_v50 = vpop.xlane.xlu1 %2136 }
 0x30b   : > { %v2230_v52 = vpop.xlane.xlu0 %2229 }
 0x30c   : > { %2498 = vst.msk [vmem:[%s4027_s27 + $0x24] sm:$0xf] %vm2488_vm5, %v2886_v49  ;;  %v2305_v53 = vmul.f32 0.25, %v2230_v52 }
 0x30e   : > { %v2338_v51 = vsel %vm2327_vm4, %v2134_v47, %v2305_v53  ;;  %v2233_v54 = vpop.xlane.xlu1 %2232 }
 0x30f   : > { %v2887_v55 = vpack.c.bf16 %v2338_v51, %v2338_v51  ;;  %v2306_v56 = vmul.f32 0.25, %v2233_v54  ;;  %v2140_v57 = vpop.xlane.xlu0 %2139 }
 0x311   : > { %2499 = vst.msk [vmem:[%s4027_s27 + $0x28] sm:$0xf] %vm2488_vm5, %v2887_v55  ;;  %v2339_v58 = vsel %vm2327_vm4, %v2137_v50, %v2306_v56 }
 0x312   : > { %v2888_v59 = vpack.c.bf16 %v2339_v58, %v2339_v58  ;;  %v2143_v60 = vpop.xlane.xlu1 %2142 }
 0x313   : > { %v2236_v61 = vpop.xlane.xlu0 %2235 }
 0x314   : > { %2500 = vst.msk [vmem:[%s4027_s27 + $0x2c] sm:$0xf] %vm2488_vm5, %v2888_v59  ;;  %v2307_v62 = vmul.f32 0.25, %v2236_v61 }
 0x316   : > { %v2340_v63 = vsel %vm2327_vm4, %v2140_v57, %v2307_v62  ;;  %v2239_v0 = vpop.xlane.xlu1 %2238 }
 0x317   : > { %v2889_v1 = vpack.c.bf16 %v2340_v63, %v2340_v63  ;;  %v2308_v2 = vmul.f32 0.25, %v2239_v0  ;;  %v2146_v3 = vpop.xlane.xlu0 %2145 }
 0x319   : > { %2501 = vst.msk [vmem:[%s4027_s27 + $0x30] sm:$0xf] %vm2488_vm5, %v2889_v1  ;;  %v2341_v4 = vsel %vm2327_vm4, %v2143_v60, %v2308_v2 }
 0x31a   : > { %v2890_v5 = vpack.c.bf16 %v2341_v4, %v2341_v4  ;;  %v2149_v6 = vpop.xlane.xlu1 %2148 }
 0x31b   : > { %v2242_v7 = vpop.xlane.xlu0 %2241 }
 0x31c   : > { %2502 = vst.msk [vmem:[%s4027_s27 + $0x34] sm:$0xf] %vm2488_vm5, %v2890_v5  ;;  %v2309_v8 = vmul.f32 0.25, %v2242_v7 }
 0x31e   : > { %v2342_v9 = vsel %vm2327_vm4, %v2146_v3, %v2309_v8  ;;  %v2245_v10 = vpop.xlane.xlu1 %2244 }
 0x31f   : > { %v2891_v11 = vpack.c.bf16 %v2342_v9, %v2342_v9  ;;  %v2310_v12 = vmul.f32 0.25, %v2245_v10  ;;  %v2152_v13 = vpop.xlane.xlu0 %2151 }
 0x321   : > { %2503 = vst.msk [vmem:[%s4027_s27 + $0x38] sm:$0xf] %vm2488_vm5, %v2891_v11  ;;  %v2343_v14 = vsel %vm2327_vm4, %v2149_v6, %v2310_v12 }
 0x322   : > { %v2892_v15 = vpack.c.bf16 %v2343_v14, %v2343_v14  ;;  %v2155_v16 = vpop.xlane.xlu1 %2154 }
 0x323   : > { %v2248_v17 = vpop.xlane.xlu0 %2247 }
 0x324   : > { %2504 = vst.msk [vmem:[%s4027_s27 + $0x3c] sm:$0xf] %vm2488_vm5, %v2892_v15  ;;  %v2311_v18 = vmul.f32 0.25, %v2248_v17 }
 0x326   : > { %v2344_v19 = vsel %vm2327_vm4, %v2152_v13, %v2311_v18  ;;  %v2251_v20 = vpop.xlane.xlu1 %2250 }
 0x327   : > { %v2893_v21 = vpack.c.bf16 %v2344_v19, %v2344_v19  ;;  %v2312_v22 = vmul.f32 0.25, %v2251_v20  ;;  %v2158_v23 = vpop.xlane.xlu0 %2157 }
 0x329   : > { %2505 = vst.msk [vmem:[%s4027_s27 + $0x40] sm:$0xf] %vm2488_vm5, %v2893_v21  ;;  %v2345_v24 = vsel %vm2327_vm4, %v2155_v16, %v2312_v22 }
 0x32a   : > { %v2894_v25 = vpack.c.bf16 %v2345_v24, %v2345_v24  ;;  %v2161_v26 = vpop.xlane.xlu1 %2160 }
 0x32b   : > { %v2254_v27 = vpop.xlane.xlu0 %2253 }
 0x32c   : > { %2506 = vst.msk [vmem:[%s4027_s27 + $0x44] sm:$0xf] %vm2488_vm5, %v2894_v25  ;;  %v2313_v28 = vmul.f32 0.25, %v2254_v27 }
 0x32e   : > { %v2346_v29 = vsel %vm2327_vm4, %v2158_v23, %v2313_v28  ;;  %v2257_v30 = vpop.xlane.xlu1 %2256 }
 0x32f   : > { %v2895_v31 = vpack.c.bf16 %v2346_v29, %v2346_v29  ;;  %v2314_v32 = vmul.f32 0.25, %v2257_v30  ;;  %v2164_v33 = vpop.xlane.xlu0 %2163 }
 0x331   : > { %2507 = vst.msk [vmem:[%s4027_s27 + $0x48] sm:$0xf] %vm2488_vm5, %v2895_v31  ;;  %v2347_v34 = vsel %vm2327_vm4, %v2161_v26, %v2314_v32 }
 0x332   : > { %v2896_v35 = vpack.c.bf16 %v2347_v34, %v2347_v34  ;;  %v2167_v36 = vpop.xlane.xlu1 %2166 }
 0x333   : > { %v2260_v38 = vpop.xlane.xlu0 %2259 }
 0x334   : > { %2508 = vst.msk [vmem:[%s4027_s27 + $0x4c] sm:$0xf] %vm2488_vm5, %v2896_v35  ;;  %v2315_v39 = vmul.f32 0.25, %v2260_v38 }
 0x336   : > { %v2348_v40 = vsel %vm2327_vm4, %v2164_v33, %v2315_v39  ;;  %v2263_v45 = vpop.xlane.xlu1 %2262 }
 0x337   : > { %v2897_v41 = vpack.c.bf16 %v2348_v40, %v2348_v40  ;;  %v2316_v42 = vmul.f32 0.25, %v2263_v45  ;;  %v2170_v43 = vpop.xlane.xlu0 %2169 }
 0x339   : > { %2509 = vst.msk [vmem:[%s4027_s27 + $0x50] sm:$0xf] %vm2488_vm5, %v2897_v41  ;;  %v2349_v44 = vsel %vm2327_vm4, %v2167_v36, %v2316_v42 }
 0x33a   : > { %v2898_v37 = vpack.c.bf16 %v2349_v44, %v2349_v44  ;;  %v2173_v46 = vpop.xlane.xlu1 %2172 }
 0x33b   : > { %v2266_v47 = vpop.xlane.xlu0 %2265 }
 0x33c   : > { %2510 = vst.msk [vmem:[%s4027_s27 + $0x54] sm:$0xf] %vm2488_vm5, %v2898_v37  ;;  %v2317_v48 = vmul.f32 0.25, %v2266_v47 }
 0x33e   : > { %v2350_v49 = vsel %vm2327_vm4, %v2170_v43, %v2317_v48  ;;  %v2269_v50 = vpop.xlane.xlu1 %2268 }
 0x33f   : > { %v2899_v52 = vpack.c.bf16 %v2350_v49, %v2350_v49  ;;  %v2318_v53 = vmul.f32 0.25, %v2269_v50  ;;  %v2176_v51 = vpop.xlane.xlu0 %2175 }
 0x341   : > { %2511 = vst.msk [vmem:[%s4027_s27 + $0x58] sm:$0xf] %vm2488_vm5, %v2899_v52  ;;  %v2351_v54 = vsel %vm2327_vm4, %v2173_v46, %v2318_v53 }
 0x342   : > { %v2900_v55 = vpack.c.bf16 %v2351_v54, %v2351_v54  ;;  %v2179_v56 = vpop.xlane.xlu1 %2178 }
 0x343   : > { %v2272_v57 = vpop.xlane.xlu0 %2271 }
 0x344   : > { %2512 = vst.msk [vmem:[%s4027_s27 + $0x5c] sm:$0xf] %vm2488_vm5, %v2900_v55  ;;  %v2319_v58 = vmul.f32 0.25, %v2272_v57 }
 0x346   : > { %v2352_v59 = vsel %vm2327_vm4, %v2176_v51, %v2319_v58  ;;  %v2275_v60 = vpop.xlane.xlu1 %2274 }
 0x347   : > { %v2901_v61 = vpack.c.bf16 %v2352_v59, %v2352_v59  ;;  %v2320_v62 = vmul.f32 0.25, %v2275_v60  ;;  %v2278_v63 = vpop.xlane.xlu0 %2277 }
 0x348   : > { %v2321_v2 = vmul.f32 0.25, %v2278_v63 }
 0x349   : > { %2513 = vst.msk [vmem:[%s4027_s27 + $0x60] sm:$0xf] %vm2488_vm5, %v2901_v61  ;;  %v2353_v0 = vsel %vm2327_vm4, %v2179_v56, %v2320_v62 }
 0x34a   : > { %v2902_v1 = vpack.c.bf16 %v2353_v0, %v2353_v0  ;;  %v2281_v3 = vpop.xlane.xlu1 %2280 }
 0x34b   : > { %v2182_v4 = vpop.xlane.xlu0 %2181  ;;  %v2322_v6 = vmul.f32 0.25, %v2281_v3 }
 0x34c   : > { %2514 = vst.msk [vmem:[%s4027_s27 + $0x64] sm:$0xf] %vm2488_vm5, %v2902_v1  ;;  %v2354_v5 = vsel %vm2327_vm4, %v2182_v4, %v2321_v2 }
 0x34d   : > { %v2903_v7 = vpack.c.bf16 %v2354_v5, %v2354_v5 }
 0x34e   : > { %v2185_v8 = vpop.xlane.xlu1 %2184 }
 0x34f   : > { %2515 = vst.msk [vmem:[%s4027_s27 + $0x68] sm:$0xf] %vm2488_vm5, %v2903_v7  ;;  %v2355_v9 = vsel %vm2327_vm4, %v2185_v8, %v2322_v6  ;;  %v2284_v10 = vpop.xlane.xlu0 %2283 }
 0x350   : > { %v2904_v11 = vpack.c.bf16 %v2355_v9, %v2355_v9  ;;  %v2323_v12 = vmul.f32 0.25, %v2284_v10 }
 0x352   : > { %2516 = vst.msk [vmem:[%s4027_s27 + $0x6c] sm:$0xf] %vm2488_vm5, %v2904_v11  ;;  %v2287_v13 = vpop.xlane.xlu1 %2286 }
 0x353   : > { %v2188_v14 = vpop.xlane.xlu0 %2187  ;;  %v2324_v16 = vmul.f32 0.25, %v2287_v13 }
 0x354   : > { %v2356_v15 = vsel %vm2327_vm4, %v2188_v14, %v2323_v12 }
 0x355   : > { %v2905_v17 = vpack.c.bf16 %v2356_v15, %v2356_v15 }
 0x356   : > { %v2191_v18 = vpop.xlane.xlu1 %2190 }
 0x357   : > { %2517 = vst.msk [vmem:[%s4027_s27 + $0x70] sm:$0xf] %vm2488_vm5, %v2905_v17  ;;  %v2357_v19 = vsel %vm2327_vm4, %v2191_v18, %v2324_v16  ;;  %v2290_v20 = vpop.xlane.xlu0 %2289 }
 0x358   : > { %v2906_v21 = vpack.c.bf16 %v2357_v19, %v2357_v19  ;;  %v2325_v22 = vmul.f32 0.25, %v2290_v20 }
 0x35a   : > { %2518 = vst.msk [vmem:[%s4027_s27 + $0x74] sm:$0xf] %vm2488_vm5, %v2906_v21  ;;  %v2293_v23 = vpop.xlane.xlu1 %2292 }
 0x35b   : > { %v2194_v24 = vpop.xlane.xlu0 %2193  ;;  %v2326_v26 = vmul.f32 0.25, %v2293_v23 }
 0x35c   : > { %v2358_v25 = vsel %vm2327_vm4, %v2194_v24, %v2325_v22 }
 0x35d   : > { %v2907_v27 = vpack.c.bf16 %v2358_v25, %v2358_v25 }
 0x35e   : > { %v2197_v28 = vpop.xlane.xlu1 %2196 }
 0x35f   : > { %2519 = vst.msk [vmem:[%s4027_s27 + $0x78] sm:$0xf] %vm2488_vm5, %v2907_v27  ;;  %v2359_v29 = vsel %vm2327_vm4, %v2197_v28, %v2326_v26 }
 0x360   : > { %v2908_v30 = vpack.c.bf16 %v2359_v29, %v2359_v29 }
 0x362   : > { %2520 = vst.msk [vmem:[%s4027_s27 + $0x7c] sm:$0xf] %vm2488_vm5, %v2908_v30 }
 0x363 PF: > { %s20_s26 = sadd.s32 1, %s3368_s26  }
 0x364   : > { %p17_p4 = scmp.ge.s32.totalorder %s20_s26, 4  }
 0x366   :  { %19 = sbr.rel (!%p17_p4) target bundleno = 3 (0x3), region = 89 }

// kernel: forward.41
= control target key start
LH: loop header
LB: loop body
LE: loop exit
PB: predicated region body
PF: predicated region fallthrough
CT: control target
= control target key end

     0   :  { %s1584_s17 = smov 0   ;;  %s1814_s0 = inlined_call_operand.vmem [shape: bf16[512,98], index: 0, kind: input, shape index: {}]   ;;  %s1815_s1 = inlined_call_operand.vmem [shape: bf16[1,98], index: 1, kind: input, shape index: {}]   ;;  %s1816_s2 = inlined_call_operand.<no memory space> [shape: f32[1,1], index: 2, kind: input, shape index: {}]   ;;  %s1817_s3 = inlined_call_operand.vmem [shape: bf16[512,4], index: 3, kind: input, shape index: {}]   ;;  %s1818_s4 = inlined_call_operand.vmem [shape: bf16[512,4], index: 4, kind: output, shape index: {}]  }
   0x1   :  { %v9_v0 = vstv %s1816_s2 }
   0x2   :  { %10 = vst [vmem:[#allocation2] sm:$0x1] %v9_v0 }
   0x3 LB: > { %s1140_s18 = sadd.s32 4294967295, %s1553_s17   ;;  %p1144_p0 = scmp.ge.s32.totalorder %s1553_s17, 1  ;;  %s1553_s17 = sphi %s1584_s17, %s16_s17  }
   0x4   : > { %p176_p1 = scmp.lt.s32.totalorder %s1553_s17, 3 }
   0x6   : > { %p177_p2 = pnand %p1144_p0, %p176_p1 }
   0x7   : > { %s1145_s19 = sshll.u32 (!%p177_p2), %s1140_s18, 5  ;;  %v289_v1 = vld [vmem:[%s1815_s1] sm:$0x1] (!%p177_p2)  ;;  %v291_v2 = vlaneseq (!%p177_p2)  ;;  %vm327_vm0 = vcmask (!%p177_p2), 801792   ;;  %vm1039_vm1 = vcmask (!%p177_p2), 27648  }
   0x8   : > { %180 = sbr.rel (%p177_p2) target bundleno = 404 (0x194), region = 36  ;;  %p208_p3 = scmp.lt.s32.totalorder (!%p177_p2), %s1145_s19, 63  ;;  %v290_v3 = vunpack.c.l.bf16 (!%p177_p2), %v289_v1 }
   0x9   : > { %v292_v4 = vshrl.u32 (!%p177_p2), %v291_v2, 7 }
   0xb   : > { %v293_v5 = vsub.s32 (!%p177_p2), 0, %v292_v4 }
   0xd   : > { %v1603_v6 = vrot.slane (!%p177_p2), %v290_v3, %v293_v5 }
   0xf   : > { %s1820_s19 = smov (!%p208_p3, %s1145_s19), 63 }
  0x10   : > { %s1595_s2 = sshll.u32 %s1820_s19, 2 }
  0x11   : > { %s1601_s24 = scalar_lea.vmem %s1814_s0, %s1595_s2  ;;  %s1723_s27 = scalar_lea.vmem %s1817_s3, %s1595_s2 }
  0x12   : > { %v1378_v7 = vld [vmem:[%s1601_s24 + $0x8] sm:$0xff]   ;;  %v1251_v8 = vld [vmem:[%s1601_s24] sm:$0xff]   ;;  %v1379_v9 = vld [vmem:[%s1601_s24 + $0x10] sm:$0xff]   ;;  %s1730_s30 = scalar_lea.vmem %s1818_s4, %s1595_s2 }
  0x13   : > { %v1256_v10 = vunpack.c.l.bf16 %v1378_v7  ;;  %v1252_v11 = vunpack.c.l.bf16 %v1251_v8  ;;  %v1257_v12 = vunpack.c.h.bf16 %v1378_v7  ;;  %v1253_v13 = vunpack.c.h.bf16 %v1251_v8  ;;  %v1380_v20 = vld [vmem:[%s1601_s24 + $0x18] sm:$0xff]   ;;  %v1381_v27 = vld [vmem:[%s1601_s24 + $0x20] sm:$0xff]   ;;  %v1382_v36 = vld [vmem:[%s1601_s24 + $0x28] sm:$0xff]  }
  0x14   : > { %v1261_v14 = vunpack.c.h.bf16 %v1379_v9  ;;  %v1260_v15 = vunpack.c.l.bf16 %v1379_v9  ;;  %v1265_v24 = vunpack.c.h.bf16 %v1380_v20  ;;  %v1264_v29 = vunpack.c.l.bf16 %v1380_v20  ;;  %v1383_v40 = vld [vmem:[%s1601_s24 + $0x30] sm:$0xff]   ;;  %v1384_v47 = vld [vmem:[%s1601_s24 + $0x38] sm:$0xff]   ;;  %v1385_v54 = vld [vmem:[%s1601_s24 + $0x40] sm:$0xff]  }
  0x15   : > { %v297_v16 = vmul.f32 %v1256_v10, %v1603_v6  ;;  %v295_v17 = vmul.f32 %v1252_v11, %v1603_v6  ;;  %v298_v18 = vmul.f32 %v1257_v12, %v1603_v6  ;;  %v296_v19 = vmul.f32 %v1253_v13, %v1603_v6  ;;  %v1386_v61 = vld [vmem:[%s1601_s24 + $0x48] sm:$0xff]   ;;  %v1387_v4 = vld [vmem:[%s1601_s24 + $0x50] sm:$0xff]   ;;  %v1388_v12 = vld [vmem:[%s1601_s24 + $0x58] sm:$0xff]  }
  0x16   : > { %v300_v23 = vmul.f32 %v1261_v14, %v1603_v6  ;;  %v299_v28 = vmul.f32 %v1260_v15, %v1603_v6  ;;  %v302_v30 = vmul.f32 %v1265_v24, %v1603_v6  ;;  %v1269_v31 = vunpack.c.h.bf16 %v1381_v27 }
  0x17   : > { %v334_v21 = vsel %vm327_vm0, %v297_v16, 0.0  ;;  %v328_v22 = vsel %vm327_vm0, %v295_v17, 0.0  ;;  %v337_v25 = vsel %vm327_vm0, %v298_v18, 0.0  ;;  %v331_v26 = vsel %vm327_vm0, %v296_v19, 0.0  ;;  %v1389_v19 = vld [vmem:[%s1601_s24 + $0x60] sm:$0xff]  }
  0x18   : > { %335 = vadd.xlane.f32.xlu1 %v334_v21  ;;  %329 = vadd.xlane.f32.xlu0 %v328_v22  ;;  %v343_v32 = vsel %vm327_vm0, %v300_v23, 0.0  ;;  %v340_v33 = vsel %vm327_vm0, %v299_v28, 0.0  ;;  %v301_v34 = vmul.f32 %v1264_v29, %v1603_v6  ;;  %v1268_v35 = vunpack.c.l.bf16 %v1381_v27 }
  0x19   : > { %v349_v37 = vsel %vm327_vm0, %v302_v30, 0.0  ;;  %v304_v38 = vmul.f32 %v1269_v31, %v1603_v6  ;;  %v1273_v39 = vunpack.c.h.bf16 %v1382_v36  ;;  %v1272_v43 = vunpack.c.l.bf16 %v1382_v36 }
  0x1a   : > { %v346_v41 = vsel %vm327_vm0, %v301_v34, 0.0  ;;  %v303_v42 = vmul.f32 %v1268_v35, %v1603_v6  ;;  %v1277_v45 = vunpack.c.h.bf16 %v1383_v40  ;;  %v1276_v50 = vunpack.c.l.bf16 %v1383_v40 }
  0x1b   : > { %v355_v44 = vsel %vm327_vm0, %v304_v38, 0.0  ;;  %v306_v46 = vmul.f32 %v1273_v39, %v1603_v6  ;;  %v305_v49 = vmul.f32 %v1272_v43, %v1603_v6  ;;  %v1281_v52 = vunpack.c.h.bf16 %v1384_v47 }
  0x1c   : > { %338 = vadd.xlane.f32.xlu1 %v337_v25  ;;  %332 = vadd.xlane.f32.xlu0 %v331_v26  ;;  %v352_v48 = vsel %vm327_vm0, %v303_v42, 0.0  ;;  %v308_v51 = vmul.f32 %v1277_v45, %v1603_v6  ;;  %v307_v56 = vmul.f32 %v1276_v50, %v1603_v6  ;;  %v1280_v57 = vunpack.c.l.bf16 %v1384_v47  ;;  %v1390_v26 = vld [vmem:[%s1601_s24 + $0x68] sm:$0xff]  }
  0x1d   : > { %v361_v53 = vsel %vm327_vm0, %v306_v46, 0.0  ;;  %v358_v55 = vsel %vm327_vm0, %v305_v49, 0.0  ;;  %v310_v58 = vmul.f32 %v1281_v52, %v1603_v6  ;;  %v1285_v59 = vunpack.c.h.bf16 %v1385_v54 }
  0x1e   : > { %v367_v60 = vsel %vm327_vm0, %v308_v51, 0.0  ;;  %v364_v62 = vsel %vm327_vm0, %v307_v56, 0.0  ;;  %v309_v63 = vmul.f32 %v1280_v57, %v1603_v6  ;;  %v1284_v0 = vunpack.c.l.bf16 %v1385_v54  ;;  %v1685_v57 = vld [vmem:[#allocation2] ss:$0 sm:$0xff] }
  0x1f   : > { %v312_v1 = vmul.f32 %v1285_v59, %v1603_v6  ;;  %v1289_v2 = vunpack.c.h.bf16 %v1386_v61  ;;  %v373_v3 = vsel %vm327_vm0, %v310_v58, 0.0  ;;  %v1288_v8 = vunpack.c.l.bf16 %v1386_v61 }
  0x20   : > { %344 = vadd.xlane.f32.xlu1 %v343_v32  ;;  %341 = vadd.xlane.f32.xlu0 %v340_v33  ;;  %v370_v5 = vsel %vm327_vm0, %v309_v63, 0.0  ;;  %v311_v7 = vmul.f32 %v1284_v0, %v1603_v6  ;;  %v1293_v10 = vunpack.c.h.bf16 %v1387_v4  ;;  %v1292_v15 = vunpack.c.l.bf16 %v1387_v4  ;;  %v1391_v33 = vld [vmem:[%s1601_s24 + $0x70] sm:$0xff]  }
  0x21   : > { %v314_v9 = vmul.f32 %v1289_v2, %v1603_v6  ;;  %v379_v11 = vsel %vm327_vm0, %v312_v1, 0.0  ;;  %v313_v14 = vmul.f32 %v1288_v8, %v1603_v6  ;;  %v1297_v17 = vunpack.c.h.bf16 %v1388_v12 }
  0x22   : > { %v376_v13 = vsel %vm327_vm0, %v311_v7, 0.0  ;;  %v316_v18 = vmul.f32 %v1293_v10, %v1603_v6  ;;  %v315_v21 = vmul.f32 %v1292_v15, %v1603_v6  ;;  %v1296_v22 = vunpack.c.l.bf16 %v1388_v12 }
  0x23   : > { %v385_v16 = vsel %vm327_vm0, %v314_v9, 0.0  ;;  %v382_v20 = vsel %vm327_vm0, %v313_v14, 0.0  ;;  %v318_v23 = vmul.f32 %v1297_v17, %v1603_v6  ;;  %v1301_v24 = vunpack.c.h.bf16 %v1389_v19 }
  0x24   : > { %350 = vadd.xlane.f32.xlu1 %v349_v37  ;;  %347 = vadd.xlane.f32.xlu0 %v346_v41  ;;  %v391_v25 = vsel %vm327_vm0, %v316_v18, 0.0  ;;  %v388_v27 = vsel %vm327_vm0, %v315_v21, 0.0  ;;  %v317_v28 = vmul.f32 %v1296_v22, %v1603_v6  ;;  %v1300_v29 = vunpack.c.l.bf16 %v1389_v19 }
  0x25   : > { %v397_v30 = vsel %vm327_vm0, %v318_v23, 0.0  ;;  %v320_v31 = vmul.f32 %v1301_v24, %v1603_v6  ;;  %v1305_v32 = vunpack.c.h.bf16 %v1390_v26  ;;  %v1304_v36 = vunpack.c.l.bf16 %v1390_v26 }
  0x26   : > { %v394_v34 = vsel %vm327_vm0, %v317_v28, 0.0  ;;  %v319_v35 = vmul.f32 %v1300_v29, %v1603_v6  ;;  %v1555_v37 = vmov 0   ;;  %v1309_v39 = vunpack.c.h.bf16 %v1391_v33 }
  0x27   : > { %1417 = vset.pattern.permute.xlu0 %v1555_v37  ;;  %1418 = vset.pattern.permute.xlu1 %v1555_v37  ;;  %v322_v38 = vmul.f32 %v1305_v32, %v1603_v6  ;;  %v403_v40 = vsel %vm327_vm0, %v320_v31, 0.0  ;;  %v321_v42 = vmul.f32 %v1304_v36, %v1603_v6  ;;  %v1308_v43 = vunpack.c.l.bf16 %v1391_v33 }
  0x28   : > { %356 = vadd.xlane.f32.xlu1 %v355_v44  ;;  %353 = vadd.xlane.f32.xlu0 %v352_v48  ;;  %v400_v41 = vsel %vm327_vm0, %v319_v35, 0.0  ;;  %v1392_v44 = vld [vmem:[%s1601_s24 + $0x78] sm:$0xff]   ;;  %v324_v46 = vmul.f32 %v1309_v39, %v1603_v6 }
  0x29   : > { %v409_v45 = vsel %vm327_vm0, %v322_v38, 0.0  ;;  %v1313_v47 = vunpack.c.h.bf16 %v1392_v44  ;;  %v406_v48 = vsel %vm327_vm0, %v321_v42, 0.0  ;;  %v323_v49 = vmul.f32 %v1308_v43, %v1603_v6 }
  0x2a   : > { %v1312_v50 = vunpack.c.l.bf16 %v1392_v44  ;;  %v415_v51 = vsel %vm327_vm0, %v324_v46, 0.0 }
  0x2b   : > { %v326_v52 = vmul.f32 %v1313_v47, %v1603_v6 }
  0x2c   : > { %362 = vadd.xlane.f32.xlu1 %v361_v53  ;;  %359 = vadd.xlane.f32.xlu0 %v358_v55  ;;  %v412_v53 = vsel %vm327_vm0, %v323_v49, 0.0  ;;  %v325_v54 = vmul.f32 %v1312_v50, %v1603_v6 }
  0x2d   : > { %v421_v55 = vsel %vm327_vm0, %v326_v52, 0.0 }
  0x2e   : > { %v418_v56 = vsel %vm327_vm0, %v325_v54, 0.0 }
  0x30   : > { %368 = vadd.xlane.f32.xlu1 %v367_v60  ;;  %365 = vadd.xlane.f32.xlu0 %v364_v62 }
  0x34   : > { %374 = vadd.xlane.f32.xlu1 %v373_v3  ;;  %371 = vadd.xlane.f32.xlu0 %v370_v5 }
  0x38   : > { %380 = vadd.xlane.f32.xlu1 %v379_v11  ;;  %377 = vadd.xlane.f32.xlu0 %v376_v13 }
  0x3c   : > { %386 = vadd.xlane.f32.xlu1 %v385_v16  ;;  %383 = vadd.xlane.f32.xlu0 %v382_v20 }
  0x40   : > { %392 = vadd.xlane.f32.xlu1 %v391_v25  ;;  %389 = vadd.xlane.f32.xlu0 %v388_v27 }
  0x44   : > { %398 = vadd.xlane.f32.xlu1 %v397_v30  ;;  %395 = vadd.xlane.f32.xlu0 %v394_v34 }
  0x48   : > { %404 = vadd.xlane.f32.xlu1 %v403_v40  ;;  %401 = vadd.xlane.f32.xlu0 %v400_v41 }
  0x4c   : > { %410 = vadd.xlane.f32.xlu1 %v409_v45  ;;  %407 = vadd.xlane.f32.xlu0 %v406_v48 }
  0x50   : > { %416 = vadd.xlane.f32.xlu1 %v415_v51  ;;  %413 = vadd.xlane.f32.xlu0 %v412_v53 }
  0x54   : > { %422 = vadd.xlane.f32.xlu1 %v421_v55  ;;  %419 = vadd.xlane.f32.xlu0 %v418_v56 }
  0xa5   : > { %v336_v58 = vpop.xlane.xlu1 %335  ;;  %v330_v59 = vpop.xlane.xlu0 %329 }
  0xa6   : > { %v433_v60 = vadd.f32 %v1685_v57, %v336_v58  ;;  %v431_v61 = vadd.f32 %v1685_v57, %v330_v59 }
  0xa8   : > { %v1154_v62 = vmul.f32 -1.442695, %v433_v60  ;;  %v1152_v63 = vmul.f32 -1.442695, %v431_v61 }
  0xa9   : > { %v339_v0 = vpop.xlane.xlu1 %338  ;;  %v333_v6 = vpop.xlane.xlu0 %332 }
  0xaa   : > { %v434_v1 = vadd.f32 %v1685_v57, %v339_v0  ;;  %v432_v2 = vadd.f32 %v1685_v57, %v333_v6  ;;  %1419 = vpow2.f32 %v1152_v63 }
  0xab   : > { %1421 = vpow2.f32 %v1154_v62 }
  0xac   : > { %v1155_v3 = vmul.f32 -1.442695, %v434_v1  ;;  %v1153_v4 = vmul.f32 -1.442695, %v432_v2 }
  0xad   : > { %v345_v5 = vpop.xlane.xlu1 %344  ;;  %v342_v7 = vpop.xlane.xlu0 %341 }
  0xae   : > { %v436_v8 = vadd.f32 %v1685_v57, %v345_v5  ;;  %v435_v9 = vadd.f32 %v1685_v57, %v342_v7  ;;  %1423 = vpow2.f32 %v1153_v4 }
  0xaf   : > { %1425 = vpow2.f32 %v1155_v3 }
  0xb0   : > { %v1157_v10 = vmul.f32 -1.442695, %v436_v8  ;;  %v1156_v11 = vmul.f32 -1.442695, %v435_v9 }
  0xb1   : > { %v351_v12 = vpop.xlane.xlu1 %350  ;;  %v348_v13 = vpop.xlane.xlu0 %347 }
  0xb2   : > { %1427 = vpow2.f32 %v1157_v10  ;;  %v437_v14 = vadd.f32 %v1685_v57, %v348_v13  ;;  %v438_v22 = vadd.f32 %v1685_v57, %v351_v12 }
  0xb3   : > { %1429 = vpow2.f32 %v1156_v11 }
  0xb4   : > { %v1420_v15 = vpop.eup %1419  ;;  %v1158_v21 = vmul.f32 -1.442695, %v437_v14  ;;  %v1159_v32 = vmul.f32 -1.442695, %v438_v22 }
  0xb5   : > { %v357_v16 = vpop.xlane.xlu1 %356  ;;  %v354_v17 = vpop.xlane.xlu0 %353  ;;  %v559_v19 = vadd.f32 1.0, %v1420_v15 }
  0xb6   : > { %v1422_v18 = vpop.eup %1421  ;;  %v440_v20 = vadd.f32 %v1685_v57, %v357_v16  ;;  %v439_v31 = vadd.f32 %v1685_v57, %v354_v17 }
  0xb7   : > { %1431 = vrcp.f32 %v559_v19  ;;  %v561_v25 = vadd.f32 1.0, %v1422_v18 }
  0xb8   : > { %v1161_v23 = vmul.f32 -1.442695, %v440_v20  ;;  %v1424_v24 = vpop.eup %1423  ;;  %v1160_v41 = vmul.f32 -1.442695, %v439_v31 }
  0xb9   : > { %v363_v26 = vpop.xlane.xlu1 %362  ;;  %v360_v27 = vpop.xlane.xlu0 %359  ;;  %v560_v29 = vadd.f32 1.0, %v1424_v24 }
  0xba   : > { %v1426_v28 = vpop.eup %1425  ;;  %1433 = vpow2.f32 %v1161_v23  ;;  %v442_v30 = vadd.f32 %v1685_v57, %v363_v26  ;;  %v441_v40 = vadd.f32 %v1685_v57, %v360_v27 }
  0xbb   : > { %1435 = vpow2.f32 %v1158_v21  ;;  %v562_v35 = vadd.f32 1.0, %v1426_v28 }
  0xbc   : > { %1437 = vrcp.f32 %v560_v29  ;;  %v1163_v33 = vmul.f32 -1.442695, %v442_v30  ;;  %v1428_v34 = vpop.eup %1427  ;;  %v1162_v50 = vmul.f32 -1.442695, %v441_v40 }
  0xbd   : > { %1439 = vrcp.f32 %v561_v25  ;;  %v369_v36 = vpop.xlane.xlu1 %368  ;;  %v366_v37 = vpop.xlane.xlu0 %365  ;;  %v564_v42 = vadd.f32 1.0, %v1428_v34 }
  0xbe   : > { %v1430_v38 = vpop.eup %1429  ;;  %1441 = vpow2.f32 %v1163_v33  ;;  %v444_v39 = vadd.f32 %v1685_v57, %v369_v36  ;;  %v443_v46 = vadd.f32 %v1685_v57, %v366_v37 }
  0xbf   : > { %1443 = vpow2.f32 %v1159_v32  ;;  %v563_v44 = vadd.f32 1.0, %v1430_v38 }
  0xc0   : > { %v1165_v43 = vmul.f32 -1.442695, %v444_v39  ;;  %1445 = vrcp.f32 %v562_v35  ;;  %v1164_v56 = vmul.f32 -1.442695, %v443_v46 }
  0xc1   : > { %v375_v45 = vpop.xlane.xlu1 %374  ;;  %v372_v47 = vpop.xlane.xlu0 %371 }
  0xc2   : > { %v1432_v48 = vpop.eup %1431  ;;  %1447 = vpow2.f32 %v1165_v43  ;;  %v446_v49 = vadd.f32 %v1685_v57, %v375_v45  ;;  %v445_v58 = vadd.f32 %v1685_v57, %v372_v47 }
  0xc3   : > { %721 = vperm.xlu0 %1417, %v1432_v48   ;;  %1449 = vpow2.f32 %v1160_v41 }
  0xc4   : > { %v1434_v51 = vpop.eup %1433  ;;  %1451 = vrcp.f32 %v564_v42  ;;  %v1167_v52 = vmul.f32 -1.442695, %v446_v49  ;;  %v1166_v3 = vmul.f32 -1.442695, %v445_v58 }
  0xc5   : > { %v1436_v53 = vpop.eup %1435  ;;  %v568_v54 = vadd.f32 1.0, %v1434_v51  ;;  %1453 = vrcp.f32 %v563_v44  ;;  %v381_v55 = vpop.xlane.xlu1 %380 }
  0xc6   : > { %v378_v59 = vpop.xlane.xlu0 %377  ;;  %v1438_v60 = vpop.eup %1437  ;;  %v448_v61 = vadd.f32 %v1685_v57, %v381_v55  ;;  %1455 = vpow2.f32 %v1162_v50  ;;  %v565_v0 = vadd.f32 1.0, %v1436_v53 }
  0xc7   : > { %v1440_v62 = vpop.eup %1439  ;;  %1457 = vrcp.f32 %v568_v54  ;;  %726 = vperm.xlu1 %1418, %v1438_v60   ;;  %v447_v9 = vadd.f32 %v1685_v57, %v378_v59 }
  0xc8   : > { %v1442_v63 = vpop.eup %1441  ;;  %1459 = vpow2.f32 %v1167_v52  ;;  %v1169_v6 = vmul.f32 -1.442695, %v448_v61 }
  0xc9   : > { %v570_v1 = vadd.f32 1.0, %v1442_v63  ;;  %v387_v2 = vpop.xlane.xlu1 %386  ;;  %1461 = vpow2.f32 %v1164_v56  ;;  %v1444_v5 = vpop.eup %1443  ;;  %v1168_v20 = vmul.f32 -1.442695, %v447_v9 }
  0xca   : > { %v384_v4 = vpop.xlane.xlu0 %383  ;;  %1463 = vpow2.f32 %v1169_v6  ;;  %v450_v7 = vadd.f32 %v1685_v57, %v387_v2  ;;  %v1446_v8 = vpop.eup %1445  ;;  %v566_v13 = vadd.f32 1.0, %v1444_v5 }
  0xcb   : > { %1465 = vrcp.f32 %v570_v1  ;;  %731 = vperm.xlu1 %1418, %v1440_v62   ;;  %v449_v26 = vadd.f32 %v1685_v57, %v384_v4 }
  0xcc   : > { %v1448_v10 = vpop.eup %1447  ;;  %1467 = vrcp.f32 %v565_v0  ;;  %v1171_v11 = vmul.f32 -1.442695, %v450_v7 }
  0xcd   : > { %v1450_v12 = vpop.eup %1449  ;;  %v572_v14 = vadd.f32 1.0, %v1448_v10  ;;  %v393_v15 = vpop.xlane.xlu1 %392  ;;  %1469 = vpow2.f32 %v1166_v3  ;;  %v1170_v38 = vmul.f32 -1.442695, %v449_v26 }
  0xce   : > { %v390_v16 = vpop.xlane.xlu0 %389  ;;  %v1452_v17 = vpop.eup %1451  ;;  %1471 = vpow2.f32 %v1171_v11  ;;  %v452_v18 = vadd.f32 %v1685_v57, %v393_v15  ;;  %v567_v22 = vadd.f32 1.0, %v1450_v12 }
  0xcf   : > { %v1454_v19 = vpop.eup %1453  ;;  %1473 = vrcp.f32 %v572_v14  ;;  %736 = vperm.xlu1 %1418, %v1446_v8   ;;  %v451_v39 = vadd.f32 %v1685_v57, %v390_v16 }
  0xd0   : > { %v1456_v21 = vpop.eup %1455  ;;  %v1173_v23 = vmul.f32 -1.442695, %v452_v18  ;;  %1475 = vrcp.f32 %v566_v13 }
  0xd1   : > { %v1458_v24 = vpop.eup %1457  ;;  %v399_v25 = vpop.xlane.xlu1 %398  ;;  %v569_v33 = vadd.f32 1.0, %v1456_v21  ;;  %v1172_v50 = vmul.f32 -1.442695, %v451_v39 }
  0xd2   : > { %v396_v27 = vpop.xlane.xlu0 %395  ;;  %v1460_v28 = vpop.eup %1459  ;;  %1477 = vpow2.f32 %v1173_v23  ;;  %v454_v29 = vadd.f32 %v1685_v57, %v399_v25  ;;  %766 = vperm.xlu0 %1417, %v1458_v24  }
  0xd3   : > { %v1462_v30 = vpop.eup %1461  ;;  %v574_v31 = vadd.f32 1.0, %v1460_v28  ;;  %741 = vperm.xlu1 %1418, %v1454_v19   ;;  %1479 = vpow2.f32 %v1168_v20  ;;  %v453_v51 = vadd.f32 %v1685_v57, %v396_v27 }
  0xd4   : > { %v1464_v32 = vpop.eup %1463  ;;  %1481 = vrcp.f32 %v567_v22  ;;  %v1175_v34 = vmul.f32 -1.442695, %v454_v29  ;;  %v571_v45 = vadd.f32 1.0, %v1462_v30 }
  0xd5   : > { %v1466_v35 = vpop.eup %1465  ;;  %1483 = vrcp.f32 %v574_v31  ;;  %v576_v36 = vadd.f32 1.0, %v1464_v32  ;;  %v405_v37 = vpop.xlane.xlu1 %404  ;;  %v1174_v62 = vmul.f32 -1.442695, %v453_v51 }
  0xd6   : > { %v402_v40 = vpop.xlane.xlu0 %401  ;;  %v1468_v41 = vpop.eup %1467  ;;  %1485 = vpow2.f32 %v1175_v34  ;;  %v456_v42 = vadd.f32 %v1685_v57, %v405_v37  ;;  %776 = vperm.xlu0 %1417, %v1466_v35  }
  0xd7   : > { %v1470_v43 = vpop.eup %1469  ;;  %1487 = vrcp.f32 %v576_v36  ;;  %746 = vperm.xlu1 %1418, %v1452_v17   ;;  %v455_v63 = vadd.f32 %v1685_v57, %v402_v40 }
  0xd8   : > { %v1472_v44 = vpop.eup %1471  ;;  %1489 = vrcp.f32 %v569_v33  ;;  %v1177_v46 = vmul.f32 -1.442695, %v456_v42  ;;  %v573_v56 = vadd.f32 1.0, %v1470_v43 }
  0xd9   : > { %v1474_v47 = vpop.eup %1473  ;;  %v578_v48 = vadd.f32 1.0, %v1472_v44  ;;  %v411_v49 = vpop.xlane.xlu1 %410  ;;  %1491 = vpow2.f32 %v1170_v38  ;;  %v1176_v10 = vmul.f32 -1.442695, %v455_v63 }
  0xda   : > { %1493 = vpow2.f32 %v1177_v46  ;;  %v458_v52 = vadd.f32 %v1685_v57, %v411_v49  ;;  %786 = vperm.xlu0 %1417, %v1474_v47   ;;  %v408_v53 = vpop.xlane.xlu0 %407  ;;  %v1476_v54 = vpop.eup %1475 }
  0xdb   : > { %1495 = vrcp.f32 %v578_v48  ;;  %751 = vperm.xlu1 %1418, %v1468_v41   ;;  %v457_v11 = vadd.f32 %v1685_v57, %v408_v53 }
  0xdc   : > { %v1478_v55 = vpop.eup %1477  ;;  %1497 = vrcp.f32 %v571_v45  ;;  %v1179_v58 = vmul.f32 -1.442695, %v458_v52 }
  0xdd   : > { %v1480_v59 = vpop.eup %1479  ;;  %v580_v60 = vadd.f32 1.0, %v1478_v55  ;;  %v417_v61 = vpop.xlane.xlu1 %416  ;;  %1499 = vpow2.f32 %v1172_v50  ;;  %v1178_v19 = vmul.f32 -1.442695, %v457_v11  ;;  %v1394_v11 = vld [vmem:[%s1723_s27 + $0x10] sm:$0xff]  }
  0xde   : > { %v1482_v0 = vpop.eup %1481  ;;  %1501 = vpow2.f32 %v1179_v58  ;;  %v460_v6 = vadd.f32 %v1685_v57, %v417_v61  ;;  %v575_v3 = vadd.f32 1.0, %v1480_v59  ;;  %v414_v5 = vpop.xlane.xlu0 %413 }
  0xdf   : > { %v1484_v1 = vpop.eup %1483  ;;  %1503 = vrcp.f32 %v580_v60  ;;  %756 = vperm.xlu1 %1418, %v1476_v54   ;;  %v459_v20 = vadd.f32 %v1685_v57, %v414_v5  ;;  %v1315_v60 = vld [vmem:[%s1723_s27] sm:$0xff]  }
  0xe0   : > { %v1486_v2 = vpop.eup %1485  ;;  %1505 = vrcp.f32 %v573_v56  ;;  %v1181_v4 = vmul.f32 -1.442695, %v460_v6  ;;  %796 = vperm.xlu0 %1417, %v1484_v1   ;;  %v1316_v61 = vunpack.c.l.bf16 %v1315_v60  ;;  %v1393_v6 = vld [vmem:[%s1723_s27 + $0x8] sm:$0xff]  }
  0xe1   : > { %v1488_v7 = vpop.eup %1487  ;;  %v582_v8 = vadd.f32 1.0, %v1486_v2  ;;  %v423_v9 = vpop.xlane.xlu1 %422  ;;  %1507 = vpow2.f32 %v1174_v62  ;;  %v1180_v28 = vmul.f32 -1.442695, %v459_v20 }
  0xe2   : > { %v1490_v12 = vpop.eup %1489  ;;  %1509 = vpow2.f32 %v1181_v4  ;;  %v462_v13 = vadd.f32 %v1685_v57, %v423_v9  ;;  %v420_v23 = vpop.xlane.xlu0 %419  ;;  %v1320_v4 = vunpack.c.l.bf16 %v1393_v6  ;;  %v1321_v9 = vunpack.c.h.bf16 %v1393_v6 }
  0xe3   : > { %v1492_v14 = vpop.eup %1491  ;;  %1511 = vrcp.f32 %v582_v8  ;;  %761 = vperm.xlu1 %1418, %v1482_v0   ;;  %v461_v29 = vadd.f32 %v1685_v57, %v420_v23  ;;  %v1317_v0 = vunpack.c.h.bf16 %v1315_v60 }
  0xe4   : > { %v1494_v15 = vpop.eup %1493  ;;  %1513 = vrcp.f32 %v575_v3  ;;  %v1183_v16 = vmul.f32 -1.442695, %v462_v13  ;;  %806 = vperm.xlu0 %1417, %v1488_v7   ;;  %v577_v22 = vadd.f32 1.0, %v1492_v14 }
  0xe5   : > { %v1496_v17 = vpop.eup %1495  ;;  %v584_v18 = vadd.f32 1.0, %v1494_v15  ;;  %1515 = vpow2.f32 %v1176_v10  ;;  %v1182_v36 = vmul.f32 -1.442695, %v461_v29  ;;  %v1396_v10 = vld [vmem:[%s1723_s27 + $0x20] sm:$0xff]  }
  0xe6   : > { %v1498_v21 = vpop.eup %1497  ;;  %1517 = vpow2.f32 %v1183_v16  ;;  %v1333_v14 = vunpack.c.h.bf16 %v1396_v10  ;;  %v1324_v16 = vunpack.c.l.bf16 %v1394_v11 }
  0xe7   : > { %v1500_v24 = vpop.eup %1499  ;;  %1519 = vrcp.f32 %v584_v18  ;;  %771 = vperm.xlu1 %1418, %v1490_v12  }
  0xe8   : > { %v1502_v25 = vpop.eup %1501  ;;  %816 = vperm.xlu0 %1417, %v1496_v17   ;;  %1521 = vpow2.f32 %v1178_v19  ;;  %v579_v31 = vadd.f32 1.0, %v1500_v24  ;;  %v1397_v17 = vld [vmem:[%s1723_s27 + $0x28] sm:$0xff]   ;;  %v1325_v24 = vunpack.c.h.bf16 %v1394_v11 }
  0xe9   : > { %v1504_v26 = vpop.eup %1503  ;;  %v586_v27 = vadd.f32 1.0, %v1502_v25  ;;  %1523 = vrcp.f32 %v577_v22  ;;  %v1337_v22 = vunpack.c.h.bf16 %v1397_v17  ;;  %v1398_v25 = vld [vmem:[%s1723_s27 + $0x30] sm:$0xff]  }
  0xea   : > { %v1506_v30 = vpop.eup %1505 }
  0xeb   : > { %v1508_v32 = vpop.eup %1507  ;;  %1525 = vrcp.f32 %v586_v27  ;;  %781 = vperm.xlu1 %1418, %v1498_v21   ;;  %v1395_v27 = vld [vmem:[%s1723_s27 + $0x18] sm:$0xff]  }
  0xec   : > { %v1510_v33 = vpop.eup %1509  ;;  %826 = vperm.xlu0 %1417, %v1504_v26   ;;  %1527 = vpow2.f32 %v1180_v28  ;;  %v581_v38 = vadd.f32 1.0, %v1508_v32  ;;  %v1341_v32 = vunpack.c.h.bf16 %v1398_v25 }
  0xed   : > { %v1512_v34 = vpop.eup %1511  ;;  %v588_v35 = vadd.f32 1.0, %v1510_v33  ;;  %1529 = vrcp.f32 %v579_v31 }
  0xee   : > { %v1514_v37 = vpop.eup %1513 }
  0xef   : > { %v1516_v39 = vpop.eup %1515  ;;  %1531 = vrcp.f32 %v588_v35  ;;  %791 = vperm.xlu1 %1418, %v1506_v30  }
  0xf0   : > { %v1518_v40 = vpop.eup %1517  ;;  %836 = vperm.xlu0 %1417, %v1512_v34   ;;  %1533 = vpow2.f32 %v1182_v36  ;;  %v583_v42 = vadd.f32 1.0, %v1516_v39  ;;  %v1328_v34 = vunpack.c.l.bf16 %v1395_v27 }
  0xf1   : > { %v1520_v57 = vpop.eup %1519  ;;  %v590_v41 = vadd.f32 1.0, %v1518_v40  ;;  %1535 = vrcp.f32 %v581_v38  ;;  %v1399_v38 = vld [vmem:[%s1723_s27 + $0x38] sm:$0xff]  }
  0xf2   : > { %v1522_v43 = vpop.eup %1521 }
  0xf3   : > { %1537 = vrcp.f32 %v590_v41  ;;  %801 = vperm.xlu1 %1418, %v1514_v37   ;;  %v1524_v44 = vpop.eup %1523  ;;  %v585_v46 = vadd.f32 1.0, %v1522_v43  ;;  %v1329_v41 = vunpack.c.h.bf16 %v1395_v27  ;;  %v1345_v43 = vunpack.c.h.bf16 %v1399_v38 }
  0xf4   : > { %846 = vperm.xlu0 %1417, %v1520_v57   ;;  %1539 = vrcp.f32 %v583_v42 }
  0xf5   : > { %v1526_v45 = vpop.eup %1525  ;;  %1541 = vrcp.f32 %v585_v46 }
  0xf6   : > { %v1528_v47 = vpop.eup %1527 }
  0xf7   : > { %811 = vperm.xlu1 %1418, %v1524_v44   ;;  %v1530_v48 = vpop.eup %1529  ;;  %v587_v50 = vadd.f32 1.0, %v1528_v47 }
  0xf8   : > { %856 = vperm.xlu0 %1417, %v1526_v45   ;;  %v1400_v45 = vld [vmem:[%s1723_s27 + $0x40] sm:$0xff]  }
  0xf9   : > { %v1532_v49 = vpop.eup %1531  ;;  %1543 = vrcp.f32 %v587_v50 }
  0xfa   : > { %v1534_v51 = vpop.eup %1533 }
  0xfb   : > { %821 = vperm.xlu1 %1418, %v1530_v48   ;;  %v1536_v52 = vpop.eup %1535  ;;  %v589_v54 = vadd.f32 1.0, %v1534_v51  ;;  %v1349_v51 = vunpack.c.h.bf16 %v1400_v45 }
  0xfc   : > { %866 = vperm.xlu0 %1417, %v1532_v49   ;;  %v1332_v49 = vunpack.c.l.bf16 %v1396_v10 }
  0xfd   : > { %v1538_v53 = vpop.eup %1537  ;;  %1545 = vrcp.f32 %v589_v54 }
  0xfe   : > { %v1540_v55 = vpop.eup %1539 }
  0xff   : > { %831 = vperm.xlu1 %1418, %v1536_v52   ;;  %v1542_v56 = vpop.eup %1541 }
 0x100   : > { %876 = vperm.xlu0 %1417, %v1538_v53   ;;  %v1401_v53 = vld [vmem:[%s1723_s27 + $0x48] sm:$0xff]  }
 0x103   : > { %841 = vperm.xlu1 %1418, %v1540_v55   ;;  %v1544_v58 = vpop.eup %1543 }
 0x107   : > { %851 = vperm.xlu1 %1418, %v1542_v56   ;;  %v1546_v59 = vpop.eup %1545 }
 0x10b   : > { %861 = vperm.xlu1 %1418, %v1544_v58  }
 0x10f   : > { %871 = vperm.xlu1 %1418, %v1546_v59   ;;  %v1336_v59 = vunpack.c.l.bf16 %v1397_v17  ;;  %v1404_v17 = vld [vmem:[%s1723_s27 + $0x60] sm:$0xff]  }
 0x142   : > { %v722_v62 = vpop.permute.xlu0 %721 }
 0x143   : > { %v879_v63 = vmul.f32 %v1316_v61, %v722_v62  ;;  %v1353_v61 = vunpack.c.h.bf16 %v1401_v53 }
 0x145   : > { %v1218_v1 = vpack.c.bf16 %v879_v63, %v879_v63  ;;  %v1402_v63 = vld [vmem:[%s1723_s27 + $0x50] sm:$0xff]  }
 0x146   : > { %v727_v2 = vpop.permute.xlu1 %726 }
 0x147   : > { %1040 = vst.msk [vmem:[%s1730_s30] sm:$0xf] %vm1039_vm1, %v1218_v1  ;;  %v880_v3 = vmul.f32 %v1317_v0, %v727_v2 }
 0x149   : > { %v1219_v5 = vpack.c.bf16 %v880_v3, %v880_v3  ;;  %v1340_v3 = vunpack.c.l.bf16 %v1398_v25 }
 0x14a   : > { %v732_v7 = vpop.permute.xlu1 %731 }
 0x14b   : > { %1041 = vst.msk [vmem:[%s1730_s30 + $0x4] sm:$0xf] %vm1039_vm1, %v1219_v5  ;;  %v881_v8 = vmul.f32 %v1320_v4, %v732_v7  ;;  %v1357_v5 = vunpack.c.h.bf16 %v1402_v63 }
 0x14d   : > { %v1220_v12 = vpack.c.bf16 %v881_v8, %v881_v8  ;;  %v1403_v8 = vld [vmem:[%s1723_s27 + $0x58] sm:$0xff]  }
 0x14e   : > { %v737_v13 = vpop.permute.xlu1 %736 }
 0x14f   : > { %1042 = vst.msk [vmem:[%s1730_s30 + $0x8] sm:$0xf] %vm1039_vm1, %v1220_v12  ;;  %v882_v15 = vmul.f32 %v1321_v9, %v737_v13  ;;  %v1344_v13 = vunpack.c.l.bf16 %v1399_v38 }
 0x151   : > { %v1221_v18 = vpack.c.bf16 %v882_v15, %v882_v15  ;;  %v767_v19 = vpop.permute.xlu0 %766  ;;  %v1361_v15 = vunpack.c.h.bf16 %v1403_v8 }
 0x152   : > { %v742_v20 = vpop.permute.xlu1 %741  ;;  %v888_v21 = vmul.f32 %v1333_v14, %v767_v19 }
 0x153   : > { %1043 = vst.msk [vmem:[%s1730_s30 + $0xc] sm:$0xf] %vm1039_vm1, %v1221_v18  ;;  %v883_v23 = vmul.f32 %v1324_v16, %v742_v20 }
 0x154   : > { %v1227_v26 = vpack.c.bf16 %v888_v21, %v888_v21 }
 0x155   : > { %v1222_v28 = vpack.c.bf16 %v883_v23, %v883_v23  ;;  %v777_v29 = vpop.permute.xlu0 %776 }
 0x156   : > { %1049 = vst.msk [vmem:[%s1730_s30 + $0x24] sm:$0xf] %vm1039_vm1, %v1227_v26  ;;  %v747_v30 = vpop.permute.xlu1 %746  ;;  %v890_v31 = vmul.f32 %v1337_v22, %v777_v29  ;;  %v1348_v22 = vunpack.c.l.bf16 %v1400_v45  ;;  %v1405_v26 = vld [vmem:[%s1723_s27 + $0x68] sm:$0xff]  }
 0x157   : > { %1044 = vst.msk [vmem:[%s1730_s30 + $0x10] sm:$0xf] %vm1039_vm1, %v1222_v28  ;;  %v884_v33 = vmul.f32 %v1325_v24, %v747_v30  ;;  %v1365_v24 = vunpack.c.h.bf16 %v1404_v17 }
 0x158   : > { %v1229_v35 = vpack.c.bf16 %v890_v31, %v890_v31  ;;  %v1352_v31 = vunpack.c.l.bf16 %v1401_v53 }
 0x159   : > { %v1223_v36 = vpack.c.bf16 %v884_v33, %v884_v33  ;;  %v787_v37 = vpop.permute.xlu0 %786  ;;  %v1369_v33 = vunpack.c.h.bf16 %v1405_v26 }
 0x15a   : > { %1051 = vst.msk [vmem:[%s1730_s30 + $0x2c] sm:$0xf] %vm1039_vm1, %v1229_v35  ;;  %v752_v39 = vpop.permute.xlu1 %751  ;;  %v892_v40 = vmul.f32 %v1341_v32, %v787_v37  ;;  %v1406_v35 = vld [vmem:[%s1723_s27 + $0x70] sm:$0xff]  }
 0x15b   : > { %1045 = vst.msk [vmem:[%s1730_s30 + $0x14] sm:$0xf] %vm1039_vm1, %v1223_v36  ;;  %v885_v57 = vmul.f32 %v1328_v34, %v752_v39 }
 0x15c   : > { %v1231_v42 = vpack.c.bf16 %v892_v40, %v892_v40  ;;  %v1356_v40 = vunpack.c.l.bf16 %v1402_v63  ;;  %v1368_v63 = vunpack.c.l.bf16 %v1405_v26 }
 0x15d   : > { %v1224_v44 = vpack.c.bf16 %v885_v57, %v885_v57 }
 0x15e   : > { %1053 = vst.msk [vmem:[%s1730_s30 + $0x34] sm:$0xf] %vm1039_vm1, %v1231_v42  ;;  %v757_v46 = vpop.permute.xlu1 %756 }
 0x15f   : > { %1046 = vst.msk [vmem:[%s1730_s30 + $0x18] sm:$0xf] %vm1039_vm1, %v1224_v44  ;;  %v886_v47 = vmul.f32 %v1329_v41, %v757_v46  ;;  %v797_v48 = vpop.permute.xlu0 %796  ;;  %v1373_v41 = vunpack.c.h.bf16 %v1406_v35 }
 0x160   : > { %v894_v50 = vmul.f32 %v1345_v43, %v797_v48  ;;  %v1407_v43 = vld [vmem:[%s1723_s27 + $0x78] sm:$0xff]   ;;  %v1360_v48 = vunpack.c.l.bf16 %v1403_v8 }
 0x161   : > { %v1225_v52 = vpack.c.bf16 %v886_v47, %v886_v47 }
 0x162   : > { %v1233_v54 = vpack.c.bf16 %v894_v50, %v894_v50  ;;  %v762_v55 = vpop.permute.xlu1 %761  ;;  %v1377_v50 = vunpack.c.h.bf16 %v1407_v43 }
 0x163   : > { %1047 = vst.msk [vmem:[%s1730_s30 + $0x1c] sm:$0xf] %vm1039_vm1, %v1225_v52  ;;  %v887_v56 = vmul.f32 %v1332_v49, %v762_v55  ;;  %v807_v58 = vpop.permute.xlu0 %806 }
 0x164   : > { %1055 = vst.msk [vmem:[%s1730_s30 + $0x3c] sm:$0xf] %vm1039_vm1, %v1233_v54  ;;  %v896_v60 = vmul.f32 %v1349_v51, %v807_v58 }
 0x165   : > { %v1226_v62 = vpack.c.bf16 %v887_v56, %v887_v56  ;;  %v1364_v56 = vunpack.c.l.bf16 %v1404_v17 }
 0x166   : > { %v1235_v0 = vpack.c.bf16 %v896_v60, %v896_v60  ;;  %v772_v6 = vpop.permute.xlu1 %771 }
 0x167   : > { %1048 = vst.msk [vmem:[%s1730_s30 + $0x20] sm:$0xf] %vm1039_vm1, %v1226_v62  ;;  %v889_v1 = vmul.f32 %v1336_v59, %v772_v6  ;;  %v817_v2 = vpop.permute.xlu0 %816 }
 0x168   : > { %1057 = vst.msk [vmem:[%s1730_s30 + $0x44] sm:$0xf] %vm1039_vm1, %v1235_v0  ;;  %v898_v4 = vmul.f32 %v1353_v61, %v817_v2  ;;  %v1372_v2 = vunpack.c.l.bf16 %v1406_v35 }
 0x169   : > { %v1228_v7 = vpack.c.bf16 %v889_v1, %v889_v1 }
 0x16a   : > { %v1237_v9 = vpack.c.bf16 %v898_v4, %v898_v4  ;;  %v782_v10 = vpop.permute.xlu1 %781 }
 0x16b   : > { %1050 = vst.msk [vmem:[%s1730_s30 + $0x28] sm:$0xf] %vm1039_vm1, %v1228_v7  ;;  %v891_v11 = vmul.f32 %v1340_v3, %v782_v10  ;;  %v827_v12 = vpop.permute.xlu0 %826  ;;  %v1376_v7 = vunpack.c.l.bf16 %v1407_v43 }
 0x16c   : > { %1059 = vst.msk [vmem:[%s1730_s30 + $0x4c] sm:$0xf] %vm1039_vm1, %v1237_v9  ;;  %v900_v14 = vmul.f32 %v1357_v5, %v827_v12 }
 0x16d   : > { %v1230_v16 = vpack.c.bf16 %v891_v11, %v891_v11 }
 0x16e   : > { %v1239_v18 = vpack.c.bf16 %v900_v14, %v900_v14  ;;  %v792_v19 = vpop.permute.xlu1 %791 }
 0x16f   : > { %1052 = vst.msk [vmem:[%s1730_s30 + $0x30] sm:$0xf] %vm1039_vm1, %v1230_v16  ;;  %v893_v20 = vmul.f32 %v1344_v13, %v792_v19  ;;  %v837_v21 = vpop.permute.xlu0 %836 }
 0x170   : > { %1061 = vst.msk [vmem:[%s1730_s30 + $0x54] sm:$0xf] %vm1039_vm1, %v1239_v18  ;;  %v902_v23 = vmul.f32 %v1361_v15, %v837_v21 }
 0x171   : > { %v1232_v25 = vpack.c.bf16 %v893_v20, %v893_v20 }
 0x172   : > { %v1241_v27 = vpack.c.bf16 %v902_v23, %v902_v23  ;;  %v802_v28 = vpop.permute.xlu1 %801 }
 0x173   : > { %1054 = vst.msk [vmem:[%s1730_s30 + $0x38] sm:$0xf] %vm1039_vm1, %v1232_v25  ;;  %v895_v29 = vmul.f32 %v1348_v22, %v802_v28  ;;  %v847_v30 = vpop.permute.xlu0 %846 }
 0x174   : > { %1063 = vst.msk [vmem:[%s1730_s30 + $0x5c] sm:$0xf] %vm1039_vm1, %v1241_v27  ;;  %v904_v32 = vmul.f32 %v1365_v24, %v847_v30 }
 0x175   : > { %v1234_v34 = vpack.c.bf16 %v895_v29, %v895_v29 }
 0x176   : > { %v1243_v36 = vpack.c.bf16 %v904_v32, %v904_v32  ;;  %v812_v37 = vpop.permute.xlu1 %811 }
 0x177   : > { %1056 = vst.msk [vmem:[%s1730_s30 + $0x40] sm:$0xf] %vm1039_vm1, %v1234_v34  ;;  %v897_v38 = vmul.f32 %v1352_v31, %v812_v37  ;;  %v857_v39 = vpop.permute.xlu0 %856 }
 0x178   : > { %1065 = vst.msk [vmem:[%s1730_s30 + $0x64] sm:$0xf] %vm1039_vm1, %v1243_v36  ;;  %v906_v57 = vmul.f32 %v1369_v33, %v857_v39 }
 0x179   : > { %v1236_v42 = vpack.c.bf16 %v897_v38, %v897_v38 }
 0x17a   : > { %v1245_v44 = vpack.c.bf16 %v906_v57, %v906_v57  ;;  %v822_v45 = vpop.permute.xlu1 %821 }
 0x17b   : > { %1058 = vst.msk [vmem:[%s1730_s30 + $0x48] sm:$0xf] %vm1039_vm1, %v1236_v42  ;;  %v899_v46 = vmul.f32 %v1356_v40, %v822_v45  ;;  %v867_v47 = vpop.permute.xlu0 %866 }
 0x17c   : > { %1067 = vst.msk [vmem:[%s1730_s30 + $0x6c] sm:$0xf] %vm1039_vm1, %v1245_v44  ;;  %v908_v49 = vmul.f32 %v1373_v41, %v867_v47 }
 0x17d   : > { %v1238_v51 = vpack.c.bf16 %v899_v46, %v899_v46 }
 0x17e   : > { %v1247_v52 = vpack.c.bf16 %v908_v49, %v908_v49  ;;  %v832_v53 = vpop.permute.xlu1 %831 }
 0x17f   : > { %1060 = vst.msk [vmem:[%s1730_s30 + $0x50] sm:$0xf] %vm1039_vm1, %v1238_v51  ;;  %v901_v54 = vmul.f32 %v1360_v48, %v832_v53  ;;  %v877_v55 = vpop.permute.xlu0 %876 }
 0x180   : > { %1069 = vst.msk [vmem:[%s1730_s30 + $0x74] sm:$0xf] %vm1039_vm1, %v1247_v52  ;;  %v910_v58 = vmul.f32 %v1377_v50, %v877_v55 }
 0x181   : > { %v1240_v59 = vpack.c.bf16 %v901_v54, %v901_v54 }
 0x182   : > { %v1249_v60 = vpack.c.bf16 %v910_v58, %v910_v58  ;;  %v842_v61 = vpop.permute.xlu1 %841 }
 0x183   : > { %1062 = vst.msk [vmem:[%s1730_s30 + $0x58] sm:$0xf] %vm1039_vm1, %v1240_v59  ;;  %v903_v62 = vmul.f32 %v1364_v56, %v842_v61 }
 0x184   : > { %1071 = vst.msk [vmem:[%s1730_s30 + $0x7c] sm:$0xf] %vm1039_vm1, %v1249_v60 }
 0x185   : > { %v1242_v0 = vpack.c.bf16 %v903_v62, %v903_v62 }
 0x186   : > { %v852_v6 = vpop.permute.xlu1 %851 }
 0x187   : > { %1064 = vst.msk [vmem:[%s1730_s30 + $0x60] sm:$0xf] %vm1039_vm1, %v1242_v0  ;;  %v905_v1 = vmul.f32 %v1368_v63, %v852_v6 }
 0x189   : > { %v1244_v3 = vpack.c.bf16 %v905_v1, %v905_v1 }
 0x18a   : > { %v862_v4 = vpop.permute.xlu1 %861 }
 0x18b   : > { %1066 = vst.msk [vmem:[%s1730_s30 + $0x68] sm:$0xf] %vm1039_vm1, %v1244_v3  ;;  %v907_v5 = vmul.f32 %v1372_v2, %v862_v4 }
 0x18d   : > { %v1246_v8 = vpack.c.bf16 %v907_v5, %v907_v5 }
 0x18e   : > { %v872_v9 = vpop.permute.xlu1 %871 }
 0x18f   : > { %1068 = vst.msk [vmem:[%s1730_s30 + $0x70] sm:$0xf] %vm1039_vm1, %v1246_v8  ;;  %v909_v10 = vmul.f32 %v1376_v7, %v872_v9 }
 0x191   : > { %v1248_v11 = vpack.c.bf16 %v909_v10, %v909_v10 }
 0x193   : > { %1070 = vst.msk [vmem:[%s1730_s30 + $0x78] sm:$0xf] %vm1039_vm1, %v1248_v11 }
 0x194 PF: > { %s16_s17 = sadd.s32 1, %s1553_s17  }
 0x195   : > { %p13_p4 = scmp.ge.s32.totalorder %s16_s17, 4  }
 0x197   :  { %15 = sbr.rel (!%p13_p4) target bundleno = 3 (0x3), region = 69 }

// kernel: forward.42
= control target key start
LH: loop header
LB: loop body
LE: loop exit
PB: predicated region body
PF: predicated region fallthrough
CT: control target
= control target key end

     0   :  { %v996_v22 = vmov 1966171168   ;;  %v156_v24 = vlaneseq  ;;  %vm19_vm0 = vcmask 517120   ;;  %vm770_vm1 = vcmask 516096   ;;  %s1234_s1 = inlined_call_operand.vmem [shape: bf16[1024,64], index: 1, kind: input, shape index: {}]   ;;  %s1235_s0 = inlined_call_operand.vmem [shape: bf16[2,1024], index: 0, kind: input, shape index: {}]   ;;  %s1236_s2 = inlined_call_operand.vmem [shape: f32[1,64], index: 2, kind: input, shape index: {}]   ;;  %s1237_s3 = inlined_call_operand.vmem [shape: bf16[2,64], index: 3, kind: output, shape index: {}]  }
   0x1   :  { %v931_v0 = vld [vmem:[%s1234_s1 + $0x40] sm:$0xff]   ;;  %v935_v4 = vld [vmem:[%s1234_s1 + $0x48] sm:$0xff]   ;;  %v939_v8 = vld [vmem:[%s1234_s1 + $0x50] sm:$0xff]   ;;  %v154_v23 = vunpack.c.l.s4 %v996_v22 }
   0x2   :  { %v932_v1 = vld [vmem:[%s1234_s1 + $0xc0] sm:$0xff]   ;;  %841 = vmatprep.subr.bf16.mxu0 %v931_v0  ;;  %v936_v5 = vld [vmem:[%s1234_s1 + $0xc8] sm:$0xff]   ;;  %v940_v9 = vld [vmem:[%s1234_s1 + $0xd0] sm:$0xff]   ;;  %v157_v30 = vshrl.u32 %v156_v24, 7 }
   0x3   :  { %v933_v2 = vld [vmem:[%s1234_s1] sm:$0xff]   ;;  %863 = vmatprep.subr.bf16.mxu1 %v932_v1  ;;  %v937_v6 = vld [vmem:[%s1234_s1 + $0x8] sm:$0xff]   ;;  %v941_v10 = vld [vmem:[%s1234_s1 + $0x10] sm:$0xff]   ;;  %v155_v29 = vunpack.c.0.s8 %v154_v23 }
   0x4   :  { %v934_v3 = vld [vmem:[%s1234_s1 + $0x80] sm:$0xff]   ;;  %842 = vmatpush3.bf16.msra.mxu0 %v933_v2  ;;  %v938_v7 = vld [vmem:[%s1234_s1 + $0x88] sm:$0xff]   ;;  %v942_v11 = vld [vmem:[%s1234_s1 + $0x90] sm:$0xff]  }
   0x5   :  { %864 = vmatpush3.bf16.msra.mxu1 %v934_v3  ;;  %843 = vmatprep.subr.bf16.mxu0 %v935_v4  ;;  %v943_v12 = vld [vmem:[%s1234_s1 + $0x58] sm:$0xff]   ;;  %v947_v16 = vld [vmem:[%s1234_s1 + $0x60] sm:$0xff]   ;;  %v951_v20 = vld [vmem:[%s1234_s1 + $0x68] sm:$0xff]   ;;  %v1108_v35 = vsub.s32 %v155_v29, %v157_v30 }
   0x6   :  { %865 = vmatprep.subr.bf16.mxu1 %v936_v5  ;;  %v944_v13 = vld [vmem:[%s1234_s1 + $0xd8] sm:$0xff]   ;;  %v948_v17 = vld [vmem:[%s1234_s1 + $0xe0] sm:$0xff]   ;;  %v952_v21 = vld [vmem:[%s1234_s1 + $0xe8] sm:$0xff]  }
   0x7   :  { %v945_v14 = vld [vmem:[%s1234_s1 + $0x18] sm:$0xff]   ;;  %v949_v18 = vld [vmem:[%s1234_s1 + $0x20] sm:$0xff]   ;;  %v953_v25 = vld [vmem:[%s1234_s1 + $0x28] sm:$0xff]  }
   0x8   :  { %844 = vmatpush3.bf16.msra.mxu0 %v937_v6  ;;  %v946_v15 = vld [vmem:[%s1234_s1 + $0x98] sm:$0xff]   ;;  %v950_v19 = vld [vmem:[%s1234_s1 + $0xa0] sm:$0xff]   ;;  %v954_v26 = vld [vmem:[%s1234_s1 + $0xa8] sm:$0xff]  }
   0x9   :  { %866 = vmatpush3.bf16.msra.mxu1 %v938_v7  ;;  %845 = vmatprep.subr.bf16.mxu0 %v939_v8  ;;  %v955_v27 = vld [vmem:[%s1234_s1 + $0x70] sm:$0xff]   ;;  %v959_v33 = vld [vmem:[%s1234_s1 + $0x78] sm:$0xff]   ;;  %v22_v38 = vld [vmem:[%s1235_s0] sm:$0xff] }
   0xa   :  { %867 = vmatprep.subr.bf16.mxu1 %v940_v9  ;;  %v956_v28 = vld [vmem:[%s1234_s1 + $0xf0] sm:$0xff]   ;;  %v960_v34 = vld [vmem:[%s1234_s1 + $0xf8] sm:$0xff]   ;;  %v152_v39 = vcombine.high %v22_v38, %v22_v38  ;;  %v159_v40 = vrot.slane %v22_v38, %v1108_v35  ;;  %v964_v41 = vld [vmem:[%s1234_s1 + $0x140] sm:$0xff]  }
   0xb   :  { %v957_v31 = vld [vmem:[%s1234_s1 + $0x30] sm:$0xff]   ;;  %v961_v36 = vld [vmem:[%s1234_s1 + $0x38] sm:$0xff]   ;;  %v965_v42 = vld [vmem:[%s1234_s1 + $0x1c0] sm:$0xff]  }
   0xc   :  { %846 = vmatpush3.bf16.msra.mxu0 %v941_v10  ;;  %v958_v32 = vld [vmem:[%s1234_s1 + $0xb0] sm:$0xff]   ;;  %v962_v37 = vld [vmem:[%s1234_s1 + $0xb8] sm:$0xff]   ;;  %v167_v43 = vcombine.high %v159_v40, %v159_v40  ;;  %v175_v44 = vrot.slane %v159_v40, %v1108_v35  ;;  %v1128_v45 = vrot.slane %v152_v39, %v1108_v35  ;;  %v966_v47 = vld [vmem:[%s1234_s1 + $0x100] sm:$0xff]  }
   0xd   :  { %868 = vmatpush3.bf16.msra.mxu1 %v942_v11  ;;  %847 = vmatprep.subr.bf16.mxu0 %v943_v12  ;;  %v968_v50 = vld [vmem:[%s1234_s1 + $0x148] sm:$0xff]   ;;  %v967_v52 = vld [vmem:[%s1234_s1 + $0x180] sm:$0xff]   ;;  %v972_v57 = vld [vmem:[%s1234_s1 + $0x150] sm:$0xff]  }
   0xe   :  { %869 = vmatprep.subr.bf16.mxu1 %v944_v13  ;;  %v189_v46 = vrot.slane %v167_v43, %v1108_v35  ;;  %v168_v48 = vcombine.high %v1128_v45, %v1128_v45  ;;  %v197_v49 = vcombine.high %v175_v44, %v175_v44  ;;  %v969_v54 = vld [vmem:[%s1234_s1 + $0x1c8] sm:$0xff]   ;;  %v973_v59 = vld [vmem:[%s1234_s1 + $0x1d0] sm:$0xff]   ;;  %v976_v61 = vld [vmem:[%s1234_s1 + $0x158] sm:$0xff]  }
   0xf   :  { %v970_v55 = vld [vmem:[%s1234_s1 + $0x108] sm:$0xff]   ;;  %v974_v60 = vld [vmem:[%s1234_s1 + $0x110] sm:$0xff]   ;;  %v977_v63 = vld [vmem:[%s1234_s1 + $0x1d8] sm:$0xff]  }
  0x10   :  { %848 = vmatpush3.bf16.msra.mxu0 %v945_v14  ;;  %625 = vmatprep.mubr.bf16.mxu0 %v189_v46  ;;  %v199_v51 = vcombine.high %v189_v46, %v189_v46  ;;  %v196_v53 = vrot.slane %v168_v48, %v1108_v35  ;;  %v971_v58 = vld [vmem:[%s1234_s1 + $0x188] sm:$0xff]   ;;  %v975_v62 = vld [vmem:[%s1234_s1 + $0x190] sm:$0xff]   ;;  %v978_v0 = vld [vmem:[%s1234_s1 + $0x118] sm:$0xff]  }
  0x11   :  { %870 = vmatpush3.bf16.msra.mxu1 %v946_v15  ;;  %849 = vmatprep.subr.bf16.mxu0 %v947_v16  ;;  %v980_v1 = vld [vmem:[%s1234_s1 + $0x160] sm:$0xff]   ;;  %v979_v2 = vld [vmem:[%s1234_s1 + $0x198] sm:$0xff]   ;;  %v984_v5 = vld [vmem:[%s1234_s1 + $0x168] sm:$0xff]  }
  0x12   :  { %871 = vmatprep.subr.bf16.mxu1 %v948_v17  ;;  %665 = vmatprep.mubr.bf16.mxu1 %v199_v51  ;;  %v200_v56 = vcombine.high %v196_v53, %v196_v53  ;;  %v981_v3 = vld [vmem:[%s1234_s1 + $0x1e0] sm:$0xff]   ;;  %v985_v7 = vld [vmem:[%s1234_s1 + $0x1e8] sm:$0xff]   ;;  %v988_v9 = vld [vmem:[%s1234_s1 + $0x170] sm:$0xff]   ;;  %v182_v17 = vrot.slane %v1128_v45, %v1108_v35 }
  0x13   :  { %v982_v4 = vld [vmem:[%s1234_s1 + $0x120] sm:$0xff]   ;;  %v986_v8 = vld [vmem:[%s1234_s1 + $0x128] sm:$0xff]   ;;  %v989_v11 = vld [vmem:[%s1234_s1 + $0x1f0] sm:$0xff]  }
  0x14   :  { %850 = vmatpush3.bf16.msra.mxu0 %v949_v18  ;;  %v983_v6 = vld [vmem:[%s1234_s1 + $0x1a0] sm:$0xff]   ;;  %v987_v10 = vld [vmem:[%s1234_s1 + $0x1a8] sm:$0xff]   ;;  %v990_v12 = vld [vmem:[%s1234_s1 + $0x130] sm:$0xff]  }
  0x15   :  { %872 = vmatpush3.bf16.msra.mxu1 %v950_v19  ;;  %851 = vmatprep.subr.bf16.mxu0 %v951_v20  ;;  %v992_v13 = vld [vmem:[%s1234_s1 + $0x178] sm:$0xff]   ;;  %v991_v14 = vld [vmem:[%s1234_s1 + $0x1b0] sm:$0xff]   ;;  %v198_v19 = vcombine.high %v182_v17, %v182_v17  ;;  %v997_v20 = vmov 0.0   ;;  %v840_v46 = vld [vmem:[%s1236_s2] ss:$0 sm:$0xff] }
  0x16   :  { %873 = vmatprep.subr.bf16.mxu1 %v952_v21  ;;  %v993_v15 = vld [vmem:[%s1234_s1 + $0x1f8] sm:$0xff]   ;;  %20 = vst.msk [vmem:[#allocation2] sm:$0x3] %vm19_vm0, %v997_v20 }
  0x17   :  { %v994_v16 = vld [vmem:[%s1234_s1 + $0x138] sm:$0xff]  }
  0x18   :  { %852 = vmatpush3.bf16.msra.mxu0 %v953_v25  ;;  %v995_v18 = vld [vmem:[%s1234_s1 + $0x1b8] sm:$0xff]  }
  0x19   :  { %874 = vmatpush3.bf16.msra.mxu1 %v954_v26  ;;  %853 = vmatprep.subr.bf16.mxu0 %v955_v27 }
  0x1a   :  { %875 = vmatprep.subr.bf16.mxu1 %v956_v28 }
  0x1c   :  { %854 = vmatpush3.bf16.msra.mxu0 %v957_v31 }
  0x1d   :  { %876 = vmatpush3.bf16.msra.mxu1 %v958_v32  ;;  %855 = vmatprep.subr.bf16.mxu0 %v959_v33 }
  0x1e   :  { %877 = vmatprep.subr.bf16.mxu1 %v960_v34 }
  0x20   :  { %856 = vmatpush3.bf16.msra.mxu0 %v961_v36 }
  0x21   :  { %878 = vmatpush3.bf16.msra.mxu1 %v962_v37  ;;  %885 = vmatprep.subr.bf16.mxu0 %v964_v41 }
  0x22   :  { %907 = vmatprep.subr.bf16.mxu1 %v965_v42  ;;  %v21_v42 = vld [vmem:[#allocation2] sm:$0x3] }
  0x23   :  { %626 = vmatmul.mubr.bf16.vlgmr.msra.gmra.mrb[0].mxu0 %v175_v44 }
  0x24   :  { %886 = vmatpush3.bf16.msra.mxu0 %v966_v47  ;;  %666 = vmatmul.mubr.bf16.vlgmr.msra.gmra.mrb[0].mxu1 %v197_v49 }
  0x25   :  { %887 = vmatprep.subr.bf16.mxu0 %v968_v50  ;;  %908 = vmatpush3.bf16.msra.mxu1 %v967_v52 }
  0x26   :  { %705 = vmatprep.mubr.bf16.mxu0 %v196_v53  ;;  %909 = vmatprep.subr.bf16.mxu1 %v969_v54 }
  0x27   :  { %745 = vmatprep.mubr.bf16.mxu1 %v200_v56 }
  0x28   :  { %888 = vmatpush3.bf16.msra.mxu0 %v970_v55 }
  0x29   :  { %889 = vmatprep.subr.bf16.mxu0 %v972_v57  ;;  %910 = vmatpush3.bf16.msra.mxu1 %v971_v58 }
  0x2a   :  { %911 = vmatprep.subr.bf16.mxu1 %v973_v59 }
  0x2c   :  { %890 = vmatpush3.bf16.msra.mxu0 %v974_v60 }
  0x2d   :  { %891 = vmatprep.subr.bf16.mxu0 %v976_v61  ;;  %912 = vmatpush3.bf16.msra.mxu1 %v975_v62 }
  0x2e   :  { %913 = vmatprep.subr.bf16.mxu1 %v977_v63 }
  0x30   :  { %892 = vmatpush3.bf16.msra.mxu0 %v978_v0 }
  0x31   :  { %893 = vmatprep.subr.bf16.mxu0 %v980_v1  ;;  %914 = vmatpush3.bf16.msra.mxu1 %v979_v2 }
  0x32   :  { %915 = vmatprep.subr.bf16.mxu1 %v981_v3 }
  0x34   :  { %894 = vmatpush3.bf16.msra.mxu0 %v982_v4 }
  0x35   :  { %895 = vmatprep.subr.bf16.mxu0 %v984_v5  ;;  %916 = vmatpush3.bf16.msra.mxu1 %v983_v6 }
  0x36   :  { %917 = vmatprep.subr.bf16.mxu1 %v985_v7 }
  0x38   :  { %896 = vmatpush3.bf16.msra.mxu0 %v986_v8 }
  0x39   :  { %897 = vmatprep.subr.bf16.mxu0 %v988_v9  ;;  %918 = vmatpush3.bf16.msra.mxu1 %v987_v10 }
  0x3a   :  { %919 = vmatprep.subr.bf16.mxu1 %v989_v11 }
  0x3c   :  { %898 = vmatpush3.bf16.msra.mxu0 %v990_v12 }
  0x3d   :  { %899 = vmatprep.subr.bf16.mxu0 %v992_v13  ;;  %920 = vmatpush3.bf16.msra.mxu1 %v991_v14 }
  0x3e   :  { %921 = vmatprep.subr.bf16.mxu1 %v993_v15 }
  0x40   :  { %900 = vmatpush3.bf16.msra.mxu0 %v994_v16 }
  0x41   :  { %922 = vmatpush3.bf16.msra.mxu1 %v995_v18 }
  0x43   :  { %706 = vmatmul.mubr.bf16.vlgmr.msra.gmra.mrb[4].mxu0 %v182_v17 }
  0x44   :  { %746 = vmatmul.mubr.bf16.vlgmr.msra.gmra.mrb[4].mxu1 %v198_v19 }
  0xf6   :  { %v857_v21 = vpop.f32.mrb[0].mxu0 }
  0xf7   :  { %v858_v22 = vpop.f32.mrb[1].mxu0  ;;  %v879_v23 = vpop.f32.mrb[0].mxu1 }
  0xf8   :  { %v859_v24 = vadd.f32 %v858_v22, %v857_v21  ;;  %v860_v25 = vpop.f32.mrb[2].mxu0  ;;  %v880_v26 = vpop.f32.mrb[1].mxu1 }
  0xf9   :  { %v861_v27 = vpop.f32.mrb[3].mxu0  ;;  %v881_v28 = vadd.f32 %v880_v26, %v879_v23  ;;  %v882_v29 = vpop.f32.mrb[2].mxu1 }
  0xfa   :  { %v883_v30 = vpop.f32.mrb[3].mxu1 }
  0xfb   :  { %v668_v31 = vadd.f32 %v881_v28, %v859_v24 }
 0x116   :  { %v901_v32 = vpop.f32.mrb[4].mxu0 }
 0x117   :  { %v902_v33 = vpop.f32.mrb[5].mxu0  ;;  %v923_v34 = vpop.f32.mrb[4].mxu1 }
 0x118   :  { %v903_v35 = vadd.f32 %v902_v33, %v901_v32  ;;  %v904_v36 = vpop.f32.mrb[6].mxu0  ;;  %v924_v37 = vpop.f32.mrb[5].mxu1 }
 0x119   :  { %v905_v38 = vpop.f32.mrb[7].mxu0  ;;  %v925_v40 = vadd.f32 %v924_v37, %v923_v34  ;;  %v926_v41 = vpop.f32.mrb[6].mxu1 }
 0x11a   :  { %v708_v39 = vadd.f32 %v903_v35, %v668_v31  ;;  %v927_v43 = vpop.f32.mrb[7].mxu1 }
 0x11c   :  { %v748_v44 = vadd.f32 %v925_v40, %v708_v39 }
 0x11e   :  { %v753_v45 = vadd.f32 %v748_v44, %v21_v42 }
 0x120   :  { %755 = vst.msk [vmem:[#allocation2] sm:$0x3] %vm19_vm0, %v753_v45 }
 0x127   :  { %v759_v47 = vld [vmem:[#allocation2] sm:$0x3] }
 0x128   :  { %v767_v48 = vadd.f32 %v840_v46, %v759_v47 }
 0x12a   :  { %v768_v49 = vmax.f32 %v767_v48, 0.0 }
 0x12c   :  { %v769_v50 = vpack.c.bf16 %v768_v49, %v768_v49 }
 0x12e   :  { %771 = vst.msk [vmem:[%s1237_s3] sm:$0x1] %vm770_vm1, %v769_v50 }

// kernel: forward.43
= control target key start
LH: loop header
LB: loop body
LE: loop exit
PB: predicated region body
PF: predicated region fallthrough
CT: control target
= control target key end

     0   :  { %v248_v1 = vmov 0.0   ;;  %vm249_vm0 = vmmov 0   ;;  %s317_s0 = inlined_call_operand.vmem [shape: bf16[2,64], index: 0, kind: input, shape index: {}]   ;;  %s318_s1 = inlined_call_operand.vmem [shape: bf16[64,16], index: 1, kind: input, shape index: {}]   ;;  %s319_s2 = inlined_call_operand.vmem [shape: f32[1,16], index: 2, kind: input, shape index: {}]   ;;  %s320_s3 = inlined_call_operand.vmem [shape: bf16[16,128], index: 3, kind: input, shape index: {}]   ;;  %s321_s4 = inlined_call_operand.vmem [shape: f32[1,128], index: 4, kind: input, shape index: {}]   ;;  %s322_s5 = inlined_call_operand.hbm [shape: f32[2,128], index: 5, kind: output, shape index: {}]  }
   0x1   :  { %v219_v0 = vld [vmem:[%s318_s1] sm:$0xff]   ;;  %198 = vmatprep.subr.bf16.mxu0 %v248_v1  ;;  %210 = vmatprep.subr.bf16.mxu1 %v248_v1  ;;  %v220_v2 = vld [vmem:[%s318_s1 + $0x8] sm:$0xff]  }
   0x2   :  { %199 = vmatpush3.bf16.msra.mxu0 %v219_v0  ;;  %206 = vmatprep.mubr.msk.bf16.mxu0 %vm249_vm0, %v248_v1 }
   0x3   :  { %200 = vmatprep.subr.bf16.mxu0 %v248_v1  ;;  %212 = vmatprep.mubr.msk.bf16.mxu1 %vm249_vm0, %v248_v1 }
   0x4   :  { %10 = vsyncpa [#allocation3], 0  ;;  %v221_v3 = vld [vmem:[%s318_s1 + $0x10] sm:$0xff]   ;;  %v222_v4 = vld [vmem:[%s318_s1 + $0x18] sm:$0xff]   ;;  %vm62_vm1 = vcmask 523264   ;;  %vm123_vm2 = vcmask 130048  }
   0x5   :  { %v22_v5 = vld [vmem:[%s317_s0] sm:$0x1]  ;;  %s250_s7 = smov [#allocation2]  }
   0x6   :  { %201 = vmatpush3.bf16.msra.mxu0 %v220_v2  ;;  %v223_v6 = vld [vmem:[%s320_s3] sm:$0xff]   ;;  %s174_s3 = sshll.u32 %s250_s7, 4  ;;  %s175_s3 = int_to_ptr.vmem [resolvable:$true] %s174_s3 }
   0x7   :  { %202 = vmatprep.subr.bf16.mxu0 %v248_v1  ;;  %211 = vmatpush3.bf16.msra.mxu1 %v223_v6  ;;  %v182_v7 = vld [vmem:[%s319_s2] ss:$0 sm:$0xff]  ;;  %s224_s2 = scalar_lea.vmem %s175_s3, 32  ;;  %p229_p1 = scmp.lt.s32.totalorder %s175_s3, %s175_s3 }
   0x8   :  { %v188_v15 = vld [vmem:[%s321_s4] ss:$0 sm:$0xff]  ;;  %p225_p0 = scmp.ne.s32.totalorder %s175_s3, %s224_s2  ;;  %p230_p2 = scmp.lt.s32.totalorder %s224_s2, %s224_s2 }
   0xa   :  { %203 = vmatpush3.bf16.msra.mxu0 %v221_v3  ;;  %p231_p3 = por %p230_p2, %p229_p1 }
   0xb   :  { %204 = vmatprep.subr.bf16.mxu0 %v248_v1 }
   0xc   :  { %p232_p4 = pnand %p231_p3, %p225_p0 }
   0xe   :  { %205 = vmatpush3.bf16.msra.mxu0 %v222_v4 }
  0x11   :  { %207 = vmatmul.mubr.msk.bf16.vlgmr.msra.gmra.mrb[0].mxu0 %vm62_vm1, %v22_v5 }
  0xe4   :  { %v100_v8 = vpop.f32.mrb[0].mxu0 }
  0xe5   :  { %v101_v9 = vadd.f32 %v182_v7, %v100_v8  ;;  %v208_v10 = vpop.f32.mrb[1].mxu0 }
  0xe6   :  { %v103_v11 = vpop.f32.mrb[2].mxu0 }
  0xe7   :  { %v106_v12 = vmax.f32 %v101_v9, 0.0  ;;  %v209_v13 = vpop.f32.mrb[3].mxu0 }
  0xe9   :  { %v107_v14 = vpack.c.bf16 %v106_v12, %v106_v12 }
  0xeb   :  { %213 = vmatmul.mubr.msk.bf16.vlgmr.msra.gmra.mrb[0].mxu1 %vm123_vm2, %v107_v14 }
 0x1be   :  { %v161_v16 = vpop.f32.mrb[0].mxu1 }
 0x1bf   :  { %v162_v17 = vadd.f32 %v188_v15, %v161_v16  ;;  %v214_v18 = vpop.f32.mrb[1].mxu1 }
 0x1c0   :  { %v164_v19 = vpop.f32.mrb[2].mxu1 }
 0x1c1   :  { %167 = vst [vmem:[#allocation2] sm:$0x3] %v162_v17  ;;  %v215_v20 = vpop.f32.mrb[3].mxu1 }
 0x1c2   :  { %235 = shalt.err (!%p232_p4)
}
 0x1c3   :  { %s236_s4 = scalar_lea.hbm %s322_s5, 32 }
 0x1c4   :  { %p237_p5 = scmp.ne.s32.totalorder %s322_s5, %s236_s4  ;;  %p240_p6 = scmp.lt.u32.totalorder %s236_s4, %s322_s5 }
 0x1c6   :  { %p242_p7 = pnand %p240_p6, %p237_p5 }
 0x1c8   :  { %245 = shalt.err (!%p242_p7)
}
 0x1c9   :  { %177 = dma.vmem_to_hbm [thread:$0]  %s175_s3, 32, %s322_s5, [#allocation3]  }
 0x1ca   :  { %246 = dma.done.wait [#allocation3], 32  }
 0x1cb   :  { %247 = vsyncadd [#allocation3], 4294967264 }
 0x1cc   :  { %181 = vsyncpa [#allocation3], 1 }

</bundles_post_ra>
